<compile_context>
chip_gen: v7x
topology: tpu7x:2x2x1
jax: 0.10.0
libtpu: 0.0.40
codegen_flags: <defaults>
</compile_context>

<pallas_src>
import functools

import jax
import jax.numpy as jnp
from jax.experimental import pallas as pl
from jax.experimental.pallas import tpu as pltpu

LANE = 128       # lane-dim padding granularity
MAX_TM = 2048    # max rows per grid step

_COMPILER_PARAMS = pltpu.CompilerParams(
    dimension_semantics=("parallel",),
    vmem_limit_bytes=64 * 1024 * 1024,
)


def _round_up(x, m):
    return ((x + m - 1) // m) * m


def _choose_tiling(m):
    """Pick (tile_rows, num_blocks): big tiles, minimal row padding, and an even
    block count where possible (v7x shares 'parallel' grid axes over 2 TCs)."""
    if m <= MAX_TM:
        tm = _round_up(-(-m // 2), 8) if m >= 16 else _round_up(m, 8)
    else:
        nblocks = 2 * (-(-m // (2 * MAX_TM)))          # even number of blocks
        tm = _round_up(-(-m // nblocks), 8)
    nblocks = -(-m // tm)
    return tm, nblocks


# ----------------------------- Pallas kernels ------------------------------

def _conv_bias_act_kernel(a_ref, w_ref, b_ref, o_ref, *, act):
    # a: (TM, Kp) bf16 patches, w: (Kp, Np) bf16, b: (1, Np) f32
    y = jnp.dot(a_ref[...], w_ref[...], preferred_element_type=jnp.float32)
    y = y + b_ref[...]
    if act == "leaky":
        y = jnp.maximum(y, 0.2 * y)
    else:  # sigmoid (kept exact, f32)
        y = 1.0 / (1.0 + jnp.exp(-y))
    o_ref[...] = y.astype(o_ref.dtype)


def _conv_bn_stats_kernel(a_ref, w_ref, o_ref, st_ref):
    # Conv (no bias: it cancels under training-mode BatchNorm) + fused per-block
    # per-channel sum / sum-of-squares.  Padded rows/cols of `a`/`w` are zero,
    # so they contribute exactly zero to the statistics.
    y = jnp.dot(a_ref[...], w_ref[...], preferred_element_type=jnp.float32)
    o_ref[...] = y
    np_ = y.shape[1]
    s = jnp.sum(y, axis=0, keepdims=True)          # (1, Np)
    q = jnp.sum(y * y, axis=0, keepdims=True)      # (1, Np)
    row = jax.lax.broadcasted_iota(jnp.int32, (8, np_), 0)
    st = jnp.where(row == 0, s, jnp.where(row == 1, q, 0.0))
    st_ref[...] = st[None]                          # (1, 8, Np)


def _affine_leaky_kernel(x_ref, s_ref, t_ref, o_ref):
    # per-channel affine (BatchNorm apply) + LeakyReLU(0.2)
    y = x_ref[...] * s_ref[...] + t_ref[...]
    o_ref[...] = jnp.maximum(y, 0.2 * y).astype(o_ref.dtype)


# ------------------------------ wrappers ------------------------------------

def conv_bias_act_pallas(a_p, w_p, b_p, tm, nblocks, act, out_dtype):
    mp, kp = a_p.shape
    np_ = w_p.shape[1]
    return pl.pallas_call(
        functools.partial(_conv_bias_act_kernel, act=act),
        out_shape=jax.ShapeDtypeStruct((mp, np_), out_dtype),
        grid=(nblocks,),
        in_specs=[
            pl.BlockSpec((tm, kp), lambda i: (i, 0)),
            pl.BlockSpec((kp, np_), lambda i: (0, 0)),
            pl.BlockSpec((1, np_), lambda i: (0, 0)),
        ],
        out_specs=pl.BlockSpec((tm, np_), lambda i: (i, 0)),
        compiler_params=_COMPILER_PARAMS,
    )(a_p, w_p, b_p)


def conv_bn_pallas(a_p, w_p, tm, nblocks):
    mp, kp = a_p.shape
    np_ = w_p.shape[1]
    return pl.pallas_call(
        _conv_bn_stats_kernel,
        out_shape=(jax.ShapeDtypeStruct((mp, np_), jnp.float32),
                   jax.ShapeDtypeStruct((nblocks, 8, np_), jnp.float32)),
        grid=(nblocks,),
        in_specs=[
            pl.BlockSpec((tm, kp), lambda i: (i, 0)),
            pl.BlockSpec((kp, np_), lambda i: (0, 0)),
        ],
        out_specs=[
            pl.BlockSpec((tm, np_), lambda i: (i, 0)),
            pl.BlockSpec((1, 8, np_), lambda i: (i, 0, 0)),
        ],
        compiler_params=_COMPILER_PARAMS,
    )(a_p, w_p)


def affine_act_pallas(y_p, scale_row, shift_row, tm, nblocks, out_dtype):
    mp, np_ = y_p.shape
    return pl.pallas_call(
        _affine_leaky_kernel,
        out_shape=jax.ShapeDtypeStruct((mp, np_), out_dtype),
        grid=(nblocks,),
        in_specs=[
            pl.BlockSpec((tm, np_), lambda i: (i, 0)),
            pl.BlockSpec((1, np_), lambda i: (0, 0)),
            pl.BlockSpec((1, np_), lambda i: (0, 0)),
        ],
        out_specs=pl.BlockSpec((tm, np_), lambda i: (i, 0)),
        compiler_params=_COMPILER_PARAMS,
    )(y_p, scale_row, shift_row)


def im2col_padded(x, kh, kw, stride, kp):
    """x: (N,H,W,C) -> patches (N*OH*OW, kp) bf16, K-order (kh, kw, C), with the
    lane (K) padding folded into a single lane-dense concatenate."""
    x = x.astype(jnp.bfloat16)
    n, h, w, c = x.shape
    oh = (h - kh) // stride + 1
    ow = (w - kw) // stride + 1
    m = n * oh * ow
    cols = []
    for i in range(kh):
        for j in range(kw):
            patch = jax.lax.slice(
                x,
                (0, i, j, 0),
                (n, i + stride * (oh - 1) + 1, j + stride * (ow - 1) + 1, c),
                (1, stride, stride, 1),
            )  # (n, oh, ow, c)
            cols.append(patch.reshape(m, c))
    k = kh * kw * c
    if kp > k:
        cols.append(jnp.zeros((m, kp - k), jnp.bfloat16))
    a = jnp.concatenate(cols, axis=-1)      # (m, kp) — lane dense
    return a, oh, ow


# ------------------------------ parameters ----------------------------------

def spectral_normalize(w_oihw, key, n_iter=1, eps=1e-12):
    """torch.nn.utils.spectral_norm forward semantics (1 power iteration)."""
    cout = w_oihw.shape[0]
    w_mat = w_oihw.reshape(cout, -1)
    u = jax.random.normal(key, (cout,), dtype=jnp.float32)
    u = u / (jnp.linalg.norm(u) + eps)
    v = None
    for _ in range(n_iter):
        v = w_mat.T @ u
        v = v / (jnp.linalg.norm(v) + eps)
        u = w_mat @ v
        u = u / (jnp.linalg.norm(u) + eps)
    sigma = u @ (w_mat @ v)
    return w_oihw / sigma


def init_params(key, channel_num):
    cfgs = [
        # (cin, cout, stride, has_bn)
        (3, channel_num // 16, 2, False),
        (channel_num // 16, channel_num // 8, 2, True),
        (channel_num // 8, channel_num // 4, 2, True),
        (channel_num // 4, channel_num // 2, 2, True),
        (channel_num // 2, channel_num, 2, True),
        (channel_num, 1, 3, False),
    ]
    params = []
    for cin, cout, stride, has_bn in cfgs:
        key, kw_, kb_, ku_ = jax.random.split(key, 4)
        fan_in = cin * 4 * 4
        bound = 1.0 / (fan_in ** 0.5)
        w = jax.random.uniform(kw_, (cout, cin, 4, 4), minval=-bound,
                               maxval=bound, dtype=jnp.float32)
        b = jax.random.uniform(kb_, (cout,), minval=-bound, maxval=bound,
                               dtype=jnp.float32)
        w = spectral_normalize(w, ku_)
        layer = {"w": w, "b": b, "stride": stride}
        if has_bn:
            layer["gamma"] = jnp.ones((cout,), jnp.float32)
            layer["beta"] = jnp.zeros((cout,), jnp.float32)
        params.append(layer)
    return params


def prepare_params(raw_params):
    """Hoist all per-forward weight preprocessing (transpose / pad / bf16 cast)
    out of the forward path.  Returns (array pytree, static config tuple)."""
    params, configs = [], []
    for layer in raw_params:
        w = layer["w"]
        cout, cin, kh, kw = w.shape
        k = kh * kw * cin
        kp = _round_up(k, LANE)
        np_ = _round_up(cout, LANE)
        w_mat = jnp.transpose(w, (2, 3, 1, 0)).reshape(k, cout)   # (kh,kw,cin)->K
        w_p = jnp.pad(w_mat, ((0, kp - k), (0, np_ - cout))).astype(jnp.bfloat16)
        entry = {"w_p": w_p}
        if "gamma" in layer:
            # conv bias is a no-op under training-mode BatchNorm -> folded away
            entry["gamma_p"] = jnp.pad(layer["gamma"], (0, np_ - cout))
            entry["beta_p"] = jnp.pad(layer["beta"], (0, np_ - cout))
        else:
            entry["b_p"] = jnp.pad(layer["b"], (0, np_ - cout)).reshape(1, np_)
        params.append(entry)
        configs.append((kh, kw, int(layer["stride"]), cout))
    return params, tuple(configs)


# -------------------------------- forward -----------------------------------

def discriminator_forward(x_nchw, params, configs):
    x = jnp.transpose(x_nchw.astype(jnp.bfloat16), (0, 2, 3, 1))  # -> NHWC
    n_layers = len(params)
    batch = x.shape[0]
    for idx, (layer, (kh, kw, stride, cout)) in enumerate(zip(params, configs)):
        is_last = idx == n_layers - 1
        kp, np_ = layer["w_p"].shape

        a, oh, ow = im2col_padded(x, kh, kw, stride, kp)
        m = a.shape[0]
        tm, nblocks = _choose_tiling(m)
        mp = tm * nblocks
        if mp > m:  # zero row padding (zero rows contribute nothing to BN stats)
            a = jnp.concatenate([a, jnp.zeros((mp - m, kp), a.dtype)], axis=0)

        if "gamma_p" in layer:
            y, stats = conv_bn_pallas(a, layer["w_p"], tm, nblocks)
            colsum = jnp.sum(stats[:, 0, :], axis=0)           # (Np,) f32
            colsq = jnp.sum(stats[:, 1, :], axis=0)
            mean = colsum / m
            var = jnp.maximum(colsq / m - mean * mean, 0.0)    # biased (training)
            scale = (layer["gamma_p"] / jnp.sqrt(var + 1e-5)).astype(jnp.float32)
            shift = (layer["beta_p"] - mean * scale).astype(jnp.float32)
            y = affine_act_pallas(y, scale.reshape(1, np_), shift.reshape(1, np_),
                                  tm, nblocks, jnp.bfloat16)
        else:
            act = "sigmoid" if is_last else "leaky"
            out_dtype = jnp.float32 if is_last else jnp.bfloat16
            y = conv_bias_act_pallas(a, layer["w_p"], layer["b_p"], tm, nblocks,
                                     act, out_dtype)

        x = y[:m, :cout].reshape(batch, oh, ow, cout)
    return jnp.transpose(x, (0, 3, 1, 2)).astype(jnp.float32)    # back to NCHW


if __name__ == "__main__":
    key = jax.random.PRNGKey(0)
    kx, kp = jax.random.split(key)
    channel_num = 32                      # must be divisible by 16
    # 190x190 is the minimum spatial size that survives all 6 VALID convs.
    x = jax.random.normal(kx, (2, 3, 190, 190), dtype=jnp.float32)
    raw_params = init_params(kp, channel_num)
    params, configs = prepare_params(raw_params)

    fwd = jax.jit(discriminator_forward, static_argnums=2)
    out = jax.block_until_ready(fwd(x, params, configs))

    assert out.shape == (2, 1, 1, 1), out.shape
    assert bool(jnp.all(jnp.isfinite(out)))
    assert bool(jnp.all((out >= 0.0) & (out <= 1.0)))  # sigmoid output range
    print("KERNEL_OK")
</pallas_src>

<mosaic_0001>
module attributes {stable_mosaic.version = 11 : i64} {
  func.func @_conv_bias_act_kernel(%arg0: i32, %arg1: memref<1768x128xbf16, #tpu.memory_space<vmem>>, %arg2: memref<128x128xbf16, #tpu.memory_space<vmem>>, %arg3: memref<1x128xf32, #tpu.memory_space<vmem>>, %arg4: memref<1768x128xbf16, #tpu.memory_space<vmem>>) attributes {dimension_semantics = [#tpu.dimension_semantics<parallel>], iteration_bounds = array<i64: 10>, scalar_prefetch = 0 : i64, scratch_operands = 0 : i64, tpu.core_type = #tpu.core_type<tc>, window_params = [{transform_indices = @transform_0, window_bounds = array<i64: 1768, 128>}, {pipeline_mode = #tpu.pipeline_mode<synchronous>, transform_indices = @transform_1, window_bounds = array<i64: 128, 128>}, {pipeline_mode = #tpu.pipeline_mode<synchronous>, transform_indices = @transform_2, window_bounds = array<i64: 1, 128>}, {transform_indices = @transform_3, window_bounds = array<i64: 1768, 128>}]} {
    %c0 = arith.constant 0 : index
    %c0_0 = arith.constant 0 : index
    %0 = vector.load %arg1[%c0, %c0_0] : memref<1768x128xbf16, #tpu.memory_space<vmem>>, vector<1768x128xbf16>
    %c0_1 = arith.constant 0 : index
    %c0_2 = arith.constant 0 : index
    %1 = vector.load %arg2[%c0_1, %c0_2] : memref<128x128xbf16, #tpu.memory_space<vmem>>, vector<128x128xbf16>
    %cst = arith.constant dense<0.000000e+00> : vector<1768x128xf32>
    %2 = tpu.matmul %0, %1, %cst {dimension_numbers = #tpu.dot_dimension_numbers<[1], [0], [0], [1], [0, 0, 1, 1], [], []>} : vector<1768x128xbf16>, vector<128x128xbf16>, vector<1768x128xf32> -> vector<1768x128xf32>
    %c0_3 = arith.constant 0 : index
    %c0_4 = arith.constant 0 : index
    %3 = vector.load %arg3[%c0_3, %c0_4] : memref<1x128xf32, #tpu.memory_space<vmem>>, vector<1x128xf32>
    %4 = vector.broadcast %3 : vector<1x128xf32> to vector<1768x128xf32>
    %5 = arith.addf %2, %4 : vector<1768x128xf32>
    %cst_5 = arith.constant 2.000000e-01 : f32
    %6 = vector.broadcast %cst_5 : f32 to vector<1768x128xf32>
    %7 = arith.mulf %6, %5 : vector<1768x128xf32>
    %8 = arith.maximumf %5, %7 : vector<1768x128xf32>
    %9 = arith.truncf %8 : vector<1768x128xf32> to vector<1768x128xbf16>
    %c0_6 = arith.constant 0 : index
    %c0_7 = arith.constant 0 : index
    %10 = vector.load %arg4[%c0_6, %c0_7] : memref<1768x128xbf16, #tpu.memory_space<vmem>>, vector<1768x128xbf16>
    tpu.vector_store %arg4[%c0_6, %c0_7], %9 {strides = array<i32>} : memref<1768x128xbf16, #tpu.memory_space<vmem>>, vector<1768x128xbf16>,
    return
  }
  func.func @transform_0(%arg0: i32) -> (i32, i32) {
    %c0_i32 = arith.constant 0 : i32
    %c0_i32_0 = arith.constant 0 : i32
    return %arg0, %c0_i32 : i32, i32
  }
  func.func @transform_1(%arg0: i32) -> (i32, i32) {
    %c0_i32 = arith.constant 0 : i32
    %c0_i32_0 = arith.constant 0 : i32
    %c0_i32_1 = arith.constant 0 : i32
    return %c0_i32, %c0_i32_0 : i32, i32
  }
  func.func @transform_2(%arg0: i32) -> (i32, i32) {
    %c0_i32 = arith.constant 0 : i32
    %c0_i32_0 = arith.constant 0 : i32
    %c0_i32_1 = arith.constant 0 : i32
    return %c0_i32, %c0_i32_0 : i32, i32
  }
  func.func @transform_3(%arg0: i32) -> (i32, i32) {
    %c0_i32 = arith.constant 0 : i32
    %c0_i32_0 = arith.constant 0 : i32
    return %arg0, %c0_i32 : i32, i32
  }
}

module attributes {stable_mosaic.version = 11 : i64} {
  func.func @_conv_bn_stats_kernel(%arg0: i32, %arg1: memref<1064x128xbf16, #tpu.memory_space<vmem>>, %arg2: memref<128x128xbf16, #tpu.memory_space<vmem>>, %arg3: memref<1064x128xf32, #tpu.memory_space<vmem>>, %arg4: memref<1x8x128xf32, #tpu.memory_space<vmem>>) attributes {dimension_semantics = [#tpu.dimension_semantics<parallel>], iteration_bounds = array<i64: 4>, scalar_prefetch = 0 : i64, scratch_operands = 0 : i64, tpu.core_type = #tpu.core_type<tc>, window_params = [{transform_indices = @transform_0, window_bounds = array<i64: 1064, 128>}, {pipeline_mode = #tpu.pipeline_mode<synchronous>, transform_indices = @transform_1, window_bounds = array<i64: 128, 128>}, {transform_indices = @transform_2, window_bounds = array<i64: 1064, 128>}, {transform_indices = @transform_3, window_bounds = array<i64: 1, 8, 128>}]} {
    %c0 = arith.constant 0 : index
    %c0_0 = arith.constant 0 : index
    %0 = vector.load %arg1[%c0, %c0_0] : memref<1064x128xbf16, #tpu.memory_space<vmem>>, vector<1064x128xbf16>
    %c0_1 = arith.constant 0 : index
    %c0_2 = arith.constant 0 : index
    %1 = vector.load %arg2[%c0_1, %c0_2] : memref<128x128xbf16, #tpu.memory_space<vmem>>, vector<128x128xbf16>
    %cst = arith.constant dense<0.000000e+00> : vector<1064x128xf32>
    %2 = tpu.matmul %0, %1, %cst {dimension_numbers = #tpu.dot_dimension_numbers<[1], [0], [0], [1], [0, 0, 1, 1], [], []>} : vector<1064x128xbf16>, vector<128x128xbf16>, vector<1064x128xf32> -> vector<1064x128xf32>
    %c0_3 = arith.constant 0 : index
    %c0_4 = arith.constant 0 : index
    %3 = vector.load %arg3[%c0_3, %c0_4] : memref<1064x128xf32, #tpu.memory_space<vmem>>, vector<1064x128xf32>
    tpu.vector_store %arg3[%c0_3, %c0_4], %2 {strides = array<i32>} : memref<1064x128xf32, #tpu.memory_space<vmem>>, vector<1064x128xf32>,
    %cst_5 = arith.constant dense<0.000000e+00> : vector<128xf32>
    %4 = vector.multi_reduction <add>, %2, %cst_5 [0] : vector<1064x128xf32> to vector<128xf32>
    %5 = vector.shape_cast %4 : vector<128xf32> to vector<1x128xf32>
    %6 = arith.mulf %2, %2 : vector<1064x128xf32>
    %cst_6 = arith.constant dense<0.000000e+00> : vector<128xf32>
    %7 = vector.multi_reduction <add>, %6, %cst_6 [0] : vector<1064x128xf32> to vector<128xf32>
    %8 = vector.shape_cast %7 : vector<128xf32> to vector<1x128xf32>
    %9 = tpu.iota {dimensions = array<i32: 0>} : vector<8x128xi32>
    %c0_i32 = arith.constant 0 : i32
    %10 = vector.broadcast %c0_i32 : i32 to vector<8x128xi32>
    %11 = arith.cmpi eq, %9, %10 : vector<8x128xi32>
    %c1_i32 = arith.constant 1 : i32
    %12 = vector.broadcast %c1_i32 : i32 to vector<8x128xi32>
    %13 = arith.cmpi eq, %9, %12 : vector<8x128xi32>
    %cst_7 = arith.constant 0.000000e+00 : f32
    %14 = vector.shape_cast %8 : vector<1x128xf32> to vector<1x128xf32>
    %15 = vector.broadcast %14 : vector<1x128xf32> to vector<8x128xf32>
    %16 = vector.broadcast %cst_7 : f32 to vector<8x128xf32>
    %17 = arith.select %13, %15, %16 : vector<8x128xi1>, vector<8x128xf32>
    %18 = vector.shape_cast %5 : vector<1x128xf32> to vector<1x128xf32>
    %19 = vector.broadcast %18 : vector<1x128xf32> to vector<8x128xf32>
    %20 = arith.select %11, %19, %17 : vector<8x128xi1>, vector<8x128xf32>
    %21 = vector.shape_cast %20 : vector<8x128xf32> to vector<1x8x128xf32>
    %c0_8 = arith.constant 0 : index
    %c0_9 = arith.constant 0 : index
    %c0_10 = arith.constant 0 : index
    %22 = vector.load %arg4[%c0_8, %c0_9, %c0_10] : memref<1x8x128xf32, #tpu.memory_space<vmem>>, vector<1x8x128xf32>
    tpu.vector_store %arg4[%c0_8, %c0_9, %c0_10], %21 {strides = array<i32>} : memref<1x8x128xf32, #tpu.memory_space<vmem>>, vector<1x8x128xf32>,
    return
  }
  func.func @transform_0(%arg0: i32) -> (i32, i32) {
    %c0_i32 = arith.constant 0 : i32
    %c0_i32_0 = arith.constant 0 : i32
    return %arg0, %c0_i32 : i32, i32
  }
  func.func @transform_1(%arg0: i32) -> (i32, i32) {
    %c0_i32 = arith.constant 0 : i32
    %c0_i32_0 = arith.constant 0 : i32
    %c0_i32_1 = arith.constant 0 : i32
    return %c0_i32, %c0_i32_0 : i32, i32
  }
  func.func @transform_2(%arg0: i32) -> (i32, i32) {
    %c0_i32 = arith.constant 0 : i32
    %c0_i32_0 = arith.constant 0 : i32
    return %arg0, %c0_i32 : i32, i32
  }
  func.func @transform_3(%arg0: i32) -> (i32, i32, i32) {
    %c0_i32 = arith.constant 0 : i32
    %c0_i32_0 = arith.constant 0 : i32
    %c0_i32_1 = arith.constant 0 : i32
    return %arg0, %c0_i32, %c0_i32_0 : i32, i32, i32
  }
}

module attributes {stable_mosaic.version = 11 : i64} {
  func.func @_affine_leaky_kernel(%arg0: i32, %arg1: memref<1064x128xf32, #tpu.memory_space<vmem>>, %arg2: memref<1x128xf32, #tpu.memory_space<vmem>>, %arg3: memref<1x128xf32, #tpu.memory_space<vmem>>, %arg4: memref<1064x128xbf16, #tpu.memory_space<vmem>>) attributes {dimension_semantics = [#tpu.dimension_semantics<parallel>], iteration_bounds = array<i64: 4>, scalar_prefetch = 0 : i64, scratch_operands = 0 : i64, tpu.core_type = #tpu.core_type<tc>, window_params = [{transform_indices = @transform_0, window_bounds = array<i64: 1064, 128>}, {pipeline_mode = #tpu.pipeline_mode<synchronous>, transform_indices = @transform_1, window_bounds = array<i64: 1, 128>}, {pipeline_mode = #tpu.pipeline_mode<synchronous>, transform_indices = @transform_2, window_bounds = array<i64: 1, 128>}, {transform_indices = @transform_3, window_bounds = array<i64: 1064, 128>}]} {
    %c0 = arith.constant 0 : index
    %c0_0 = arith.constant 0 : index
    %0 = vector.load %arg1[%c0, %c0_0] : memref<1064x128xf32, #tpu.memory_space<vmem>>, vector<1064x128xf32>
    %c0_1 = arith.constant 0 : index
    %c0_2 = arith.constant 0 : index
    %1 = vector.load %arg2[%c0_1, %c0_2] : memref<1x128xf32, #tpu.memory_space<vmem>>, vector<1x128xf32>
    %2 = vector.broadcast %1 : vector<1x128xf32> to vector<1064x128xf32>
    %3 = arith.mulf %0, %2 : vector<1064x128xf32>
    %c0_3 = arith.constant 0 : index
    %c0_4 = arith.constant 0 : index
    %4 = vector.load %arg3[%c0_3, %c0_4] : memref<1x128xf32, #tpu.memory_space<vmem>>, vector<1x128xf32>
    %5 = vector.broadcast %4 : vector<1x128xf32> to vector<1064x128xf32>
    %6 = arith.addf %3, %5 : vector<1064x128xf32>
    %cst = arith.constant 2.000000e-01 : f32
    %7 = vector.broadcast %cst : f32 to vector<1064x128xf32>
    %8 = arith.mulf %7, %6 : vector<1064x128xf32>
    %9 = arith.maximumf %6, %8 : vector<1064x128xf32>
    %10 = arith.truncf %9 : vector<1064x128xf32> to vector<1064x128xbf16>
    %c0_5 = arith.constant 0 : index
    %c0_6 = arith.constant 0 : index
    %11 = vector.load %arg4[%c0_5, %c0_6] : memref<1064x128xbf16, #tpu.memory_space<vmem>>, vector<1064x128xbf16>
    tpu.vector_store %arg4[%c0_5, %c0_6], %10 {strides = array<i32>} : memref<1064x128xbf16, #tpu.memory_space<vmem>>, vector<1064x128xbf16>,
    return
  }
  func.func @transform_0(%arg0: i32) -> (i32, i32) {
    %c0_i32 = arith.constant 0 : i32
    %c0_i32_0 = arith.constant 0 : i32
    return %arg0, %c0_i32 : i32, i32
  }
  func.func @transform_1(%arg0: i32) -> (i32, i32) {
    %c0_i32 = arith.constant 0 : i32
    %c0_i32_0 = arith.constant 0 : i32
    %c0_i32_1 = arith.constant 0 : i32
    return %c0_i32, %c0_i32_0 : i32, i32
  }
  func.func @transform_2(%arg0: i32) -> (i32, i32) {
    %c0_i32 = arith.constant 0 : i32
    %c0_i32_0 = arith.constant 0 : i32
    %c0_i32_1 = arith.constant 0 : i32
    return %c0_i32, %c0_i32_0 : i32, i32
  }
  func.func @transform_3(%arg0: i32) -> (i32, i32) {
    %c0_i32 = arith.constant 0 : i32
    %c0_i32_0 = arith.constant 0 : i32
    return %arg0, %c0_i32 : i32, i32
  }
}

module attributes {stable_mosaic.version = 11 : i64} {
  func.func @_conv_bn_stats_kernel(%arg0: i32, %arg1: memref<488x128xbf16, #tpu.memory_space<vmem>>, %arg2: memref<128x128xbf16, #tpu.memory_space<vmem>>, %arg3: memref<488x128xf32, #tpu.memory_space<vmem>>, %arg4: memref<1x8x128xf32, #tpu.memory_space<vmem>>) attributes {dimension_semantics = [#tpu.dimension_semantics<parallel>], iteration_bounds = array<i64: 2>, scalar_prefetch = 0 : i64, scratch_operands = 0 : i64, tpu.core_type = #tpu.core_type<tc>, window_params = [{transform_indices = @transform_0, window_bounds = array<i64: 488, 128>}, {pipeline_mode = #tpu.pipeline_mode<synchronous>, transform_indices = @transform_1, window_bounds = array<i64: 128, 128>}, {transform_indices = @transform_2, window_bounds = array<i64: 488, 128>}, {transform_indices = @transform_3, window_bounds = array<i64: 1, 8, 128>}]} {
    %c0 = arith.constant 0 : index
    %c0_0 = arith.constant 0 : index
    %0 = vector.load %arg1[%c0, %c0_0] : memref<488x128xbf16, #tpu.memory_space<vmem>>, vector<488x128xbf16>
    %c0_1 = arith.constant 0 : index
    %c0_2 = arith.constant 0 : index
    %1 = vector.load %arg2[%c0_1, %c0_2] : memref<128x128xbf16, #tpu.memory_space<vmem>>, vector<128x128xbf16>
    %cst = arith.constant dense<0.000000e+00> : vector<488x128xf32>
    %2 = tpu.matmul %0, %1, %cst {dimension_numbers = #tpu.dot_dimension_numbers<[1], [0], [0], [1], [0, 0, 1, 1], [], []>} : vector<488x128xbf16>, vector<128x128xbf16>, vector<488x128xf32> -> vector<488x128xf32>
    %c0_3 = arith.constant 0 : index
    %c0_4 = arith.constant 0 : index
    %3 = vector.load %arg3[%c0_3, %c0_4] : memref<488x128xf32, #tpu.memory_space<vmem>>, vector<488x128xf32>
    tpu.vector_store %arg3[%c0_3, %c0_4], %2 {strides = array<i32>} : memref<488x128xf32, #tpu.memory_space<vmem>>, vector<488x128xf32>,
    %cst_5 = arith.constant dense<0.000000e+00> : vector<128xf32>
    %4 = vector.multi_reduction <add>, %2, %cst_5 [0] : vector<488x128xf32> to vector<128xf32>
    %5 = vector.shape_cast %4 : vector<128xf32> to vector<1x128xf32>
    %6 = arith.mulf %2, %2 : vector<488x128xf32>
    %cst_6 = arith.constant dense<0.000000e+00> : vector<128xf32>
    %7 = vector.multi_reduction <add>, %6, %cst_6 [0] : vector<488x128xf32> to vector<128xf32>
    %8 = vector.shape_cast %7 : vector<128xf32> to vector<1x128xf32>
    %9 = tpu.iota {dimensions = array<i32: 0>} : vector<8x128xi32>
    %c0_i32 = arith.constant 0 : i32
    %10 = vector.broadcast %c0_i32 : i32 to vector<8x128xi32>
    %11 = arith.cmpi eq, %9, %10 : vector<8x128xi32>
    %c1_i32 = arith.constant 1 : i32
    %12 = vector.broadcast %c1_i32 : i32 to vector<8x128xi32>
    %13 = arith.cmpi eq, %9, %12 : vector<8x128xi32>
    %cst_7 = arith.constant 0.000000e+00 : f32
    %14 = vector.shape_cast %8 : vector<1x128xf32> to vector<1x128xf32>
    %15 = vector.broadcast %14 : vector<1x128xf32> to vector<8x128xf32>
    %16 = vector.broadcast %cst_7 : f32 to vector<8x128xf32>
    %17 = arith.select %13, %15, %16 : vector<8x128xi1>, vector<8x128xf32>
    %18 = vector.shape_cast %5 : vector<1x128xf32> to vector<1x128xf32>
    %19 = vector.broadcast %18 : vector<1x128xf32> to vector<8x128xf32>
    %20 = arith.select %11, %19, %17 : vector<8x128xi1>, vector<8x128xf32>
    %21 = vector.shape_cast %20 : vector<8x128xf32> to vector<1x8x128xf32>
    %c0_8 = arith.constant 0 : index
    %c0_9 = arith.constant 0 : index
    %c0_10 = arith.constant 0 : index
    %22 = vector.load %arg4[%c0_8, %c0_9, %c0_10] : memref<1x8x128xf32, #tpu.memory_space<vmem>>, vector<1x8x128xf32>
    tpu.vector_store %arg4[%c0_8, %c0_9, %c0_10], %21 {strides = array<i32>} : memref<1x8x128xf32, #tpu.memory_space<vmem>>, vector<1x8x128xf32>,
    return
  }
  func.func @transform_0(%arg0: i32) -> (i32, i32) {
    %c0_i32 = arith.constant 0 : i32
    %c0_i32_0 = arith.constant 0 : i32
    return %arg0, %c0_i32 : i32, i32
  }
  func.func @transform_1(%arg0: i32) -> (i32, i32) {
    %c0_i32 = arith.constant 0 : i32
    %c0_i32_0 = arith.constant 0 : i32
    %c0_i32_1 = arith.constant 0 : i32
    return %c0_i32, %c0_i32_0 : i32, i32
  }
  func.func @transform_2(%arg0: i32) -> (i32, i32) {
    %c0_i32 = arith.constant 0 : i32
    %c0_i32_0 = arith.constant 0 : i32
    return %arg0, %c0_i32 : i32, i32
  }
  func.func @transform_3(%arg0: i32) -> (i32, i32, i32) {
    %c0_i32 = arith.constant 0 : i32
    %c0_i32_0 = arith.constant 0 : i32
    %c0_i32_1 = arith.constant 0 : i32
    return %arg0, %c0_i32, %c0_i32_0 : i32, i32, i32
  }
}

module attributes {stable_mosaic.version = 11 : i64} {
  func.func @_affine_leaky_kernel(%arg0: i32, %arg1: memref<488x128xf32, #tpu.memory_space<vmem>>, %arg2: memref<1x128xf32, #tpu.memory_space<vmem>>, %arg3: memref<1x128xf32, #tpu.memory_space<vmem>>, %arg4: memref<488x128xbf16, #tpu.memory_space<vmem>>) attributes {dimension_semantics = [#tpu.dimension_semantics<parallel>], iteration_bounds = array<i64: 2>, scalar_prefetch = 0 : i64, scratch_operands = 0 : i64, tpu.core_type = #tpu.core_type<tc>, window_params = [{transform_indices = @transform_0, window_bounds = array<i64: 488, 128>}, {pipeline_mode = #tpu.pipeline_mode<synchronous>, transform_indices = @transform_1, window_bounds = array<i64: 1, 128>}, {pipeline_mode = #tpu.pipeline_mode<synchronous>, transform_indices = @transform_2, window_bounds = array<i64: 1, 128>}, {transform_indices = @transform_3, window_bounds = array<i64: 488, 128>}]} {
    %c0 = arith.constant 0 : index
    %c0_0 = arith.constant 0 : index
    %0 = vector.load %arg1[%c0, %c0_0] : memref<488x128xf32, #tpu.memory_space<vmem>>, vector<488x128xf32>
    %c0_1 = arith.constant 0 : index
    %c0_2 = arith.constant 0 : index
    %1 = vector.load %arg2[%c0_1, %c0_2] : memref<1x128xf32, #tpu.memory_space<vmem>>, vector<1x128xf32>
    %2 = vector.broadcast %1 : vector<1x128xf32> to vector<488x128xf32>
    %3 = arith.mulf %0, %2 : vector<488x128xf32>
    %c0_3 = arith.constant 0 : index
    %c0_4 = arith.constant 0 : index
    %4 = vector.load %arg3[%c0_3, %c0_4] : memref<1x128xf32, #tpu.memory_space<vmem>>, vector<1x128xf32>
    %5 = vector.broadcast %4 : vector<1x128xf32> to vector<488x128xf32>
    %6 = arith.addf %3, %5 : vector<488x128xf32>
    %cst = arith.constant 2.000000e-01 : f32
    %7 = vector.broadcast %cst : f32 to vector<488x128xf32>
    %8 = arith.mulf %7, %6 : vector<488x128xf32>
    %9 = arith.maximumf %6, %8 : vector<488x128xf32>
    %10 = arith.truncf %9 : vector<488x128xf32> to vector<488x128xbf16>
    %c0_5 = arith.constant 0 : index
    %c0_6 = arith.constant 0 : index
    %11 = vector.load %arg4[%c0_5, %c0_6] : memref<488x128xbf16, #tpu.memory_space<vmem>>, vector<488x128xbf16>
    tpu.vector_store %arg4[%c0_5, %c0_6], %10 {strides = array<i32>} : memref<488x128xbf16, #tpu.memory_space<vmem>>, vector<488x128xbf16>,
    return
  }
  func.func @transform_0(%arg0: i32) -> (i32, i32) {
    %c0_i32 = arith.constant 0 : i32
    %c0_i32_0 = arith.constant 0 : i32
    return %arg0, %c0_i32 : i32, i32
  }
  func.func @transform_1(%arg0: i32) -> (i32, i32) {
    %c0_i32 = arith.constant 0 : i32
    %c0_i32_0 = arith.constant 0 : i32
    %c0_i32_1 = arith.constant 0 : i32
    return %c0_i32, %c0_i32_0 : i32, i32
  }
  func.func @transform_2(%arg0: i32) -> (i32, i32) {
    %c0_i32 = arith.constant 0 : i32
    %c0_i32_0 = arith.constant 0 : i32
    %c0_i32_1 = arith.constant 0 : i32
    return %c0_i32, %c0_i32_0 : i32, i32
  }
  func.func @transform_3(%arg0: i32) -> (i32, i32) {
    %c0_i32 = arith.constant 0 : i32
    %c0_i32_0 = arith.constant 0 : i32
    return %arg0, %c0_i32 : i32, i32
  }
}

module attributes {stable_mosaic.version = 11 : i64} {
  func.func @_affine_leaky_kernel(%arg0: i32, %arg1: memref<104x128xf32, #tpu.memory_space<vmem>>, %arg2: memref<1x128xf32, #tpu.memory_space<vmem>>, %arg3: memref<1x128xf32, #tpu.memory_space<vmem>>, %arg4: memref<104x128xbf16, #tpu.memory_space<vmem>>) attributes {dimension_semantics = [#tpu.dimension_semantics<parallel>], iteration_bounds = array<i64: 2>, scalar_prefetch = 0 : i64, scratch_operands = 0 : i64, tpu.core_type = #tpu.core_type<tc>, window_params = [{transform_indices = @transform_0, window_bounds = array<i64: 104, 128>}, {pipeline_mode = #tpu.pipeline_mode<synchronous>, transform_indices = @transform_1, window_bounds = array<i64: 1, 128>}, {pipeline_mode = #tpu.pipeline_mode<synchronous>, transform_indices = @transform_2, window_bounds = array<i64: 1, 128>}, {transform_indices = @transform_3, window_bounds = array<i64: 104, 128>}]} {
    %c0 = arith.constant 0 : index
    %c0_0 = arith.constant 0 : index
    %0 = vector.load %arg1[%c0, %c0_0] : memref<104x128xf32, #tpu.memory_space<vmem>>, vector<104x128xf32>
    %c0_1 = arith.constant 0 : index
    %c0_2 = arith.constant 0 : index
    %1 = vector.load %arg2[%c0_1, %c0_2] : memref<1x128xf32, #tpu.memory_space<vmem>>, vector<1x128xf32>
    %2 = vector.broadcast %1 : vector<1x128xf32> to vector<104x128xf32>
    %3 = arith.mulf %0, %2 : vector<104x128xf32>
    %c0_3 = arith.constant 0 : index
    %c0_4 = arith.constant 0 : index
    %4 = vector.load %arg3[%c0_3, %c0_4] : memref<1x128xf32, #tpu.memory_space<vmem>>, vector<1x128xf32>
    %5 = vector.broadcast %4 : vector<1x128xf32> to vector<104x128xf32>
    %6 = arith.addf %3, %5 : vector<104x128xf32>
    %cst = arith.constant 2.000000e-01 : f32
    %7 = vector.broadcast %cst : f32 to vector<104x128xf32>
    %8 = arith.mulf %7, %6 : vector<104x128xf32>
    %9 = arith.maximumf %6, %8 : vector<104x128xf32>
    %10 = arith.truncf %9 : vector<104x128xf32> to vector<104x128xbf16>
    %c0_5 = arith.constant 0 : index
    %c0_6 = arith.constant 0 : index
    %11 = vector.load %arg4[%c0_5, %c0_6] : memref<104x128xbf16, #tpu.memory_space<vmem>>, vector<104x128xbf16>
    tpu.vector_store %arg4[%c0_5, %c0_6], %10 {strides = array<i32>} : memref<104x128xbf16, #tpu.memory_space<vmem>>, vector<104x128xbf16>,
    return
  }
  func.func @transform_0(%arg0: i32) -> (i32, i32) {
    %c0_i32 = arith.constant 0 : i32
    %c0_i32_0 = arith.constant 0 : i32
    return %arg0, %c0_i32 : i32, i32
  }
  func.func @transform_1(%arg0: i32) -> (i32, i32) {
    %c0_i32 = arith.constant 0 : i32
    %c0_i32_0 = arith.constant 0 : i32
    %c0_i32_1 = arith.constant 0 : i32
    return %c0_i32, %c0_i32_0 : i32, i32
  }
  func.func @transform_2(%arg0: i32) -> (i32, i32) {
    %c0_i32 = arith.constant 0 : i32
    %c0_i32_0 = arith.constant 0 : i32
    %c0_i32_1 = arith.constant 0 : i32
    return %c0_i32, %c0_i32_0 : i32, i32
  }
  func.func @transform_3(%arg0: i32) -> (i32, i32) {
    %c0_i32 = arith.constant 0 : i32
    %c0_i32_0 = arith.constant 0 : i32
    return %arg0, %c0_i32 : i32, i32
  }
}

module attributes {stable_mosaic.version = 11 : i64} {
  func.func @_conv_bn_stats_kernel(%arg0: i32, %arg1: memref<104x128xbf16, #tpu.memory_space<vmem>>, %arg2: memref<128x128xbf16, #tpu.memory_space<vmem>>, %arg3: memref<104x128xf32, #tpu.memory_space<vmem>>, %arg4: memref<1x8x128xf32, #tpu.memory_space<vmem>>) attributes {dimension_semantics = [#tpu.dimension_semantics<parallel>], iteration_bounds = array<i64: 2>, scalar_prefetch = 0 : i64, scratch_operands = 0 : i64, tpu.core_type = #tpu.core_type<tc>, window_params = [{transform_indices = @transform_0, window_bounds = array<i64: 104, 128>}, {pipeline_mode = #tpu.pipeline_mode<synchronous>, transform_indices = @transform_1, window_bounds = array<i64: 128, 128>}, {transform_indices = @transform_2, window_bounds = array<i64: 104, 128>}, {transform_indices = @transform_3, window_bounds = array<i64: 1, 8, 128>}]} {
    %c0 = arith.constant 0 : index
    %c0_0 = arith.constant 0 : index
    %0 = vector.load %arg1[%c0, %c0_0] : memref<104x128xbf16, #tpu.memory_space<vmem>>, vector<104x128xbf16>
    %c0_1 = arith.constant 0 : index
    %c0_2 = arith.constant 0 : index
    %1 = vector.load %arg2[%c0_1, %c0_2] : memref<128x128xbf16, #tpu.memory_space<vmem>>, vector<128x128xbf16>
    %cst = arith.constant dense<0.000000e+00> : vector<104x128xf32>
    %2 = tpu.matmul %0, %1, %cst {dimension_numbers = #tpu.dot_dimension_numbers<[1], [0], [0], [1], [0, 0, 1, 1], [], []>} : vector<104x128xbf16>, vector<128x128xbf16>, vector<104x128xf32> -> vector<104x128xf32>
    %c0_3 = arith.constant 0 : index
    %c0_4 = arith.constant 0 : index
    %3 = vector.load %arg3[%c0_3, %c0_4] : memref<104x128xf32, #tpu.memory_space<vmem>>, vector<104x128xf32>
    tpu.vector_store %arg3[%c0_3, %c0_4], %2 {strides = array<i32>} : memref<104x128xf32, #tpu.memory_space<vmem>>, vector<104x128xf32>,
    %cst_5 = arith.constant dense<0.000000e+00> : vector<128xf32>
    %4 = vector.multi_reduction <add>, %2, %cst_5 [0] : vector<104x128xf32> to vector<128xf32>
    %5 = vector.shape_cast %4 : vector<128xf32> to vector<1x128xf32>
    %6 = arith.mulf %2, %2 : vector<104x128xf32>
    %cst_6 = arith.constant dense<0.000000e+00> : vector<128xf32>
    %7 = vector.multi_reduction <add>, %6, %cst_6 [0] : vector<104x128xf32> to vector<128xf32>
    %8 = vector.shape_cast %7 : vector<128xf32> to vector<1x128xf32>
    %9 = tpu.iota {dimensions = array<i32: 0>} : vector<8x128xi32>
    %c0_i32 = arith.constant 0 : i32
    %10 = vector.broadcast %c0_i32 : i32 to vector<8x128xi32>
    %11 = arith.cmpi eq, %9, %10 : vector<8x128xi32>
    %c1_i32 = arith.constant 1 : i32
    %12 = vector.broadcast %c1_i32 : i32 to vector<8x128xi32>
    %13 = arith.cmpi eq, %9, %12 : vector<8x128xi32>
    %cst_7 = arith.constant 0.000000e+00 : f32
    %14 = vector.shape_cast %8 : vector<1x128xf32> to vector<1x128xf32>
    %15 = vector.broadcast %14 : vector<1x128xf32> to vector<8x128xf32>
    %16 = vector.broadcast %cst_7 : f32 to vector<8x128xf32>
    %17 = arith.select %13, %15, %16 : vector<8x128xi1>, vector<8x128xf32>
    %18 = vector.shape_cast %5 : vector<1x128xf32> to vector<1x128xf32>
    %19 = vector.broadcast %18 : vector<1x128xf32> to vector<8x128xf32>
    %20 = arith.select %11, %19, %17 : vector<8x128xi1>, vector<8x128xf32>
    %21 = vector.shape_cast %20 : vector<8x128xf32> to vector<1x8x128xf32>
    %c0_8 = arith.constant 0 : index
    %c0_9 = arith.constant 0 : index
    %c0_10 = arith.constant 0 : index
    %22 = vector.load %arg4[%c0_8, %c0_9, %c0_10] : memref<1x8x128xf32, #tpu.memory_space<vmem>>, vector<1x8x128xf32>
    tpu.vector_store %arg4[%c0_8, %c0_9, %c0_10], %21 {strides = array<i32>} : memref<1x8x128xf32, #tpu.memory_space<vmem>>, vector<1x8x128xf32>,
    return
  }
  func.func @transform_0(%arg0: i32) -> (i32, i32) {
    %c0_i32 = arith.constant 0 : i32
    %c0_i32_0 = arith.constant 0 : i32
    return %arg0, %c0_i32 : i32, i32
  }
  func.func @transform_1(%arg0: i32) -> (i32, i32) {
    %c0_i32 = arith.constant 0 : i32
    %c0_i32_0 = arith.constant 0 : i32
    %c0_i32_1 = arith.constant 0 : i32
    return %c0_i32, %c0_i32_0 : i32, i32
  }
  func.func @transform_2(%arg0: i32) -> (i32, i32) {
    %c0_i32 = arith.constant 0 : i32
    %c0_i32_0 = arith.constant 0 : i32
    return %arg0, %c0_i32 : i32, i32
  }
  func.func @transform_3(%arg0: i32) -> (i32, i32, i32) {
    %c0_i32 = arith.constant 0 : i32
    %c0_i32_0 = arith.constant 0 : i32
    %c0_i32_1 = arith.constant 0 : i32
    return %arg0, %c0_i32, %c0_i32_0 : i32, i32, i32
  }
}

module attributes {stable_mosaic.version = 11 : i64} {
  func.func @_affine_leaky_kernel(%arg0: i32, %arg1: memref<16x128xf32, #tpu.memory_space<vmem>>, %arg2: memref<1x128xf32, #tpu.memory_space<vmem>>, %arg3: memref<1x128xf32, #tpu.memory_space<vmem>>, %arg4: memref<16x128xbf16, #tpu.memory_space<vmem>>) attributes {dimension_semantics = [#tpu.dimension_semantics<parallel>], iteration_bounds = array<i64: 2>, scalar_prefetch = 0 : i64, scratch_operands = 0 : i64, tpu.core_type = #tpu.core_type<tc>, window_params = [{transform_indices = @transform_0, window_bounds = array<i64: 16, 128>}, {pipeline_mode = #tpu.pipeline_mode<synchronous>, transform_indices = @transform_1, window_bounds = array<i64: 1, 128>}, {pipeline_mode = #tpu.pipeline_mode<synchronous>, transform_indices = @transform_2, window_bounds = array<i64: 1, 128>}, {transform_indices = @transform_3, window_bounds = array<i64: 16, 128>}]} {
    %c0 = arith.constant 0 : index
    %c0_0 = arith.constant 0 : index
    %0 = vector.load %arg1[%c0, %c0_0] : memref<16x128xf32, #tpu.memory_space<vmem>>, vector<16x128xf32>
    %c0_1 = arith.constant 0 : index
    %c0_2 = arith.constant 0 : index
    %1 = vector.load %arg2[%c0_1, %c0_2] : memref<1x128xf32, #tpu.memory_space<vmem>>, vector<1x128xf32>
    %2 = vector.broadcast %1 : vector<1x128xf32> to vector<16x128xf32>
    %3 = arith.mulf %0, %2 : vector<16x128xf32>
    %c0_3 = arith.constant 0 : index
    %c0_4 = arith.constant 0 : index
    %4 = vector.load %arg3[%c0_3, %c0_4] : memref<1x128xf32, #tpu.memory_space<vmem>>, vector<1x128xf32>
    %5 = vector.broadcast %4 : vector<1x128xf32> to vector<16x128xf32>
    %6 = arith.addf %3, %5 : vector<16x128xf32>
    %cst = arith.constant 2.000000e-01 : f32
    %7 = vector.broadcast %cst : f32 to vector<16x128xf32>
    %8 = arith.mulf %7, %6 : vector<16x128xf32>
    %9 = arith.maximumf %6, %8 : vector<16x128xf32>
    %10 = arith.truncf %9 : vector<16x128xf32> to vector<16x128xbf16>
    %c0_5 = arith.constant 0 : index
    %c0_6 = arith.constant 0 : index
    %11 = vector.load %arg4[%c0_5, %c0_6] : memref<16x128xbf16, #tpu.memory_space<vmem>>, vector<16x128xbf16>
    tpu.vector_store %arg4[%c0_5, %c0_6], %10 {strides = array<i32>} : memref<16x128xbf16, #tpu.memory_space<vmem>>, vector<16x128xbf16>,
    return
  }
  func.func @transform_0(%arg0: i32) -> (i32, i32) {
    %c0_i32 = arith.constant 0 : i32
    %c0_i32_0 = arith.constant 0 : i32
    return %arg0, %c0_i32 : i32, i32
  }
  func.func @transform_1(%arg0: i32) -> (i32, i32) {
    %c0_i32 = arith.constant 0 : i32
    %c0_i32_0 = arith.constant 0 : i32
    %c0_i32_1 = arith.constant 0 : i32
    return %c0_i32, %c0_i32_0 : i32, i32
  }
  func.func @transform_2(%arg0: i32) -> (i32, i32) {
    %c0_i32 = arith.constant 0 : i32
    %c0_i32_0 = arith.constant 0 : i32
    %c0_i32_1 = arith.constant 0 : i32
    return %c0_i32, %c0_i32_0 : i32, i32
  }
  func.func @transform_3(%arg0: i32) -> (i32, i32) {
    %c0_i32 = arith.constant 0 : i32
    %c0_i32_0 = arith.constant 0 : i32
    return %arg0, %c0_i32 : i32, i32
  }
}

module attributes {stable_mosaic.version = 11 : i64} {
  func.func @_conv_bn_stats_kernel(%arg0: i32, %arg1: memref<16x256xbf16, #tpu.memory_space<vmem>>, %arg2: memref<256x128xbf16, #tpu.memory_space<vmem>>, %arg3: memref<16x128xf32, #tpu.memory_space<vmem>>, %arg4: memref<1x8x128xf32, #tpu.memory_space<vmem>>) attributes {dimension_semantics = [#tpu.dimension_semantics<parallel>], iteration_bounds = array<i64: 2>, scalar_prefetch = 0 : i64, scratch_operands = 0 : i64, tpu.core_type = #tpu.core_type<tc>, window_params = [{transform_indices = @transform_0, window_bounds = array<i64: 16, 256>}, {pipeline_mode = #tpu.pipeline_mode<synchronous>, transform_indices = @transform_1, window_bounds = array<i64: 256, 128>}, {transform_indices = @transform_2, window_bounds = array<i64: 16, 128>}, {transform_indices = @transform_3, window_bounds = array<i64: 1, 8, 128>}]} {
    %c0 = arith.constant 0 : index
    %c0_0 = arith.constant 0 : index
    %0 = vector.load %arg1[%c0, %c0_0] : memref<16x256xbf16, #tpu.memory_space<vmem>>, vector<16x256xbf16>
    %c0_1 = arith.constant 0 : index
    %c0_2 = arith.constant 0 : index
    %1 = vector.load %arg2[%c0_1, %c0_2] : memref<256x128xbf16, #tpu.memory_space<vmem>>, vector<256x128xbf16>
    %cst = arith.constant dense<0.000000e+00> : vector<16x128xf32>
    %2 = tpu.matmul %0, %1, %cst {dimension_numbers = #tpu.dot_dimension_numbers<[1], [0], [0], [1], [0, 0, 1, 1], [], []>} : vector<16x256xbf16>, vector<256x128xbf16>, vector<16x128xf32> -> vector<16x128xf32>
    %c0_3 = arith.constant 0 : index
    %c0_4 = arith.constant 0 : index
    %3 = vector.load %arg3[%c0_3, %c0_4] : memref<16x128xf32, #tpu.memory_space<vmem>>, vector<16x128xf32>
    tpu.vector_store %arg3[%c0_3, %c0_4], %2 {strides = array<i32>} : memref<16x128xf32, #tpu.memory_space<vmem>>, vector<16x128xf32>,
    %cst_5 = arith.constant dense<0.000000e+00> : vector<128xf32>
    %4 = vector.multi_reduction <add>, %2, %cst_5 [0] : vector<16x128xf32> to vector<128xf32>
    %5 = vector.shape_cast %4 : vector<128xf32> to vector<1x128xf32>
    %6 = arith.mulf %2, %2 : vector<16x128xf32>
    %cst_6 = arith.constant dense<0.000000e+00> : vector<128xf32>
    %7 = vector.multi_reduction <add>, %6, %cst_6 [0] : vector<16x128xf32> to vector<128xf32>
    %8 = vector.shape_cast %7 : vector<128xf32> to vector<1x128xf32>
    %9 = tpu.iota {dimensions = array<i32: 0>} : vector<8x128xi32>
    %c0_i32 = arith.constant 0 : i32
    %10 = vector.broadcast %c0_i32 : i32 to vector<8x128xi32>
    %11 = arith.cmpi eq, %9, %10 : vector<8x128xi32>
    %c1_i32 = arith.constant 1 : i32
    %12 = vector.broadcast %c1_i32 : i32 to vector<8x128xi32>
    %13 = arith.cmpi eq, %9, %12 : vector<8x128xi32>
    %cst_7 = arith.constant 0.000000e+00 : f32
    %14 = vector.shape_cast %8 : vector<1x128xf32> to vector<1x128xf32>
    %15 = vector.broadcast %14 : vector<1x128xf32> to vector<8x128xf32>
    %16 = vector.broadcast %cst_7 : f32 to vector<8x128xf32>
    %17 = arith.select %13, %15, %16 : vector<8x128xi1>, vector<8x128xf32>
    %18 = vector.shape_cast %5 : vector<1x128xf32> to vector<1x128xf32>
    %19 = vector.broadcast %18 : vector<1x128xf32> to vector<8x128xf32>
    %20 = arith.select %11, %19, %17 : vector<8x128xi1>, vector<8x128xf32>
    %21 = vector.shape_cast %20 : vector<8x128xf32> to vector<1x8x128xf32>
    %c0_8 = arith.constant 0 : index
    %c0_9 = arith.constant 0 : index
    %c0_10 = arith.constant 0 : index
    %22 = vector.load %arg4[%c0_8, %c0_9, %c0_10] : memref<1x8x128xf32, #tpu.memory_space<vmem>>, vector<1x8x128xf32>
    tpu.vector_store %arg4[%c0_8, %c0_9, %c0_10], %21 {strides = array<i32>} : memref<1x8x128xf32, #tpu.memory_space<vmem>>, vector<1x8x128xf32>,
    return
  }
  func.func @transform_0(%arg0: i32) -> (i32, i32) {
    %c0_i32 = arith.constant 0 : i32
    %c0_i32_0 = arith.constant 0 : i32
    return %arg0, %c0_i32 : i32, i32
  }
  func.func @transform_1(%arg0: i32) -> (i32, i32) {
    %c0_i32 = arith.constant 0 : i32
    %c0_i32_0 = arith.constant 0 : i32
    %c0_i32_1 = arith.constant 0 : i32
    return %c0_i32, %c0_i32_0 : i32, i32
  }
  func.func @transform_2(%arg0: i32) -> (i32, i32) {
    %c0_i32 = arith.constant 0 : i32
    %c0_i32_0 = arith.constant 0 : i32
    return %arg0, %c0_i32 : i32, i32
  }
  func.func @transform_3(%arg0: i32) -> (i32, i32, i32) {
    %c0_i32 = arith.constant 0 : i32
    %c0_i32_0 = arith.constant 0 : i32
    %c0_i32_1 = arith.constant 0 : i32
    return %arg0, %c0_i32, %c0_i32_0 : i32, i32, i32
  }
}

module attributes {stable_mosaic.version = 11 : i64} {
  func.func @_conv_bias_act_kernel(%arg0: i32, %arg1: memref<8x512xbf16, #tpu.memory_space<vmem>>, %arg2: memref<512x128xbf16, #tpu.memory_space<vmem>>, %arg3: memref<1x128xf32, #tpu.memory_space<vmem>>, %arg4: memref<8x128xf32, #tpu.memory_space<vmem>>) attributes {dimension_semantics = [#tpu.dimension_semantics<parallel>], iteration_bounds = array<i64: 1>, scalar_prefetch = 0 : i64, scratch_operands = 0 : i64, tpu.core_type = #tpu.core_type<tc>, window_params = [{transform_indices = @transform_0, window_bounds = array<i64: 8, 512>}, {pipeline_mode = #tpu.pipeline_mode<synchronous>, transform_indices = @transform_1, window_bounds = array<i64: 512, 128>}, {pipeline_mode = #tpu.pipeline_mode<synchronous>, transform_indices = @transform_2, window_bounds = array<i64: 1, 128>}, {transform_indices = @transform_3, window_bounds = array<i64: 8, 128>}]} {
    %c0 = arith.constant 0 : index
    %c0_0 = arith.constant 0 : index
    %0 = vector.load %arg1[%c0, %c0_0] : memref<8x512xbf16, #tpu.memory_space<vmem>>, vector<8x512xbf16>
    %c0_1 = arith.constant 0 : index
    %c0_2 = arith.constant 0 : index
    %1 = vector.load %arg2[%c0_1, %c0_2] : memref<512x128xbf16, #tpu.memory_space<vmem>>, vector<512x128xbf16>
    %cst = arith.constant dense<0.000000e+00> : vector<8x128xf32>
    %2 = tpu.matmul %0, %1, %cst {dimension_numbers = #tpu.dot_dimension_numbers<[1], [0], [0], [1], [0, 0, 1, 1], [], []>} : vector<8x512xbf16>, vector<512x128xbf16>, vector<8x128xf32> -> vector<8x128xf32>
    %c0_3 = arith.constant 0 : index
    %c0_4 = arith.constant 0 : index
    %3 = vector.load %arg3[%c0_3, %c0_4] : memref<1x128xf32, #tpu.memory_space<vmem>>, vector<1x128xf32>
    %4 = vector.broadcast %3 : vector<1x128xf32> to vector<8x128xf32>
    %5 = arith.addf %2, %4 : vector<8x128xf32>
    %cst_5 = arith.constant 0.000000e+00 : f32
    %6 = vector.broadcast %cst_5 : f32 to vector<8x128xf32>
    %7 = arith.subf %6, %5 : vector<8x128xf32>
    %8 = math.exp %7 : vector<8x128xf32>
    %cst_6 = arith.constant 1.000000e+00 : f32
    %9 = vector.broadcast %cst_6 : f32 to vector<8x128xf32>
    %10 = arith.addf %9, %8 : vector<8x128xf32>
    %cst_7 = arith.constant 1.000000e+00 : f32
    %11 = vector.broadcast %cst_7 : f32 to vector<8x128xf32>
    %12 = arith.divf %11, %10 : vector<8x128xf32>
    %c0_8 = arith.constant 0 : index
    %c0_9 = arith.constant 0 : index
    %13 = vector.load %arg4[%c0_8, %c0_9] : memref<8x128xf32, #tpu.memory_space<vmem>>, vector<8x128xf32>
    tpu.vector_store %arg4[%c0_8, %c0_9], %12 {strides = array<i32>} : memref<8x128xf32, #tpu.memory_space<vmem>>, vector<8x128xf32>,
    return
  }
  func.func @transform_0(%arg0: i32) -> (i32, i32) {
    %c0_i32 = arith.constant 0 : i32
    %c0_i32_0 = arith.constant 0 : i32
    return %arg0, %c0_i32 : i32, i32
  }
  func.func @transform_1(%arg0: i32) -> (i32, i32) {
    %c0_i32 = arith.constant 0 : i32
    %c0_i32_0 = arith.constant 0 : i32
    %c0_i32_1 = arith.constant 0 : i32
    return %c0_i32, %c0_i32_0 : i32, i32
  }
  func.func @transform_2(%arg0: i32) -> (i32, i32) {
    %c0_i32 = arith.constant 0 : i32
    %c0_i32_0 = arith.constant 0 : i32
    %c0_i32_1 = arith.constant 0 : i32
    return %c0_i32, %c0_i32_0 : i32, i32
  }
  func.func @transform_3(%arg0: i32) -> (i32, i32) {
    %c0_i32 = arith.constant 0 : i32
    %c0_i32_0 = arith.constant 0 : i32
    return %arg0, %c0_i32 : i32, i32
  }
}

</mosaic_0001>

<bundles_post_ra>
// kernel: discriminator_forward.10
= control target key start
LH: loop header
LB: loop body
LE: loop exit
PB: predicated region body
PF: predicated region fallthrough
CT: control target
= control target key end

     0   :  { %8 = vsyncpa [#allocation3], 0  ;;  %s6891_s0 = inlined_call_operand.hbm [shape: bf16[17680,128], index: 0, kind: input, shape index: {}]   ;;  %s6892_s1 = inlined_call_operand.hbm [shape: bf16[128,128], index: 1, kind: input, shape index: {}]   ;;  %s6893_s2 = inlined_call_operand.hbm [shape: f32[1,128], index: 2, kind: input, shape index: {}]   ;;  %s6894_s3 = inlined_call_operand.hbm [shape: bf16[17680,128], index: 3, kind: output, shape index: {}]  }
   0x1   :  { %10 = vsyncpa [#allocation3 + $0x1], 0 }
   0x2   :  { %11 = vsyncpa [#allocation6], 0 }
   0x3   :  { %12 = vsyncpa [#allocation4], 0 }
   0x4   :  { %14 = vsyncpa [#allocation4 + $0x1], 0  ;;  %s5963_s12 = smov 0   ;;  %s5965_s13 = smov 0  }
   0x5   :  { %s5967_s14 = smov 0   ;;  %s5969_s15 = smov 0  }
   0x6 LB: > { %s5984_s16 = sadd.s32 4294967295, %s5931_s15   ;;  %s3749_s17 = sadd.s32 4294967294, %s5931_s15   ;;  %s5931_s15 = sphi %s5969_s15, %s6913_s15   ;;  %s5927_s14 = sphi %s5967_s14, %s6912_s14   ;;  %s5923_s13 = sphi %s5965_s13, %s6911_s13   ;;  %s5919_s12 = sphi %s5963_s12, %s6910_s12  }
   0x7   : > { %p40_p0 = scmp.ne.s32.totalorder %s5923_s13, %s5919_s12  ;;  %p6895_p1 = scmp.eq.s32.totalorder %s5984_s16, 0 }
   0x8   : > { %p112_p3 = scmp.eq.s32.totalorder %s3749_s17, 9  ;;  %p3750_p5 = scmp.ge.s32.totalorder %s5931_s15, 1 }
   0x9   : > { %p5993_p4 = por %p6895_p1, %p40_p0  ;;  %p119_p7 = scmp.lt.s32.totalorder %s5931_s15, 11 }
   0xa   : > { %p5998_p6 = por %p112_p3, %p40_p0  ;;  %s5933_s21 = smov [#allocation5]  }
   0xb   : > { %s6898_s18 = scalar_select %p5993_p4, 1, 0 }
   0xc   : > { %s6899_s19 = scalar_select %p5998_p6, 1, 0 }
   0xd   : > { %p6003_p8 = pnand %p3750_p5, %p119_p7  ;;  %s131_s22 = sshll.u32 %s5933_s21, 4  ;;  %s132_s22 = int_to_ptr.vmem [resolvable:$true] %s131_s22 }
   0xe   : > { %s5934_s24 = smov [#allocation7]   ;;  %s5775_s28 = scalar_lea.hbm %s6892_s1, 1024 }
   0xf   : > { %s6900_s20 = scalar_select %p6003_p8, 1, 0 }
  0x10   : > { %p5593_p9 = pneg %p6003_p8  ;;  %s145_s25 = sshll.u32 %s5934_s24, 4  ;;  %s6015_s25 = int_to_ptr.vmem [resolvable:$true] %s145_s25 }
  0x11   : > { %p5776_p11 = scmp.ne.s32.totalorder %s6892_s1, %s5775_s28  ;;  %p5782_p3 = scmp.lt.u32.totalorder %s5775_s28, %s6892_s1 }
  0x12   : > { %p6011_p10 = pnand %p5593_p9, %p6895_p1 }
  0x14   : > { %p5777_p12 = pneg %p6011_p10 }
  0x16   : > { %p5778_p13 = pnand %p5777_p12, %p5776_p11 }
  0x18   : > { %p5779_p0 = pneg %p5778_p13 }
  0x1a   : > { %p5784_p5 = pnand %p5782_p3, %p5779_p0 }
  0x1c   : > { %5787 = shalt.err (!%p5784_p5)
}
  0x1d   : > { %s5788_s6 = scalar_lea.vmem %s132_s22, 1024  ;;  %p5796_p2 = scmp.lt.s32.totalorder %s132_s22, %s132_s22 }
  0x1e   : > { %p5789_p7 = scmp.ne.s32.totalorder %s132_s22, %s5788_s6  ;;  %p5797_p6 = scmp.lt.s32.totalorder %s5788_s6, %s5788_s6 }
  0x20   : > { %p5791_p9 = pnand %p5789_p7, %p5777_p12  ;;  %p5798_p4 = por %p5797_p6, %p5796_p2 }
  0x22   : > { %p5792_p1 = pneg %p5791_p9 }
  0x24   : > { %p5799_p8 = pnand %p5798_p4, %p5792_p1 }
  0x26   : > { %5802 = shalt.err (!%p5799_p8)
}
  0x27   : > { %s5935_s7 = smov 64   ;;  %s5936_s8 = smov 4  }
  0x28   : > { %5596 = dma.hbm_to_vmem [thread:$0]  (!%p6011_p10), %s6892_s1, 1024, %s132_s22, [#allocation6], %s5935_s7, %s5935_s7, %s5936_s8  }
  0x29   : > { %s5803_s21 = scalar_lea.hbm %s6893_s2, 16 }
  0x2a   : > { %p5804_p1 = scmp.ne.s32.totalorder %s6893_s2, %s5803_s21  ;;  %p5810_p6 = scmp.lt.u32.totalorder %s5803_s21, %s6893_s2 }
  0x2c   : > { %p5806_p2 = pnand %p5804_p1, %p5777_p12 }
  0x2e   : > { %p5807_p4 = pneg %p5806_p2 }
  0x30   : > { %p5812_p8 = pnand %p5810_p6, %p5807_p4 }
  0x32   : > { %5815 = shalt.err (!%p5812_p8)
}
  0x33   : > { %s5816_s22 = scalar_lea.vmem %s6015_s25, 16  ;;  %s5823_s29 = scalar_lea.vmem %s6015_s25, 32 }
  0x34   : > { %p5817_p11 = scmp.ne.s32.totalorder %s6015_s25, %s5816_s22  ;;  %p5824_p3 = scmp.lt.s32.totalorder %s6015_s25, %s6015_s25 }
  0x35   : > { %p5825_p5 = scmp.lt.s32.totalorder %s5823_s29, %s5816_s22 }
  0x36   : > { %p5819_p13 = pnand %p5817_p11, %p5777_p12 }
  0x37   : > { %p5826_p7 = por %p5825_p5, %p5824_p3 }
  0x38   : > { %p5820_p0 = pneg %p5819_p13 }
  0x3a   : > { %p5827_p9 = pnand %p5826_p7, %p5820_p0 }
  0x3c   : > { %5830 = shalt.err (!%p5827_p9)
}
  0x3d   : > { %5599 = dma.hbm_to_vmem [thread:$0]  (!%p6011_p10), %s6893_s2, 16, %s6015_s25, [#allocation6]  }
  0x3e   : > { %s6069_s5 = sadd.s32 1, %s5931_s15   ;;  %s27_s23 = sadd.s32 1, %s5927_s14 }
  0x3f   : > { %s24_s6 = ssub.s32 %s5931_s15, %s6069_s5  ;;  %p34_p12 = scmp.ne.s32.totalorder %s5927_s14, %s5923_s13 }
  0x40   : > { %p25_p1 = scmp.eq.s32.totalorder %s24_s6, 0  ;;  %p35_p2 = scmp.eq.s32.totalorder %s5931_s15, 0 }
  0x41   : > { %p6902_p4 = scmp.eq.s32.totalorder %s5984_s16, 9  ;;  %p5610_p8 = scmp.lt.s32.totalorder %s5931_s15, 10 }
  0x42   : > { %s6085_s10 = scalar_select %p25_p1, %s5927_s14, %s27_s23  }
  0x43   : > { %p6079_p6 = por %p6902_p4, %p34_p12  ;;  %p36_p11 = por %p35_p2, %p34_p12 }
  0x44   : > { %s156_s11 = sand.u32 1, %s5927_s14   ;;  %s4102_s25 = smul.u32 14144, %s5931_s15 }
  0x45   : > { %s5579_s17 = smul.u32 884, %s156_s11  ;;  %p6089_p10 = pnand %p5610_p8, %p36_p11 }
  0x46   : > { %s6096_s27 = scalar_lea.hbm %s6891_s0, %s4102_s25  ;;  %s6100_s29 = scalar_lea.sflag [#allocation3], %s156_s11 }
  0x47   : > { %s160_s28 = scalar_lea.vmem [#allocation2], %s5579_s17  ;;  %s5831_s30 = scalar_lea.hbm %s6096_s27, 14144 }
  0x48   : > { %s167_s22 = sshll.u32 %s160_s28, 4  ;;  %p5832_p13 = scmp.ne.s32.totalorder %s6096_s27, %s5831_s30  ;;  %s6098_s22 = int_to_ptr.vmem [resolvable:$true] %s167_s22 }
  0x49   : > { %p5833_p0 = pneg %p6089_p10  ;;  %s5836_s6 = scalar_lea.hbm %s6891_s0, 141440 }
  0x4a   : > { %p5837_p7 = scmp.lt.u32.totalorder %s6096_s27, %s6891_s0  ;;  %p5838_p9 = scmp.lt.u32.totalorder %s5836_s6, %s5831_s30 }
  0x4b   : > { %p5834_p3 = pnand %p5833_p0, %p5832_p13  ;;  %p5840_p1 = scmp.lt.u32.totalorder %s5831_s30, %s6096_s27 }
  0x4c   : > { %p5839_p12 = por %p5838_p9, %p5837_p7 }
  0x4d   : > { %p5835_p5 = pneg %p5834_p3 }
  0x4e   : > { %p5841_p2 = por %p5840_p1, %p5839_p12 }
  0x50   : > { %p5842_p4 = pnand %p5841_p2, %p5835_p5 }
  0x52   : > { %5845 = shalt.err (!%p5842_p4)
}
  0x53   : > { %s5846_s11 = scalar_lea.vmem %s6098_s22, 14144  ;;  %s5937_s17 = smov [#allocation2]  }
  0x54   : > { %p5847_p8 = scmp.ne.s32.totalorder %s6098_s22, %s5846_s11  ;;  %s5851_s26 = sshll.u32 %s5937_s17, 4  ;;  %s5852_s26 = int_to_ptr.vmem [resolvable:$false] %s5851_s26 }
  0x55   : > { %s5853_s28 = scalar_lea.vmem %s5852_s26, 28288  ;;  %p5854_p3 = scmp.lt.s32.totalorder %s6098_s22, %s5852_s26 }
  0x56   : > { %p5849_p11 = pnand %p5847_p8, %p5833_p0  ;;  %p5855_p7 = scmp.lt.s32.totalorder %s5853_s28, %s5846_s11 }
  0x58   : > { %p5850_p13 = pneg %p5849_p11  ;;  %p5856_p9 = por %p5855_p7, %p5854_p3 }
  0x5a   : > { %p5857_p12 = pnand %p5856_p9, %p5850_p13 }
  0x5c   : > { %5860 = shalt.err (!%p5857_p12)
}
  0x5d   : > { %5603 = dma.hbm_to_vmem [thread:$0]  (!%p6089_p10), %s6096_s27, 14144, %s6098_s22, %s6100_s29, %s5935_s7, %s5935_s7, %s5936_s8  }
  0x5e   : > { %p6905_p0 = scmp.ne.s32.totalorder %s6900_s20, 0 }
  0x5f   : > { %s6134_s30 = sand.u32 (!%p6905_p0), 1, %s5923_s13   ;;  %p6906_p5 = scmp.ne.s32.totalorder (!%p6905_p0), %s6898_s18, 0 }
  0x60   : > { %179 = sbr.rel (%p6905_p0) target bundleno = 818 (0x332), region = 32  ;;  %s182_s23 = scalar_lea.sflag (!%p6905_p0), [#allocation3], %s6134_s30 }
  0x61   : > { %s5580_s4 = smul.u32 (!%p6905_p0), 884, %s6134_s30 }
  0x63   : > { %s6140_s21 = scalar_lea.vmem (!%p6905_p0), [#allocation2], %s5580_s4 }
  0x67   : > { %5906 = dma.done.wait (%p6906_p5), %s182_s23, 14144  }
  0x68   : > { %5908 = vsyncadd (%p6906_p5), %s182_s23, 4294953152  ;;  %p6907_p10 = scmp.eq.s32.totalorder %s5984_s16, 0 }
  0x6a   : > { %5910 = dma.done.wait (%p6907_p10), [#allocation6], 1040   ;;  %p6908_p1 = pmov %p6907_p10 }
  0x6b   : > { %v5938_v0 = vmov 0.0   ;;  %vm5939_vm0 = vmmov 0   ;;  %v5654_v1 = vld [vmem:[#allocation5] sm:$0xff]   ;;  %v5655_v2 = vld [vmem:[#allocation5 + $0x8] sm:$0xff]   ;;  %v5656_v3 = vld [vmem:[#allocation5 + $0x10] sm:$0xff]   ;;  %s6350_s18 = scalar_lea.vmem [#allocation8], %s5580_s4 }
  0x6c   : > { %5912 = vsyncadd (%p6908_p1), [#allocation6], 4294966256  ;;  %5103 = vmatprep.subr.bf16.mxu0 %v5938_v0  ;;  %5563 = vmatprep.subr.bf16.mxu1 %v5938_v0  ;;  %v5657_v4 = vld [vmem:[#allocation5 + $0x18] sm:$0xff]   ;;  %v5658_v5 = vld [vmem:[#allocation5 + $0x20] sm:$0xff]   ;;  %s4324_s20 = smul.u32 14144, %s5984_s16  ;;  %s3657_s7 = sshll.u32 %s6350_s18, 4  ;;  %s6847_s7 = int_to_ptr.vmem [resolvable:$true] %s3657_s7 }
  0x6d   : > { %5119 = vmatprep.mubr.msk.bf16.mxu0 %vm5939_vm0, %v5938_v0  ;;  %5343 = vmatprep.mubr.msk.bf16.mxu1 %vm5939_vm0, %v5938_v0  ;;  %v5659_v6 = vld [vmem:[#allocation5 + $0x28] sm:$0xff]   ;;  %v5660_v7 = vld [vmem:[#allocation5 + $0x30] sm:$0xff]   ;;  %v5661_v8 = vld [vmem:[#allocation5 + $0x38] sm:$0xff]   ;;  %s3644_s29 = scalar_lea.sflag [#allocation4], %s6134_s30  ;;  %s5861_s6 = scalar_lea.vmem %s6847_s7, 14144 }
  0x6e   : > { %5104 = vmatpush3.bf16.msra.mxu0 %v5654_v1  ;;  %5571 = vmatpush3.bf16.msra.mxu1 %v5654_v1  ;;  %v5662_v9 = vld [vmem:[%s6140_s21] sm:$0xff]   ;;  %v5664_v11 = vld [vmem:[%s6140_s21 + $0x8] sm:$0xff]   ;;  %v5666_v13 = vld [vmem:[%s6140_s21 + $0x10] sm:$0xff]   ;;  %s6845_s22 = scalar_lea.hbm %s6894_s3, %s4324_s20  ;;  %p5862_p2 = scmp.ne.s32.totalorder %s6847_s7, %s5861_s6 }
  0x6f   : > { %5105 = vmatprep.subr.bf16.mxu0 %v5938_v0  ;;  %5564 = vmatprep.subr.bf16.mxu1 %v5938_v0  ;;  %v5663_v10 = vld [vmem:[%s6140_s21 + $0x1c0] sm:$0xff]   ;;  %v5665_v12 = vld [vmem:[%s6140_s21 + $0x1c8] sm:$0xff]   ;;  %v5667_v14 = vld [vmem:[%s6140_s21 + $0x1d0] sm:$0xff]   ;;  %s5940_s16 = smov [#allocation8]  }
  0x70   : > { %v5668_v15 = vld [vmem:[%s6140_s21 + $0x18] sm:$0xff]   ;;  %v5670_v17 = vld [vmem:[%s6140_s21 + $0x20] sm:$0xff]   ;;  %v5672_v19 = vld [vmem:[%s6140_s21 + $0x28] sm:$0xff]   ;;  %p5863_p4 = pnand %p5862_p2, %p6079_p6  ;;  %s5865_s25 = sshll.u32 %s5940_s16, 4  ;;  %s5866_s25 = int_to_ptr.vmem [resolvable:$false] %s5865_s25 }
  0x71   : > { %v5669_v16 = vld [vmem:[%s6140_s21 + $0x1d8] sm:$0xff]   ;;  %v5671_v18 = vld [vmem:[%s6140_s21 + $0x1e0] sm:$0xff]   ;;  %v5673_v20 = vld [vmem:[%s6140_s21 + $0x1e8] sm:$0xff]   ;;  %s5867_s24 = scalar_lea.vmem %s5866_s25, 28288  ;;  %p5868_p11 = scmp.lt.s32.totalorder %s6847_s7, %s5866_s25 }
  0x72   : > { %5106 = vmatpush3.bf16.msra.mxu0 %v5655_v2  ;;  %5572 = vmatpush3.bf16.msra.mxu1 %v5655_v2  ;;  %v5674_v21 = vld [vmem:[%s6140_s21 + $0x30] sm:$0xff]   ;;  %v5676_v23 = vld [vmem:[%s6140_s21 + $0x38] sm:$0xff]   ;;  %v5678_v25 = vld [vmem:[%s6140_s21 + $0x40] sm:$0xff]   ;;  %p5864_p8 = pneg %p5863_p4  ;;  %p5869_p13 = scmp.lt.s32.totalorder %s5867_s24, %s5861_s6 }
  0x73   : > { %5107 = vmatprep.subr.bf16.mxu0 %v5938_v0  ;;  %5565 = vmatprep.subr.bf16.mxu1 %v5938_v0  ;;  %v5675_v22 = vld [vmem:[%s6140_s21 + $0x1f0] sm:$0xff]   ;;  %v5677_v24 = vld [vmem:[%s6140_s21 + $0x1f8] sm:$0xff]   ;;  %v5679_v26 = vld [vmem:[%s6140_s21 + $0x200] sm:$0xff]  }
  0x74   : > { %v5680_v27 = vld [vmem:[%s6140_s21 + $0x48] sm:$0xff]   ;;  %v5682_v29 = vld [vmem:[%s6140_s21 + $0x50] sm:$0xff]   ;;  %v5684_v31 = vld [vmem:[%s6140_s21 + $0x58] sm:$0xff]   ;;  %p5870_p3 = por %p5869_p13, %p5868_p11 }
  0x75   : > { %v5681_v28 = vld [vmem:[%s6140_s21 + $0x208] sm:$0xff]   ;;  %v5683_v30 = vld [vmem:[%s6140_s21 + $0x210] sm:$0xff]   ;;  %v5685_v32 = vld [vmem:[%s6140_s21 + $0x218] sm:$0xff]  }
  0x76   : > { %5108 = vmatpush3.bf16.msra.mxu0 %v5656_v3  ;;  %5573 = vmatpush3.bf16.msra.mxu1 %v5656_v3  ;;  %v5686_v33 = vld [vmem:[%s6140_s21 + $0x60] sm:$0xff]   ;;  %v5688_v35 = vld [vmem:[%s6140_s21 + $0x68] sm:$0xff]   ;;  %v5690_v37 = vld [vmem:[%s6140_s21 + $0x70] sm:$0xff]   ;;  %p5871_p7 = pnand %p5870_p3, %p5864_p8 }
  0x77   : > { %5109 = vmatprep.subr.bf16.mxu0 %v5938_v0  ;;  %5566 = vmatprep.subr.bf16.mxu1 %v5938_v0  ;;  %v5687_v34 = vld [vmem:[%s6140_s21 + $0x220] sm:$0xff]   ;;  %v5689_v36 = vld [vmem:[%s6140_s21 + $0x228] sm:$0xff]   ;;  %v5691_v38 = vld [vmem:[%s6140_s21 + $0x230] sm:$0xff]  }
  0x78   : > { %v5692_v39 = vld [vmem:[%s6140_s21 + $0x78] sm:$0xff]   ;;  %v5694_v41 = vld [vmem:[%s6140_s21 + $0x80] sm:$0xff]   ;;  %v5696_v43 = vld [vmem:[%s6140_s21 + $0x88] sm:$0xff]  }
  0x79   : > { %v5693_v40 = vld [vmem:[%s6140_s21 + $0x238] sm:$0xff]   ;;  %v5695_v42 = vld [vmem:[%s6140_s21 + $0x240] sm:$0xff]   ;;  %v5697_v44 = vld [vmem:[%s6140_s21 + $0x248] sm:$0xff]  }
  0x7a   : > { %5110 = vmatpush3.bf16.msra.mxu0 %v5657_v4  ;;  %5574 = vmatpush3.bf16.msra.mxu1 %v5657_v4  ;;  %v5698_v45 = vld [vmem:[%s6140_s21 + $0x90] sm:$0xff]   ;;  %v5700_v47 = vld [vmem:[%s6140_s21 + $0x98] sm:$0xff]   ;;  %v5702_v49 = vld [vmem:[%s6140_s21 + $0xa0] sm:$0xff]  }
  0x7b   : > { %5111 = vmatprep.subr.bf16.mxu0 %v5938_v0  ;;  %5567 = vmatprep.subr.bf16.mxu1 %v5938_v0  ;;  %v5699_v46 = vld [vmem:[%s6140_s21 + $0x250] sm:$0xff]   ;;  %v5701_v48 = vld [vmem:[%s6140_s21 + $0x258] sm:$0xff]   ;;  %v5703_v50 = vld [vmem:[%s6140_s21 + $0x260] sm:$0xff]  }
  0x7c   : > { %v5704_v51 = vld [vmem:[%s6140_s21 + $0xa8] sm:$0xff]   ;;  %v5706_v53 = vld [vmem:[%s6140_s21 + $0xb0] sm:$0xff]   ;;  %v5708_v55 = vld [vmem:[%s6140_s21 + $0xb8] sm:$0xff]  }
  0x7d   : > { %v5705_v52 = vld [vmem:[%s6140_s21 + $0x268] sm:$0xff]   ;;  %v5707_v54 = vld [vmem:[%s6140_s21 + $0x270] sm:$0xff]   ;;  %v5709_v56 = vld [vmem:[%s6140_s21 + $0x278] sm:$0xff]  }
  0x7e   : > { %5112 = vmatpush3.bf16.msra.mxu0 %v5658_v5  ;;  %5575 = vmatpush3.bf16.msra.mxu1 %v5658_v5  ;;  %v5710_v57 = vld [vmem:[%s6140_s21 + $0xc0] sm:$0xff]   ;;  %v5712_v59 = vld [vmem:[%s6140_s21 + $0xc8] sm:$0xff]   ;;  %v5714_v61 = vld [vmem:[%s6140_s21 + $0xd0] sm:$0xff]  }
  0x7f   : > { %5113 = vmatprep.subr.bf16.mxu0 %v5938_v0  ;;  %5568 = vmatprep.subr.bf16.mxu1 %v5938_v0  ;;  %v5711_v58 = vld [vmem:[%s6140_s21 + $0x280] sm:$0xff]   ;;  %v5713_v60 = vld [vmem:[%s6140_s21 + $0x288] sm:$0xff]   ;;  %v5715_v62 = vld [vmem:[%s6140_s21 + $0x290] sm:$0xff]  }
  0x80   : > { %v6328_v63 = vld [vmem:[#allocation7] ss:$0 sm:$0xff]  ;;  %v5716_v5 = vld [vmem:[%s6140_s21 + $0xd8] sm:$0xff]  }
  0x82   : > { %5114 = vmatpush3.bf16.msra.mxu0 %v5659_v6  ;;  %5576 = vmatpush3.bf16.msra.mxu1 %v5659_v6 }
  0x83   : > { %5115 = vmatprep.subr.bf16.mxu0 %v5938_v0  ;;  %5569 = vmatprep.subr.bf16.mxu1 %v5938_v0 }
  0x86   : > { %5116 = vmatpush3.bf16.msra.mxu0 %v5660_v7  ;;  %5577 = vmatpush3.bf16.msra.mxu1 %v5660_v7 }
  0x87   : > { %5117 = vmatprep.subr.bf16.mxu0 %v5938_v0  ;;  %5570 = vmatprep.subr.bf16.mxu1 %v5938_v0 }
  0x8a   : > { %5118 = vmatpush3.bf16.msra.mxu0 %v5661_v8  ;;  %5578 = vmatpush3.bf16.msra.mxu1 %v5661_v8  ;;  %v5717_v8 = vld [vmem:[%s6140_s21 + $0x298] sm:$0xff]  }
  0x8d   : > { %5120 = vmatmul.mubr.bf16.vlgmr.msra.gmra.mrb[0].mxu0 %v5662_v9  ;;  %5344 = vmatmul.mubr.bf16.vlgmr.msra.gmra.mrb[0].mxu1 %v5663_v10 }
  0x8e   : > { %5123 = vmatprep.mubr.msk.bf16.mxu0 %vm5939_vm0, %v5938_v0  ;;  %5347 = vmatprep.mubr.msk.bf16.mxu1 %vm5939_vm0, %v5938_v0 }
  0x95   : > { %5124 = vmatmul.mubr.bf16.gmra.mrb[4].mxu0 %v5664_v11  ;;  %5348 = vmatmul.mubr.bf16.gmra.mrb[4].mxu1 %v5665_v12 }
  0x96   : > { %5127 = vmatprep.mubr.msk.bf16.mxu0 %vm5939_vm0, %v5938_v0  ;;  %5351 = vmatprep.mubr.msk.bf16.mxu1 %vm5939_vm0, %v5938_v0 }
  0x9d   : > { %5128 = vmatmul.mubr.bf16.gmra.mrb[8].mxu0 %v5666_v13  ;;  %5352 = vmatmul.mubr.bf16.gmra.mrb[8].mxu1 %v5667_v14 }
  0x9e   : > { %5131 = vmatprep.mubr.msk.bf16.mxu0 %vm5939_vm0, %v5938_v0  ;;  %5355 = vmatprep.mubr.msk.bf16.mxu1 %vm5939_vm0, %v5938_v0 }
  0xa5   : > { %5132 = vmatmul.mubr.bf16.gmra.mrb[12].mxu0 %v5668_v15  ;;  %5356 = vmatmul.mubr.bf16.gmra.mrb[12].mxu1 %v5669_v16 }
  0xa6   : > { %5135 = vmatprep.mubr.msk.bf16.mxu0 %vm5939_vm0, %v5938_v0  ;;  %5359 = vmatprep.mubr.msk.bf16.mxu1 %vm5939_vm0, %v5938_v0 }
  0xad   : > { %5136 = vmatmul.mubr.bf16.gmra.mrb[16].mxu0 %v5670_v17  ;;  %5360 = vmatmul.mubr.bf16.gmra.mrb[16].mxu1 %v5671_v18 }
  0xae   : > { %5139 = vmatprep.mubr.msk.bf16.mxu0 %vm5939_vm0, %v5938_v0  ;;  %5363 = vmatprep.mubr.msk.bf16.mxu1 %vm5939_vm0, %v5938_v0 }
  0xb5   : > { %5140 = vmatmul.mubr.bf16.gmra.mrb[20].mxu0 %v5672_v19  ;;  %5364 = vmatmul.mubr.bf16.gmra.mrb[20].mxu1 %v5673_v20 }
  0xb6   : > { %5143 = vmatprep.mubr.msk.bf16.mxu0 %vm5939_vm0, %v5938_v0  ;;  %5367 = vmatprep.mubr.msk.bf16.mxu1 %vm5939_vm0, %v5938_v0 }
  0xbd   : > { %5144 = vmatmul.mubr.bf16.gmra.mrb[24].mxu0 %v5674_v21  ;;  %5368 = vmatmul.mubr.bf16.gmra.mrb[24].mxu1 %v5675_v22 }
  0xbe   : > { %5147 = vmatprep.mubr.msk.bf16.mxu0 %vm5939_vm0, %v5938_v0  ;;  %5371 = vmatprep.mubr.msk.bf16.mxu1 %vm5939_vm0, %v5938_v0 }
  0xc5   : > { %5148 = vmatmul.mubr.bf16.gmra.mrb[28].mxu0 %v5676_v23  ;;  %5372 = vmatmul.mubr.bf16.gmra.mrb[28].mxu1 %v5677_v24 }
  0xc6   : > { %5151 = vmatprep.mubr.msk.bf16.mxu0 %vm5939_vm0, %v5938_v0  ;;  %5375 = vmatprep.mubr.msk.bf16.mxu1 %vm5939_vm0, %v5938_v0 }
  0xcd   : > { %5152 = vmatmul.mubr.bf16.gmra.mrb[32].mxu0 %v5678_v25  ;;  %5376 = vmatmul.mubr.bf16.gmra.mrb[32].mxu1 %v5679_v26 }
  0xce   : > { %5155 = vmatprep.mubr.msk.bf16.mxu0 %vm5939_vm0, %v5938_v0  ;;  %5379 = vmatprep.mubr.msk.bf16.mxu1 %vm5939_vm0, %v5938_v0 }
  0xd5   : > { %5156 = vmatmul.mubr.bf16.gmra.mrb[36].mxu0 %v5680_v27  ;;  %5380 = vmatmul.mubr.bf16.gmra.mrb[36].mxu1 %v5681_v28 }
  0xd6   : > { %5159 = vmatprep.mubr.msk.bf16.mxu0 %vm5939_vm0, %v5938_v0  ;;  %5383 = vmatprep.mubr.msk.bf16.mxu1 %vm5939_vm0, %v5938_v0 }
  0xdd   : > { %5160 = vmatmul.mubr.bf16.gmra.mrb[40].mxu0 %v5682_v29  ;;  %5384 = vmatmul.mubr.bf16.gmra.mrb[40].mxu1 %v5683_v30  ;;  %v5718_v29 = vld [vmem:[%s6140_s21 + $0xe0] sm:$0xff]  }
  0xde   : > { %5163 = vmatprep.mubr.msk.bf16.mxu0 %vm5939_vm0, %v5938_v0  ;;  %5387 = vmatprep.mubr.msk.bf16.mxu1 %vm5939_vm0, %v5938_v0 }
  0xe5   : > { %5164 = vmatmul.mubr.bf16.gmra.mrb[44].mxu0 %v5684_v31  ;;  %5388 = vmatmul.mubr.bf16.gmra.mrb[44].mxu1 %v5685_v32  ;;  %v5719_v32 = vld [vmem:[%s6140_s21 + $0x2a0] sm:$0xff]  }
  0xe6   : > { %5167 = vmatprep.mubr.msk.bf16.mxu0 %vm5939_vm0, %v5938_v0  ;;  %5391 = vmatprep.mubr.msk.bf16.mxu1 %vm5939_vm0, %v5938_v0 }
  0xed   : > { %5168 = vmatmul.mubr.bf16.gmra.mrb[48].mxu0 %v5686_v33  ;;  %5392 = vmatmul.mubr.bf16.gmra.mrb[48].mxu1 %v5687_v34 }
  0xee   : > { %5171 = vmatprep.mubr.msk.bf16.mxu0 %vm5939_vm0, %v5938_v0  ;;  %5395 = vmatprep.mubr.msk.bf16.mxu1 %vm5939_vm0, %v5938_v0 }
  0xf5   : > { %5172 = vmatmul.mubr.bf16.gmra.mrb[52].mxu0 %v5688_v35  ;;  %5396 = vmatmul.mubr.bf16.gmra.mrb[52].mxu1 %v5689_v36 }
  0xf6   : > { %5175 = vmatprep.mubr.msk.bf16.mxu0 %vm5939_vm0, %v5938_v0  ;;  %5399 = vmatprep.mubr.msk.bf16.mxu1 %vm5939_vm0, %v5938_v0 }
  0xfd   : > { %5176 = vmatmul.mubr.bf16.gmra.mrb[56].mxu0 %v5690_v37  ;;  %5400 = vmatmul.mubr.bf16.gmra.mrb[56].mxu1 %v5691_v38 }
  0xfe   : > { %5179 = vmatprep.mubr.msk.bf16.mxu0 %vm5939_vm0, %v5938_v0  ;;  %5403 = vmatprep.mubr.msk.bf16.mxu1 %vm5939_vm0, %v5938_v0 }
 0x105   : > { %5180 = vmatmul.mubr.bf16.gmra.mrb[60].mxu0 %v5692_v39  ;;  %5404 = vmatmul.mubr.bf16.gmra.mrb[60].mxu1 %v5693_v40 }
 0x106   : > { %5183 = vmatprep.mubr.msk.bf16.mxu0 %vm5939_vm0, %v5938_v0  ;;  %5407 = vmatprep.mubr.msk.bf16.mxu1 %vm5939_vm0, %v5938_v0 }
 0x10d   : > { %5184 = vmatmul.mubr.bf16.gmra.mrb[64].mxu0 %v5694_v41  ;;  %5408 = vmatmul.mubr.bf16.gmra.mrb[64].mxu1 %v5695_v42 }
 0x10e   : > { %5187 = vmatprep.mubr.msk.bf16.mxu0 %vm5939_vm0, %v5938_v0  ;;  %5411 = vmatprep.mubr.msk.bf16.mxu1 %vm5939_vm0, %v5938_v0 }
 0x115   : > { %5188 = vmatmul.mubr.bf16.gmra.mrb[68].mxu0 %v5696_v43  ;;  %5412 = vmatmul.mubr.bf16.gmra.mrb[68].mxu1 %v5697_v44 }
 0x116   : > { %5191 = vmatprep.mubr.msk.bf16.mxu0 %vm5939_vm0, %v5938_v0  ;;  %5415 = vmatprep.mubr.msk.bf16.mxu1 %vm5939_vm0, %v5938_v0 }
 0x11d   : > { %5192 = vmatmul.mubr.bf16.gmra.mrb[72].mxu0 %v5698_v45  ;;  %5416 = vmatmul.mubr.bf16.gmra.mrb[72].mxu1 %v5699_v46 }
 0x11e   : > { %5195 = vmatprep.mubr.msk.bf16.mxu0 %vm5939_vm0, %v5938_v0  ;;  %5419 = vmatprep.mubr.msk.bf16.mxu1 %vm5939_vm0, %v5938_v0 }
 0x125   : > { %5196 = vmatmul.mubr.bf16.gmra.mrb[76].mxu0 %v5700_v47  ;;  %5420 = vmatmul.mubr.bf16.gmra.mrb[76].mxu1 %v5701_v48 }
 0x126   : > { %5199 = vmatprep.mubr.msk.bf16.mxu0 %vm5939_vm0, %v5938_v0  ;;  %5423 = vmatprep.mubr.msk.bf16.mxu1 %vm5939_vm0, %v5938_v0 }
 0x12d   : > { %5200 = vmatmul.mubr.bf16.gmra.mrb[80].mxu0 %v5702_v49  ;;  %5424 = vmatmul.mubr.bf16.gmra.mrb[80].mxu1 %v5703_v50 }
 0x12e   : > { %5203 = vmatprep.mubr.msk.bf16.mxu0 %vm5939_vm0, %v5938_v0  ;;  %5427 = vmatprep.mubr.msk.bf16.mxu1 %vm5939_vm0, %v5938_v0 }
 0x135   : > { %5204 = vmatmul.mubr.bf16.gmra.mrb[84].mxu0 %v5704_v51  ;;  %5428 = vmatmul.mubr.bf16.gmra.mrb[84].mxu1 %v5705_v52 }
 0x136   : > { %5207 = vmatprep.mubr.msk.bf16.mxu0 %vm5939_vm0, %v5938_v0  ;;  %5431 = vmatprep.mubr.msk.bf16.mxu1 %vm5939_vm0, %v5938_v0 }
 0x13d   : > { %5208 = vmatmul.mubr.bf16.gmra.mrb[88].mxu0 %v5706_v53  ;;  %5432 = vmatmul.mubr.bf16.gmra.mrb[88].mxu1 %v5707_v54  ;;  %v5720_v53 = vld [vmem:[%s6140_s21 + $0xe8] sm:$0xff]  }
 0x13e   : > { %5211 = vmatprep.mubr.msk.bf16.mxu0 %vm5939_vm0, %v5938_v0  ;;  %5435 = vmatprep.mubr.msk.bf16.mxu1 %vm5939_vm0, %v5938_v0 }
 0x145   : > { %5212 = vmatmul.mubr.bf16.gmra.mrb[92].mxu0 %v5708_v55  ;;  %5436 = vmatmul.mubr.bf16.gmra.mrb[92].mxu1 %v5709_v56  ;;  %v5721_v56 = vld [vmem:[%s6140_s21 + $0x2a8] sm:$0xff]  }
 0x146   : > { %5215 = vmatprep.mubr.msk.bf16.mxu0 %vm5939_vm0, %v5938_v0  ;;  %5439 = vmatprep.mubr.msk.bf16.mxu1 %vm5939_vm0, %v5938_v0 }
 0x14d   : > { %5216 = vmatmul.mubr.bf16.gmra.mrb[96].mxu0 %v5710_v57  ;;  %5440 = vmatmul.mubr.bf16.gmra.mrb[96].mxu1 %v5711_v58 }
 0x14e   : > { %5219 = vmatprep.mubr.msk.bf16.mxu0 %vm5939_vm0, %v5938_v0  ;;  %5443 = vmatprep.mubr.msk.bf16.mxu1 %vm5939_vm0, %v5938_v0 }
 0x155   : > { %5220 = vmatmul.mubr.bf16.gmra.mrb[100].mxu0 %v5712_v59  ;;  %5444 = vmatmul.mubr.bf16.gmra.mrb[100].mxu1 %v5713_v60 }
 0x156   : > { %5223 = vmatprep.mubr.msk.bf16.mxu0 %vm5939_vm0, %v5938_v0  ;;  %5447 = vmatprep.mubr.msk.bf16.mxu1 %vm5939_vm0, %v5938_v0 }
 0x15d   : > { %5224 = vmatmul.mubr.bf16.gmra.mrb[104].mxu0 %v5714_v61  ;;  %5448 = vmatmul.mubr.bf16.gmra.mrb[104].mxu1 %v5715_v62 }
 0x15e   : > { %5227 = vmatprep.mubr.msk.bf16.mxu0 %vm5939_vm0, %v5938_v0  ;;  %5451 = vmatprep.mubr.msk.bf16.mxu1 %vm5939_vm0, %v5938_v0 }
 0x160   : > { %v1209_v1 = vpop.f32.mrb[0].mxu0  ;;  %v1657_v2 = vpop.f32.mrb[0].mxu1 }
 0x161   : > { %v1210_v3 = vadd.f32 %v6328_v63, %v1209_v1  ;;  %v5121_v4 = vpop.f32.mrb[1].mxu0  ;;  %v1658_v6 = vadd.f32 %v6328_v63, %v1657_v2  ;;  %v5345_v7 = vpop.f32.mrb[1].mxu1 }
 0x162   : > { %v1212_v9 = vpop.f32.mrb[2].mxu0  ;;  %v1660_v10 = vpop.f32.mrb[2].mxu1 }
 0x163   : > { %v2095_v11 = vmul.f32 0.2, %v1210_v3  ;;  %v1213_v12 = vadd.f32 %v6328_v63, %v1212_v9  ;;  %v5122_v13 = vpop.f32.mrb[3].mxu0  ;;  %v2207_v14 = vmul.f32 0.2, %v1658_v6  ;;  %v1661_v15 = vadd.f32 %v6328_v63, %v1660_v10  ;;  %v5346_v16 = vpop.f32.mrb[3].mxu1 }
 0x165   : > { %v2096_v17 = vmul.f32 0.2, %v1213_v12  ;;  %5228 = vmatmul.mubr.bf16.gmra.mrb[108].mxu0 %v5716_v5  ;;  %v2428_v18 = vmax.f32 %v1658_v6, %v2207_v14  ;;  %v2208_v19 = vmul.f32 0.2, %v1661_v15  ;;  %5452 = vmatmul.mubr.bf16.gmra.mrb[108].mxu1 %v5717_v8  ;;  %v2316_v20 = vmax.f32 %v1210_v3, %v2095_v11 }
 0x166   : > { %5231 = vmatprep.mubr.msk.bf16.mxu0 %vm5939_vm0, %v5938_v0  ;;  %5455 = vmatprep.mubr.msk.bf16.mxu1 %vm5939_vm0, %v5938_v0 }
 0x167   : > { %v2317_v21 = vmax.f32 %v1213_v12, %v2096_v17  ;;  %v2429_v22 = vmax.f32 %v1661_v15, %v2208_v19  ;;  %v5722_v15 = vld [vmem:[%s6140_s21 + $0xf0] sm:$0xff]  }
 0x168   : > { %v1217_v23 = vpop.f32.mrb[4].mxu0  ;;  %v1665_v24 = vpop.f32.mrb[4].mxu1 }
 0x169   : > { %v4328_v25 = vpack.c.bf16 %v2317_v21, %v2316_v20  ;;  %v1218_v26 = vadd.f32 %v6328_v63, %v1217_v23  ;;  %v4608_v27 = vpack.c.bf16 %v2429_v22, %v2428_v18  ;;  %v5125_v28 = vpop.f32.mrb[5].mxu0  ;;  %v1666_v30 = vadd.f32 %v6328_v63, %v1665_v24  ;;  %v5349_v31 = vpop.f32.mrb[5].mxu1  ;;  %v5723_v18 = vld [vmem:[%s6140_s21 + $0x2b0] sm:$0xff]  }
 0x16a   : > { %v1220_v33 = vpop.f32.mrb[6].mxu0  ;;  %v1668_v34 = vpop.f32.mrb[6].mxu1 }
 0x16b   : > { %4329 = vst [vmem:[%s6350_s18] sm:$0xff] %v4328_v25   ;;  %v2097_v35 = vmul.f32 0.2, %v1218_v26  ;;  %4930 = vst [vmem:[%s6350_s18 + $0x1c0] sm:$0xff] %v4608_v27   ;;  %v1221_v36 = vadd.f32 %v6328_v63, %v1220_v33  ;;  %v5126_v37 = vpop.f32.mrb[7].mxu0  ;;  %v2209_v38 = vmul.f32 0.2, %v1666_v30  ;;  %v1669_v39 = vadd.f32 %v6328_v63, %v1668_v34 }
 0x16c   : > { %v5350_v40 = vpop.f32.mrb[7].mxu1 }
 0x16d   : > { %v2098_v41 = vmul.f32 0.2, %v1221_v36  ;;  %5232 = vmatmul.mubr.bf16.gmra.mrb[112].mxu0 %v5718_v29  ;;  %v2430_v42 = vmax.f32 %v1666_v30, %v2209_v38  ;;  %v2210_v43 = vmul.f32 0.2, %v1669_v39  ;;  %5456 = vmatmul.mubr.bf16.gmra.mrb[112].mxu1 %v5719_v32  ;;  %v2318_v44 = vmax.f32 %v1218_v26, %v2097_v35 }
 0x16e   : > { %5235 = vmatprep.mubr.msk.bf16.mxu0 %vm5939_vm0, %v5938_v0  ;;  %5459 = vmatprep.mubr.msk.bf16.mxu1 %vm5939_vm0, %v5938_v0 }
 0x16f   : > { %v2319_v45 = vmax.f32 %v1221_v36, %v2098_v41  ;;  %v2431_v46 = vmax.f32 %v1669_v39, %v2210_v43  ;;  %v5724_v39 = vld [vmem:[%s6140_s21 + $0xf8] sm:$0xff]  }
 0x170   : > { %v1225_v47 = vpop.f32.mrb[8].mxu0  ;;  %v1673_v48 = vpop.f32.mrb[8].mxu1 }
 0x171   : > { %v4333_v49 = vpack.c.bf16 %v2319_v45, %v2318_v44  ;;  %v1226_v50 = vadd.f32 %v6328_v63, %v1225_v47  ;;  %v4613_v51 = vpack.c.bf16 %v2431_v46, %v2430_v42  ;;  %v5129_v52 = vpop.f32.mrb[9].mxu0  ;;  %v1674_v54 = vadd.f32 %v6328_v63, %v1673_v48  ;;  %v5353_v55 = vpop.f32.mrb[9].mxu1  ;;  %v5725_v42 = vld [vmem:[%s6140_s21 + $0x2b8] sm:$0xff]  }
 0x172   : > { %v1228_v57 = vpop.f32.mrb[10].mxu0  ;;  %v1676_v58 = vpop.f32.mrb[10].mxu1 }
 0x173   : > { %4875 = vst [vmem:[%s6350_s18 + $0x8] sm:$0xff] %v4333_v49   ;;  %v2099_v59 = vmul.f32 0.2, %v1226_v50  ;;  %4931 = vst [vmem:[%s6350_s18 + $0x1c8] sm:$0xff] %v4613_v51   ;;  %v1229_v60 = vadd.f32 %v6328_v63, %v1228_v57  ;;  %v5130_v61 = vpop.f32.mrb[11].mxu0  ;;  %v1677_v1 = vadd.f32 %v6328_v63, %v1676_v58  ;;  %v5354_v2 = vpop.f32.mrb[11].mxu1 }
 0x174   : > { %v2211_v62 = vmul.f32 0.2, %v1674_v54 }
 0x175   : > { %v2100_v3 = vmul.f32 0.2, %v1229_v60  ;;  %5236 = vmatmul.mubr.bf16.gmra.mrb[116].mxu0 %v5720_v53  ;;  %v2212_v5 = vmul.f32 0.2, %v1677_v1  ;;  %5460 = vmatmul.mubr.bf16.gmra.mrb[116].mxu1 %v5721_v56  ;;  %v2320_v6 = vmax.f32 %v1226_v50, %v2099_v59 }
 0x176   : > { %v2432_v4 = vmax.f32 %v1674_v54, %v2211_v62  ;;  %5239 = vmatprep.mubr.msk.bf16.mxu0 %vm5939_vm0, %v5938_v0  ;;  %5463 = vmatprep.mubr.msk.bf16.mxu1 %vm5939_vm0, %v5938_v0 }
 0x177   : > { %v2321_v7 = vmax.f32 %v1229_v60, %v2100_v3  ;;  %v2433_v8 = vmax.f32 %v1677_v1, %v2212_v5  ;;  %v5726_v1 = vld [vmem:[%s6140_s21 + $0x100] sm:$0xff]  }
 0x178   : > { %v1233_v9 = vpop.f32.mrb[12].mxu0  ;;  %v1681_v10 = vpop.f32.mrb[12].mxu1 }
 0x179   : > { %v4338_v11 = vpack.c.bf16 %v2321_v7, %v2320_v6  ;;  %v1234_v12 = vadd.f32 %v6328_v63, %v1233_v9  ;;  %v4618_v13 = vpack.c.bf16 %v2433_v8, %v2432_v4  ;;  %v5133_v14 = vpop.f32.mrb[13].mxu0  ;;  %v1682_v16 = vadd.f32 %v6328_v63, %v1681_v10  ;;  %v5357_v17 = vpop.f32.mrb[13].mxu1  ;;  %v5727_v4 = vld [vmem:[%s6140_s21 + $0x2c0] sm:$0xff]  }
 0x17a   : > { %v1236_v19 = vpop.f32.mrb[14].mxu0  ;;  %v1684_v20 = vpop.f32.mrb[14].mxu1 }
 0x17b   : > { %4876 = vst [vmem:[%s6350_s18 + $0x10] sm:$0xff] %v4338_v11   ;;  %v2101_v21 = vmul.f32 0.2, %v1234_v12  ;;  %4932 = vst [vmem:[%s6350_s18 + $0x1d0] sm:$0xff] %v4618_v13   ;;  %v1237_v22 = vadd.f32 %v6328_v63, %v1236_v19  ;;  %v5134_v23 = vpop.f32.mrb[15].mxu0  ;;  %v1685_v25 = vadd.f32 %v6328_v63, %v1684_v20  ;;  %v5358_v26 = vpop.f32.mrb[15].mxu1 }
 0x17c   : > { %v2213_v24 = vmul.f32 0.2, %v1682_v16 }
 0x17d   : > { %v2102_v27 = vmul.f32 0.2, %v1237_v22  ;;  %5240 = vmatmul.mubr.bf16.gmra.mrb[120].mxu0 %v5722_v15  ;;  %v2214_v29 = vmul.f32 0.2, %v1685_v25  ;;  %5464 = vmatmul.mubr.bf16.gmra.mrb[120].mxu1 %v5723_v18  ;;  %v2322_v30 = vmax.f32 %v1234_v12, %v2101_v21 }
 0x17e   : > { %v2434_v28 = vmax.f32 %v1682_v16, %v2213_v24  ;;  %5243 = vmatprep.mubr.msk.bf16.mxu0 %vm5939_vm0, %v5938_v0  ;;  %5467 = vmatprep.mubr.msk.bf16.mxu1 %vm5939_vm0, %v5938_v0 }
 0x17f   : > { %v2323_v31 = vmax.f32 %v1237_v22, %v2102_v27  ;;  %v2435_v32 = vmax.f32 %v1685_v25, %v2214_v29  ;;  %v5728_v25 = vld [vmem:[%s6140_s21 + $0x108] sm:$0xff]  }
 0x180   : > { %v1241_v33 = vpop.f32.mrb[16].mxu0  ;;  %v1689_v34 = vpop.f32.mrb[16].mxu1 }
 0x181   : > { %v4343_v35 = vpack.c.bf16 %v2323_v31, %v2322_v30  ;;  %v1242_v36 = vadd.f32 %v6328_v63, %v1241_v33  ;;  %v4623_v37 = vpack.c.bf16 %v2435_v32, %v2434_v28  ;;  %v5137_v38 = vpop.f32.mrb[17].mxu0  ;;  %v1690_v40 = vadd.f32 %v6328_v63, %v1689_v34  ;;  %v5361_v41 = vpop.f32.mrb[17].mxu1  ;;  %v5729_v28 = vld [vmem:[%s6140_s21 + $0x2c8] sm:$0xff]  }
 0x182   : > { %v1244_v43 = vpop.f32.mrb[18].mxu0  ;;  %v1692_v44 = vpop.f32.mrb[18].mxu1 }
 0x183   : > { %4877 = vst [vmem:[%s6350_s18 + $0x18] sm:$0xff] %v4343_v35   ;;  %v2103_v45 = vmul.f32 0.2, %v1242_v36  ;;  %4933 = vst [vmem:[%s6350_s18 + $0x1d8] sm:$0xff] %v4623_v37   ;;  %v1245_v46 = vadd.f32 %v6328_v63, %v1244_v43  ;;  %v5138_v47 = vpop.f32.mrb[19].mxu0  ;;  %v1693_v49 = vadd.f32 %v6328_v63, %v1692_v44  ;;  %v5362_v50 = vpop.f32.mrb[19].mxu1 }
 0x184   : > { %v2215_v48 = vmul.f32 0.2, %v1690_v40 }
 0x185   : > { %v2104_v51 = vmul.f32 0.2, %v1245_v46  ;;  %5244 = vmatmul.mubr.bf16.gmra.mrb[124].mxu0 %v5724_v39  ;;  %v2216_v53 = vmul.f32 0.2, %v1693_v49  ;;  %5468 = vmatmul.mubr.bf16.gmra.mrb[124].mxu1 %v5725_v42  ;;  %v2324_v54 = vmax.f32 %v1242_v36, %v2103_v45 }
 0x186   : > { %v2436_v52 = vmax.f32 %v1690_v40, %v2215_v48  ;;  %5247 = vmatprep.mubr.msk.bf16.mxu0 %vm5939_vm0, %v5938_v0  ;;  %5471 = vmatprep.mubr.msk.bf16.mxu1 %vm5939_vm0, %v5938_v0 }
 0x187   : > { %v2325_v55 = vmax.f32 %v1245_v46, %v2104_v51  ;;  %v2437_v56 = vmax.f32 %v1693_v49, %v2216_v53  ;;  %v5730_v49 = vld [vmem:[%s6140_s21 + $0x110] sm:$0xff]  }
 0x188   : > { %v1249_v57 = vpop.f32.mrb[20].mxu0  ;;  %v1697_v58 = vpop.f32.mrb[20].mxu1 }
 0x189   : > { %v4348_v59 = vpack.c.bf16 %v2325_v55, %v2324_v54  ;;  %v1250_v60 = vadd.f32 %v6328_v63, %v1249_v57  ;;  %v4628_v61 = vpack.c.bf16 %v2437_v56, %v2436_v52  ;;  %v5141_v62 = vpop.f32.mrb[21].mxu0  ;;  %v1698_v2 = vadd.f32 %v6328_v63, %v1697_v58  ;;  %v5365_v3 = vpop.f32.mrb[21].mxu1  ;;  %v5731_v52 = vld [vmem:[%s6140_s21 + $0x2d0] sm:$0xff]  }
 0x18a   : > { %v1252_v5 = vpop.f32.mrb[22].mxu0  ;;  %v1700_v6 = vpop.f32.mrb[22].mxu1 }
 0x18b   : > { %4878 = vst [vmem:[%s6350_s18 + $0x20] sm:$0xff] %v4348_v59   ;;  %v2105_v7 = vmul.f32 0.2, %v1250_v60  ;;  %4934 = vst [vmem:[%s6350_s18 + $0x1e0] sm:$0xff] %v4628_v61   ;;  %v1253_v8 = vadd.f32 %v6328_v63, %v1252_v5  ;;  %v5142_v9 = vpop.f32.mrb[23].mxu0  ;;  %v1701_v11 = vadd.f32 %v6328_v63, %v1700_v6  ;;  %v5366_v12 = vpop.f32.mrb[23].mxu1 }
 0x18c   : > { %v2217_v10 = vmul.f32 0.2, %v1698_v2 }
 0x18d   : > { %v2106_v13 = vmul.f32 0.2, %v1253_v8  ;;  %5248 = vmatmul.mubr.bf16.gmra.mrb[128].mxu0 %v5726_v1  ;;  %v2218_v15 = vmul.f32 0.2, %v1701_v11  ;;  %5472 = vmatmul.mubr.bf16.gmra.mrb[128].mxu1 %v5727_v4  ;;  %v2326_v16 = vmax.f32 %v1250_v60, %v2105_v7 }
 0x18e   : > { %v2438_v14 = vmax.f32 %v1698_v2, %v2217_v10  ;;  %5251 = vmatprep.mubr.msk.bf16.mxu0 %vm5939_vm0, %v5938_v0  ;;  %5475 = vmatprep.mubr.msk.bf16.mxu1 %vm5939_vm0, %v5938_v0 }
 0x18f   : > { %v2327_v17 = vmax.f32 %v1253_v8, %v2106_v13  ;;  %v2439_v18 = vmax.f32 %v1701_v11, %v2218_v15  ;;  %v5732_v11 = vld [vmem:[%s6140_s21 + $0x118] sm:$0xff]  }
 0x190   : > { %v1257_v19 = vpop.f32.mrb[24].mxu0  ;;  %v1705_v20 = vpop.f32.mrb[24].mxu1 }
 0x191   : > { %v4353_v21 = vpack.c.bf16 %v2327_v17, %v2326_v16  ;;  %v1258_v22 = vadd.f32 %v6328_v63, %v1257_v19  ;;  %v4633_v23 = vpack.c.bf16 %v2439_v18, %v2438_v14  ;;  %v5145_v24 = vpop.f32.mrb[25].mxu0  ;;  %v1706_v26 = vadd.f32 %v6328_v63, %v1705_v20  ;;  %v5369_v27 = vpop.f32.mrb[25].mxu1  ;;  %v5733_v14 = vld [vmem:[%s6140_s21 + $0x2d8] sm:$0xff]  }
 0x192   : > { %v1260_v29 = vpop.f32.mrb[26].mxu0  ;;  %v1708_v30 = vpop.f32.mrb[26].mxu1 }
 0x193   : > { %4879 = vst [vmem:[%s6350_s18 + $0x28] sm:$0xff] %v4353_v21   ;;  %v2107_v31 = vmul.f32 0.2, %v1258_v22  ;;  %4935 = vst [vmem:[%s6350_s18 + $0x1e8] sm:$0xff] %v4633_v23   ;;  %v1261_v32 = vadd.f32 %v6328_v63, %v1260_v29  ;;  %v5146_v33 = vpop.f32.mrb[27].mxu0  ;;  %v1709_v35 = vadd.f32 %v6328_v63, %v1708_v30  ;;  %v5370_v36 = vpop.f32.mrb[27].mxu1 }
 0x194   : > { %v2219_v34 = vmul.f32 0.2, %v1706_v26 }
 0x195   : > { %v2108_v37 = vmul.f32 0.2, %v1261_v32  ;;  %5252 = vmatmul.mubr.bf16.gmra.mrb[132].mxu0 %v5728_v25  ;;  %v2220_v39 = vmul.f32 0.2, %v1709_v35  ;;  %5476 = vmatmul.mubr.bf16.gmra.mrb[132].mxu1 %v5729_v28  ;;  %v2328_v40 = vmax.f32 %v1258_v22, %v2107_v31 }
 0x196   : > { %v2440_v38 = vmax.f32 %v1706_v26, %v2219_v34  ;;  %5255 = vmatprep.mubr.msk.bf16.mxu0 %vm5939_vm0, %v5938_v0  ;;  %5479 = vmatprep.mubr.msk.bf16.mxu1 %vm5939_vm0, %v5938_v0 }
 0x197   : > { %v2329_v41 = vmax.f32 %v1261_v32, %v2108_v37  ;;  %v2441_v42 = vmax.f32 %v1709_v35, %v2220_v39  ;;  %v5734_v35 = vld [vmem:[%s6140_s21 + $0x120] sm:$0xff]  }
 0x198   : > { %v1265_v43 = vpop.f32.mrb[28].mxu0  ;;  %v1713_v44 = vpop.f32.mrb[28].mxu1 }
 0x199   : > { %v4358_v45 = vpack.c.bf16 %v2329_v41, %v2328_v40  ;;  %v1266_v46 = vadd.f32 %v6328_v63, %v1265_v43  ;;  %v4638_v47 = vpack.c.bf16 %v2441_v42, %v2440_v38  ;;  %v5149_v48 = vpop.f32.mrb[29].mxu0  ;;  %v1714_v50 = vadd.f32 %v6328_v63, %v1713_v44  ;;  %v5373_v51 = vpop.f32.mrb[29].mxu1  ;;  %v5735_v38 = vld [vmem:[%s6140_s21 + $0x2e0] sm:$0xff]  }
 0x19a   : > { %v1268_v53 = vpop.f32.mrb[30].mxu0  ;;  %v1716_v54 = vpop.f32.mrb[30].mxu1 }
 0x19b   : > { %4880 = vst [vmem:[%s6350_s18 + $0x30] sm:$0xff] %v4358_v45   ;;  %v2109_v55 = vmul.f32 0.2, %v1266_v46  ;;  %4936 = vst [vmem:[%s6350_s18 + $0x1f0] sm:$0xff] %v4638_v47   ;;  %v1269_v56 = vadd.f32 %v6328_v63, %v1268_v53  ;;  %v5150_v57 = vpop.f32.mrb[31].mxu0  ;;  %v1717_v59 = vadd.f32 %v6328_v63, %v1716_v54  ;;  %v5374_v60 = vpop.f32.mrb[31].mxu1 }
 0x19c   : > { %v2221_v58 = vmul.f32 0.2, %v1714_v50 }
 0x19d   : > { %v2110_v61 = vmul.f32 0.2, %v1269_v56  ;;  %5256 = vmatmul.mubr.bf16.gmra.mrb[136].mxu0 %v5730_v49  ;;  %v2222_v1 = vmul.f32 0.2, %v1717_v59  ;;  %5480 = vmatmul.mubr.bf16.gmra.mrb[136].mxu1 %v5731_v52  ;;  %v2330_v2 = vmax.f32 %v1266_v46, %v2109_v55 }
 0x19e   : > { %v2442_v62 = vmax.f32 %v1714_v50, %v2221_v58  ;;  %5259 = vmatprep.mubr.msk.bf16.mxu0 %vm5939_vm0, %v5938_v0  ;;  %5483 = vmatprep.mubr.msk.bf16.mxu1 %vm5939_vm0, %v5938_v0 }
 0x19f   : > { %v2331_v3 = vmax.f32 %v1269_v56, %v2110_v61  ;;  %v2443_v4 = vmax.f32 %v1717_v59, %v2222_v1  ;;  %v5736_v59 = vld [vmem:[%s6140_s21 + $0x128] sm:$0xff]  }
 0x1a0   : > { %v1273_v5 = vpop.f32.mrb[32].mxu0  ;;  %v1721_v6 = vpop.f32.mrb[32].mxu1 }
 0x1a1   : > { %v4363_v7 = vpack.c.bf16 %v2331_v3, %v2330_v2  ;;  %v1274_v8 = vadd.f32 %v6328_v63, %v1273_v5  ;;  %v4643_v9 = vpack.c.bf16 %v2443_v4, %v2442_v62  ;;  %v5153_v10 = vpop.f32.mrb[33].mxu0  ;;  %v1722_v12 = vadd.f32 %v6328_v63, %v1721_v6  ;;  %v5377_v13 = vpop.f32.mrb[33].mxu1  ;;  %v5737_v62 = vld [vmem:[%s6140_s21 + $0x2e8] sm:$0xff]  }
 0x1a2   : > { %v1276_v15 = vpop.f32.mrb[34].mxu0  ;;  %v1724_v16 = vpop.f32.mrb[34].mxu1 }
 0x1a3   : > { %4881 = vst [vmem:[%s6350_s18 + $0x38] sm:$0xff] %v4363_v7   ;;  %v2111_v17 = vmul.f32 0.2, %v1274_v8  ;;  %4937 = vst [vmem:[%s6350_s18 + $0x1f8] sm:$0xff] %v4643_v9   ;;  %v1277_v18 = vadd.f32 %v6328_v63, %v1276_v15  ;;  %v5154_v19 = vpop.f32.mrb[35].mxu0  ;;  %v1725_v21 = vadd.f32 %v6328_v63, %v1724_v16  ;;  %v5378_v22 = vpop.f32.mrb[35].mxu1 }
 0x1a4   : > { %v2223_v20 = vmul.f32 0.2, %v1722_v12 }
 0x1a5   : > { %v2112_v23 = vmul.f32 0.2, %v1277_v18  ;;  %5260 = vmatmul.mubr.bf16.gmra.mrb[140].mxu0 %v5732_v11  ;;  %v2224_v25 = vmul.f32 0.2, %v1725_v21  ;;  %5484 = vmatmul.mubr.bf16.gmra.mrb[140].mxu1 %v5733_v14  ;;  %v2332_v26 = vmax.f32 %v1274_v8, %v2111_v17 }
 0x1a6   : > { %v2444_v24 = vmax.f32 %v1722_v12, %v2223_v20  ;;  %5263 = vmatprep.mubr.msk.bf16.mxu0 %vm5939_vm0, %v5938_v0  ;;  %5487 = vmatprep.mubr.msk.bf16.mxu1 %vm5939_vm0, %v5938_v0 }
 0x1a7   : > { %v2333_v27 = vmax.f32 %v1277_v18, %v2112_v23  ;;  %v2445_v28 = vmax.f32 %v1725_v21, %v2224_v25  ;;  %v5738_v21 = vld [vmem:[%s6140_s21 + $0x130] sm:$0xff]  }
 0x1a8   : > { %v1281_v29 = vpop.f32.mrb[36].mxu0  ;;  %v1729_v30 = vpop.f32.mrb[36].mxu1 }
 0x1a9   : > { %v4368_v31 = vpack.c.bf16 %v2333_v27, %v2332_v26  ;;  %v1282_v32 = vadd.f32 %v6328_v63, %v1281_v29  ;;  %v4648_v33 = vpack.c.bf16 %v2445_v28, %v2444_v24  ;;  %v5157_v34 = vpop.f32.mrb[37].mxu0  ;;  %v1730_v36 = vadd.f32 %v6328_v63, %v1729_v30  ;;  %v5381_v37 = vpop.f32.mrb[37].mxu1  ;;  %v5739_v24 = vld [vmem:[%s6140_s21 + $0x2f0] sm:$0xff]  }
 0x1aa   : > { %v1284_v39 = vpop.f32.mrb[38].mxu0  ;;  %v1732_v40 = vpop.f32.mrb[38].mxu1 }
 0x1ab   : > { %4882 = vst [vmem:[%s6350_s18 + $0x40] sm:$0xff] %v4368_v31   ;;  %v2113_v41 = vmul.f32 0.2, %v1282_v32  ;;  %4938 = vst [vmem:[%s6350_s18 + $0x200] sm:$0xff] %v4648_v33   ;;  %v1285_v42 = vadd.f32 %v6328_v63, %v1284_v39  ;;  %v5158_v43 = vpop.f32.mrb[39].mxu0  ;;  %v1733_v45 = vadd.f32 %v6328_v63, %v1732_v40  ;;  %v5382_v46 = vpop.f32.mrb[39].mxu1 }
 0x1ac   : > { %v2225_v44 = vmul.f32 0.2, %v1730_v36 }
 0x1ad   : > { %v2114_v47 = vmul.f32 0.2, %v1285_v42  ;;  %5264 = vmatmul.mubr.bf16.gmra.mrb[144].mxu0 %v5734_v35  ;;  %v2226_v49 = vmul.f32 0.2, %v1733_v45  ;;  %5488 = vmatmul.mubr.bf16.gmra.mrb[144].mxu1 %v5735_v38  ;;  %v2334_v50 = vmax.f32 %v1282_v32, %v2113_v41 }
 0x1ae   : > { %v2446_v48 = vmax.f32 %v1730_v36, %v2225_v44  ;;  %5267 = vmatprep.mubr.msk.bf16.mxu0 %vm5939_vm0, %v5938_v0  ;;  %5491 = vmatprep.mubr.msk.bf16.mxu1 %vm5939_vm0, %v5938_v0 }
 0x1af   : > { %v2335_v51 = vmax.f32 %v1285_v42, %v2114_v47  ;;  %v2447_v52 = vmax.f32 %v1733_v45, %v2226_v49  ;;  %v5740_v45 = vld [vmem:[%s6140_s21 + $0x138] sm:$0xff]  }
 0x1b0   : > { %v1289_v53 = vpop.f32.mrb[40].mxu0  ;;  %v1737_v54 = vpop.f32.mrb[40].mxu1 }
 0x1b1   : > { %v4373_v55 = vpack.c.bf16 %v2335_v51, %v2334_v50  ;;  %v1290_v56 = vadd.f32 %v6328_v63, %v1289_v53  ;;  %v4653_v57 = vpack.c.bf16 %v2447_v52, %v2446_v48  ;;  %v5161_v58 = vpop.f32.mrb[41].mxu0  ;;  %v1738_v60 = vadd.f32 %v6328_v63, %v1737_v54  ;;  %v5385_v61 = vpop.f32.mrb[41].mxu1  ;;  %v5741_v48 = vld [vmem:[%s6140_s21 + $0x2f8] sm:$0xff]  }
 0x1b2   : > { %v1292_v1 = vpop.f32.mrb[42].mxu0  ;;  %v1740_v2 = vpop.f32.mrb[42].mxu1 }
 0x1b3   : > { %4883 = vst [vmem:[%s6350_s18 + $0x48] sm:$0xff] %v4373_v55   ;;  %v2115_v3 = vmul.f32 0.2, %v1290_v56  ;;  %4939 = vst [vmem:[%s6350_s18 + $0x208] sm:$0xff] %v4653_v57   ;;  %v1293_v4 = vadd.f32 %v6328_v63, %v1292_v1  ;;  %v5162_v5 = vpop.f32.mrb[43].mxu0  ;;  %v1741_v7 = vadd.f32 %v6328_v63, %v1740_v2  ;;  %v5386_v8 = vpop.f32.mrb[43].mxu1 }
 0x1b4   : > { %v2227_v6 = vmul.f32 0.2, %v1738_v60 }
 0x1b5   : > { %v2116_v9 = vmul.f32 0.2, %v1293_v4  ;;  %5268 = vmatmul.mubr.bf16.gmra.mrb[148].mxu0 %v5736_v59  ;;  %v2228_v11 = vmul.f32 0.2, %v1741_v7  ;;  %5492 = vmatmul.mubr.bf16.gmra.mrb[148].mxu1 %v5737_v62  ;;  %v2336_v12 = vmax.f32 %v1290_v56, %v2115_v3 }
 0x1b6   : > { %v2448_v10 = vmax.f32 %v1738_v60, %v2227_v6  ;;  %5271 = vmatprep.mubr.msk.bf16.mxu0 %vm5939_vm0, %v5938_v0  ;;  %5495 = vmatprep.mubr.msk.bf16.mxu1 %vm5939_vm0, %v5938_v0 }
 0x1b7   : > { %v2337_v13 = vmax.f32 %v1293_v4, %v2116_v9  ;;  %v2449_v14 = vmax.f32 %v1741_v7, %v2228_v11  ;;  %v5742_v7 = vld [vmem:[%s6140_s21 + $0x140] sm:$0xff]  }
 0x1b8   : > { %v1297_v15 = vpop.f32.mrb[44].mxu0  ;;  %v1745_v16 = vpop.f32.mrb[44].mxu1 }
 0x1b9   : > { %v4378_v17 = vpack.c.bf16 %v2337_v13, %v2336_v12  ;;  %v1298_v18 = vadd.f32 %v6328_v63, %v1297_v15  ;;  %v4658_v19 = vpack.c.bf16 %v2449_v14, %v2448_v10  ;;  %v5165_v20 = vpop.f32.mrb[45].mxu0  ;;  %v1746_v22 = vadd.f32 %v6328_v63, %v1745_v16  ;;  %v5389_v23 = vpop.f32.mrb[45].mxu1  ;;  %v5743_v10 = vld [vmem:[%s6140_s21 + $0x300] sm:$0xff]  }
 0x1ba   : > { %v1300_v25 = vpop.f32.mrb[46].mxu0  ;;  %v1748_v26 = vpop.f32.mrb[46].mxu1 }
 0x1bb   : > { %4884 = vst [vmem:[%s6350_s18 + $0x50] sm:$0xff] %v4378_v17   ;;  %v2117_v27 = vmul.f32 0.2, %v1298_v18  ;;  %4940 = vst [vmem:[%s6350_s18 + $0x210] sm:$0xff] %v4658_v19   ;;  %v1301_v28 = vadd.f32 %v6328_v63, %v1300_v25  ;;  %v5166_v29 = vpop.f32.mrb[47].mxu0  ;;  %v1749_v31 = vadd.f32 %v6328_v63, %v1748_v26  ;;  %v5390_v32 = vpop.f32.mrb[47].mxu1 }
 0x1bc   : > { %v2229_v30 = vmul.f32 0.2, %v1746_v22 }
 0x1bd   : > { %v2118_v33 = vmul.f32 0.2, %v1301_v28  ;;  %5272 = vmatmul.mubr.bf16.gmra.mrb[152].mxu0 %v5738_v21  ;;  %v2230_v35 = vmul.f32 0.2, %v1749_v31  ;;  %5496 = vmatmul.mubr.bf16.gmra.mrb[152].mxu1 %v5739_v24  ;;  %v2338_v36 = vmax.f32 %v1298_v18, %v2117_v27 }
 0x1be   : > { %v2450_v34 = vmax.f32 %v1746_v22, %v2229_v30  ;;  %5275 = vmatprep.mubr.msk.bf16.mxu0 %vm5939_vm0, %v5938_v0  ;;  %5499 = vmatprep.mubr.msk.bf16.mxu1 %vm5939_vm0, %v5938_v0 }
 0x1bf   : > { %v2339_v37 = vmax.f32 %v1301_v28, %v2118_v33  ;;  %v2451_v38 = vmax.f32 %v1749_v31, %v2230_v35  ;;  %v5744_v31 = vld [vmem:[%s6140_s21 + $0x148] sm:$0xff]  }
 0x1c0   : > { %v1305_v39 = vpop.f32.mrb[48].mxu0  ;;  %v1753_v40 = vpop.f32.mrb[48].mxu1 }
 0x1c1   : > { %v4383_v41 = vpack.c.bf16 %v2339_v37, %v2338_v36  ;;  %v1306_v42 = vadd.f32 %v6328_v63, %v1305_v39  ;;  %v4663_v43 = vpack.c.bf16 %v2451_v38, %v2450_v34  ;;  %v5169_v44 = vpop.f32.mrb[49].mxu0  ;;  %v1754_v46 = vadd.f32 %v6328_v63, %v1753_v40  ;;  %v5393_v47 = vpop.f32.mrb[49].mxu1  ;;  %v5745_v34 = vld [vmem:[%s6140_s21 + $0x308] sm:$0xff]  }
 0x1c2   : > { %v1308_v49 = vpop.f32.mrb[50].mxu0  ;;  %v1756_v50 = vpop.f32.mrb[50].mxu1 }
 0x1c3   : > { %4885 = vst [vmem:[%s6350_s18 + $0x58] sm:$0xff] %v4383_v41   ;;  %v2119_v51 = vmul.f32 0.2, %v1306_v42  ;;  %4941 = vst [vmem:[%s6350_s18 + $0x218] sm:$0xff] %v4663_v43   ;;  %v1309_v52 = vadd.f32 %v6328_v63, %v1308_v49  ;;  %v5170_v53 = vpop.f32.mrb[51].mxu0  ;;  %v1757_v55 = vadd.f32 %v6328_v63, %v1756_v50  ;;  %v5394_v56 = vpop.f32.mrb[51].mxu1 }
 0x1c4   : > { %v2231_v54 = vmul.f32 0.2, %v1754_v46 }
 0x1c5   : > { %v2120_v57 = vmul.f32 0.2, %v1309_v52  ;;  %5276 = vmatmul.mubr.bf16.gmra.mrb[156].mxu0 %v5740_v45  ;;  %v2232_v59 = vmul.f32 0.2, %v1757_v55  ;;  %5500 = vmatmul.mubr.bf16.gmra.mrb[156].mxu1 %v5741_v48  ;;  %v2340_v60 = vmax.f32 %v1306_v42, %v2119_v51 }
 0x1c6   : > { %v2452_v58 = vmax.f32 %v1754_v46, %v2231_v54  ;;  %5279 = vmatprep.mubr.msk.bf16.mxu0 %vm5939_vm0, %v5938_v0  ;;  %5503 = vmatprep.mubr.msk.bf16.mxu1 %vm5939_vm0, %v5938_v0 }
 0x1c7   : > { %v2341_v61 = vmax.f32 %v1309_v52, %v2120_v57  ;;  %v2453_v62 = vmax.f32 %v1757_v55, %v2232_v59  ;;  %v5746_v55 = vld [vmem:[%s6140_s21 + $0x150] sm:$0xff]  }
 0x1c8   : > { %v1313_v1 = vpop.f32.mrb[52].mxu0  ;;  %v1761_v2 = vpop.f32.mrb[52].mxu1 }
 0x1c9   : > { %v4388_v3 = vpack.c.bf16 %v2341_v61, %v2340_v60  ;;  %v1314_v4 = vadd.f32 %v6328_v63, %v1313_v1  ;;  %v4668_v5 = vpack.c.bf16 %v2453_v62, %v2452_v58  ;;  %v5173_v6 = vpop.f32.mrb[53].mxu0  ;;  %v1762_v8 = vadd.f32 %v6328_v63, %v1761_v2  ;;  %v5397_v9 = vpop.f32.mrb[53].mxu1  ;;  %v5747_v58 = vld [vmem:[%s6140_s21 + $0x310] sm:$0xff]  }
 0x1ca   : > { %v1316_v11 = vpop.f32.mrb[54].mxu0  ;;  %v1764_v12 = vpop.f32.mrb[54].mxu1 }
 0x1cb   : > { %4886 = vst [vmem:[%s6350_s18 + $0x60] sm:$0xff] %v4388_v3   ;;  %v2121_v13 = vmul.f32 0.2, %v1314_v4  ;;  %4942 = vst [vmem:[%s6350_s18 + $0x220] sm:$0xff] %v4668_v5   ;;  %v1317_v14 = vadd.f32 %v6328_v63, %v1316_v11  ;;  %v5174_v15 = vpop.f32.mrb[55].mxu0  ;;  %v1765_v17 = vadd.f32 %v6328_v63, %v1764_v12  ;;  %v5398_v18 = vpop.f32.mrb[55].mxu1 }
 0x1cc   : > { %v2233_v16 = vmul.f32 0.2, %v1762_v8 }
 0x1cd   : > { %v2122_v19 = vmul.f32 0.2, %v1317_v14  ;;  %5280 = vmatmul.mubr.bf16.gmra.mrb[160].mxu0 %v5742_v7  ;;  %v2234_v21 = vmul.f32 0.2, %v1765_v17  ;;  %5504 = vmatmul.mubr.bf16.gmra.mrb[160].mxu1 %v5743_v10  ;;  %v2342_v22 = vmax.f32 %v1314_v4, %v2121_v13 }
 0x1ce   : > { %v2454_v20 = vmax.f32 %v1762_v8, %v2233_v16  ;;  %5283 = vmatprep.mubr.msk.bf16.mxu0 %vm5939_vm0, %v5938_v0  ;;  %5507 = vmatprep.mubr.msk.bf16.mxu1 %vm5939_vm0, %v5938_v0 }
 0x1cf   : > { %v2343_v23 = vmax.f32 %v1317_v14, %v2122_v19  ;;  %v2455_v24 = vmax.f32 %v1765_v17, %v2234_v21  ;;  %v5748_v17 = vld [vmem:[%s6140_s21 + $0x158] sm:$0xff]  }
 0x1d0   : > { %v1321_v25 = vpop.f32.mrb[56].mxu0  ;;  %v1769_v26 = vpop.f32.mrb[56].mxu1 }
 0x1d1   : > { %v4393_v27 = vpack.c.bf16 %v2343_v23, %v2342_v22  ;;  %v1322_v28 = vadd.f32 %v6328_v63, %v1321_v25  ;;  %v4673_v29 = vpack.c.bf16 %v2455_v24, %v2454_v20  ;;  %v5177_v30 = vpop.f32.mrb[57].mxu0  ;;  %v1770_v32 = vadd.f32 %v6328_v63, %v1769_v26  ;;  %v5401_v33 = vpop.f32.mrb[57].mxu1  ;;  %v5749_v20 = vld [vmem:[%s6140_s21 + $0x318] sm:$0xff]  }
 0x1d2   : > { %v1324_v35 = vpop.f32.mrb[58].mxu0  ;;  %v1772_v36 = vpop.f32.mrb[58].mxu1 }
 0x1d3   : > { %4887 = vst [vmem:[%s6350_s18 + $0x68] sm:$0xff] %v4393_v27   ;;  %v2123_v37 = vmul.f32 0.2, %v1322_v28  ;;  %4943 = vst [vmem:[%s6350_s18 + $0x228] sm:$0xff] %v4673_v29   ;;  %v1325_v38 = vadd.f32 %v6328_v63, %v1324_v35  ;;  %v5178_v39 = vpop.f32.mrb[59].mxu0  ;;  %v1773_v41 = vadd.f32 %v6328_v63, %v1772_v36  ;;  %v5402_v42 = vpop.f32.mrb[59].mxu1 }
 0x1d4   : > { %v2235_v40 = vmul.f32 0.2, %v1770_v32 }
 0x1d5   : > { %v2124_v43 = vmul.f32 0.2, %v1325_v38  ;;  %5284 = vmatmul.mubr.bf16.gmra.mrb[164].mxu0 %v5744_v31  ;;  %v2236_v45 = vmul.f32 0.2, %v1773_v41  ;;  %5508 = vmatmul.mubr.bf16.gmra.mrb[164].mxu1 %v5745_v34  ;;  %v2344_v46 = vmax.f32 %v1322_v28, %v2123_v37  ;;  %v6540_v37 = vld [vmem:[#allocation7] ss:$0 sm:$0xff] }
 0x1d6   : > { %v2456_v44 = vmax.f32 %v1770_v32, %v2235_v40  ;;  %5287 = vmatprep.mubr.msk.bf16.mxu0 %vm5939_vm0, %v5938_v0  ;;  %5511 = vmatprep.mubr.msk.bf16.mxu1 %vm5939_vm0, %v5938_v0 }
 0x1d7   : > { %v2345_v47 = vmax.f32 %v1325_v38, %v2124_v43  ;;  %v2457_v48 = vmax.f32 %v1773_v41, %v2236_v45  ;;  %v5750_v41 = vld [vmem:[%s6140_s21 + $0x160] sm:$0xff]  }
 0x1d8   : > { %v1329_v49 = vpop.f32.mrb[60].mxu0  ;;  %v1777_v50 = vpop.f32.mrb[60].mxu1 }
 0x1d9   : > { %v4398_v51 = vpack.c.bf16 %v2345_v47, %v2344_v46  ;;  %v1330_v52 = vadd.f32 %v6328_v63, %v1329_v49  ;;  %v4678_v53 = vpack.c.bf16 %v2457_v48, %v2456_v44  ;;  %v5181_v54 = vpop.f32.mrb[61].mxu0  ;;  %v1778_v56 = vadd.f32 %v6328_v63, %v1777_v50  ;;  %v5405_v57 = vpop.f32.mrb[61].mxu1  ;;  %v5751_v44 = vld [vmem:[%s6140_s21 + $0x320] sm:$0xff]  }
 0x1da   : > { %v1332_v59 = vpop.f32.mrb[62].mxu0  ;;  %v1780_v60 = vpop.f32.mrb[62].mxu1 }
 0x1db   : > { %4888 = vst [vmem:[%s6350_s18 + $0x70] sm:$0xff] %v4398_v51   ;;  %v2125_v61 = vmul.f32 0.2, %v1330_v52  ;;  %4944 = vst [vmem:[%s6350_s18 + $0x230] sm:$0xff] %v4678_v53   ;;  %v1333_v62 = vadd.f32 %v6328_v63, %v1332_v59  ;;  %v5182_v1 = vpop.f32.mrb[63].mxu0  ;;  %v1781_v3 = vadd.f32 %v6328_v63, %v1780_v60  ;;  %v5406_v4 = vpop.f32.mrb[63].mxu1 }
 0x1dc   : > { %v2237_v2 = vmul.f32 0.2, %v1778_v56 }
 0x1dd   : > { %v2126_v5 = vmul.f32 0.2, %v1333_v62  ;;  %5288 = vmatmul.mubr.bf16.gmra.mrb[168].mxu0 %v5746_v55  ;;  %v2238_v7 = vmul.f32 0.2, %v1781_v3  ;;  %5512 = vmatmul.mubr.bf16.gmra.mrb[168].mxu1 %v5747_v58  ;;  %v2346_v8 = vmax.f32 %v1330_v52, %v2125_v61 }
 0x1de   : > { %v2458_v6 = vmax.f32 %v1778_v56, %v2237_v2  ;;  %5291 = vmatprep.mubr.msk.bf16.mxu0 %vm5939_vm0, %v5938_v0  ;;  %5515 = vmatprep.mubr.msk.bf16.mxu1 %vm5939_vm0, %v5938_v0 }
 0x1df   : > { %v2347_v9 = vmax.f32 %v1333_v62, %v2126_v5  ;;  %v2459_v10 = vmax.f32 %v1781_v3, %v2238_v7  ;;  %v5752_v3 = vld [vmem:[%s6140_s21 + $0x168] sm:$0xff]  }
 0x1e0   : > { %v1337_v11 = vpop.f32.mrb[64].mxu0  ;;  %v1785_v12 = vpop.f32.mrb[64].mxu1 }
 0x1e1   : > { %v4403_v13 = vpack.c.bf16 %v2347_v9, %v2346_v8  ;;  %v1338_v14 = vadd.f32 %v6328_v63, %v1337_v11  ;;  %v4683_v15 = vpack.c.bf16 %v2459_v10, %v2458_v6  ;;  %v5185_v16 = vpop.f32.mrb[65].mxu0  ;;  %v1786_v18 = vadd.f32 %v6328_v63, %v1785_v12  ;;  %v5409_v19 = vpop.f32.mrb[65].mxu1  ;;  %v5753_v6 = vld [vmem:[%s6140_s21 + $0x328] sm:$0xff]  }
 0x1e2   : > { %v1340_v21 = vpop.f32.mrb[66].mxu0  ;;  %v1788_v22 = vpop.f32.mrb[66].mxu1 }
 0x1e3   : > { %4889 = vst [vmem:[%s6350_s18 + $0x78] sm:$0xff] %v4403_v13   ;;  %v2127_v23 = vmul.f32 0.2, %v1338_v14  ;;  %4945 = vst [vmem:[%s6350_s18 + $0x238] sm:$0xff] %v4683_v15   ;;  %v1341_v24 = vadd.f32 %v6328_v63, %v1340_v21  ;;  %v5186_v25 = vpop.f32.mrb[67].mxu0  ;;  %v1789_v27 = vadd.f32 %v6328_v63, %v1788_v22  ;;  %v5410_v28 = vpop.f32.mrb[67].mxu1 }
 0x1e4   : > { %v2239_v26 = vmul.f32 0.2, %v1786_v18 }
 0x1e5   : > { %v2128_v29 = vmul.f32 0.2, %v1341_v24  ;;  %5292 = vmatmul.mubr.bf16.gmra.mrb[172].mxu0 %v5748_v17  ;;  %v2240_v31 = vmul.f32 0.2, %v1789_v27  ;;  %5516 = vmatmul.mubr.bf16.gmra.mrb[172].mxu1 %v5749_v20  ;;  %v2348_v32 = vmax.f32 %v1338_v14, %v2127_v23 }
 0x1e6   : > { %v2460_v30 = vmax.f32 %v1786_v18, %v2239_v26  ;;  %5295 = vmatprep.mubr.msk.bf16.mxu0 %vm5939_vm0, %v5938_v0  ;;  %5519 = vmatprep.mubr.msk.bf16.mxu1 %vm5939_vm0, %v5938_v0 }
 0x1e7   : > { %v2349_v33 = vmax.f32 %v1341_v24, %v2128_v29  ;;  %v2461_v34 = vmax.f32 %v1789_v27, %v2240_v31  ;;  %v5754_v27 = vld [vmem:[%s6140_s21 + $0x170] sm:$0xff]  }
 0x1e8   : > { %v1345_v63 = vpop.f32.mrb[68].mxu0  ;;  %v1793_v35 = vpop.f32.mrb[68].mxu1 }
 0x1e9   : > { %v4408_v36 = vpack.c.bf16 %v2349_v33, %v2348_v32  ;;  %v1346_v38 = vadd.f32 %v6540_v37, %v1345_v63  ;;  %v4688_v39 = vpack.c.bf16 %v2461_v34, %v2460_v30  ;;  %v5189_v40 = vpop.f32.mrb[69].mxu0  ;;  %v1794_v42 = vadd.f32 %v6540_v37, %v1793_v35  ;;  %v5413_v43 = vpop.f32.mrb[69].mxu1  ;;  %v5755_v30 = vld [vmem:[%s6140_s21 + $0x330] sm:$0xff]  }
 0x1ea   : > { %v1348_v45 = vpop.f32.mrb[70].mxu0  ;;  %v1796_v46 = vpop.f32.mrb[70].mxu1 }
 0x1eb   : > { %4890 = vst [vmem:[%s6350_s18 + $0x80] sm:$0xff] %v4408_v36   ;;  %v2129_v47 = vmul.f32 0.2, %v1346_v38  ;;  %4946 = vst [vmem:[%s6350_s18 + $0x240] sm:$0xff] %v4688_v39   ;;  %v1349_v48 = vadd.f32 %v6540_v37, %v1348_v45  ;;  %v5190_v49 = vpop.f32.mrb[71].mxu0  ;;  %v1797_v51 = vadd.f32 %v6540_v37, %v1796_v46  ;;  %v5414_v52 = vpop.f32.mrb[71].mxu1 }
 0x1ec   : > { %v2241_v50 = vmul.f32 0.2, %v1794_v42 }
 0x1ed   : > { %v2130_v53 = vmul.f32 0.2, %v1349_v48  ;;  %5296 = vmatmul.mubr.bf16.gmra.mrb[176].mxu0 %v5750_v41  ;;  %v2242_v55 = vmul.f32 0.2, %v1797_v51  ;;  %5520 = vmatmul.mubr.bf16.gmra.mrb[176].mxu1 %v5751_v44  ;;  %v2350_v56 = vmax.f32 %v1346_v38, %v2129_v47 }
 0x1ee   : > { %v2462_v54 = vmax.f32 %v1794_v42, %v2241_v50  ;;  %5299 = vmatprep.mubr.msk.bf16.mxu0 %vm5939_vm0, %v5938_v0  ;;  %5523 = vmatprep.mubr.msk.bf16.mxu1 %vm5939_vm0, %v5938_v0 }
 0x1ef   : > { %v2351_v57 = vmax.f32 %v1349_v48, %v2130_v53  ;;  %v2463_v58 = vmax.f32 %v1797_v51, %v2242_v55  ;;  %v5756_v51 = vld [vmem:[%s6140_s21 + $0x178] sm:$0xff]  }
 0x1f0   : > { %v1353_v59 = vpop.f32.mrb[72].mxu0  ;;  %v1801_v60 = vpop.f32.mrb[72].mxu1 }
 0x1f1   : > { %v4413_v61 = vpack.c.bf16 %v2351_v57, %v2350_v56  ;;  %v1354_v62 = vadd.f32 %v6540_v37, %v1353_v59  ;;  %v4693_v1 = vpack.c.bf16 %v2463_v58, %v2462_v54  ;;  %v5193_v2 = vpop.f32.mrb[73].mxu0  ;;  %v1802_v4 = vadd.f32 %v6540_v37, %v1801_v60  ;;  %v5417_v5 = vpop.f32.mrb[73].mxu1  ;;  %v5757_v54 = vld [vmem:[%s6140_s21 + $0x338] sm:$0xff]  }
 0x1f2   : > { %v1356_v7 = vpop.f32.mrb[74].mxu0  ;;  %v1804_v8 = vpop.f32.mrb[74].mxu1 }
 0x1f3   : > { %4891 = vst [vmem:[%s6350_s18 + $0x88] sm:$0xff] %v4413_v61   ;;  %v2131_v9 = vmul.f32 0.2, %v1354_v62  ;;  %4947 = vst [vmem:[%s6350_s18 + $0x248] sm:$0xff] %v4693_v1   ;;  %v1357_v10 = vadd.f32 %v6540_v37, %v1356_v7  ;;  %v5194_v11 = vpop.f32.mrb[75].mxu0  ;;  %v1805_v13 = vadd.f32 %v6540_v37, %v1804_v8  ;;  %v5418_v14 = vpop.f32.mrb[75].mxu1 }
 0x1f4   : > { %v2243_v12 = vmul.f32 0.2, %v1802_v4 }
 0x1f5   : > { %v2132_v15 = vmul.f32 0.2, %v1357_v10  ;;  %5300 = vmatmul.mubr.bf16.gmra.mrb[180].mxu0 %v5752_v3  ;;  %v2244_v17 = vmul.f32 0.2, %v1805_v13  ;;  %5524 = vmatmul.mubr.bf16.gmra.mrb[180].mxu1 %v5753_v6  ;;  %v2352_v18 = vmax.f32 %v1354_v62, %v2131_v9 }
 0x1f6   : > { %v2464_v16 = vmax.f32 %v1802_v4, %v2243_v12  ;;  %5303 = vmatprep.mubr.msk.bf16.mxu0 %vm5939_vm0, %v5938_v0  ;;  %5527 = vmatprep.mubr.msk.bf16.mxu1 %vm5939_vm0, %v5938_v0 }
 0x1f7   : > { %v2353_v19 = vmax.f32 %v1357_v10, %v2132_v15  ;;  %v2465_v20 = vmax.f32 %v1805_v13, %v2244_v17  ;;  %v5758_v13 = vld [vmem:[%s6140_s21 + $0x180] sm:$0xff]  }
 0x1f8   : > { %v1361_v21 = vpop.f32.mrb[76].mxu0  ;;  %v1809_v22 = vpop.f32.mrb[76].mxu1 }
 0x1f9   : > { %v4418_v23 = vpack.c.bf16 %v2353_v19, %v2352_v18  ;;  %v1362_v24 = vadd.f32 %v6540_v37, %v1361_v21  ;;  %v4698_v25 = vpack.c.bf16 %v2465_v20, %v2464_v16  ;;  %v5197_v26 = vpop.f32.mrb[77].mxu0  ;;  %v1810_v28 = vadd.f32 %v6540_v37, %v1809_v22  ;;  %v5421_v29 = vpop.f32.mrb[77].mxu1  ;;  %v5759_v16 = vld [vmem:[%s6140_s21 + $0x340] sm:$0xff]  }
 0x1fa   : > { %v1364_v31 = vpop.f32.mrb[78].mxu0  ;;  %v1812_v32 = vpop.f32.mrb[78].mxu1 }
 0x1fb   : > { %4892 = vst [vmem:[%s6350_s18 + $0x90] sm:$0xff] %v4418_v23   ;;  %v2133_v33 = vmul.f32 0.2, %v1362_v24  ;;  %4948 = vst [vmem:[%s6350_s18 + $0x250] sm:$0xff] %v4698_v25   ;;  %v1365_v34 = vadd.f32 %v6540_v37, %v1364_v31  ;;  %v5198_v63 = vpop.f32.mrb[79].mxu0  ;;  %v1813_v36 = vadd.f32 %v6540_v37, %v1812_v32  ;;  %v5422_v38 = vpop.f32.mrb[79].mxu1 }
 0x1fc   : > { %v2245_v35 = vmul.f32 0.2, %v1810_v28 }
 0x1fd   : > { %v2134_v39 = vmul.f32 0.2, %v1365_v34  ;;  %5304 = vmatmul.mubr.bf16.gmra.mrb[184].mxu0 %v5754_v27  ;;  %v2246_v41 = vmul.f32 0.2, %v1813_v36  ;;  %5528 = vmatmul.mubr.bf16.gmra.mrb[184].mxu1 %v5755_v30  ;;  %v2354_v42 = vmax.f32 %v1362_v24, %v2133_v33 }
 0x1fe   : > { %v2466_v40 = vmax.f32 %v1810_v28, %v2245_v35  ;;  %5307 = vmatprep.mubr.msk.bf16.mxu0 %vm5939_vm0, %v5938_v0  ;;  %5531 = vmatprep.mubr.msk.bf16.mxu1 %vm5939_vm0, %v5938_v0 }
 0x1ff   : > { %v2355_v43 = vmax.f32 %v1365_v34, %v2134_v39  ;;  %v2467_v44 = vmax.f32 %v1813_v36, %v2246_v41  ;;  %v5760_v36 = vld [vmem:[%s6140_s21 + $0x188] sm:$0xff]  }
 0x200   : > { %v1369_v45 = vpop.f32.mrb[80].mxu0  ;;  %v1817_v46 = vpop.f32.mrb[80].mxu1 }
 0x201   : > { %v4423_v47 = vpack.c.bf16 %v2355_v43, %v2354_v42  ;;  %v1370_v48 = vadd.f32 %v6540_v37, %v1369_v45  ;;  %v4703_v49 = vpack.c.bf16 %v2467_v44, %v2466_v40  ;;  %v5201_v50 = vpop.f32.mrb[81].mxu0  ;;  %v1818_v52 = vadd.f32 %v6540_v37, %v1817_v46  ;;  %v5425_v53 = vpop.f32.mrb[81].mxu1  ;;  %v5761_v40 = vld [vmem:[%s6140_s21 + $0x348] sm:$0xff]  }
 0x202   : > { %v1372_v55 = vpop.f32.mrb[82].mxu0  ;;  %v1820_v56 = vpop.f32.mrb[82].mxu1 }
 0x203   : > { %4893 = vst [vmem:[%s6350_s18 + $0x98] sm:$0xff] %v4423_v47   ;;  %v2135_v57 = vmul.f32 0.2, %v1370_v48  ;;  %4949 = vst [vmem:[%s6350_s18 + $0x258] sm:$0xff] %v4703_v49   ;;  %v1373_v58 = vadd.f32 %v6540_v37, %v1372_v55  ;;  %v5202_v59 = vpop.f32.mrb[83].mxu0  ;;  %v1821_v61 = vadd.f32 %v6540_v37, %v1820_v56  ;;  %v5426_v62 = vpop.f32.mrb[83].mxu1 }
 0x204   : > { %v2247_v60 = vmul.f32 0.2, %v1818_v52 }
 0x205   : > { %v2136_v1 = vmul.f32 0.2, %v1373_v58  ;;  %5308 = vmatmul.mubr.bf16.gmra.mrb[188].mxu0 %v5756_v51  ;;  %v2248_v3 = vmul.f32 0.2, %v1821_v61  ;;  %5532 = vmatmul.mubr.bf16.gmra.mrb[188].mxu1 %v5757_v54  ;;  %v2356_v4 = vmax.f32 %v1370_v48, %v2135_v57 }
 0x206   : > { %v2468_v2 = vmax.f32 %v1818_v52, %v2247_v60  ;;  %5311 = vmatprep.mubr.msk.bf16.mxu0 %vm5939_vm0, %v5938_v0  ;;  %5535 = vmatprep.mubr.msk.bf16.mxu1 %vm5939_vm0, %v5938_v0 }
 0x207   : > { %v2357_v5 = vmax.f32 %v1373_v58, %v2136_v1  ;;  %v2469_v6 = vmax.f32 %v1821_v61, %v2248_v3  ;;  %v5762_v61 = vld [vmem:[%s6140_s21 + $0x190] sm:$0xff]  }
 0x208   : > { %v1377_v7 = vpop.f32.mrb[84].mxu0  ;;  %v1825_v8 = vpop.f32.mrb[84].mxu1 }
 0x209   : > { %v4428_v9 = vpack.c.bf16 %v2357_v5, %v2356_v4  ;;  %v1378_v10 = vadd.f32 %v6540_v37, %v1377_v7  ;;  %v4708_v11 = vpack.c.bf16 %v2469_v6, %v2468_v2  ;;  %v5205_v12 = vpop.f32.mrb[85].mxu0  ;;  %v1826_v14 = vadd.f32 %v6540_v37, %v1825_v8  ;;  %v5429_v15 = vpop.f32.mrb[85].mxu1  ;;  %v5763_v2 = vld [vmem:[%s6140_s21 + $0x350] sm:$0xff]  }
 0x20a   : > { %v1380_v17 = vpop.f32.mrb[86].mxu0  ;;  %v1828_v18 = vpop.f32.mrb[86].mxu1 }
 0x20b   : > { %4894 = vst [vmem:[%s6350_s18 + $0xa0] sm:$0xff] %v4428_v9   ;;  %v2137_v19 = vmul.f32 0.2, %v1378_v10  ;;  %4950 = vst [vmem:[%s6350_s18 + $0x260] sm:$0xff] %v4708_v11   ;;  %v1381_v20 = vadd.f32 %v6540_v37, %v1380_v17  ;;  %v5206_v21 = vpop.f32.mrb[87].mxu0  ;;  %v1829_v23 = vadd.f32 %v6540_v37, %v1828_v18  ;;  %v5430_v24 = vpop.f32.mrb[87].mxu1 }
 0x20c   : > { %v2249_v22 = vmul.f32 0.2, %v1826_v14 }
 0x20d   : > { %v2138_v25 = vmul.f32 0.2, %v1381_v20  ;;  %5312 = vmatmul.mubr.bf16.gmra.mrb[192].mxu0 %v5758_v13  ;;  %v2250_v27 = vmul.f32 0.2, %v1829_v23  ;;  %5536 = vmatmul.mubr.bf16.gmra.mrb[192].mxu1 %v5759_v16  ;;  %v2358_v28 = vmax.f32 %v1378_v10, %v2137_v19 }
 0x20e   : > { %v2470_v26 = vmax.f32 %v1826_v14, %v2249_v22  ;;  %5315 = vmatprep.mubr.msk.bf16.mxu0 %vm5939_vm0, %v5938_v0  ;;  %5539 = vmatprep.mubr.msk.bf16.mxu1 %vm5939_vm0, %v5938_v0 }
 0x20f   : > { %v2359_v29 = vmax.f32 %v1381_v20, %v2138_v25  ;;  %v2471_v30 = vmax.f32 %v1829_v23, %v2250_v27  ;;  %v5764_v23 = vld [vmem:[%s6140_s21 + $0x198] sm:$0xff]  }
 0x210   : > { %v1385_v31 = vpop.f32.mrb[88].mxu0  ;;  %v1833_v32 = vpop.f32.mrb[88].mxu1 }
 0x211   : > { %v4433_v33 = vpack.c.bf16 %v2359_v29, %v2358_v28  ;;  %v1386_v34 = vadd.f32 %v6540_v37, %v1385_v31  ;;  %v4713_v63 = vpack.c.bf16 %v2471_v30, %v2470_v26  ;;  %v5209_v35 = vpop.f32.mrb[89].mxu0  ;;  %v1834_v38 = vadd.f32 %v6540_v37, %v1833_v32  ;;  %v5433_v39 = vpop.f32.mrb[89].mxu1  ;;  %v5765_v26 = vld [vmem:[%s6140_s21 + $0x358] sm:$0xff]  }
 0x212   : > { %v1388_v41 = vpop.f32.mrb[90].mxu0  ;;  %v1836_v42 = vpop.f32.mrb[90].mxu1 }
 0x213   : > { %4895 = vst [vmem:[%s6350_s18 + $0xa8] sm:$0xff] %v4433_v33   ;;  %v2139_v43 = vmul.f32 0.2, %v1386_v34  ;;  %4951 = vst [vmem:[%s6350_s18 + $0x268] sm:$0xff] %v4713_v63   ;;  %v1389_v44 = vadd.f32 %v6540_v37, %v1388_v41  ;;  %v5210_v45 = vpop.f32.mrb[91].mxu0  ;;  %v1837_v47 = vadd.f32 %v6540_v37, %v1836_v42  ;;  %v5434_v48 = vpop.f32.mrb[91].mxu1 }
 0x214   : > { %v2251_v46 = vmul.f32 0.2, %v1834_v38 }
 0x215   : > { %v2140_v49 = vmul.f32 0.2, %v1389_v44  ;;  %5316 = vmatmul.mubr.bf16.gmra.mrb[196].mxu0 %v5760_v36  ;;  %v2252_v51 = vmul.f32 0.2, %v1837_v47  ;;  %5540 = vmatmul.mubr.bf16.gmra.mrb[196].mxu1 %v5761_v40  ;;  %v2360_v52 = vmax.f32 %v1386_v34, %v2139_v43 }
 0x216   : > { %v2472_v50 = vmax.f32 %v1834_v38, %v2251_v46  ;;  %5319 = vmatprep.mubr.msk.bf16.mxu0 %vm5939_vm0, %v5938_v0  ;;  %5543 = vmatprep.mubr.msk.bf16.mxu1 %vm5939_vm0, %v5938_v0 }
 0x217   : > { %v2361_v53 = vmax.f32 %v1389_v44, %v2140_v49  ;;  %v2473_v54 = vmax.f32 %v1837_v47, %v2252_v51  ;;  %v5766_v47 = vld [vmem:[%s6140_s21 + $0x1a0] sm:$0xff]  }
 0x218   : > { %v1393_v55 = vpop.f32.mrb[92].mxu0  ;;  %v1841_v56 = vpop.f32.mrb[92].mxu1 }
 0x219   : > { %v4438_v57 = vpack.c.bf16 %v2361_v53, %v2360_v52  ;;  %v1394_v58 = vadd.f32 %v6540_v37, %v1393_v55  ;;  %v4718_v59 = vpack.c.bf16 %v2473_v54, %v2472_v50  ;;  %v5213_v60 = vpop.f32.mrb[93].mxu0  ;;  %v1842_v62 = vadd.f32 %v6540_v37, %v1841_v56  ;;  %v5437_v1 = vpop.f32.mrb[93].mxu1  ;;  %v5767_v50 = vld [vmem:[%s6140_s21 + $0x360] sm:$0xff]  }
 0x21a   : > { %v1396_v3 = vpop.f32.mrb[94].mxu0  ;;  %v1844_v4 = vpop.f32.mrb[94].mxu1 }
 0x21b   : > { %4896 = vst [vmem:[%s6350_s18 + $0xb0] sm:$0xff] %v4438_v57   ;;  %v2141_v5 = vmul.f32 0.2, %v1394_v58  ;;  %4952 = vst [vmem:[%s6350_s18 + $0x270] sm:$0xff] %v4718_v59   ;;  %v1397_v6 = vadd.f32 %v6540_v37, %v1396_v3  ;;  %v5214_v7 = vpop.f32.mrb[95].mxu0  ;;  %v1845_v9 = vadd.f32 %v6540_v37, %v1844_v4  ;;  %v5438_v10 = vpop.f32.mrb[95].mxu1 }
 0x21c   : > { %v2253_v8 = vmul.f32 0.2, %v1842_v62 }
 0x21d   : > { %v2142_v11 = vmul.f32 0.2, %v1397_v6  ;;  %5320 = vmatmul.mubr.bf16.gmra.mrb[200].mxu0 %v5762_v61  ;;  %v2254_v13 = vmul.f32 0.2, %v1845_v9  ;;  %5544 = vmatmul.mubr.bf16.gmra.mrb[200].mxu1 %v5763_v2  ;;  %v2362_v14 = vmax.f32 %v1394_v58, %v2141_v5 }
 0x21e   : > { %v2474_v12 = vmax.f32 %v1842_v62, %v2253_v8  ;;  %5323 = vmatprep.mubr.msk.bf16.mxu0 %vm5939_vm0, %v5938_v0  ;;  %5547 = vmatprep.mubr.msk.bf16.mxu1 %vm5939_vm0, %v5938_v0 }
 0x21f   : > { %v2363_v15 = vmax.f32 %v1397_v6, %v2142_v11  ;;  %v2475_v16 = vmax.f32 %v1845_v9, %v2254_v13  ;;  %v5768_v9 = vld [vmem:[%s6140_s21 + $0x1a8] sm:$0xff]  }
 0x220   : > { %v1401_v17 = vpop.f32.mrb[96].mxu0  ;;  %v1849_v18 = vpop.f32.mrb[96].mxu1 }
 0x221   : > { %v4443_v19 = vpack.c.bf16 %v2363_v15, %v2362_v14  ;;  %v1402_v20 = vadd.f32 %v6540_v37, %v1401_v17  ;;  %v4723_v21 = vpack.c.bf16 %v2475_v16, %v2474_v12  ;;  %v5217_v22 = vpop.f32.mrb[97].mxu0  ;;  %v1850_v24 = vadd.f32 %v6540_v37, %v1849_v18  ;;  %v5441_v25 = vpop.f32.mrb[97].mxu1  ;;  %v5769_v12 = vld [vmem:[%s6140_s21 + $0x368] sm:$0xff]  }
 0x222   : > { %v1404_v27 = vpop.f32.mrb[98].mxu0  ;;  %v1852_v28 = vpop.f32.mrb[98].mxu1 }
 0x223   : > { %4897 = vst [vmem:[%s6350_s18 + $0xb8] sm:$0xff] %v4443_v19   ;;  %v2143_v29 = vmul.f32 0.2, %v1402_v20  ;;  %4953 = vst [vmem:[%s6350_s18 + $0x278] sm:$0xff] %v4723_v21   ;;  %v1405_v30 = vadd.f32 %v6540_v37, %v1404_v27  ;;  %v5218_v31 = vpop.f32.mrb[99].mxu0  ;;  %v1853_v33 = vadd.f32 %v6540_v37, %v1852_v28  ;;  %v5442_v34 = vpop.f32.mrb[99].mxu1 }
 0x224   : > { %v2255_v32 = vmul.f32 0.2, %v1850_v24 }
 0x225   : > { %v2144_v63 = vmul.f32 0.2, %v1405_v30  ;;  %5324 = vmatmul.mubr.bf16.gmra.mrb[204].mxu0 %v5764_v23  ;;  %v2256_v36 = vmul.f32 0.2, %v1853_v33  ;;  %5548 = vmatmul.mubr.bf16.gmra.mrb[204].mxu1 %v5765_v26  ;;  %v2364_v38 = vmax.f32 %v1402_v20, %v2143_v29 }
 0x226   : > { %v2476_v35 = vmax.f32 %v1850_v24, %v2255_v32  ;;  %5327 = vmatprep.mubr.msk.bf16.mxu0 %vm5939_vm0, %v5938_v0  ;;  %5551 = vmatprep.mubr.msk.bf16.mxu1 %vm5939_vm0, %v5938_v0 }
 0x227   : > { %v2365_v39 = vmax.f32 %v1405_v30, %v2144_v63  ;;  %v2477_v40 = vmax.f32 %v1853_v33, %v2256_v36  ;;  %v5770_v33 = vld [vmem:[%s6140_s21 + $0x1b0] sm:$0xff]  }
 0x228   : > { %v1409_v41 = vpop.f32.mrb[100].mxu0  ;;  %v1857_v42 = vpop.f32.mrb[100].mxu1 }
 0x229   : > { %v4448_v43 = vpack.c.bf16 %v2365_v39, %v2364_v38  ;;  %v1410_v44 = vadd.f32 %v6540_v37, %v1409_v41  ;;  %v4728_v45 = vpack.c.bf16 %v2477_v40, %v2476_v35  ;;  %v5221_v46 = vpop.f32.mrb[101].mxu0  ;;  %v1858_v48 = vadd.f32 %v6540_v37, %v1857_v42  ;;  %v5445_v49 = vpop.f32.mrb[101].mxu1  ;;  %v5771_v35 = vld [vmem:[%s6140_s21 + $0x370] ss:$0 sps:$4 sm:$0xff]  }
 0x22a   : > { %v1412_v51 = vpop.f32.mrb[102].mxu0  ;;  %v1860_v52 = vpop.f32.mrb[102].mxu1 }
 0x22b   : > { %4898 = vst [vmem:[%s6350_s18 + $0xc0] sm:$0xff] %v4448_v43   ;;  %v2145_v53 = vmul.f32 0.2, %v1410_v44  ;;  %4954 = vst [vmem:[%s6350_s18 + $0x280] sm:$0xff] %v4728_v45   ;;  %v1413_v54 = vadd.f32 %v6540_v37, %v1412_v51  ;;  %v5222_v55 = vpop.f32.mrb[103].mxu0  ;;  %v1861_v57 = vadd.f32 %v6540_v37, %v1860_v52  ;;  %v5446_v58 = vpop.f32.mrb[103].mxu1 }
 0x22c   : > { %v2257_v56 = vmul.f32 0.2, %v1858_v48 }
 0x22d   : > { %v2146_v59 = vmul.f32 0.2, %v1413_v54  ;;  %5328 = vmatmul.mubr.bf16.gmra.mrb[208].mxu0 %v5766_v47  ;;  %v2258_v61 = vmul.f32 0.2, %v1861_v57  ;;  %5552 = vmatmul.mubr.bf16.gmra.mrb[208].mxu1 %v5767_v50  ;;  %v2366_v62 = vmax.f32 %v1410_v44, %v2145_v53 }
 0x22e   : > { %v2478_v60 = vmax.f32 %v1858_v48, %v2257_v56  ;;  %5331 = vmatprep.mubr.msk.bf16.mxu0 %vm5939_vm0, %v5938_v0  ;;  %5555 = vmatprep.mubr.msk.bf16.mxu1 %vm5939_vm0, %v5938_v0 }
 0x22f   : > { %v2367_v1 = vmax.f32 %v1413_v54, %v2146_v59  ;;  %v2479_v2 = vmax.f32 %v1861_v57, %v2258_v61  ;;  %v5772_v57 = vld [vmem:[%s6140_s21 + $0x1b8] sm:$0xff]  }
 0x230   : > { %v1417_v3 = vpop.f32.mrb[104].mxu0  ;;  %v1865_v4 = vpop.f32.mrb[104].mxu1 }
 0x231   : > { %v4453_v5 = vpack.c.bf16 %v2367_v1, %v2366_v62  ;;  %v1418_v6 = vadd.f32 %v6540_v37, %v1417_v3  ;;  %v4733_v7 = vpack.c.bf16 %v2479_v2, %v2478_v60  ;;  %v5225_v8 = vpop.f32.mrb[105].mxu0  ;;  %v1866_v10 = vadd.f32 %v6540_v37, %v1865_v4  ;;  %v5449_v11 = vpop.f32.mrb[105].mxu1 }
 0x232   : > { %v1420_v13 = vpop.f32.mrb[106].mxu0  ;;  %v1868_v14 = vpop.f32.mrb[106].mxu1 }
 0x233   : > { %4899 = vst [vmem:[%s6350_s18 + $0xc8] sm:$0xff] %v4453_v5   ;;  %v2147_v15 = vmul.f32 0.2, %v1418_v6  ;;  %4955 = vst [vmem:[%s6350_s18 + $0x288] sm:$0xff] %v4733_v7   ;;  %v1421_v16 = vadd.f32 %v6540_v37, %v1420_v13  ;;  %v5226_v17 = vpop.f32.mrb[107].mxu0  ;;  %v1869_v19 = vadd.f32 %v6540_v37, %v1868_v14  ;;  %v5450_v20 = vpop.f32.mrb[107].mxu1 }
 0x234   : > { %v2259_v18 = vmul.f32 0.2, %v1866_v10 }
 0x235   : > { %v2148_v21 = vmul.f32 0.2, %v1421_v16  ;;  %5332 = vmatmul.mubr.bf16.gmra.mrb[212].mxu0 %v5768_v9  ;;  %v2260_v23 = vmul.f32 0.2, %v1869_v19  ;;  %5556 = vmatmul.mubr.bf16.gmra.mrb[212].mxu1 %v5769_v12  ;;  %v2368_v24 = vmax.f32 %v1418_v6, %v2147_v15 }
 0x236   : > { %v2480_v22 = vmax.f32 %v1866_v10, %v2259_v18  ;;  %5335 = vmatprep.mubr.msk.bf16.mxu0 %vm5939_vm0, %v5938_v0  ;;  %5559 = vmatprep.mubr.msk.bf16.mxu1 %vm5939_vm0, %v5938_v0 }
 0x237   : > { %v2369_v25 = vmax.f32 %v1421_v16, %v2148_v21  ;;  %v2481_v26 = vmax.f32 %v1869_v19, %v2260_v23 }
 0x238   : > { %v1425_v27 = vpop.f32.mrb[108].mxu0  ;;  %v1873_v28 = vpop.f32.mrb[108].mxu1 }
 0x239   : > { %v4458_v29 = vpack.c.bf16 %v2369_v25, %v2368_v24  ;;  %v1426_v30 = vadd.f32 %v6540_v37, %v1425_v27  ;;  %v4738_v31 = vpack.c.bf16 %v2481_v26, %v2480_v22  ;;  %v5229_v32 = vpop.f32.mrb[109].mxu0  ;;  %v1874_v34 = vadd.f32 %v6540_v37, %v1873_v28  ;;  %v5453_v63 = vpop.f32.mrb[109].mxu1 }
 0x23a   : > { %v1428_v36 = vpop.f32.mrb[110].mxu0  ;;  %v1876_v38 = vpop.f32.mrb[110].mxu1 }
 0x23b   : > { %4900 = vst [vmem:[%s6350_s18 + $0xd0] sm:$0xff] %v4458_v29   ;;  %v2149_v39 = vmul.f32 0.2, %v1426_v30  ;;  %4956 = vst [vmem:[%s6350_s18 + $0x290] sm:$0xff] %v4738_v31   ;;  %v1429_v40 = vadd.f32 %v6540_v37, %v1428_v36  ;;  %v5230_v41 = vpop.f32.mrb[111].mxu0  ;;  %v1877_v43 = vadd.f32 %v6540_v37, %v1876_v38  ;;  %v5454_v44 = vpop.f32.mrb[111].mxu1 }
 0x23c   : > { %v2261_v42 = vmul.f32 0.2, %v1874_v34 }
 0x23d   : > { %v2150_v45 = vmul.f32 0.2, %v1429_v40  ;;  %5336 = vmatmul.mubr.bf16.gmra.mrb[216].mxu0 %v5770_v33  ;;  %v2262_v47 = vmul.f32 0.2, %v1877_v43  ;;  %5560 = vmatmul.mubr.bf16.gmra.mrb[216].mxu1 %v5771_v35  ;;  %v2370_v48 = vmax.f32 %v1426_v30, %v2149_v39 }
 0x23e   : > { %v2482_v46 = vmax.f32 %v1874_v34, %v2261_v42  ;;  %5339 = vmatprep.mubr.msk.bf16.mxu0 %vm5939_vm0, %v5938_v0 }
 0x23f   : > { %v2371_v49 = vmax.f32 %v1429_v40, %v2150_v45  ;;  %v2483_v50 = vmax.f32 %v1877_v43, %v2262_v47 }
 0x240   : > { %v1433_v51 = vpop.f32.mrb[112].mxu0  ;;  %v1881_v52 = vpop.f32.mrb[112].mxu1 }
 0x241   : > { %v4463_v53 = vpack.c.bf16 %v2371_v49, %v2370_v48  ;;  %v1434_v54 = vadd.f32 %v6540_v37, %v1433_v51  ;;  %v4743_v55 = vpack.c.bf16 %v2483_v50, %v2482_v46  ;;  %v5233_v56 = vpop.f32.mrb[113].mxu0  ;;  %v1882_v58 = vadd.f32 %v6540_v37, %v1881_v52  ;;  %v5457_v59 = vpop.f32.mrb[113].mxu1 }
 0x242   : > { %v1436_v60 = vpop.f32.mrb[114].mxu0  ;;  %v1884_v61 = vpop.f32.mrb[114].mxu1 }
 0x243   : > { %4901 = vst [vmem:[%s6350_s18 + $0xd8] sm:$0xff] %v4463_v53   ;;  %v2151_v62 = vmul.f32 0.2, %v1434_v54  ;;  %4957 = vst [vmem:[%s6350_s18 + $0x298] sm:$0xff] %v4743_v55   ;;  %v1437_v0 = vadd.f32 %v6540_v37, %v1436_v60  ;;  %v5234_v1 = vpop.f32.mrb[115].mxu0  ;;  %v1885_v3 = vadd.f32 %v6540_v37, %v1884_v61  ;;  %v5458_v4 = vpop.f32.mrb[115].mxu1 }
 0x244   : > { %v2263_v2 = vmul.f32 0.2, %v1882_v58 }
 0x245   : > { %v2152_v5 = vmul.f32 0.2, %v1437_v0  ;;  %5340 = vmatmul.mubr.bf16.gmra.mrb[220].mxu0 %v5772_v57  ;;  %v2264_v7 = vmul.f32 0.2, %v1885_v3  ;;  %v2372_v8 = vmax.f32 %v1434_v54, %v2151_v62 }
 0x246   : > { %v2484_v6 = vmax.f32 %v1882_v58, %v2263_v2 }
 0x247   : > { %v2373_v9 = vmax.f32 %v1437_v0, %v2152_v5  ;;  %v2485_v10 = vmax.f32 %v1885_v3, %v2264_v7 }
 0x248   : > { %v1441_v11 = vpop.f32.mrb[116].mxu0  ;;  %v1889_v12 = vpop.f32.mrb[116].mxu1 }
 0x249   : > { %v4468_v13 = vpack.c.bf16 %v2373_v9, %v2372_v8  ;;  %v1442_v14 = vadd.f32 %v6540_v37, %v1441_v11  ;;  %v4748_v15 = vpack.c.bf16 %v2485_v10, %v2484_v6  ;;  %v5237_v16 = vpop.f32.mrb[117].mxu0  ;;  %v1890_v17 = vadd.f32 %v6540_v37, %v1889_v12  ;;  %v5461_v18 = vpop.f32.mrb[117].mxu1 }
 0x24a   : > { %v1444_v19 = vpop.f32.mrb[118].mxu0  ;;  %v1892_v20 = vpop.f32.mrb[118].mxu1 }
 0x24b   : > { %4902 = vst [vmem:[%s6350_s18 + $0xe0] sm:$0xff] %v4468_v13   ;;  %v2153_v21 = vmul.f32 0.2, %v1442_v14  ;;  %4958 = vst [vmem:[%s6350_s18 + $0x2a0] sm:$0xff] %v4748_v15   ;;  %v1445_v22 = vadd.f32 %v6540_v37, %v1444_v19  ;;  %v5238_v23 = vpop.f32.mrb[119].mxu0  ;;  %v1893_v25 = vadd.f32 %v6540_v37, %v1892_v20  ;;  %v5462_v26 = vpop.f32.mrb[119].mxu1 }
 0x24c   : > { %v2265_v24 = vmul.f32 0.2, %v1890_v17 }
 0x24d   : > { %v2154_v27 = vmul.f32 0.2, %v1445_v22  ;;  %v2266_v29 = vmul.f32 0.2, %v1893_v25  ;;  %v2374_v30 = vmax.f32 %v1442_v14, %v2153_v21 }
 0x24e   : > { %v2486_v28 = vmax.f32 %v1890_v17, %v2265_v24 }
 0x24f   : > { %v2375_v31 = vmax.f32 %v1445_v22, %v2154_v27  ;;  %v2487_v32 = vmax.f32 %v1893_v25, %v2266_v29 }
 0x250   : > { %v1449_v33 = vpop.f32.mrb[120].mxu0  ;;  %v1897_v34 = vpop.f32.mrb[120].mxu1 }
 0x251   : > { %v4473_v63 = vpack.c.bf16 %v2375_v31, %v2374_v30  ;;  %v1450_v35 = vadd.f32 %v6540_v37, %v1449_v33  ;;  %v4753_v36 = vpack.c.bf16 %v2487_v32, %v2486_v28  ;;  %v5241_v38 = vpop.f32.mrb[121].mxu0  ;;  %v1898_v39 = vadd.f32 %v6540_v37, %v1897_v34  ;;  %v5465_v40 = vpop.f32.mrb[121].mxu1 }
 0x252   : > { %v1452_v41 = vpop.f32.mrb[122].mxu0  ;;  %v1900_v42 = vpop.f32.mrb[122].mxu1 }
 0x253   : > { %4903 = vst [vmem:[%s6350_s18 + $0xe8] sm:$0xff] %v4473_v63   ;;  %v2155_v43 = vmul.f32 0.2, %v1450_v35  ;;  %4959 = vst [vmem:[%s6350_s18 + $0x2a8] sm:$0xff] %v4753_v36   ;;  %v1453_v44 = vadd.f32 %v6540_v37, %v1452_v41  ;;  %v5242_v45 = vpop.f32.mrb[123].mxu0  ;;  %v1901_v47 = vadd.f32 %v6540_v37, %v1900_v42  ;;  %v5466_v48 = vpop.f32.mrb[123].mxu1 }
 0x254   : > { %v2267_v46 = vmul.f32 0.2, %v1898_v39 }
 0x255   : > { %v2156_v49 = vmul.f32 0.2, %v1453_v44  ;;  %v2268_v51 = vmul.f32 0.2, %v1901_v47  ;;  %v2376_v52 = vmax.f32 %v1450_v35, %v2155_v43 }
 0x256   : > { %v2488_v50 = vmax.f32 %v1898_v39, %v2267_v46 }
 0x257   : > { %v2377_v53 = vmax.f32 %v1453_v44, %v2156_v49  ;;  %v2489_v54 = vmax.f32 %v1901_v47, %v2268_v51 }
 0x258   : > { %v1457_v55 = vpop.f32.mrb[124].mxu0  ;;  %v1905_v56 = vpop.f32.mrb[124].mxu1 }
 0x259   : > { %v4478_v57 = vpack.c.bf16 %v2377_v53, %v2376_v52  ;;  %v1458_v58 = vadd.f32 %v6540_v37, %v1457_v55  ;;  %v4758_v59 = vpack.c.bf16 %v2489_v54, %v2488_v50  ;;  %v5245_v60 = vpop.f32.mrb[125].mxu0  ;;  %v1906_v61 = vadd.f32 %v6540_v37, %v1905_v56  ;;  %v5469_v62 = vpop.f32.mrb[125].mxu1 }
 0x25a   : > { %v1460_v0 = vpop.f32.mrb[126].mxu0  ;;  %v1908_v1 = vpop.f32.mrb[126].mxu1 }
 0x25b   : > { %4904 = vst [vmem:[%s6350_s18 + $0xf0] sm:$0xff] %v4478_v57   ;;  %v2157_v2 = vmul.f32 0.2, %v1458_v58  ;;  %4960 = vst [vmem:[%s6350_s18 + $0x2b0] sm:$0xff] %v4758_v59   ;;  %v1461_v3 = vadd.f32 %v6540_v37, %v1460_v0  ;;  %v5246_v4 = vpop.f32.mrb[127].mxu0  ;;  %v1909_v6 = vadd.f32 %v6540_v37, %v1908_v1  ;;  %v5470_v7 = vpop.f32.mrb[127].mxu1 }
 0x25c   : > { %v2269_v5 = vmul.f32 0.2, %v1906_v61 }
 0x25d   : > { %v2158_v8 = vmul.f32 0.2, %v1461_v3  ;;  %v2270_v10 = vmul.f32 0.2, %v1909_v6  ;;  %v2378_v11 = vmax.f32 %v1458_v58, %v2157_v2 }
 0x25e   : > { %v2490_v9 = vmax.f32 %v1906_v61, %v2269_v5 }
 0x25f   : > { %v2379_v12 = vmax.f32 %v1461_v3, %v2158_v8  ;;  %v2491_v13 = vmax.f32 %v1909_v6, %v2270_v10 }
 0x260   : > { %v1465_v14 = vpop.f32.mrb[128].mxu0  ;;  %v1913_v15 = vpop.f32.mrb[128].mxu1 }
 0x261   : > { %v4483_v16 = vpack.c.bf16 %v2379_v12, %v2378_v11  ;;  %v1466_v17 = vadd.f32 %v6540_v37, %v1465_v14  ;;  %v4763_v18 = vpack.c.bf16 %v2491_v13, %v2490_v9  ;;  %v5249_v19 = vpop.f32.mrb[129].mxu0  ;;  %v1914_v20 = vadd.f32 %v6540_v37, %v1913_v15  ;;  %v5473_v21 = vpop.f32.mrb[129].mxu1 }
 0x262   : > { %v1468_v22 = vpop.f32.mrb[130].mxu0  ;;  %v1916_v23 = vpop.f32.mrb[130].mxu1 }
 0x263   : > { %4905 = vst [vmem:[%s6350_s18 + $0xf8] sm:$0xff] %v4483_v16   ;;  %v2159_v24 = vmul.f32 0.2, %v1466_v17  ;;  %4961 = vst [vmem:[%s6350_s18 + $0x2b8] sm:$0xff] %v4763_v18   ;;  %v1469_v25 = vadd.f32 %v6540_v37, %v1468_v22  ;;  %v5250_v26 = vpop.f32.mrb[131].mxu0  ;;  %v1917_v28 = vadd.f32 %v6540_v37, %v1916_v23  ;;  %v5474_v29 = vpop.f32.mrb[131].mxu1 }
 0x264   : > { %v2271_v27 = vmul.f32 0.2, %v1914_v20 }
 0x265   : > { %v2160_v30 = vmul.f32 0.2, %v1469_v25  ;;  %v2272_v32 = vmul.f32 0.2, %v1917_v28  ;;  %v2380_v33 = vmax.f32 %v1466_v17, %v2159_v24 }
 0x266   : > { %v2492_v31 = vmax.f32 %v1914_v20, %v2271_v27 }
 0x267   : > { %v2381_v34 = vmax.f32 %v1469_v25, %v2160_v30  ;;  %v2493_v63 = vmax.f32 %v1917_v28, %v2272_v32 }
 0x268   : > { %v1473_v35 = vpop.f32.mrb[132].mxu0  ;;  %v1921_v36 = vpop.f32.mrb[132].mxu1 }
 0x269   : > { %v4488_v38 = vpack.c.bf16 %v2381_v34, %v2380_v33  ;;  %v1474_v39 = vadd.f32 %v6540_v37, %v1473_v35  ;;  %v4768_v40 = vpack.c.bf16 %v2493_v63, %v2492_v31  ;;  %v5253_v41 = vpop.f32.mrb[133].mxu0  ;;  %v1922_v42 = vadd.f32 %v6540_v37, %v1921_v36  ;;  %v5477_v43 = vpop.f32.mrb[133].mxu1  ;;  %v6720_v31 = vld [vmem:[#allocation7] ss:$0 sm:$0xff] }
 0x26a   : > { %v1476_v44 = vpop.f32.mrb[134].mxu0  ;;  %v1924_v45 = vpop.f32.mrb[134].mxu1 }
 0x26b   : > { %4906 = vst [vmem:[%s6350_s18 + $0x100] sm:$0xff] %v4488_v38   ;;  %v2161_v46 = vmul.f32 0.2, %v1474_v39  ;;  %4962 = vst [vmem:[%s6350_s18 + $0x2c0] sm:$0xff] %v4768_v40   ;;  %v1477_v47 = vadd.f32 %v6540_v37, %v1476_v44  ;;  %v5254_v48 = vpop.f32.mrb[135].mxu0  ;;  %v1925_v50 = vadd.f32 %v6540_v37, %v1924_v45  ;;  %v5478_v51 = vpop.f32.mrb[135].mxu1 }
 0x26c   : > { %v2273_v49 = vmul.f32 0.2, %v1922_v42 }
 0x26d   : > { %v2162_v52 = vmul.f32 0.2, %v1477_v47  ;;  %v2274_v54 = vmul.f32 0.2, %v1925_v50  ;;  %v2382_v55 = vmax.f32 %v1474_v39, %v2161_v46 }
 0x26e   : > { %v2494_v53 = vmax.f32 %v1922_v42, %v2273_v49 }
 0x26f   : > { %v2383_v56 = vmax.f32 %v1477_v47, %v2162_v52  ;;  %v2495_v57 = vmax.f32 %v1925_v50, %v2274_v54 }
 0x270   : > { %v1481_v58 = vpop.f32.mrb[136].mxu0  ;;  %v1929_v59 = vpop.f32.mrb[136].mxu1 }
 0x271   : > { %v4493_v60 = vpack.c.bf16 %v2383_v56, %v2382_v55  ;;  %v1482_v61 = vadd.f32 %v6540_v37, %v1481_v58  ;;  %v4773_v62 = vpack.c.bf16 %v2495_v57, %v2494_v53  ;;  %v5257_v0 = vpop.f32.mrb[137].mxu0  ;;  %v1930_v1 = vadd.f32 %v6540_v37, %v1929_v59  ;;  %v5481_v2 = vpop.f32.mrb[137].mxu1 }
 0x272   : > { %v1484_v3 = vpop.f32.mrb[138].mxu0  ;;  %v1932_v4 = vpop.f32.mrb[138].mxu1 }
 0x273   : > { %4907 = vst [vmem:[%s6350_s18 + $0x108] sm:$0xff] %v4493_v60   ;;  %v2163_v5 = vmul.f32 0.2, %v1482_v61  ;;  %4963 = vst [vmem:[%s6350_s18 + $0x2c8] sm:$0xff] %v4773_v62   ;;  %v1485_v6 = vadd.f32 %v6540_v37, %v1484_v3  ;;  %v5258_v7 = vpop.f32.mrb[139].mxu0  ;;  %v1933_v9 = vadd.f32 %v6540_v37, %v1932_v4  ;;  %v5482_v10 = vpop.f32.mrb[139].mxu1 }
 0x274   : > { %v2275_v8 = vmul.f32 0.2, %v1930_v1 }
 0x275   : > { %v2164_v11 = vmul.f32 0.2, %v1485_v6  ;;  %v2276_v13 = vmul.f32 0.2, %v1933_v9  ;;  %v2384_v14 = vmax.f32 %v1482_v61, %v2163_v5 }
 0x276   : > { %v2496_v12 = vmax.f32 %v1930_v1, %v2275_v8 }
 0x277   : > { %v2385_v15 = vmax.f32 %v1485_v6, %v2164_v11  ;;  %v2497_v16 = vmax.f32 %v1933_v9, %v2276_v13 }
 0x278   : > { %v1489_v17 = vpop.f32.mrb[140].mxu0  ;;  %v1937_v18 = vpop.f32.mrb[140].mxu1 }
 0x279   : > { %v4498_v19 = vpack.c.bf16 %v2385_v15, %v2384_v14  ;;  %v1490_v20 = vadd.f32 %v6540_v37, %v1489_v17  ;;  %v4778_v21 = vpack.c.bf16 %v2497_v16, %v2496_v12  ;;  %v5261_v22 = vpop.f32.mrb[141].mxu0  ;;  %v1938_v23 = vadd.f32 %v6540_v37, %v1937_v18  ;;  %v5485_v24 = vpop.f32.mrb[141].mxu1 }
 0x27a   : > { %v1492_v25 = vpop.f32.mrb[142].mxu0  ;;  %v1940_v26 = vpop.f32.mrb[142].mxu1 }
 0x27b   : > { %4908 = vst [vmem:[%s6350_s18 + $0x110] sm:$0xff] %v4498_v19   ;;  %v2165_v27 = vmul.f32 0.2, %v1490_v20  ;;  %4964 = vst [vmem:[%s6350_s18 + $0x2d0] sm:$0xff] %v4778_v21   ;;  %v1493_v28 = vadd.f32 %v6540_v37, %v1492_v25  ;;  %v5262_v29 = vpop.f32.mrb[143].mxu0  ;;  %v1941_v32 = vadd.f32 %v6720_v31, %v1940_v26  ;;  %v5486_v33 = vpop.f32.mrb[143].mxu1 }
 0x27c   : > { %v2277_v30 = vmul.f32 0.2, %v1938_v23 }
 0x27d   : > { %v2166_v34 = vmul.f32 0.2, %v1493_v28  ;;  %v2278_v35 = vmul.f32 0.2, %v1941_v32  ;;  %v2386_v36 = vmax.f32 %v1490_v20, %v2165_v27 }
 0x27e   : > { %v2498_v63 = vmax.f32 %v1938_v23, %v2277_v30 }
 0x27f   : > { %v2387_v38 = vmax.f32 %v1493_v28, %v2166_v34  ;;  %v2499_v39 = vmax.f32 %v1941_v32, %v2278_v35 }
 0x280   : > { %v1497_v40 = vpop.f32.mrb[144].mxu0  ;;  %v1945_v41 = vpop.f32.mrb[144].mxu1 }
 0x281   : > { %v4503_v42 = vpack.c.bf16 %v2387_v38, %v2386_v36  ;;  %v1498_v37 = vadd.f32 %v6720_v31, %v1497_v40  ;;  %v4783_v43 = vpack.c.bf16 %v2499_v39, %v2498_v63  ;;  %v5265_v44 = vpop.f32.mrb[145].mxu0  ;;  %v1946_v45 = vadd.f32 %v6720_v31, %v1945_v41  ;;  %v5489_v46 = vpop.f32.mrb[145].mxu1 }
 0x282   : > { %v1500_v47 = vpop.f32.mrb[146].mxu0  ;;  %v1948_v48 = vpop.f32.mrb[146].mxu1 }
 0x283   : > { %4909 = vst [vmem:[%s6350_s18 + $0x118] sm:$0xff] %v4503_v42   ;;  %v2167_v49 = vmul.f32 0.2, %v1498_v37  ;;  %4965 = vst [vmem:[%s6350_s18 + $0x2d8] sm:$0xff] %v4783_v43   ;;  %v1501_v50 = vadd.f32 %v6720_v31, %v1500_v47  ;;  %v5266_v51 = vpop.f32.mrb[147].mxu0  ;;  %v1949_v53 = vadd.f32 %v6720_v31, %v1948_v48  ;;  %v5490_v54 = vpop.f32.mrb[147].mxu1 }
 0x284   : > { %v2279_v52 = vmul.f32 0.2, %v1946_v45 }
 0x285   : > { %v2168_v55 = vmul.f32 0.2, %v1501_v50  ;;  %v2280_v57 = vmul.f32 0.2, %v1949_v53  ;;  %v2388_v58 = vmax.f32 %v1498_v37, %v2167_v49 }
 0x286   : > { %v2500_v56 = vmax.f32 %v1946_v45, %v2279_v52 }
 0x287   : > { %v2389_v59 = vmax.f32 %v1501_v50, %v2168_v55  ;;  %v2501_v60 = vmax.f32 %v1949_v53, %v2280_v57 }
 0x288   : > { %v1505_v61 = vpop.f32.mrb[148].mxu0  ;;  %v1953_v62 = vpop.f32.mrb[148].mxu1 }
 0x289   : > { %v4508_v0 = vpack.c.bf16 %v2389_v59, %v2388_v58  ;;  %v1506_v1 = vadd.f32 %v6720_v31, %v1505_v61  ;;  %v4788_v2 = vpack.c.bf16 %v2501_v60, %v2500_v56  ;;  %v5269_v3 = vpop.f32.mrb[149].mxu0  ;;  %v1954_v4 = vadd.f32 %v6720_v31, %v1953_v62  ;;  %v5493_v5 = vpop.f32.mrb[149].mxu1 }
 0x28a   : > { %v1508_v6 = vpop.f32.mrb[150].mxu0  ;;  %v1956_v7 = vpop.f32.mrb[150].mxu1 }
 0x28b   : > { %4910 = vst [vmem:[%s6350_s18 + $0x120] sm:$0xff] %v4508_v0   ;;  %v2169_v8 = vmul.f32 0.2, %v1506_v1  ;;  %4966 = vst [vmem:[%s6350_s18 + $0x2e0] sm:$0xff] %v4788_v2   ;;  %v1509_v9 = vadd.f32 %v6720_v31, %v1508_v6  ;;  %v5270_v10 = vpop.f32.mrb[151].mxu0  ;;  %v1957_v12 = vadd.f32 %v6720_v31, %v1956_v7  ;;  %v5494_v13 = vpop.f32.mrb[151].mxu1 }
 0x28c   : > { %v2281_v11 = vmul.f32 0.2, %v1954_v4 }
 0x28d   : > { %v2170_v14 = vmul.f32 0.2, %v1509_v9  ;;  %v2282_v16 = vmul.f32 0.2, %v1957_v12  ;;  %v2390_v17 = vmax.f32 %v1506_v1, %v2169_v8 }
 0x28e   : > { %v2502_v15 = vmax.f32 %v1954_v4, %v2281_v11 }
 0x28f   : > { %v2391_v18 = vmax.f32 %v1509_v9, %v2170_v14  ;;  %v2503_v19 = vmax.f32 %v1957_v12, %v2282_v16 }
 0x290   : > { %v1513_v20 = vpop.f32.mrb[152].mxu0  ;;  %v1961_v21 = vpop.f32.mrb[152].mxu1 }
 0x291   : > { %v4513_v22 = vpack.c.bf16 %v2391_v18, %v2390_v17  ;;  %v1514_v23 = vadd.f32 %v6720_v31, %v1513_v20  ;;  %v4793_v24 = vpack.c.bf16 %v2503_v19, %v2502_v15  ;;  %v5273_v25 = vpop.f32.mrb[153].mxu0  ;;  %v1962_v26 = vadd.f32 %v6720_v31, %v1961_v21  ;;  %v5497_v27 = vpop.f32.mrb[153].mxu1 }
 0x292   : > { %v1516_v28 = vpop.f32.mrb[154].mxu0  ;;  %v1964_v29 = vpop.f32.mrb[154].mxu1 }
 0x293   : > { %4911 = vst [vmem:[%s6350_s18 + $0x128] sm:$0xff] %v4513_v22   ;;  %v2171_v30 = vmul.f32 0.2, %v1514_v23  ;;  %4967 = vst [vmem:[%s6350_s18 + $0x2e8] sm:$0xff] %v4793_v24   ;;  %v1517_v32 = vadd.f32 %v6720_v31, %v1516_v28  ;;  %v5274_v33 = vpop.f32.mrb[155].mxu0  ;;  %v1965_v63 = vadd.f32 %v6720_v31, %v1964_v29  ;;  %v5498_v35 = vpop.f32.mrb[155].mxu1 }
 0x294   : > { %v2283_v34 = vmul.f32 0.2, %v1962_v26 }
 0x295   : > { %v2172_v36 = vmul.f32 0.2, %v1517_v32  ;;  %v2284_v39 = vmul.f32 0.2, %v1965_v63  ;;  %v2392_v40 = vmax.f32 %v1514_v23, %v2171_v30 }
 0x296   : > { %v2504_v38 = vmax.f32 %v1962_v26, %v2283_v34 }
 0x297   : > { %v2393_v41 = vmax.f32 %v1517_v32, %v2172_v36  ;;  %v2505_v42 = vmax.f32 %v1965_v63, %v2284_v39 }
 0x298   : > { %v1521_v37 = vpop.f32.mrb[156].mxu0  ;;  %v1969_v43 = vpop.f32.mrb[156].mxu1 }
 0x299   : > { %v4518_v44 = vpack.c.bf16 %v2393_v41, %v2392_v40  ;;  %v1522_v45 = vadd.f32 %v6720_v31, %v1521_v37  ;;  %v4798_v46 = vpack.c.bf16 %v2505_v42, %v2504_v38  ;;  %v5277_v47 = vpop.f32.mrb[157].mxu0  ;;  %v1970_v48 = vadd.f32 %v6720_v31, %v1969_v43  ;;  %v5501_v49 = vpop.f32.mrb[157].mxu1 }
 0x29a   : > { %v1524_v50 = vpop.f32.mrb[158].mxu0  ;;  %v1972_v51 = vpop.f32.mrb[158].mxu1 }
 0x29b   : > { %4912 = vst [vmem:[%s6350_s18 + $0x130] sm:$0xff] %v4518_v44   ;;  %v2173_v52 = vmul.f32 0.2, %v1522_v45  ;;  %4968 = vst [vmem:[%s6350_s18 + $0x2f0] sm:$0xff] %v4798_v46   ;;  %v1525_v53 = vadd.f32 %v6720_v31, %v1524_v50  ;;  %v5278_v54 = vpop.f32.mrb[159].mxu0  ;;  %v1973_v56 = vadd.f32 %v6720_v31, %v1972_v51  ;;  %v5502_v57 = vpop.f32.mrb[159].mxu1 }
 0x29c   : > { %v2285_v55 = vmul.f32 0.2, %v1970_v48 }
 0x29d   : > { %v2174_v58 = vmul.f32 0.2, %v1525_v53  ;;  %v2286_v60 = vmul.f32 0.2, %v1973_v56  ;;  %v2394_v61 = vmax.f32 %v1522_v45, %v2173_v52 }
 0x29e   : > { %v2506_v59 = vmax.f32 %v1970_v48, %v2285_v55 }
 0x29f   : > { %v2395_v62 = vmax.f32 %v1525_v53, %v2174_v58  ;;  %v2507_v0 = vmax.f32 %v1973_v56, %v2286_v60 }
 0x2a0   : > { %v1529_v1 = vpop.f32.mrb[160].mxu0  ;;  %v1977_v2 = vpop.f32.mrb[160].mxu1 }
 0x2a1   : > { %v4523_v3 = vpack.c.bf16 %v2395_v62, %v2394_v61  ;;  %v1530_v4 = vadd.f32 %v6720_v31, %v1529_v1  ;;  %v4803_v5 = vpack.c.bf16 %v2507_v0, %v2506_v59  ;;  %v5281_v6 = vpop.f32.mrb[161].mxu0  ;;  %v1978_v7 = vadd.f32 %v6720_v31, %v1977_v2  ;;  %v5505_v8 = vpop.f32.mrb[161].mxu1 }
 0x2a2   : > { %v1532_v9 = vpop.f32.mrb[162].mxu0  ;;  %v1980_v10 = vpop.f32.mrb[162].mxu1 }
 0x2a3   : > { %4913 = vst [vmem:[%s6350_s18 + $0x138] sm:$0xff] %v4523_v3   ;;  %v2175_v11 = vmul.f32 0.2, %v1530_v4  ;;  %4969 = vst [vmem:[%s6350_s18 + $0x2f8] sm:$0xff] %v4803_v5   ;;  %v1533_v12 = vadd.f32 %v6720_v31, %v1532_v9  ;;  %v5282_v13 = vpop.f32.mrb[163].mxu0  ;;  %v1981_v15 = vadd.f32 %v6720_v31, %v1980_v10  ;;  %v5506_v16 = vpop.f32.mrb[163].mxu1 }
 0x2a4   : > { %v2287_v14 = vmul.f32 0.2, %v1978_v7 }
 0x2a5   : > { %v2176_v17 = vmul.f32 0.2, %v1533_v12  ;;  %v2288_v19 = vmul.f32 0.2, %v1981_v15  ;;  %v2396_v20 = vmax.f32 %v1530_v4, %v2175_v11 }
 0x2a6   : > { %v2508_v18 = vmax.f32 %v1978_v7, %v2287_v14 }
 0x2a7   : > { %v2397_v21 = vmax.f32 %v1533_v12, %v2176_v17  ;;  %v2509_v22 = vmax.f32 %v1981_v15, %v2288_v19 }
 0x2a8   : > { %v1537_v23 = vpop.f32.mrb[164].mxu0  ;;  %v1985_v24 = vpop.f32.mrb[164].mxu1 }
 0x2a9   : > { %v4528_v25 = vpack.c.bf16 %v2397_v21, %v2396_v20  ;;  %v1538_v26 = vadd.f32 %v6720_v31, %v1537_v23  ;;  %v4808_v27 = vpack.c.bf16 %v2509_v22, %v2508_v18  ;;  %v5285_v28 = vpop.f32.mrb[165].mxu0  ;;  %v1986_v29 = vadd.f32 %v6720_v31, %v1985_v24  ;;  %v5509_v30 = vpop.f32.mrb[165].mxu1 }
 0x2aa   : > { %v1540_v32 = vpop.f32.mrb[166].mxu0  ;;  %v1988_v33 = vpop.f32.mrb[166].mxu1 }
 0x2ab   : > { %4914 = vst [vmem:[%s6350_s18 + $0x140] sm:$0xff] %v4528_v25   ;;  %v2177_v34 = vmul.f32 0.2, %v1538_v26  ;;  %4970 = vst [vmem:[%s6350_s18 + $0x300] sm:$0xff] %v4808_v27   ;;  %v1541_v63 = vadd.f32 %v6720_v31, %v1540_v32  ;;  %v5286_v35 = vpop.f32.mrb[167].mxu0  ;;  %v1989_v38 = vadd.f32 %v6720_v31, %v1988_v33  ;;  %v5510_v39 = vpop.f32.mrb[167].mxu1 }
 0x2ac   : > { %v2289_v36 = vmul.f32 0.2, %v1986_v29 }
 0x2ad   : > { %v2178_v40 = vmul.f32 0.2, %v1541_v63  ;;  %v2290_v42 = vmul.f32 0.2, %v1989_v38  ;;  %v2398_v37 = vmax.f32 %v1538_v26, %v2177_v34 }
 0x2ae   : > { %v2510_v41 = vmax.f32 %v1986_v29, %v2289_v36 }
 0x2af   : > { %v2399_v43 = vmax.f32 %v1541_v63, %v2178_v40  ;;  %v2511_v44 = vmax.f32 %v1989_v38, %v2290_v42 }
 0x2b0   : > { %v1545_v45 = vpop.f32.mrb[168].mxu0  ;;  %v1993_v46 = vpop.f32.mrb[168].mxu1 }
 0x2b1   : > { %v4533_v47 = vpack.c.bf16 %v2399_v43, %v2398_v37  ;;  %v1546_v48 = vadd.f32 %v6720_v31, %v1545_v45  ;;  %v4813_v49 = vpack.c.bf16 %v2511_v44, %v2510_v41  ;;  %v5289_v50 = vpop.f32.mrb[169].mxu0  ;;  %v1994_v51 = vadd.f32 %v6720_v31, %v1993_v46  ;;  %v5513_v52 = vpop.f32.mrb[169].mxu1 }
 0x2b2   : > { %v1548_v53 = vpop.f32.mrb[170].mxu0  ;;  %v1996_v54 = vpop.f32.mrb[170].mxu1 }
 0x2b3   : > { %4915 = vst [vmem:[%s6350_s18 + $0x148] sm:$0xff] %v4533_v47   ;;  %v2179_v55 = vmul.f32 0.2, %v1546_v48  ;;  %4971 = vst [vmem:[%s6350_s18 + $0x308] sm:$0xff] %v4813_v49   ;;  %v1549_v56 = vadd.f32 %v6720_v31, %v1548_v53  ;;  %v5290_v57 = vpop.f32.mrb[171].mxu0  ;;  %v1997_v59 = vadd.f32 %v6720_v31, %v1996_v54  ;;  %v5514_v60 = vpop.f32.mrb[171].mxu1 }
 0x2b4   : > { %v2291_v58 = vmul.f32 0.2, %v1994_v51 }
 0x2b5   : > { %v2180_v61 = vmul.f32 0.2, %v1549_v56  ;;  %v2292_v0 = vmul.f32 0.2, %v1997_v59  ;;  %v2400_v1 = vmax.f32 %v1546_v48, %v2179_v55 }
 0x2b6   : > { %v2512_v62 = vmax.f32 %v1994_v51, %v2291_v58 }
 0x2b7   : > { %v2401_v2 = vmax.f32 %v1549_v56, %v2180_v61  ;;  %v2513_v3 = vmax.f32 %v1997_v59, %v2292_v0 }
 0x2b8   : > { %v1553_v4 = vpop.f32.mrb[172].mxu0  ;;  %v2001_v5 = vpop.f32.mrb[172].mxu1 }
 0x2b9   : > { %v4538_v6 = vpack.c.bf16 %v2401_v2, %v2400_v1  ;;  %v1554_v7 = vadd.f32 %v6720_v31, %v1553_v4  ;;  %v4818_v8 = vpack.c.bf16 %v2513_v3, %v2512_v62  ;;  %v5293_v9 = vpop.f32.mrb[173].mxu0  ;;  %v2002_v10 = vadd.f32 %v6720_v31, %v2001_v5  ;;  %v5517_v11 = vpop.f32.mrb[173].mxu1 }
 0x2ba   : > { %v1556_v12 = vpop.f32.mrb[174].mxu0  ;;  %v2004_v13 = vpop.f32.mrb[174].mxu1 }
 0x2bb   : > { %4916 = vst [vmem:[%s6350_s18 + $0x150] sm:$0xff] %v4538_v6   ;;  %v2181_v14 = vmul.f32 0.2, %v1554_v7  ;;  %4972 = vst [vmem:[%s6350_s18 + $0x310] sm:$0xff] %v4818_v8   ;;  %v1557_v15 = vadd.f32 %v6720_v31, %v1556_v12  ;;  %v5294_v16 = vpop.f32.mrb[175].mxu0  ;;  %v2005_v18 = vadd.f32 %v6720_v31, %v2004_v13  ;;  %v5518_v19 = vpop.f32.mrb[175].mxu1 }
 0x2bc   : > { %v2293_v17 = vmul.f32 0.2, %v2002_v10 }
 0x2bd   : > { %v2182_v20 = vmul.f32 0.2, %v1557_v15  ;;  %v2294_v22 = vmul.f32 0.2, %v2005_v18  ;;  %v2402_v23 = vmax.f32 %v1554_v7, %v2181_v14 }
 0x2be   : > { %v2514_v21 = vmax.f32 %v2002_v10, %v2293_v17 }
 0x2bf   : > { %v2403_v24 = vmax.f32 %v1557_v15, %v2182_v20  ;;  %v2515_v25 = vmax.f32 %v2005_v18, %v2294_v22 }
 0x2c0   : > { %v1561_v26 = vpop.f32.mrb[176].mxu0  ;;  %v2009_v27 = vpop.f32.mrb[176].mxu1 }
 0x2c1   : > { %v4543_v28 = vpack.c.bf16 %v2403_v24, %v2402_v23  ;;  %v1562_v29 = vadd.f32 %v6720_v31, %v1561_v26  ;;  %v4823_v30 = vpack.c.bf16 %v2515_v25, %v2514_v21  ;;  %v5297_v32 = vpop.f32.mrb[177].mxu0  ;;  %v2010_v33 = vadd.f32 %v6720_v31, %v2009_v27  ;;  %v5521_v34 = vpop.f32.mrb[177].mxu1 }
 0x2c2   : > { %v1564_v63 = vpop.f32.mrb[178].mxu0  ;;  %v2012_v35 = vpop.f32.mrb[178].mxu1 }
 0x2c3   : > { %4917 = vst [vmem:[%s6350_s18 + $0x158] sm:$0xff] %v4543_v28   ;;  %v2183_v36 = vmul.f32 0.2, %v1562_v29  ;;  %4973 = vst [vmem:[%s6350_s18 + $0x318] sm:$0xff] %v4823_v30   ;;  %v1565_v38 = vadd.f32 %v6720_v31, %v1564_v63  ;;  %v5298_v39 = vpop.f32.mrb[179].mxu0  ;;  %v2013_v41 = vadd.f32 %v6720_v31, %v2012_v35  ;;  %v5522_v42 = vpop.f32.mrb[179].mxu1 }
 0x2c4   : > { %v2295_v40 = vmul.f32 0.2, %v2010_v33 }
 0x2c5   : > { %v2184_v37 = vmul.f32 0.2, %v1565_v38  ;;  %v2296_v44 = vmul.f32 0.2, %v2013_v41  ;;  %v2404_v45 = vmax.f32 %v1562_v29, %v2183_v36 }
 0x2c6   : > { %v2516_v43 = vmax.f32 %v2010_v33, %v2295_v40 }
 0x2c7   : > { %v2405_v46 = vmax.f32 %v1565_v38, %v2184_v37  ;;  %v2517_v47 = vmax.f32 %v2013_v41, %v2296_v44 }
 0x2c8   : > { %v1569_v48 = vpop.f32.mrb[180].mxu0  ;;  %v2017_v49 = vpop.f32.mrb[180].mxu1 }
 0x2c9   : > { %v4548_v50 = vpack.c.bf16 %v2405_v46, %v2404_v45  ;;  %v1570_v51 = vadd.f32 %v6720_v31, %v1569_v48  ;;  %v4828_v52 = vpack.c.bf16 %v2517_v47, %v2516_v43  ;;  %v5301_v53 = vpop.f32.mrb[181].mxu0  ;;  %v2018_v54 = vadd.f32 %v6720_v31, %v2017_v49  ;;  %v5525_v55 = vpop.f32.mrb[181].mxu1 }
 0x2ca   : > { %v1572_v56 = vpop.f32.mrb[182].mxu0  ;;  %v2020_v57 = vpop.f32.mrb[182].mxu1 }
 0x2cb   : > { %4918 = vst [vmem:[%s6350_s18 + $0x160] sm:$0xff] %v4548_v50   ;;  %v2185_v58 = vmul.f32 0.2, %v1570_v51  ;;  %4974 = vst [vmem:[%s6350_s18 + $0x320] sm:$0xff] %v4828_v52   ;;  %v1573_v59 = vadd.f32 %v6720_v31, %v1572_v56  ;;  %v5302_v60 = vpop.f32.mrb[183].mxu0  ;;  %v2021_v62 = vadd.f32 %v6720_v31, %v2020_v57  ;;  %v5526_v0 = vpop.f32.mrb[183].mxu1 }
 0x2cc   : > { %v2297_v61 = vmul.f32 0.2, %v2018_v54 }
 0x2cd   : > { %v2186_v1 = vmul.f32 0.2, %v1573_v59  ;;  %v2298_v3 = vmul.f32 0.2, %v2021_v62  ;;  %v2406_v4 = vmax.f32 %v1570_v51, %v2185_v58 }
 0x2ce   : > { %v2518_v2 = vmax.f32 %v2018_v54, %v2297_v61 }
 0x2cf   : > { %v2407_v5 = vmax.f32 %v1573_v59, %v2186_v1  ;;  %v2519_v6 = vmax.f32 %v2021_v62, %v2298_v3 }
 0x2d0   : > { %v1577_v7 = vpop.f32.mrb[184].mxu0  ;;  %v2025_v8 = vpop.f32.mrb[184].mxu1 }
 0x2d1   : > { %v4553_v9 = vpack.c.bf16 %v2407_v5, %v2406_v4  ;;  %v1578_v10 = vadd.f32 %v6720_v31, %v1577_v7  ;;  %v4833_v11 = vpack.c.bf16 %v2519_v6, %v2518_v2  ;;  %v5305_v12 = vpop.f32.mrb[185].mxu0  ;;  %v2026_v13 = vadd.f32 %v6720_v31, %v2025_v8  ;;  %v5529_v14 = vpop.f32.mrb[185].mxu1 }
 0x2d2   : > { %v1580_v15 = vpop.f32.mrb[186].mxu0  ;;  %v2028_v16 = vpop.f32.mrb[186].mxu1 }
 0x2d3   : > { %4919 = vst [vmem:[%s6350_s18 + $0x168] sm:$0xff] %v4553_v9   ;;  %v2187_v17 = vmul.f32 0.2, %v1578_v10  ;;  %4975 = vst [vmem:[%s6350_s18 + $0x328] sm:$0xff] %v4833_v11   ;;  %v1581_v18 = vadd.f32 %v6720_v31, %v1580_v15  ;;  %v5306_v19 = vpop.f32.mrb[187].mxu0  ;;  %v2029_v21 = vadd.f32 %v6720_v31, %v2028_v16  ;;  %v5530_v22 = vpop.f32.mrb[187].mxu1 }
 0x2d4   : > { %v2299_v20 = vmul.f32 0.2, %v2026_v13 }
 0x2d5   : > { %v2188_v23 = vmul.f32 0.2, %v1581_v18  ;;  %v2300_v25 = vmul.f32 0.2, %v2029_v21  ;;  %v2408_v26 = vmax.f32 %v1578_v10, %v2187_v17 }
 0x2d6   : > { %v2520_v24 = vmax.f32 %v2026_v13, %v2299_v20 }
 0x2d7   : > { %v2409_v27 = vmax.f32 %v1581_v18, %v2188_v23  ;;  %v2521_v28 = vmax.f32 %v2029_v21, %v2300_v25 }
 0x2d8   : > { %v1585_v29 = vpop.f32.mrb[188].mxu0  ;;  %v2033_v30 = vpop.f32.mrb[188].mxu1 }
 0x2d9   : > { %v4558_v32 = vpack.c.bf16 %v2409_v27, %v2408_v26  ;;  %v1586_v33 = vadd.f32 %v6720_v31, %v1585_v29  ;;  %v4838_v34 = vpack.c.bf16 %v2521_v28, %v2520_v24  ;;  %v5309_v63 = vpop.f32.mrb[189].mxu0  ;;  %v2034_v35 = vadd.f32 %v6720_v31, %v2033_v30  ;;  %v5533_v36 = vpop.f32.mrb[189].mxu1 }
 0x2da   : > { %v1588_v38 = vpop.f32.mrb[190].mxu0  ;;  %v2036_v39 = vpop.f32.mrb[190].mxu1 }
 0x2db   : > { %4920 = vst [vmem:[%s6350_s18 + $0x170] sm:$0xff] %v4558_v32   ;;  %v2189_v40 = vmul.f32 0.2, %v1586_v33  ;;  %4976 = vst [vmem:[%s6350_s18 + $0x330] sm:$0xff] %v4838_v34   ;;  %v1589_v41 = vadd.f32 %v6720_v31, %v1588_v38  ;;  %v5310_v42 = vpop.f32.mrb[191].mxu0  ;;  %v2037_v43 = vadd.f32 %v6720_v31, %v2036_v39  ;;  %v5534_v44 = vpop.f32.mrb[191].mxu1 }
 0x2dc   : > { %v2301_v37 = vmul.f32 0.2, %v2034_v35 }
 0x2dd   : > { %v2190_v45 = vmul.f32 0.2, %v1589_v41  ;;  %v2302_v47 = vmul.f32 0.2, %v2037_v43  ;;  %v2410_v48 = vmax.f32 %v1586_v33, %v2189_v40 }
 0x2de   : > { %v2522_v46 = vmax.f32 %v2034_v35, %v2301_v37 }
 0x2df   : > { %v2411_v49 = vmax.f32 %v1589_v41, %v2190_v45  ;;  %v2523_v50 = vmax.f32 %v2037_v43, %v2302_v47 }
 0x2e0   : > { %v1593_v51 = vpop.f32.mrb[192].mxu0  ;;  %v2041_v52 = vpop.f32.mrb[192].mxu1 }
 0x2e1   : > { %v4563_v53 = vpack.c.bf16 %v2411_v49, %v2410_v48  ;;  %v1594_v54 = vadd.f32 %v6720_v31, %v1593_v51  ;;  %v4843_v55 = vpack.c.bf16 %v2523_v50, %v2522_v46  ;;  %v5313_v56 = vpop.f32.mrb[193].mxu0  ;;  %v2042_v57 = vadd.f32 %v6720_v31, %v2041_v52  ;;  %v5537_v58 = vpop.f32.mrb[193].mxu1 }
 0x2e2   : > { %v1596_v59 = vpop.f32.mrb[194].mxu0  ;;  %v2044_v60 = vpop.f32.mrb[194].mxu1 }
 0x2e3   : > { %4921 = vst [vmem:[%s6350_s18 + $0x178] sm:$0xff] %v4563_v53   ;;  %v2191_v61 = vmul.f32 0.2, %v1594_v54  ;;  %4977 = vst [vmem:[%s6350_s18 + $0x338] sm:$0xff] %v4843_v55   ;;  %v1597_v62 = vadd.f32 %v6720_v31, %v1596_v59  ;;  %v5314_v0 = vpop.f32.mrb[195].mxu0  ;;  %v2045_v2 = vadd.f32 %v6720_v31, %v2044_v60  ;;  %v5538_v3 = vpop.f32.mrb[195].mxu1 }
 0x2e4   : > { %v2303_v1 = vmul.f32 0.2, %v2042_v57 }
 0x2e5   : > { %v2192_v4 = vmul.f32 0.2, %v1597_v62  ;;  %v2304_v6 = vmul.f32 0.2, %v2045_v2  ;;  %v2412_v7 = vmax.f32 %v1594_v54, %v2191_v61 }
 0x2e6   : > { %v2524_v5 = vmax.f32 %v2042_v57, %v2303_v1 }
 0x2e7   : > { %v2413_v8 = vmax.f32 %v1597_v62, %v2192_v4  ;;  %v2525_v9 = vmax.f32 %v2045_v2, %v2304_v6 }
 0x2e8   : > { %v1601_v10 = vpop.f32.mrb[196].mxu0  ;;  %v2049_v11 = vpop.f32.mrb[196].mxu1 }
 0x2e9   : > { %v4568_v12 = vpack.c.bf16 %v2413_v8, %v2412_v7  ;;  %v1602_v13 = vadd.f32 %v6720_v31, %v1601_v10  ;;  %v4848_v14 = vpack.c.bf16 %v2525_v9, %v2524_v5  ;;  %v5317_v15 = vpop.f32.mrb[197].mxu0  ;;  %v2050_v16 = vadd.f32 %v6720_v31, %v2049_v11  ;;  %v5541_v17 = vpop.f32.mrb[197].mxu1 }
 0x2ea   : > { %v1604_v18 = vpop.f32.mrb[198].mxu0  ;;  %v2052_v19 = vpop.f32.mrb[198].mxu1 }
 0x2eb   : > { %4922 = vst [vmem:[%s6350_s18 + $0x180] sm:$0xff] %v4568_v12   ;;  %v2193_v20 = vmul.f32 0.2, %v1602_v13  ;;  %4978 = vst [vmem:[%s6350_s18 + $0x340] sm:$0xff] %v4848_v14   ;;  %v1605_v21 = vadd.f32 %v6720_v31, %v1604_v18  ;;  %v5318_v22 = vpop.f32.mrb[199].mxu0  ;;  %v2053_v24 = vadd.f32 %v6720_v31, %v2052_v19  ;;  %v5542_v25 = vpop.f32.mrb[199].mxu1 }
 0x2ec   : > { %v2305_v23 = vmul.f32 0.2, %v2050_v16 }
 0x2ed   : > { %v2194_v26 = vmul.f32 0.2, %v1605_v21  ;;  %v2306_v28 = vmul.f32 0.2, %v2053_v24  ;;  %v2414_v29 = vmax.f32 %v1602_v13, %v2193_v20 }
 0x2ee   : > { %v2526_v27 = vmax.f32 %v2050_v16, %v2305_v23 }
 0x2ef   : > { %v2415_v30 = vmax.f32 %v1605_v21, %v2194_v26  ;;  %v2527_v32 = vmax.f32 %v2053_v24, %v2306_v28 }
 0x2f0   : > { %v1609_v33 = vpop.f32.mrb[200].mxu0  ;;  %v2057_v34 = vpop.f32.mrb[200].mxu1 }
 0x2f1   : > { %v4573_v63 = vpack.c.bf16 %v2415_v30, %v2414_v29  ;;  %v1610_v35 = vadd.f32 %v6720_v31, %v1609_v33  ;;  %v4853_v36 = vpack.c.bf16 %v2527_v32, %v2526_v27  ;;  %v5321_v38 = vpop.f32.mrb[201].mxu0  ;;  %v2058_v39 = vadd.f32 %v6720_v31, %v2057_v34  ;;  %v5545_v40 = vpop.f32.mrb[201].mxu1 }
 0x2f2   : > { %v1612_v41 = vpop.f32.mrb[202].mxu0  ;;  %v2060_v42 = vpop.f32.mrb[202].mxu1 }
 0x2f3   : > { %4923 = vst [vmem:[%s6350_s18 + $0x188] sm:$0xff] %v4573_v63   ;;  %v2195_v37 = vmul.f32 0.2, %v1610_v35  ;;  %4979 = vst [vmem:[%s6350_s18 + $0x348] sm:$0xff] %v4853_v36   ;;  %v1613_v43 = vadd.f32 %v6720_v31, %v1612_v41  ;;  %v5322_v44 = vpop.f32.mrb[203].mxu0  ;;  %v2061_v46 = vadd.f32 %v6720_v31, %v2060_v42  ;;  %v5546_v47 = vpop.f32.mrb[203].mxu1 }
 0x2f4   : > { %v2307_v45 = vmul.f32 0.2, %v2058_v39 }
 0x2f5   : > { %v2196_v48 = vmul.f32 0.2, %v1613_v43  ;;  %v2308_v50 = vmul.f32 0.2, %v2061_v46  ;;  %v2416_v51 = vmax.f32 %v1610_v35, %v2195_v37 }
 0x2f6   : > { %v2528_v49 = vmax.f32 %v2058_v39, %v2307_v45 }
 0x2f7   : > { %v2417_v52 = vmax.f32 %v1613_v43, %v2196_v48  ;;  %v2529_v53 = vmax.f32 %v2061_v46, %v2308_v50 }
 0x2f8   : > { %v1617_v54 = vpop.f32.mrb[204].mxu0  ;;  %v2065_v55 = vpop.f32.mrb[204].mxu1 }
 0x2f9   : > { %v4578_v56 = vpack.c.bf16 %v2417_v52, %v2416_v51  ;;  %v1618_v57 = vadd.f32 %v6720_v31, %v1617_v54  ;;  %v4858_v58 = vpack.c.bf16 %v2529_v53, %v2528_v49  ;;  %v5325_v59 = vpop.f32.mrb[205].mxu0  ;;  %v2066_v60 = vadd.f32 %v6720_v31, %v2065_v55  ;;  %v5549_v61 = vpop.f32.mrb[205].mxu1 }
 0x2fa   : > { %v1620_v62 = vpop.f32.mrb[206].mxu0  ;;  %v2068_v0 = vpop.f32.mrb[206].mxu1 }
 0x2fb   : > { %4924 = vst [vmem:[%s6350_s18 + $0x190] sm:$0xff] %v4578_v56   ;;  %v2197_v1 = vmul.f32 0.2, %v1618_v57  ;;  %4980 = vst [vmem:[%s6350_s18 + $0x350] sm:$0xff] %v4858_v58   ;;  %v1621_v2 = vadd.f32 %v6720_v31, %v1620_v62  ;;  %v5326_v3 = vpop.f32.mrb[207].mxu0  ;;  %v2069_v5 = vadd.f32 %v6720_v31, %v2068_v0  ;;  %v5550_v6 = vpop.f32.mrb[207].mxu1 }
 0x2fc   : > { %v2309_v4 = vmul.f32 0.2, %v2066_v60 }
 0x2fd   : > { %v2198_v7 = vmul.f32 0.2, %v1621_v2  ;;  %v2310_v9 = vmul.f32 0.2, %v2069_v5  ;;  %v2418_v10 = vmax.f32 %v1618_v57, %v2197_v1 }
 0x2fe   : > { %v2530_v8 = vmax.f32 %v2066_v60, %v2309_v4 }
 0x2ff   : > { %v2419_v11 = vmax.f32 %v1621_v2, %v2198_v7  ;;  %v2531_v12 = vmax.f32 %v2069_v5, %v2310_v9 }
 0x300   : > { %v1625_v13 = vpop.f32.mrb[208].mxu0  ;;  %v2073_v14 = vpop.f32.mrb[208].mxu1 }
 0x301   : > { %v4583_v15 = vpack.c.bf16 %v2419_v11, %v2418_v10  ;;  %v1626_v16 = vadd.f32 %v6720_v31, %v1625_v13  ;;  %v4863_v17 = vpack.c.bf16 %v2531_v12, %v2530_v8  ;;  %v5329_v18 = vpop.f32.mrb[209].mxu0  ;;  %v2074_v19 = vadd.f32 %v6720_v31, %v2073_v14  ;;  %v5553_v20 = vpop.f32.mrb[209].mxu1 }
 0x302   : > { %v1628_v21 = vpop.f32.mrb[210].mxu0  ;;  %v2076_v22 = vpop.f32.mrb[210].mxu1 }
 0x303   : > { %4925 = vst [vmem:[%s6350_s18 + $0x198] sm:$0xff] %v4583_v15   ;;  %v2199_v23 = vmul.f32 0.2, %v1626_v16  ;;  %4981 = vst [vmem:[%s6350_s18 + $0x358] sm:$0xff] %v4863_v17   ;;  %v1629_v24 = vadd.f32 %v6720_v31, %v1628_v21  ;;  %v5330_v25 = vpop.f32.mrb[211].mxu0  ;;  %v2077_v27 = vadd.f32 %v6720_v31, %v2076_v22  ;;  %v5554_v28 = vpop.f32.mrb[211].mxu1 }
 0x304   : > { %v2311_v26 = vmul.f32 0.2, %v2074_v19 }
 0x305   : > { %v2200_v29 = vmul.f32 0.2, %v1629_v24  ;;  %v2312_v32 = vmul.f32 0.2, %v2077_v27  ;;  %v2420_v33 = vmax.f32 %v1626_v16, %v2199_v23 }
 0x306   : > { %v2532_v30 = vmax.f32 %v2074_v19, %v2311_v26 }
 0x307   : > { %v2421_v34 = vmax.f32 %v1629_v24, %v2200_v29  ;;  %v2533_v63 = vmax.f32 %v2077_v27, %v2312_v32 }
 0x308   : > { %v1633_v35 = vpop.f32.mrb[212].mxu0  ;;  %v2081_v36 = vpop.f32.mrb[212].mxu1 }
 0x309   : > { %v4588_v38 = vpack.c.bf16 %v2421_v34, %v2420_v33  ;;  %v1634_v39 = vadd.f32 %v6720_v31, %v1633_v35  ;;  %v4868_v40 = vpack.c.bf16 %v2533_v63, %v2532_v30  ;;  %v5333_v41 = vpop.f32.mrb[213].mxu0  ;;  %v2082_v42 = vadd.f32 %v6720_v31, %v2081_v36  ;;  %v5557_v37 = vpop.f32.mrb[213].mxu1 }
 0x30a   : > { %v1636_v43 = vpop.f32.mrb[214].mxu0  ;;  %v2084_v44 = vpop.f32.mrb[214].mxu1 }
 0x30b   : > { %4926 = vst [vmem:[%s6350_s18 + $0x1a0] sm:$0xff] %v4588_v38   ;;  %v2201_v45 = vmul.f32 0.2, %v1634_v39  ;;  %4982 = vst [vmem:[%s6350_s18 + $0x360] sm:$0xff] %v4868_v40   ;;  %v1637_v46 = vadd.f32 %v6720_v31, %v1636_v43  ;;  %v5334_v47 = vpop.f32.mrb[215].mxu0  ;;  %v2085_v49 = vadd.f32 %v6720_v31, %v2084_v44  ;;  %v5558_v50 = vpop.f32.mrb[215].mxu1 }
 0x30c   : > { %v2313_v48 = vmul.f32 0.2, %v2082_v42 }
 0x30d   : > { %v2202_v51 = vmul.f32 0.2, %v1637_v46  ;;  %v2314_v53 = vmul.f32 0.2, %v2085_v49  ;;  %v2422_v54 = vmax.f32 %v1634_v39, %v2201_v45 }
 0x30e   : > { %v2534_v52 = vmax.f32 %v2082_v42, %v2313_v48 }
 0x30f   : > { %v2423_v55 = vmax.f32 %v1637_v46, %v2202_v51  ;;  %v2535_v56 = vmax.f32 %v2085_v49, %v2314_v53 }
 0x310   : > { %v1641_v57 = vpop.f32.mrb[216].mxu0  ;;  %v2089_v58 = vpop.f32.mrb[216].mxu1 }
 0x311   : > { %v4593_v59 = vpack.c.bf16 %v2423_v55, %v2422_v54  ;;  %v1642_v60 = vadd.f32 %v6720_v31, %v1641_v57  ;;  %v4873_v61 = vpack.c.bf16 %v2535_v56, %v2534_v52  ;;  %v5337_v62 = vpop.f32.mrb[217].mxu0  ;;  %v2090_v0 = vadd.f32 %v6720_v31, %v2089_v58  ;;  %v5561_v1 = vpop.f32.mrb[217].mxu1 }
 0x312   : > { %v1644_v2 = vpop.f32.mrb[218].mxu0  ;;  %v2092_v3 = vpop.f32.mrb[218].mxu1 }
 0x313   : > { %4927 = vst [vmem:[%s6350_s18 + $0x1a8] sm:$0xff] %v4593_v59   ;;  %v2203_v4 = vmul.f32 0.2, %v1642_v60  ;;  %4983 = vst [vmem:[%s6350_s18 + $0x368] sm:$0xff] %v4873_v61   ;;  %v1645_v5 = vadd.f32 %v6720_v31, %v1644_v2  ;;  %v5338_v6 = vpop.f32.mrb[219].mxu0  ;;  %v5562_v8 = vpop.f32.mrb[219].mxu1 }
 0x314   : > { %v2315_v7 = vmul.f32 0.2, %v2090_v0 }
 0x315   : > { %v2204_v9 = vmul.f32 0.2, %v1645_v5  ;;  %v2424_v11 = vmax.f32 %v1642_v60, %v2203_v4 }
 0x316   : > { %v2536_v10 = vmax.f32 %v2090_v0, %v2315_v7 }
 0x317   : > { %v2425_v12 = vmax.f32 %v1645_v5, %v2204_v9 }
 0x318   : > { %v4323_v13 = vpack.c.bf16 %v2536_v10, %v2536_v10  ;;  %v1649_v14 = vpop.f32.mrb[220].mxu0 }
 0x319   : > { %v4598_v15 = vpack.c.bf16 %v2425_v12, %v2424_v11  ;;  %v1650_v16 = vadd.f32 %v6720_v31, %v1649_v14  ;;  %v5341_v17 = vpop.f32.mrb[221].mxu0 }
 0x31a   : > { %3642 = vst [vmem:[%s6350_s18 + $0x370] sm:$0xf] %v4323_v13  ;;  %v1652_v18 = vpop.f32.mrb[222].mxu0 }
 0x31b   : > { %4928 = vst [vmem:[%s6350_s18 + $0x1b0] sm:$0xff] %v4598_v15   ;;  %v2205_v19 = vmul.f32 0.2, %v1650_v16  ;;  %v1653_v20 = vadd.f32 %v6720_v31, %v1652_v18  ;;  %v5342_v21 = vpop.f32.mrb[223].mxu0 }
 0x31d   : > { %v2206_v22 = vmul.f32 0.2, %v1653_v20  ;;  %v2426_v23 = vmax.f32 %v1650_v16, %v2205_v19 }
 0x31f   : > { %v2427_v24 = vmax.f32 %v1653_v20, %v2206_v22 }
 0x321   : > { %v4603_v25 = vpack.c.bf16 %v2427_v24, %v2426_v23 }
 0x323   : > { %4929 = vst [vmem:[%s6350_s18 + $0x1b8] sm:$0xff] %v4603_v25  }
 0x324   : > { %5874 = shalt.err (!%p5871_p7)
}
 0x325   : > { %s5875_s11 = scalar_lea.hbm %s6845_s22, 14144  ;;  %s5879_s28 = scalar_lea.hbm %s6894_s3, 141440 }
 0x326   : > { %p5876_p9 = scmp.ne.s32.totalorder %s6845_s22, %s5875_s11  ;;  %p5880_p5 = scmp.lt.u32.totalorder %s6845_s22, %s6894_s3 }
 0x327   : > { %p5881_p10 = scmp.lt.u32.totalorder %s5879_s28, %s5875_s11  ;;  %p5883_p2 = scmp.lt.u32.totalorder %s5875_s11, %s6845_s22 }
 0x328   : > { %p5877_p12 = pnand %p5876_p9, %p6079_p6 }
 0x329   : > { %p5882_p1 = por %p5881_p10, %p5880_p5 }
 0x32a   : > { %p5878_p0 = pneg %p5877_p12 }
 0x32b   : > { %p5884_p4 = por %p5883_p2, %p5882_p1 }
 0x32d   : > { %p5885_p8 = pnand %p5884_p4, %p5878_p0 }
 0x32f   : > { %5888 = shalt.err (!%p5885_p8)
}
 0x330   : > { %s5941_s21 = smov 64   ;;  %s5942_s18 = smov 4  }
 0x331   : > { %5591 = dma.vmem_to_hbm [thread:$0]  (%p6079_p6), %s6847_s7, 14144, %s6845_s22, %s3644_s29, %s5941_s21, %s5941_s21, %s5942_s18  }
 0x332 PF: > { %p5613_p11 = scmp.ge.s32.totalorder %s5931_s15, 2  ;;  %s3672_s20 = sand.u32 1, %s5919_s12  }
 0x333   : > { %p6909_p13 = scmp.ne.s32.totalorder %s6899_s19, 0  ;;  %s3673_s8 = scalar_lea.sflag [#allocation4], %s3672_s20 }
 0x335   : > { %p5605_p3 = pnand %p5613_p11, %p6909_p13 }
 0x337   : > { %5914 = dma.done.wait (!%p5605_p3), %s3673_s8, 14144  }
 0x338   : > { %5916 = vsyncadd (!%p5605_p3), %s3673_s8, 4294953152  ;;  %p17_p7 = scmp.ge.s32.totalorder %s6069_s5, 12   ;;  %s6910_s12 = smov %s5923_s13 }
 0x339   : > { %s6911_s13 = smov %s5927_s14  ;;  %s6912_s14 = smov %s6085_s10 }
 0x33a   : > { %s6913_s15 = smov %s6069_s5  ;;  %19 = sbr.rel (!%p17_p7) target bundleno = 6 (0x6), region = 85 }
 0x341   :  { %3678 = vsyncpa [#allocation3], 1 }
 0x342   :  { %3680 = vsyncpa [#allocation3 + $0x1], 1 }
 0x343   :  { %3681 = vsyncpa [#allocation6], 1 }
 0x344   :  { %3682 = vsyncpa [#allocation4], 1 }
 0x345   :  { %3684 = vsyncpa [#allocation4 + $0x1], 1 }

// kernel: discriminator_forward.11
= control target key start
LH: loop header
LB: loop body
LE: loop exit
PB: predicated region body
PF: predicated region fallthrough
CT: control target
= control target key end

     0   :  { %9 = vsyncpa [#allocation3], 0  ;;  %s3817_s0 = inlined_call_operand.hbm [shape: bf16[4256,128], index: 0, kind: input, shape index: {}]   ;;  %s3818_s1 = inlined_call_operand.hbm [shape: bf16[128,128], index: 1, kind: input, shape index: {}]   ;;  %s3819_s2 = inlined_call_operand.hbm [shape: f32[4256,128], index: 2, kind: output, shape index: {0}]   ;;  %s3820_s3 = inlined_call_operand.hbm [shape: f32[4,8,128], index: 3, kind: output, shape index: {1}]  }
   0x1   :  { %11 = vsyncpa [#allocation3 + $0x1], 0 }
   0x2   :  { %12 = vsyncpa [#allocation6], 0 }
   0x3   :  { %13 = vsyncpa [#allocation4], 0 }
   0x4   :  { %15 = vsyncpa [#allocation4 + $0x1], 0 }
   0x5   :  { %16 = vsyncpa [#allocation9], 0 }
   0x6   :  { %18 = vsyncpa [#allocation9 + $0x1], 0  ;;  %s2892_s12 = smov 0   ;;  %s2894_s13 = smov 0  }
   0x7   :  { %s2896_s14 = smov 0   ;;  %s2898_s15 = smov 0  }
   0x8 LB: > { %s2913_s16 = sadd.s32 4294967295, %s2860_s15   ;;  %s2079_s17 = sadd.s32 4294967294, %s2860_s15   ;;  %s2860_s15 = sphi %s2898_s15, %s3887_s15   ;;  %s2856_s14 = sphi %s2896_s14, %s3886_s14   ;;  %s2852_s13 = sphi %s2894_s13, %s3885_s13   ;;  %s2848_s12 = sphi %s2892_s12, %s3884_s12  }
   0x9   : > { %p44_p0 = scmp.ne.s32.totalorder %s2852_s13, %s2848_s12  ;;  %p3821_p1 = scmp.eq.s32.totalorder %s2913_s16, 0 }
   0xa   : > { %p95_p3 = scmp.eq.s32.totalorder %s2079_s17, 3  ;;  %p2080_p5 = scmp.ge.s32.totalorder %s2860_s15, 1 }
   0xb   : > { %p2922_p4 = por %p3821_p1, %p44_p0  ;;  %p128_p7 = scmp.lt.s32.totalorder %s2860_s15, 5 }
   0xc   : > { %p2927_p6 = por %p95_p3, %p44_p0  ;;  %s2862_s21 = smov [#allocation5]  }
   0xd   : > { %s3848_s18 = scalar_select %p2922_p4, 1, 0 }
   0xe   : > { %s3849_s19 = scalar_select %p2927_p6, 1, 0 }
   0xf   : > { %p2932_p8 = pnand %p2080_p5, %p128_p7  ;;  %s140_s22 = sshll.u32 %s2862_s21, 4  ;;  %s141_s22 = int_to_ptr.vmem [resolvable:$true] %s140_s22 }
  0x10   : > { %s2945_s24 = sadd.s32 1, %s2860_s15   ;;  %s31_s25 = sadd.s32 1, %s2856_s14 }
  0x11   : > { %s3850_s20 = scalar_select %p2932_p8, 1, 0 }
  0x12   : > { %p2557_p9 = pneg %p2932_p8  ;;  %s28_s26 = ssub.s32 %s2860_s15, %s2945_s24 }
  0x13   : > { %s2700_s29 = scalar_lea.hbm %s3818_s1, 1024 }
  0x14   : > { %p2940_p10 = pnand %p2557_p9, %p3821_p1  ;;  %p2701_p11 = scmp.ne.s32.totalorder %s3818_s1, %s2700_s29 }
  0x15   : > { %p2707_p3 = scmp.lt.u32.totalorder %s2700_s29, %s3818_s1 }
  0x16   : > { %p2702_p12 = pneg %p2940_p10 }
  0x18   : > { %p2703_p13 = pnand %p2702_p12, %p2701_p11 }
  0x1a   : > { %p2704_p0 = pneg %p2703_p13 }
  0x1c   : > { %p2709_p5 = pnand %p2707_p3, %p2704_p0 }
  0x1e   : > { %2712 = shalt.err (!%p2709_p5)
}
  0x1f   : > { %s2713_s7 = scalar_lea.vmem %s141_s22, 1024  ;;  %p2721_p2 = scmp.lt.s32.totalorder %s141_s22, %s141_s22 }
  0x20   : > { %p2714_p7 = scmp.ne.s32.totalorder %s141_s22, %s2713_s7  ;;  %p2722_p6 = scmp.lt.s32.totalorder %s2713_s7, %s2713_s7 }
  0x22   : > { %p2716_p9 = pnand %p2714_p7, %p2702_p12  ;;  %p2723_p4 = por %p2722_p6, %p2721_p2 }
  0x24   : > { %p2717_p1 = pneg %p2716_p9 }
  0x26   : > { %p2724_p8 = pnand %p2723_p4, %p2717_p1 }
  0x28   : > { %2727 = shalt.err (!%p2724_p8)
}
  0x29   : > { %s2863_s8 = smov 64   ;;  %s2864_s9 = smov 4  }
  0x2a   : > { %2560 = dma.hbm_to_vmem [thread:$0]  (!%p2940_p10), %s3818_s1, 1024, %s141_s22, [#allocation6], %s2863_s8, %s2863_s8, %s2864_s9  }
  0x2b   : > { %p29_p1 = scmp.eq.s32.totalorder %s28_s26, 0  ;;  %p38_p2 = scmp.ne.s32.totalorder %s2856_s14, %s2852_s13 }
  0x2c   : > { %p39_p4 = scmp.eq.s32.totalorder %s2860_s15, 0  ;;  %p2573_p6 = scmp.lt.s32.totalorder %s2860_s15, 4 }
  0x2d   : > { %s2974_s17 = scalar_select %p29_p1, %s2856_s14, %s31_s25  }
  0x2e   : > { %p40_p8 = por %p39_p4, %p38_p2  ;;  %p3852_p11 = scmp.eq.s32.totalorder %s2913_s16, 3 }
  0x2f   : > { %s154_s23 = sand.u32 1, %s2856_s14   ;;  %s2167_s27 = smul.u32 8512, %s2860_s15 }
  0x30   : > { %p2978_p12 = por %p3852_p11, %p38_p2  ;;  %s2544_s28 = smul.u32 532, %s154_s23 }
  0x31   : > { %p2984_p13 = pnand %p2573_p6, %p40_p8  ;;  %s2991_s25 = scalar_lea.hbm %s3817_s0, %s2167_s27 }
  0x32   : > { %s158_s30 = scalar_lea.vmem [#allocation2], %s2544_s28  ;;  %s2995_s5 = scalar_lea.sflag [#allocation3], %s154_s23 }
  0x33   : > { %s165_s4 = sshll.u32 %s158_s30, 4  ;;  %s2728_s6 = scalar_lea.hbm %s2991_s25, 8512  ;;  %s2993_s4 = int_to_ptr.vmem [resolvable:$true] %s165_s4 }
  0x34   : > { %p2729_p10 = scmp.ne.s32.totalorder %s2991_s25, %s2728_s6  ;;  %p2730_p0 = pneg %p2984_p13 }
  0x35   : > { %s2733_s11 = scalar_lea.hbm %s3817_s0, 34048  ;;  %p2734_p7 = scmp.lt.u32.totalorder %s2991_s25, %s3817_s0 }
  0x36   : > { %p2731_p3 = pnand %p2730_p0, %p2729_p10  ;;  %p2735_p9 = scmp.lt.u32.totalorder %s2733_s11, %s2728_s6 }
  0x37   : > { %p2737_p2 = scmp.lt.u32.totalorder %s2728_s6, %s2991_s25 }
  0x38   : > { %p2732_p5 = pneg %p2731_p3  ;;  %p2736_p1 = por %p2735_p9, %p2734_p7 }
  0x3a   : > { %p2738_p4 = por %p2737_p2, %p2736_p1 }
  0x3c   : > { %p2739_p6 = pnand %p2738_p4, %p2732_p5 }
  0x3e   : > { %2742 = shalt.err (!%p2739_p6)
}
  0x3f   : > { %s2743_s23 = scalar_lea.vmem %s2993_s4, 8512  ;;  %s2865_s28 = smov [#allocation2]  }
  0x40   : > { %p2744_p8 = scmp.ne.s32.totalorder %s2993_s4, %s2743_s23  ;;  %s2748_s26 = sshll.u32 %s2865_s28, 4  ;;  %s2749_s26 = int_to_ptr.vmem [resolvable:$false] %s2748_s26 }
  0x41   : > { %s2750_s30 = scalar_lea.vmem %s2749_s26, 17024  ;;  %p2751_p3 = scmp.lt.s32.totalorder %s2993_s4, %s2749_s26 }
  0x42   : > { %p2746_p11 = pnand %p2744_p8, %p2730_p0  ;;  %p2752_p7 = scmp.lt.s32.totalorder %s2750_s30, %s2743_s23 }
  0x44   : > { %p2747_p10 = pneg %p2746_p11  ;;  %p2753_p9 = por %p2752_p7, %p2751_p3 }
  0x46   : > { %p2754_p1 = pnand %p2753_p9, %p2747_p10 }
  0x48   : > { %2757 = shalt.err (!%p2754_p1)
}
  0x49   : > { %2564 = dma.hbm_to_vmem [thread:$0]  (!%p2984_p13), %s2991_s25, 8512, %s2993_s4, %s2995_s5, %s2863_s8, %s2863_s8, %s2864_s9  }
  0x4a   : > { %p3855_p0 = scmp.ne.s32.totalorder %s3850_s20, 0 }
  0x4c   : > { %177 = sbr.rel (%p3855_p0) target bundleno = 776 (0x308), region = 28 }
  0x53   : > { %s3029_s6 = sand.u32 1, %s2852_s13   ;;  %p3856_p5 = scmp.ne.s32.totalorder %s3848_s18, 0 }
  0x54   : > { %s2545_s7 = smul.u32 532, %s3029_s6  ;;  %s180_s10 = scalar_lea.sflag [#allocation3], %s3029_s6 }
  0x56   : > { %s3033_s11 = scalar_lea.vmem [#allocation2], %s2545_s7 }
  0x57   : > { %2831 = dma.done.wait (%p3856_p5), %s180_s10, 8512  }
  0x58   : > { %2833 = vsyncadd (%p3856_p5), %s180_s10, 4294958784  ;;  %p3857_p13 = scmp.eq.s32.totalorder %s2913_s16, 0 }
  0x5a   : > { %2835 = dma.done.wait (%p3857_p13), [#allocation6], 1024   ;;  %p3858_p2 = pmov %p3857_p13 }
  0x5b   : > { %v2866_v0 = vmov 0.0   ;;  %vm2867_vm0 = vmmov 0   ;;  %v2615_v1 = vld [vmem:[#allocation5] sm:$0xff]   ;;  %v2616_v2 = vld [vmem:[#allocation5 + $0x8] sm:$0xff]   ;;  %v2617_v3 = vld [vmem:[#allocation5 + $0x10] sm:$0xff]   ;;  %s2546_s18 = smul.u32 1064, %s3029_s6 }
  0x5c   : > { %2837 = vsyncadd (%p3858_p2), [#allocation6], 4294966272  ;;  %2244 = vmatprep.subr.bf16.mxu0 %v2866_v0  ;;  %2260 = vmatprep.mubr.msk.bf16.mxu0 %vm2867_vm0, %v2866_v0  ;;  %v2618_v4 = vld [vmem:[#allocation5 + $0x18] sm:$0xff]   ;;  %v2619_v5 = vld [vmem:[#allocation5 + $0x20] sm:$0xff]   ;;  %s2168_s8 = smul.u32 17024, %s2913_s16  ;;  %s1933_s5 = scalar_lea.sflag [#allocation4], %s3029_s6 }
  0x5d   : > { %2528 = vmatprep.subr.bf16.mxu1 %v2866_v0  ;;  %2396 = vmatprep.mubr.msk.bf16.mxu1 %vm2867_vm0, %v2866_v0  ;;  %v2620_v6 = vld [vmem:[#allocation5 + $0x28] sm:$0xff]   ;;  %v2621_v7 = vld [vmem:[#allocation5 + $0x30] sm:$0xff]   ;;  %v2622_v8 = vld [vmem:[#allocation5 + $0x38] sm:$0xff]   ;;  %s3223_s20 = scalar_lea.vmem [#allocation7], %s2546_s18  ;;  %s2868_s22 = smov [#allocation7]  }
  0x5e   : > { %2245 = vmatpush3.bf16.msra.mxu0 %v2615_v1  ;;  %2536 = vmatpush3.bf16.msra.mxu1 %v2615_v1  ;;  %v2623_v9 = vld [vmem:[%s3033_s11] sm:$0xff]   ;;  %v2624_v10 = vld [vmem:[%s3033_s11 + $0x8] sm:$0xff]   ;;  %v2641_v11 = vld [vmem:[%s3033_s11 + $0x110] sm:$0xff]   ;;  %s1951_s9 = sshll.u32 %s3223_s20, 4  ;;  %s3575_s4 = scalar_lea.hbm %s3819_s2, %s2168_s8  ;;  %s3577_s9 = int_to_ptr.vmem [resolvable:$true] %s1951_s9 }
  0x5f   : > { %2246 = vmatprep.subr.bf16.mxu0 %v2866_v0  ;;  %2529 = vmatprep.subr.bf16.mxu1 %v2866_v0  ;;  %v2625_v12 = vld [vmem:[%s3033_s11 + $0x10] sm:$0xff]   ;;  %v2643_v13 = vld [vmem:[%s3033_s11 + $0x118] sm:$0xff]   ;;  %v2645_v15 = vld [vmem:[%s3033_s11 + $0x120] sm:$0xff]   ;;  %s2758_s27 = scalar_lea.vmem %s3577_s9, 17024  ;;  %s2762_s23 = sshll.u32 %s2868_s22, 4  ;;  %s2763_s23 = int_to_ptr.vmem [resolvable:$false] %s2762_s23 }
  0x60   : > { %v2626_v14 = vld [vmem:[%s3033_s11 + $0x18] sm:$0xff]   ;;  %v2627_v16 = vld [vmem:[%s3033_s11 + $0x20] sm:$0xff]   ;;  %v2647_v17 = vld [vmem:[%s3033_s11 + $0x128] sm:$0xff]   ;;  %p2759_p4 = scmp.ne.s32.totalorder %s3577_s9, %s2758_s27  ;;  %s2764_s28 = scalar_lea.vmem %s2763_s23, 34048 }
  0x61   : > { %v2628_v18 = vld [vmem:[%s3033_s11 + $0x28] sm:$0xff]   ;;  %v2649_v19 = vld [vmem:[%s3033_s11 + $0x130] sm:$0xff]   ;;  %v2651_v21 = vld [vmem:[%s3033_s11 + $0x138] sm:$0xff]   ;;  %p2765_p11 = scmp.lt.s32.totalorder %s3577_s9, %s2763_s23  ;;  %p2766_p10 = scmp.lt.s32.totalorder %s2764_s28, %s2758_s27 }
  0x62   : > { %2247 = vmatpush3.bf16.msra.mxu0 %v2616_v2  ;;  %2537 = vmatpush3.bf16.msra.mxu1 %v2616_v2  ;;  %v2629_v20 = vld [vmem:[%s3033_s11 + $0x30] sm:$0xff]   ;;  %v2630_v22 = vld [vmem:[%s3033_s11 + $0x38] sm:$0xff]   ;;  %v2653_v23 = vld [vmem:[%s3033_s11 + $0x140] sm:$0xff]   ;;  %p2760_p6 = pnand %p2759_p4, %p2978_p12 }
  0x63   : > { %2248 = vmatprep.subr.bf16.mxu0 %v2866_v0  ;;  %2530 = vmatprep.subr.bf16.mxu1 %v2866_v0  ;;  %v2631_v24 = vld [vmem:[%s3033_s11 + $0x40] sm:$0xff]   ;;  %v2655_v25 = vld [vmem:[%s3033_s11 + $0x148] sm:$0xff]   ;;  %v2657_v27 = vld [vmem:[%s3033_s11 + $0x150] sm:$0xff]   ;;  %p2767_p3 = por %p2766_p10, %p2765_p11 }
  0x64   : > { %v2632_v26 = vld [vmem:[%s3033_s11 + $0x48] sm:$0xff]   ;;  %v2633_v28 = vld [vmem:[%s3033_s11 + $0x50] sm:$0xff]   ;;  %v2659_v29 = vld [vmem:[%s3033_s11 + $0x158] sm:$0xff]   ;;  %p2761_p8 = pneg %p2760_p6 }
  0x65   : > { %v2634_v30 = vld [vmem:[%s3033_s11 + $0x58] sm:$0xff]   ;;  %v2661_v31 = vld [vmem:[%s3033_s11 + $0x160] sm:$0xff]   ;;  %v2663_v33 = vld [vmem:[%s3033_s11 + $0x168] sm:$0xff]  }
  0x66   : > { %2249 = vmatpush3.bf16.msra.mxu0 %v2617_v3  ;;  %2538 = vmatpush3.bf16.msra.mxu1 %v2617_v3  ;;  %v2635_v32 = vld [vmem:[%s3033_s11 + $0x60] sm:$0xff]   ;;  %v2636_v34 = vld [vmem:[%s3033_s11 + $0x68] sm:$0xff]   ;;  %v2665_v35 = vld [vmem:[%s3033_s11 + $0x170] sm:$0xff]   ;;  %p2768_p7 = pnand %p2767_p3, %p2761_p8 }
  0x67   : > { %2250 = vmatprep.subr.bf16.mxu0 %v2866_v0  ;;  %2531 = vmatprep.subr.bf16.mxu1 %v2866_v0  ;;  %v2637_v36 = vld [vmem:[%s3033_s11 + $0x70] sm:$0xff]   ;;  %v2667_v37 = vld [vmem:[%s3033_s11 + $0x178] sm:$0xff]   ;;  %v2669_v39 = vld [vmem:[%s3033_s11 + $0x180] sm:$0xff]  }
  0x68   : > { %v2638_v38 = vld [vmem:[%s3033_s11 + $0x78] sm:$0xff]   ;;  %v2639_v40 = vld [vmem:[%s3033_s11 + $0x80] sm:$0xff]   ;;  %v2671_v41 = vld [vmem:[%s3033_s11 + $0x188] sm:$0xff]  }
  0x69   : > { %v2640_v42 = vld [vmem:[%s3033_s11 + $0x88] sm:$0xff]   ;;  %v2673_v43 = vld [vmem:[%s3033_s11 + $0x190] sm:$0xff]   ;;  %v2674_v45 = vld [vmem:[%s3033_s11 + $0x198] sm:$0xff]  }
  0x6a   : > { %2251 = vmatpush3.bf16.msra.mxu0 %v2618_v4  ;;  %2539 = vmatpush3.bf16.msra.mxu1 %v2618_v4  ;;  %v2642_v44 = vld [vmem:[%s3033_s11 + $0x90] sm:$0xff]   ;;  %v2644_v46 = vld [vmem:[%s3033_s11 + $0x98] sm:$0xff]   ;;  %v2675_v47 = vld [vmem:[%s3033_s11 + $0x1a0] sm:$0xff]  }
  0x6b   : > { %2252 = vmatprep.subr.bf16.mxu0 %v2866_v0  ;;  %2532 = vmatprep.subr.bf16.mxu1 %v2866_v0  ;;  %v2646_v48 = vld [vmem:[%s3033_s11 + $0xa0] sm:$0xff]   ;;  %v2676_v49 = vld [vmem:[%s3033_s11 + $0x1a8] sm:$0xff]   ;;  %v2677_v51 = vld [vmem:[%s3033_s11 + $0x1b0] sm:$0xff]  }
  0x6c   : > { %v2648_v50 = vld [vmem:[%s3033_s11 + $0xa8] sm:$0xff]   ;;  %v2650_v52 = vld [vmem:[%s3033_s11 + $0xb0] sm:$0xff]   ;;  %v2678_v53 = vld [vmem:[%s3033_s11 + $0x1b8] sm:$0xff]  }
  0x6d   : > { %v2652_v54 = vld [vmem:[%s3033_s11 + $0xb8] sm:$0xff]   ;;  %v2679_v55 = vld [vmem:[%s3033_s11 + $0x1c0] sm:$0xff]   ;;  %v2680_v57 = vld [vmem:[%s3033_s11 + $0x1c8] sm:$0xff]  }
  0x6e   : > { %2253 = vmatpush3.bf16.msra.mxu0 %v2619_v5  ;;  %2540 = vmatpush3.bf16.msra.mxu1 %v2619_v5  ;;  %v2654_v56 = vld [vmem:[%s3033_s11 + $0xc0] sm:$0xff]   ;;  %v2656_v58 = vld [vmem:[%s3033_s11 + $0xc8] sm:$0xff]   ;;  %v2681_v59 = vld [vmem:[%s3033_s11 + $0x1d0] sm:$0xff]  }
  0x6f   : > { %2254 = vmatprep.subr.bf16.mxu0 %v2866_v0  ;;  %2533 = vmatprep.subr.bf16.mxu1 %v2866_v0  ;;  %v2658_v60 = vld [vmem:[%s3033_s11 + $0xd0] sm:$0xff]   ;;  %v2682_v61 = vld [vmem:[%s3033_s11 + $0x1d8] sm:$0xff]  }
  0x70   : > { %v2660_v1 = vld [vmem:[%s3033_s11 + $0xd8] sm:$0xff]  }
  0x72   : > { %2255 = vmatpush3.bf16.msra.mxu0 %v2620_v6  ;;  %2541 = vmatpush3.bf16.msra.mxu1 %v2620_v6 }
  0x73   : > { %2256 = vmatprep.subr.bf16.mxu0 %v2866_v0  ;;  %2534 = vmatprep.subr.bf16.mxu1 %v2866_v0 }
  0x76   : > { %2257 = vmatpush3.bf16.msra.mxu0 %v2621_v7  ;;  %2542 = vmatpush3.bf16.msra.mxu1 %v2621_v7  ;;  %v2683_v7 = vld [vmem:[%s3033_s11 + $0x1e0] sm:$0xff]  }
  0x77   : > { %2258 = vmatprep.subr.bf16.mxu0 %v2866_v0  ;;  %2535 = vmatprep.subr.bf16.mxu1 %v2866_v0 }
  0x7a   : > { %2259 = vmatpush3.bf16.msra.mxu0 %v2622_v8  ;;  %2543 = vmatpush3.bf16.msra.mxu1 %v2622_v8 }
  0x7d   : > { %2261 = vmatmul.mubr.bf16.vlgmr.msra.gmra.mrb[0].mxu0 %v2623_v9  ;;  %2397 = vmatmul.mubr.bf16.vlgmr.msra.gmra.mrb[0].mxu1 %v2641_v11 }
  0x7e   : > { %2264 = vmatprep.mubr.msk.bf16.mxu0 %vm2867_vm0, %v2866_v0  ;;  %2400 = vmatprep.mubr.msk.bf16.mxu1 %vm2867_vm0, %v2866_v0 }
  0x85   : > { %2265 = vmatmul.mubr.bf16.gmra.mrb[4].mxu0 %v2624_v10  ;;  %2401 = vmatmul.mubr.bf16.gmra.mrb[4].mxu1 %v2643_v13  ;;  %v2662_v13 = vld [vmem:[%s3033_s11 + $0xe0] sm:$0xff]  }
  0x86   : > { %2268 = vmatprep.mubr.msk.bf16.mxu0 %vm2867_vm0, %v2866_v0  ;;  %2404 = vmatprep.mubr.msk.bf16.mxu1 %vm2867_vm0, %v2866_v0 }
  0x8d   : > { %2269 = vmatmul.mubr.bf16.gmra.mrb[8].mxu0 %v2625_v12  ;;  %2405 = vmatmul.mubr.bf16.gmra.mrb[8].mxu1 %v2645_v15 }
  0x8e   : > { %2272 = vmatprep.mubr.msk.bf16.mxu0 %vm2867_vm0, %v2866_v0  ;;  %2408 = vmatprep.mubr.msk.bf16.mxu1 %vm2867_vm0, %v2866_v0 }
  0x95   : > { %2273 = vmatmul.mubr.bf16.gmra.mrb[12].mxu0 %v2626_v14  ;;  %2409 = vmatmul.mubr.bf16.gmra.mrb[12].mxu1 %v2647_v17 }
  0x96   : > { %2276 = vmatprep.mubr.msk.bf16.mxu0 %vm2867_vm0, %v2866_v0  ;;  %2412 = vmatprep.mubr.msk.bf16.mxu1 %vm2867_vm0, %v2866_v0 }
  0x9d   : > { %2277 = vmatmul.mubr.bf16.gmra.mrb[16].mxu0 %v2627_v16  ;;  %2413 = vmatmul.mubr.bf16.gmra.mrb[16].mxu1 %v2649_v19 }
  0x9e   : > { %2280 = vmatprep.mubr.msk.bf16.mxu0 %vm2867_vm0, %v2866_v0  ;;  %2416 = vmatprep.mubr.msk.bf16.mxu1 %vm2867_vm0, %v2866_v0 }
  0xa5   : > { %2281 = vmatmul.mubr.bf16.gmra.mrb[20].mxu0 %v2628_v18  ;;  %2417 = vmatmul.mubr.bf16.gmra.mrb[20].mxu1 %v2651_v21 }
  0xa6   : > { %2284 = vmatprep.mubr.msk.bf16.mxu0 %vm2867_vm0, %v2866_v0  ;;  %2420 = vmatprep.mubr.msk.bf16.mxu1 %vm2867_vm0, %v2866_v0 }
  0xad   : > { %2285 = vmatmul.mubr.bf16.gmra.mrb[24].mxu0 %v2629_v20  ;;  %2421 = vmatmul.mubr.bf16.gmra.mrb[24].mxu1 %v2653_v23  ;;  %v2684_v23 = vld [vmem:[%s3033_s11 + $0x1e8] sm:$0xff]  }
  0xae   : > { %2288 = vmatprep.mubr.msk.bf16.mxu0 %vm2867_vm0, %v2866_v0  ;;  %2424 = vmatprep.mubr.msk.bf16.mxu1 %vm2867_vm0, %v2866_v0 }
  0xb5   : > { %2289 = vmatmul.mubr.bf16.gmra.mrb[28].mxu0 %v2630_v22  ;;  %2425 = vmatmul.mubr.bf16.gmra.mrb[28].mxu1 %v2655_v25 }
  0xb6   : > { %2292 = vmatprep.mubr.msk.bf16.mxu0 %vm2867_vm0, %v2866_v0  ;;  %2428 = vmatprep.mubr.msk.bf16.mxu1 %vm2867_vm0, %v2866_v0 }
  0xbd   : > { %2293 = vmatmul.mubr.bf16.gmra.mrb[32].mxu0 %v2631_v24  ;;  %2429 = vmatmul.mubr.bf16.gmra.mrb[32].mxu1 %v2657_v27 }
  0xbe   : > { %2296 = vmatprep.mubr.msk.bf16.mxu0 %vm2867_vm0, %v2866_v0  ;;  %2432 = vmatprep.mubr.msk.bf16.mxu1 %vm2867_vm0, %v2866_v0 }
  0xc5   : > { %2297 = vmatmul.mubr.bf16.gmra.mrb[36].mxu0 %v2632_v26  ;;  %2433 = vmatmul.mubr.bf16.gmra.mrb[36].mxu1 %v2659_v29  ;;  %v2664_v29 = vld [vmem:[%s3033_s11 + $0xe8] sm:$0xff]  }
  0xc6   : > { %2300 = vmatprep.mubr.msk.bf16.mxu0 %vm2867_vm0, %v2866_v0  ;;  %2436 = vmatprep.mubr.msk.bf16.mxu1 %vm2867_vm0, %v2866_v0 }
  0xcd   : > { %2301 = vmatmul.mubr.bf16.gmra.mrb[40].mxu0 %v2633_v28  ;;  %2437 = vmatmul.mubr.bf16.gmra.mrb[40].mxu1 %v2661_v31 }
  0xce   : > { %2304 = vmatprep.mubr.msk.bf16.mxu0 %vm2867_vm0, %v2866_v0  ;;  %2440 = vmatprep.mubr.msk.bf16.mxu1 %vm2867_vm0, %v2866_v0 }
  0xd5   : > { %2305 = vmatmul.mubr.bf16.gmra.mrb[44].mxu0 %v2634_v30  ;;  %2441 = vmatmul.mubr.bf16.gmra.mrb[44].mxu1 %v2663_v33 }
  0xd6   : > { %2308 = vmatprep.mubr.msk.bf16.mxu0 %vm2867_vm0, %v2866_v0  ;;  %2444 = vmatprep.mubr.msk.bf16.mxu1 %vm2867_vm0, %v2866_v0 }
  0xdd   : > { %2309 = vmatmul.mubr.bf16.gmra.mrb[48].mxu0 %v2635_v32  ;;  %2445 = vmatmul.mubr.bf16.gmra.mrb[48].mxu1 %v2665_v35 }
  0xde   : > { %2312 = vmatprep.mubr.msk.bf16.mxu0 %vm2867_vm0, %v2866_v0  ;;  %2448 = vmatprep.mubr.msk.bf16.mxu1 %vm2867_vm0, %v2866_v0 }
  0xe5   : > { %2313 = vmatmul.mubr.bf16.gmra.mrb[52].mxu0 %v2636_v34  ;;  %2449 = vmatmul.mubr.bf16.gmra.mrb[52].mxu1 %v2667_v37 }
  0xe6   : > { %2316 = vmatprep.mubr.msk.bf16.mxu0 %vm2867_vm0, %v2866_v0  ;;  %2452 = vmatprep.mubr.msk.bf16.mxu1 %vm2867_vm0, %v2866_v0 }
  0xed   : > { %2317 = vmatmul.mubr.bf16.gmra.mrb[56].mxu0 %v2637_v36  ;;  %2453 = vmatmul.mubr.bf16.gmra.mrb[56].mxu1 %v2669_v39  ;;  %v2685_v39 = vld [vmem:[%s3033_s11 + $0x1f0] sm:$0xff]  }
  0xee   : > { %2320 = vmatprep.mubr.msk.bf16.mxu0 %vm2867_vm0, %v2866_v0  ;;  %2456 = vmatprep.mubr.msk.bf16.mxu1 %vm2867_vm0, %v2866_v0 }
  0xf5   : > { %2321 = vmatmul.mubr.bf16.gmra.mrb[60].mxu0 %v2638_v38  ;;  %2457 = vmatmul.mubr.bf16.gmra.mrb[60].mxu1 %v2671_v41 }
  0xf6   : > { %2324 = vmatprep.mubr.msk.bf16.mxu0 %vm2867_vm0, %v2866_v0  ;;  %2460 = vmatprep.mubr.msk.bf16.mxu1 %vm2867_vm0, %v2866_v0 }
  0xfd   : > { %2325 = vmatmul.mubr.bf16.gmra.mrb[64].mxu0 %v2639_v40  ;;  %2461 = vmatmul.mubr.bf16.gmra.mrb[64].mxu1 %v2673_v43 }
  0xfe   : > { %2328 = vmatprep.mubr.msk.bf16.mxu0 %vm2867_vm0, %v2866_v0  ;;  %2464 = vmatprep.mubr.msk.bf16.mxu1 %vm2867_vm0, %v2866_v0 }
 0x105   : > { %2329 = vmatmul.mubr.bf16.gmra.mrb[68].mxu0 %v2640_v42  ;;  %2465 = vmatmul.mubr.bf16.gmra.mrb[68].mxu1 %v2674_v45  ;;  %v2666_v45 = vld [vmem:[%s3033_s11 + $0xf0] sm:$0xff]  }
 0x106   : > { %2332 = vmatprep.mubr.msk.bf16.mxu0 %vm2867_vm0, %v2866_v0  ;;  %2468 = vmatprep.mubr.msk.bf16.mxu1 %vm2867_vm0, %v2866_v0 }
 0x10d   : > { %2333 = vmatmul.mubr.bf16.gmra.mrb[72].mxu0 %v2642_v44  ;;  %2469 = vmatmul.mubr.bf16.gmra.mrb[72].mxu1 %v2675_v47 }
 0x10e   : > { %2336 = vmatprep.mubr.msk.bf16.mxu0 %vm2867_vm0, %v2866_v0  ;;  %2472 = vmatprep.mubr.msk.bf16.mxu1 %vm2867_vm0, %v2866_v0 }
 0x115   : > { %2337 = vmatmul.mubr.bf16.gmra.mrb[76].mxu0 %v2644_v46  ;;  %2473 = vmatmul.mubr.bf16.gmra.mrb[76].mxu1 %v2676_v49 }
 0x116   : > { %2340 = vmatprep.mubr.msk.bf16.mxu0 %vm2867_vm0, %v2866_v0  ;;  %2476 = vmatprep.mubr.msk.bf16.mxu1 %vm2867_vm0, %v2866_v0 }
 0x11d   : > { %2341 = vmatmul.mubr.bf16.gmra.mrb[80].mxu0 %v2646_v48  ;;  %2477 = vmatmul.mubr.bf16.gmra.mrb[80].mxu1 %v2677_v51 }
 0x11e   : > { %2344 = vmatprep.mubr.msk.bf16.mxu0 %vm2867_vm0, %v2866_v0  ;;  %2480 = vmatprep.mubr.msk.bf16.mxu1 %vm2867_vm0, %v2866_v0 }
 0x125   : > { %2345 = vmatmul.mubr.bf16.gmra.mrb[84].mxu0 %v2648_v50  ;;  %2481 = vmatmul.mubr.bf16.gmra.mrb[84].mxu1 %v2678_v53 }
 0x126   : > { %2348 = vmatprep.mubr.msk.bf16.mxu0 %vm2867_vm0, %v2866_v0  ;;  %2484 = vmatprep.mubr.msk.bf16.mxu1 %vm2867_vm0, %v2866_v0 }
 0x12d   : > { %2349 = vmatmul.mubr.bf16.gmra.mrb[88].mxu0 %v2650_v52  ;;  %2485 = vmatmul.mubr.bf16.gmra.mrb[88].mxu1 %v2679_v55  ;;  %v2686_v55 = vld [vmem:[%s3033_s11 + $0x1f8] sm:$0xff]  }
 0x12e   : > { %2352 = vmatprep.mubr.msk.bf16.mxu0 %vm2867_vm0, %v2866_v0  ;;  %2488 = vmatprep.mubr.msk.bf16.mxu1 %vm2867_vm0, %v2866_v0 }
 0x135   : > { %2353 = vmatmul.mubr.bf16.gmra.mrb[92].mxu0 %v2652_v54  ;;  %2489 = vmatmul.mubr.bf16.gmra.mrb[92].mxu1 %v2680_v57 }
 0x136   : > { %2356 = vmatprep.mubr.msk.bf16.mxu0 %vm2867_vm0, %v2866_v0  ;;  %2492 = vmatprep.mubr.msk.bf16.mxu1 %vm2867_vm0, %v2866_v0 }
 0x13d   : > { %2357 = vmatmul.mubr.bf16.gmra.mrb[96].mxu0 %v2654_v56  ;;  %2493 = vmatmul.mubr.bf16.gmra.mrb[96].mxu1 %v2681_v59 }
 0x13e   : > { %2360 = vmatprep.mubr.msk.bf16.mxu0 %vm2867_vm0, %v2866_v0  ;;  %2496 = vmatprep.mubr.msk.bf16.mxu1 %vm2867_vm0, %v2866_v0 }
 0x145   : > { %2361 = vmatmul.mubr.bf16.gmra.mrb[100].mxu0 %v2656_v58  ;;  %2497 = vmatmul.mubr.bf16.gmra.mrb[100].mxu1 %v2682_v61  ;;  %v2668_v61 = vld [vmem:[%s3033_s11 + $0xf8] sm:$0xff]  }
 0x146   : > { %2364 = vmatprep.mubr.msk.bf16.mxu0 %vm2867_vm0, %v2866_v0  ;;  %2500 = vmatprep.mubr.msk.bf16.mxu1 %vm2867_vm0, %v2866_v0 }
 0x14d   : > { %2365 = vmatmul.mubr.bf16.gmra.mrb[104].mxu0 %v2658_v60  ;;  %2501 = vmatmul.mubr.bf16.gmra.mrb[104].mxu1 %v2683_v7 }
 0x14e   : > { %2368 = vmatprep.mubr.msk.bf16.mxu0 %vm2867_vm0, %v2866_v0  ;;  %2504 = vmatprep.mubr.msk.bf16.mxu1 %vm2867_vm0, %v2866_v0 }
 0x150   : > { %v849_v62 = vpop.f32.mrb[0].mxu0  ;;  %v1121_v14 = vpop.f32.mrb[0].mxu1 }
 0x151   : > { %1383 = vst [vmem:[%s3223_s20] sm:$0xff] %v849_v62  ;;  %v2262_v63 = vpop.f32.mrb[1].mxu0  ;;  %v1654_v3 = vmul.f32 %v849_v62, %v849_v62  ;;  %1451 = vst [vmem:[%s3223_s20 + $0x220] sm:$0xff] %v1121_v14  ;;  %v2398_v16 = vpop.f32.mrb[1].mxu1  ;;  %v2670_v14 = vld [vmem:[%s3033_s11 + $0x100] sm:$0xff]  }
 0x152   : > { %v852_v2 = vpop.f32.mrb[2].mxu0  ;;  %v1124_v21 = vpop.f32.mrb[2].mxu1 }
 0x153   : > { %1384 = vst [vmem:[%s3223_s20 + $0x8] sm:$0xff] %v852_v2  ;;  %v1516_v4 = vadd.f32 %v852_v2, %v849_v62  ;;  %v1655_v5 = vmul.f32 %v852_v2, %v852_v2  ;;  %v2263_v6 = vpop.f32.mrb[3].mxu0  ;;  %1452 = vst [vmem:[%s3223_s20 + $0x228] sm:$0xff] %v1124_v21  ;;  %v2399_v22 = vpop.f32.mrb[3].mxu1 }
 0x155   : > { %v1787_v8 = vadd.f32 %v1655_v5, %v1654_v3  ;;  %2369 = vmatmul.mubr.bf16.gmra.mrb[108].mxu0 %v2660_v1  ;;  %2505 = vmatmul.mubr.bf16.gmra.mrb[108].mxu1 %v2684_v23 }
 0x156   : > { %2372 = vmatprep.mubr.msk.bf16.mxu0 %vm2867_vm0, %v2866_v0  ;;  %2508 = vmatprep.mubr.msk.bf16.mxu1 %vm2867_vm0, %v2866_v0 }
 0x158   : > { %v857_v9 = vpop.f32.mrb[4].mxu0  ;;  %v1129_v30 = vpop.f32.mrb[4].mxu1 }
 0x159   : > { %1385 = vst [vmem:[%s3223_s20 + $0x10] sm:$0xff] %v857_v9  ;;  %v1517_v10 = vadd.f32 %v1516_v4, %v857_v9  ;;  %v1656_v11 = vmul.f32 %v857_v9, %v857_v9  ;;  %v2266_v12 = vpop.f32.mrb[5].mxu0  ;;  %1453 = vst [vmem:[%s3223_s20 + $0x230] sm:$0xff] %v1129_v30  ;;  %v2402_v32 = vpop.f32.mrb[5].mxu1  ;;  %v2672_v30 = vld [vmem:[%s3033_s11 + $0x108] sm:$0xff]  }
 0x15a   : > { %v860_v15 = vpop.f32.mrb[6].mxu0  ;;  %v1132_v37 = vpop.f32.mrb[6].mxu1 }
 0x15b   : > { %v1788_v17 = vadd.f32 %v1787_v8, %v1656_v11  ;;  %1386 = vst [vmem:[%s3223_s20 + $0x18] sm:$0xff] %v860_v15  ;;  %v1518_v18 = vadd.f32 %v1517_v10, %v860_v15  ;;  %v1657_v19 = vmul.f32 %v860_v15, %v860_v15  ;;  %v2267_v20 = vpop.f32.mrb[7].mxu0  ;;  %1454 = vst [vmem:[%s3223_s20 + $0x238] sm:$0xff] %v1132_v37  ;;  %v2403_v38 = vpop.f32.mrb[7].mxu1  ;;  %v2687_v8 = vld [vmem:[%s3033_s11 + $0x200] sm:$0xff]  }
 0x15d   : > { %v1789_v24 = vadd.f32 %v1788_v17, %v1657_v19  ;;  %2373 = vmatmul.mubr.bf16.gmra.mrb[112].mxu0 %v2662_v13  ;;  %2509 = vmatmul.mubr.bf16.gmra.mrb[112].mxu1 %v2685_v39  ;;  %v2689_v39 = vld [vmem:[%s3033_s11 + $0x210] ss:$0 sps:$4 sm:$0xff]  }
 0x15e   : > { %2376 = vmatprep.mubr.msk.bf16.mxu0 %vm2867_vm0, %v2866_v0  ;;  %2512 = vmatprep.mubr.msk.bf16.mxu1 %vm2867_vm0, %v2866_v0 }
 0x160   : > { %v865_v25 = vpop.f32.mrb[8].mxu0  ;;  %v1137_v46 = vpop.f32.mrb[8].mxu1 }
 0x161   : > { %1387 = vst [vmem:[%s3223_s20 + $0x20] sm:$0xff] %v865_v25  ;;  %v1519_v26 = vadd.f32 %v1518_v18, %v865_v25  ;;  %v1658_v27 = vmul.f32 %v865_v25, %v865_v25  ;;  %v2270_v28 = vpop.f32.mrb[9].mxu0  ;;  %1455 = vst [vmem:[%s3223_s20 + $0x240] sm:$0xff] %v1137_v46  ;;  %v2406_v48 = vpop.f32.mrb[9].mxu1 }
 0x162   : > { %v868_v31 = vpop.f32.mrb[10].mxu0  ;;  %v1140_v53 = vpop.f32.mrb[10].mxu1 }
 0x163   : > { %v1790_v33 = vadd.f32 %v1789_v24, %v1658_v27  ;;  %1388 = vst [vmem:[%s3223_s20 + $0x28] sm:$0xff] %v868_v31  ;;  %v1520_v34 = vadd.f32 %v1519_v26, %v868_v31  ;;  %v1659_v35 = vmul.f32 %v868_v31, %v868_v31  ;;  %v2271_v36 = vpop.f32.mrb[11].mxu0  ;;  %1456 = vst [vmem:[%s3223_s20 + $0x248] sm:$0xff] %v1140_v53  ;;  %v2407_v54 = vpop.f32.mrb[11].mxu1  ;;  %v2688_v24 = vld [vmem:[%s3033_s11 + $0x208] sm:$0xff]  }
 0x165   : > { %v1791_v40 = vadd.f32 %v1790_v33, %v1659_v35  ;;  %2377 = vmatmul.mubr.bf16.gmra.mrb[116].mxu0 %v2664_v29  ;;  %2513 = vmatmul.mubr.bf16.gmra.mrb[116].mxu1 %v2686_v55 }
 0x166   : > { %2380 = vmatprep.mubr.msk.bf16.mxu0 %vm2867_vm0, %v2866_v0  ;;  %2516 = vmatprep.mubr.msk.bf16.mxu1 %vm2867_vm0, %v2866_v0 }
 0x168   : > { %v873_v41 = vpop.f32.mrb[12].mxu0  ;;  %v1145_v62 = vpop.f32.mrb[12].mxu1 }
 0x169   : > { %1389 = vst [vmem:[%s3223_s20 + $0x30] sm:$0xff] %v873_v41  ;;  %v1521_v42 = vadd.f32 %v1520_v34, %v873_v41  ;;  %v1660_v43 = vmul.f32 %v873_v41, %v873_v41  ;;  %v2274_v44 = vpop.f32.mrb[13].mxu0  ;;  %1457 = vst [vmem:[%s3223_s20 + $0x250] sm:$0xff] %v1145_v62  ;;  %v2410_v1 = vpop.f32.mrb[13].mxu1 }
 0x16a   : > { %v876_v47 = vpop.f32.mrb[14].mxu0  ;;  %v1148_v6 = vpop.f32.mrb[14].mxu1 }
 0x16b   : > { %v1792_v49 = vadd.f32 %v1791_v40, %v1660_v43  ;;  %1390 = vst [vmem:[%s3223_s20 + $0x38] sm:$0xff] %v876_v47  ;;  %v1522_v50 = vadd.f32 %v1521_v42, %v876_v47  ;;  %v1661_v51 = vmul.f32 %v876_v47, %v876_v47  ;;  %v2275_v52 = vpop.f32.mrb[15].mxu0  ;;  %1458 = vst [vmem:[%s3223_s20 + $0x258] sm:$0xff] %v1148_v6  ;;  %v2411_v7 = vpop.f32.mrb[15].mxu1 }
 0x16d   : > { %v1793_v56 = vadd.f32 %v1792_v49, %v1661_v51  ;;  %2381 = vmatmul.mubr.bf16.gmra.mrb[120].mxu0 %v2666_v45  ;;  %2517 = vmatmul.mubr.bf16.gmra.mrb[120].mxu1 %v2687_v8 }
 0x16e   : > { %2384 = vmatprep.mubr.msk.bf16.mxu0 %vm2867_vm0, %v2866_v0  ;;  %2520 = vmatprep.mubr.msk.bf16.mxu1 %vm2867_vm0, %v2866_v0 }
 0x170   : > { %v881_v57 = vpop.f32.mrb[16].mxu0  ;;  %v1153_v15 = vpop.f32.mrb[16].mxu1 }
 0x171   : > { %1391 = vst [vmem:[%s3223_s20 + $0x40] sm:$0xff] %v881_v57  ;;  %v1523_v58 = vadd.f32 %v1522_v50, %v881_v57  ;;  %v1662_v59 = vmul.f32 %v881_v57, %v881_v57  ;;  %v2278_v60 = vpop.f32.mrb[17].mxu0  ;;  %1459 = vst [vmem:[%s3223_s20 + $0x260] sm:$0xff] %v1153_v15  ;;  %v2414_v17 = vpop.f32.mrb[17].mxu1 }
 0x172   : > { %v884_v63 = vpop.f32.mrb[18].mxu0  ;;  %v1156_v22 = vpop.f32.mrb[18].mxu1 }
 0x173   : > { %v1794_v2 = vadd.f32 %v1793_v56, %v1662_v59  ;;  %1392 = vst [vmem:[%s3223_s20 + $0x48] sm:$0xff] %v884_v63  ;;  %v1524_v3 = vadd.f32 %v1523_v58, %v884_v63  ;;  %v1663_v4 = vmul.f32 %v884_v63, %v884_v63  ;;  %v2279_v5 = vpop.f32.mrb[19].mxu0  ;;  %1460 = vst [vmem:[%s3223_s20 + $0x268] sm:$0xff] %v1156_v22  ;;  %v2415_v23 = vpop.f32.mrb[19].mxu1 }
 0x175   : > { %v1795_v9 = vadd.f32 %v1794_v2, %v1663_v4  ;;  %2385 = vmatmul.mubr.bf16.gmra.mrb[124].mxu0 %v2668_v61  ;;  %2521 = vmatmul.mubr.bf16.gmra.mrb[124].mxu1 %v2688_v24 }
 0x176   : > { %2388 = vmatprep.mubr.msk.bf16.mxu0 %vm2867_vm0, %v2866_v0  ;;  %2524 = vmatprep.mubr.msk.bf16.mxu1 %vm2867_vm0, %v2866_v0 }
 0x178   : > { %v889_v10 = vpop.f32.mrb[20].mxu0  ;;  %v3285_v31 = vpop.f32.mrb[20].mxu1 }
 0x179   : > { %1393 = vst [vmem:[%s3223_s20 + $0x50] sm:$0xff] %v889_v10  ;;  %v1525_v11 = vadd.f32 %v1524_v3, %v889_v10  ;;  %v1664_v12 = vmul.f32 %v889_v10, %v889_v10  ;;  %v2282_v13 = vpop.f32.mrb[21].mxu0  ;;  %1461 = vst [vmem:[%s3223_s20 + $0x270] sm:$0xff] %v3285_v31  ;;  %v2418_v33 = vpop.f32.mrb[21].mxu1 }
 0x17a   : > { %v892_v16 = vpop.f32.mrb[22].mxu0  ;;  %v3290_v37 = vpop.f32.mrb[22].mxu1 }
 0x17b   : > { %v1796_v18 = vadd.f32 %v1795_v9, %v1664_v12  ;;  %1394 = vst [vmem:[%s3223_s20 + $0x58] sm:$0xff] %v892_v16  ;;  %v1526_v19 = vadd.f32 %v1525_v11, %v892_v16  ;;  %v1665_v20 = vmul.f32 %v892_v16, %v892_v16  ;;  %v2283_v21 = vpop.f32.mrb[23].mxu0  ;;  %1462 = vst [vmem:[%s3223_s20 + $0x278] sm:$0xff] %v3290_v37  ;;  %v2419_v38 = vpop.f32.mrb[23].mxu1 }
 0x17d   : > { %v1797_v25 = vadd.f32 %v1796_v18, %v1665_v20  ;;  %2389 = vmatmul.mubr.bf16.gmra.mrb[128].mxu0 %v2670_v14  ;;  %2525 = vmatmul.mubr.bf16.gmra.mrb[128].mxu1 %v2689_v39 }
 0x17e   : > { %2392 = vmatprep.mubr.msk.bf16.mxu0 %vm2867_vm0, %v2866_v0 }
 0x180   : > { %v897_v26 = vpop.f32.mrb[24].mxu0  ;;  %v3296_v45 = vpop.f32.mrb[24].mxu1 }
 0x181   : > { %1395 = vst [vmem:[%s3223_s20 + $0x60] sm:$0xff] %v897_v26  ;;  %v1527_v27 = vadd.f32 %v1526_v19, %v897_v26  ;;  %v1666_v28 = vmul.f32 %v897_v26, %v897_v26  ;;  %v2286_v29 = vpop.f32.mrb[25].mxu0  ;;  %1463 = vst [vmem:[%s3223_s20 + $0x280] sm:$0xff] %v3296_v45  ;;  %v2422_v47 = vpop.f32.mrb[25].mxu1 }
 0x182   : > { %v900_v32 = vpop.f32.mrb[26].mxu0  ;;  %v3301_v52 = vpop.f32.mrb[26].mxu1 }
 0x183   : > { %v1798_v34 = vadd.f32 %v1797_v25, %v1666_v28  ;;  %1396 = vst [vmem:[%s3223_s20 + $0x68] sm:$0xff] %v900_v32  ;;  %v1528_v35 = vadd.f32 %v1527_v27, %v900_v32  ;;  %v1667_v36 = vmul.f32 %v900_v32, %v900_v32  ;;  %v2287_v0 = vpop.f32.mrb[27].mxu0  ;;  %1464 = vst [vmem:[%s3223_s20 + $0x288] sm:$0xff] %v3301_v52  ;;  %v2423_v53 = vpop.f32.mrb[27].mxu1 }
 0x185   : > { %v1799_v40 = vadd.f32 %v1798_v34, %v1667_v36  ;;  %2393 = vmatmul.mubr.bf16.gmra.mrb[132].mxu0 %v2672_v30 }
 0x188   : > { %v905_v41 = vpop.f32.mrb[28].mxu0  ;;  %v3306_v59 = vpop.f32.mrb[28].mxu1 }
 0x189   : > { %1397 = vst [vmem:[%s3223_s20 + $0x70] sm:$0xff] %v905_v41  ;;  %v1529_v42 = vadd.f32 %v1528_v35, %v905_v41  ;;  %v1668_v43 = vmul.f32 %v905_v41, %v905_v41  ;;  %v2290_v44 = vpop.f32.mrb[29].mxu0  ;;  %1465 = vst [vmem:[%s3223_s20 + $0x290] sm:$0xff] %v3306_v59  ;;  %v2426_v61 = vpop.f32.mrb[29].mxu1 }
 0x18a   : > { %v908_v46 = vpop.f32.mrb[30].mxu0  ;;  %v3311_v3 = vpop.f32.mrb[30].mxu1 }
 0x18b   : > { %v1800_v48 = vadd.f32 %v1799_v40, %v1668_v43  ;;  %1398 = vst [vmem:[%s3223_s20 + $0x78] sm:$0xff] %v908_v46  ;;  %v1530_v49 = vadd.f32 %v1529_v42, %v908_v46  ;;  %v1669_v50 = vmul.f32 %v908_v46, %v908_v46  ;;  %v2291_v51 = vpop.f32.mrb[31].mxu0  ;;  %1466 = vst [vmem:[%s3223_s20 + $0x298] sm:$0xff] %v3311_v3  ;;  %v2427_v4 = vpop.f32.mrb[31].mxu1 }
 0x18d   : > { %v1801_v54 = vadd.f32 %v1800_v48, %v1669_v50 }
 0x190   : > { %v913_v55 = vpop.f32.mrb[32].mxu0  ;;  %v3316_v10 = vpop.f32.mrb[32].mxu1 }
 0x191   : > { %1399 = vst [vmem:[%s3223_s20 + $0x80] sm:$0xff] %v913_v55  ;;  %v1531_v56 = vadd.f32 %v1530_v49, %v913_v55  ;;  %v1670_v57 = vmul.f32 %v913_v55, %v913_v55  ;;  %v2294_v58 = vpop.f32.mrb[33].mxu0  ;;  %1467 = vst [vmem:[%s3223_s20 + $0x2a0] sm:$0xff] %v3316_v10  ;;  %v2430_v12 = vpop.f32.mrb[33].mxu1 }
 0x192   : > { %v916_v60 = vpop.f32.mrb[34].mxu0  ;;  %v3321_v17 = vpop.f32.mrb[34].mxu1 }
 0x193   : > { %v1802_v62 = vadd.f32 %v1801_v54, %v1670_v57  ;;  %1400 = vst [vmem:[%s3223_s20 + $0x88] sm:$0xff] %v916_v60  ;;  %v1532_v63 = vadd.f32 %v1531_v56, %v916_v60  ;;  %v1671_v1 = vmul.f32 %v916_v60, %v916_v60  ;;  %v2295_v2 = vpop.f32.mrb[35].mxu0  ;;  %1468 = vst [vmem:[%s3223_s20 + $0x2a8] sm:$0xff] %v3321_v17  ;;  %v2431_v18 = vpop.f32.mrb[35].mxu1 }
 0x195   : > { %v1803_v5 = vadd.f32 %v1802_v62, %v1671_v1 }
 0x198   : > { %v921_v6 = vpop.f32.mrb[36].mxu0  ;;  %v3326_v24 = vpop.f32.mrb[36].mxu1 }
 0x199   : > { %1401 = vst [vmem:[%s3223_s20 + $0x90] sm:$0xff] %v921_v6  ;;  %v1533_v7 = vadd.f32 %v1532_v63, %v921_v6  ;;  %v1672_v8 = vmul.f32 %v921_v6, %v921_v6  ;;  %v2298_v9 = vpop.f32.mrb[37].mxu0  ;;  %1469 = vst [vmem:[%s3223_s20 + $0x2b0] sm:$0xff] %v3326_v24  ;;  %v2434_v26 = vpop.f32.mrb[37].mxu1 }
 0x19a   : > { %v924_v11 = vpop.f32.mrb[38].mxu0  ;;  %v3331_v32 = vpop.f32.mrb[38].mxu1 }
 0x19b   : > { %v1804_v13 = vadd.f32 %v1803_v5, %v1672_v8  ;;  %1402 = vst [vmem:[%s3223_s20 + $0x98] sm:$0xff] %v924_v11  ;;  %v1534_v14 = vadd.f32 %v1533_v7, %v924_v11  ;;  %v1673_v15 = vmul.f32 %v924_v11, %v924_v11  ;;  %v2299_v16 = vpop.f32.mrb[39].mxu0  ;;  %1470 = vst [vmem:[%s3223_s20 + $0x2b8] sm:$0xff] %v3331_v32  ;;  %v2435_v33 = vpop.f32.mrb[39].mxu1 }
 0x19d   : > { %v1805_v19 = vadd.f32 %v1804_v13, %v1673_v15 }
 0x1a0   : > { %v929_v20 = vpop.f32.mrb[40].mxu0  ;;  %v3336_v39 = vpop.f32.mrb[40].mxu1 }
 0x1a1   : > { %1403 = vst [vmem:[%s3223_s20 + $0xa0] sm:$0xff] %v929_v20  ;;  %v1535_v21 = vadd.f32 %v1534_v14, %v929_v20  ;;  %v1674_v22 = vmul.f32 %v929_v20, %v929_v20  ;;  %v2302_v23 = vpop.f32.mrb[41].mxu0  ;;  %1471 = vst [vmem:[%s3223_s20 + $0x2c0] sm:$0xff] %v3336_v39  ;;  %v2438_v41 = vpop.f32.mrb[41].mxu1 }
 0x1a2   : > { %v932_v25 = vpop.f32.mrb[42].mxu0  ;;  %v3341_v47 = vpop.f32.mrb[42].mxu1 }
 0x1a3   : > { %v1806_v27 = vadd.f32 %v1805_v19, %v1674_v22  ;;  %1404 = vst [vmem:[%s3223_s20 + $0xa8] sm:$0xff] %v932_v25  ;;  %v1536_v28 = vadd.f32 %v1535_v21, %v932_v25  ;;  %v1675_v29 = vmul.f32 %v932_v25, %v932_v25  ;;  %v2303_v30 = vpop.f32.mrb[43].mxu0  ;;  %1472 = vst [vmem:[%s3223_s20 + $0x2c8] sm:$0xff] %v3341_v47  ;;  %v2439_v48 = vpop.f32.mrb[43].mxu1 }
 0x1a5   : > { %v1807_v34 = vadd.f32 %v1806_v27, %v1675_v29 }
 0x1a8   : > { %v937_v35 = vpop.f32.mrb[44].mxu0  ;;  %v3346_v55 = vpop.f32.mrb[44].mxu1 }
 0x1a9   : > { %1405 = vst [vmem:[%s3223_s20 + $0xb0] sm:$0xff] %v937_v35  ;;  %v1537_v36 = vadd.f32 %v1536_v28, %v937_v35  ;;  %v1676_v0 = vmul.f32 %v937_v35, %v937_v35  ;;  %v2306_v38 = vpop.f32.mrb[45].mxu0  ;;  %1473 = vst [vmem:[%s3223_s20 + $0x2d0] sm:$0xff] %v3346_v55  ;;  %v2442_v57 = vpop.f32.mrb[45].mxu1 }
 0x1aa   : > { %v940_v40 = vpop.f32.mrb[46].mxu0  ;;  %v3351_v63 = vpop.f32.mrb[46].mxu1 }
 0x1ab   : > { %v1808_v42 = vadd.f32 %v1807_v34, %v1676_v0  ;;  %1406 = vst [vmem:[%s3223_s20 + $0xb8] sm:$0xff] %v940_v40  ;;  %v1538_v43 = vadd.f32 %v1537_v36, %v940_v40  ;;  %v1677_v44 = vmul.f32 %v940_v40, %v940_v40  ;;  %v2307_v46 = vpop.f32.mrb[47].mxu0  ;;  %1474 = vst [vmem:[%s3223_s20 + $0x2d8] sm:$0xff] %v3351_v63  ;;  %v2443_v1 = vpop.f32.mrb[47].mxu1 }
 0x1ad   : > { %v1809_v49 = vadd.f32 %v1808_v42, %v1677_v44 }
 0x1b0   : > { %v945_v50 = vpop.f32.mrb[48].mxu0  ;;  %v3356_v8 = vpop.f32.mrb[48].mxu1 }
 0x1b1   : > { %1407 = vst [vmem:[%s3223_s20 + $0xc0] sm:$0xff] %v945_v50  ;;  %v1539_v51 = vadd.f32 %v1538_v43, %v945_v50  ;;  %v1678_v53 = vmul.f32 %v945_v50, %v945_v50  ;;  %v2310_v54 = vpop.f32.mrb[49].mxu0  ;;  %1475 = vst [vmem:[%s3223_s20 + $0x2e0] sm:$0xff] %v3356_v8  ;;  %v2446_v11 = vpop.f32.mrb[49].mxu1 }
 0x1b2   : > { %v948_v56 = vpop.f32.mrb[50].mxu0  ;;  %v3361_v16 = vpop.f32.mrb[50].mxu1 }
 0x1b3   : > { %v1810_v58 = vadd.f32 %v1809_v49, %v1678_v53  ;;  %1408 = vst [vmem:[%s3223_s20 + $0xc8] sm:$0xff] %v948_v56  ;;  %v1540_v60 = vadd.f32 %v1539_v51, %v948_v56  ;;  %v1679_v61 = vmul.f32 %v948_v56, %v948_v56  ;;  %v2311_v62 = vpop.f32.mrb[51].mxu0  ;;  %1476 = vst [vmem:[%s3223_s20 + $0x2e8] sm:$0xff] %v3361_v16  ;;  %v2447_v18 = vpop.f32.mrb[51].mxu1 }
 0x1b5   : > { %v1811_v2 = vadd.f32 %v1810_v58, %v1679_v61 }
 0x1b8   : > { %v953_v4 = vpop.f32.mrb[52].mxu0  ;;  %v3366_v25 = vpop.f32.mrb[52].mxu1 }
 0x1b9   : > { %1409 = vst [vmem:[%s3223_s20 + $0xd0] sm:$0xff] %v953_v4  ;;  %v1541_v5 = vadd.f32 %v1540_v60, %v953_v4  ;;  %v1680_v6 = vmul.f32 %v953_v4, %v953_v4  ;;  %v2314_v7 = vpop.f32.mrb[53].mxu0  ;;  %1477 = vst [vmem:[%s3223_s20 + $0x2f0] sm:$0xff] %v3366_v25  ;;  %v2450_v27 = vpop.f32.mrb[53].mxu1 }
 0x1ba   : > { %v956_v9 = vpop.f32.mrb[54].mxu0  ;;  %v3371_v34 = vpop.f32.mrb[54].mxu1 }
 0x1bb   : > { %v1812_v12 = vadd.f32 %v1811_v2, %v1680_v6  ;;  %1410 = vst [vmem:[%s3223_s20 + $0xd8] sm:$0xff] %v956_v9  ;;  %v1542_v13 = vadd.f32 %v1541_v5, %v956_v9  ;;  %v1681_v14 = vmul.f32 %v956_v9, %v956_v9  ;;  %v2315_v15 = vpop.f32.mrb[55].mxu0  ;;  %1478 = vst [vmem:[%s3223_s20 + $0x2f8] sm:$0xff] %v3371_v34  ;;  %v2451_v35 = vpop.f32.mrb[55].mxu1 }
 0x1bd   : > { %v1813_v19 = vadd.f32 %v1812_v12, %v1681_v14 }
 0x1c0   : > { %v961_v20 = vpop.f32.mrb[56].mxu0  ;;  %v3376_v42 = vpop.f32.mrb[56].mxu1 }
 0x1c1   : > { %1411 = vst [vmem:[%s3223_s20 + $0xe0] sm:$0xff] %v961_v20  ;;  %v1543_v21 = vadd.f32 %v1542_v13, %v961_v20  ;;  %v1682_v22 = vmul.f32 %v961_v20, %v961_v20  ;;  %v2318_v23 = vpop.f32.mrb[57].mxu0  ;;  %1479 = vst [vmem:[%s3223_s20 + $0x300] sm:$0xff] %v3376_v42  ;;  %v2454_v44 = vpop.f32.mrb[57].mxu1 }
 0x1c2   : > { %v964_v26 = vpop.f32.mrb[58].mxu0  ;;  %v3381_v51 = vpop.f32.mrb[58].mxu1 }
 0x1c3   : > { %v1814_v28 = vadd.f32 %v1813_v19, %v1682_v22  ;;  %1412 = vst [vmem:[%s3223_s20 + $0xe8] sm:$0xff] %v964_v26  ;;  %v1544_v29 = vadd.f32 %v1543_v21, %v964_v26  ;;  %v1683_v30 = vmul.f32 %v964_v26, %v964_v26  ;;  %v2319_v33 = vpop.f32.mrb[59].mxu0  ;;  %1480 = vst [vmem:[%s3223_s20 + $0x308] sm:$0xff] %v3381_v51  ;;  %v2455_v53 = vpop.f32.mrb[59].mxu1 }
 0x1c5   : > { %v1815_v36 = vadd.f32 %v1814_v28, %v1683_v30 }
 0x1c8   : > { %v969_v0 = vpop.f32.mrb[60].mxu0  ;;  %v3386_v61 = vpop.f32.mrb[60].mxu1 }
 0x1c9   : > { %1413 = vst [vmem:[%s3223_s20 + $0xf0] sm:$0xff] %v969_v0  ;;  %v1545_v38 = vadd.f32 %v1544_v29, %v969_v0  ;;  %v1684_v40 = vmul.f32 %v969_v0, %v969_v0  ;;  %v2322_v41 = vpop.f32.mrb[61].mxu0  ;;  %1481 = vst [vmem:[%s3223_s20 + $0x310] sm:$0xff] %v3386_v61  ;;  %v2458_v1 = vpop.f32.mrb[61].mxu1 }
 0x1ca   : > { %v972_v43 = vpop.f32.mrb[62].mxu0  ;;  %v3391_v7 = vpop.f32.mrb[62].mxu1 }
 0x1cb   : > { %v1816_v46 = vadd.f32 %v1815_v36, %v1684_v40  ;;  %1414 = vst [vmem:[%s3223_s20 + $0xf8] sm:$0xff] %v972_v43  ;;  %v1546_v48 = vadd.f32 %v1545_v38, %v972_v43  ;;  %v1685_v49 = vmul.f32 %v972_v43, %v972_v43  ;;  %v2323_v50 = vpop.f32.mrb[63].mxu0  ;;  %1482 = vst [vmem:[%s3223_s20 + $0x318] sm:$0xff] %v3391_v7  ;;  %v2459_v9 = vpop.f32.mrb[63].mxu1 }
 0x1cd   : > { %v1817_v54 = vadd.f32 %v1816_v46, %v1685_v49 }
 0x1d0   : > { %v977_v56 = vpop.f32.mrb[64].mxu0  ;;  %v3396_v18 = vpop.f32.mrb[64].mxu1 }
 0x1d1   : > { %1415 = vst [vmem:[%s3223_s20 + $0x100] sm:$0xff] %v977_v56  ;;  %v1547_v57 = vadd.f32 %v1546_v48, %v977_v56  ;;  %v1686_v58 = vmul.f32 %v977_v56, %v977_v56  ;;  %v2326_v60 = vpop.f32.mrb[65].mxu0  ;;  %1483 = vst [vmem:[%s3223_s20 + $0x320] sm:$0xff] %v3396_v18  ;;  %v2462_v20 = vpop.f32.mrb[65].mxu1 }
 0x1d2   : > { %v980_v62 = vpop.f32.mrb[66].mxu0  ;;  %v3401_v27 = vpop.f32.mrb[66].mxu1 }
 0x1d3   : > { %v1818_v2 = vadd.f32 %v1817_v54, %v1686_v58  ;;  %1416 = vst [vmem:[%s3223_s20 + $0x108] sm:$0xff] %v980_v62  ;;  %v1548_v4 = vadd.f32 %v1547_v57, %v980_v62  ;;  %v1687_v5 = vmul.f32 %v980_v62, %v980_v62  ;;  %v2327_v6 = vpop.f32.mrb[67].mxu0  ;;  %1484 = vst [vmem:[%s3223_s20 + $0x328] sm:$0xff] %v3401_v27  ;;  %v2463_v28 = vpop.f32.mrb[67].mxu1 }
 0x1d5   : > { %v1819_v11 = vadd.f32 %v1818_v2, %v1687_v5 }
 0x1d8   : > { %v985_v12 = vpop.f32.mrb[68].mxu0  ;;  %v3406_v0 = vpop.f32.mrb[68].mxu1 }
 0x1d9   : > { %1417 = vst [vmem:[%s3223_s20 + $0x110] sm:$0xff] %v985_v12  ;;  %v1549_v13 = vadd.f32 %v1548_v4, %v985_v12  ;;  %v1688_v14 = vmul.f32 %v985_v12, %v985_v12  ;;  %v2330_v15 = vpop.f32.mrb[69].mxu0  ;;  %1485 = vst [vmem:[%s3223_s20 + $0x330] sm:$0xff] %v3406_v0  ;;  %v2466_v40 = vpop.f32.mrb[69].mxu1 }
 0x1da   : > { %v988_v19 = vpop.f32.mrb[70].mxu0  ;;  %v3411_v48 = vpop.f32.mrb[70].mxu1 }
 0x1db   : > { %v1820_v21 = vadd.f32 %v1819_v11, %v1688_v14  ;;  %1418 = vst [vmem:[%s3223_s20 + $0x118] sm:$0xff] %v988_v19  ;;  %v1550_v22 = vadd.f32 %v1549_v13, %v988_v19  ;;  %v1689_v23 = vmul.f32 %v988_v19, %v988_v19  ;;  %v2331_v26 = vpop.f32.mrb[71].mxu0  ;;  %1486 = vst [vmem:[%s3223_s20 + $0x338] sm:$0xff] %v3411_v48  ;;  %v2467_v49 = vpop.f32.mrb[71].mxu1 }
 0x1dd   : > { %v1821_v29 = vadd.f32 %v1820_v21, %v1689_v23 }
 0x1e0   : > { %v993_v30 = vpop.f32.mrb[72].mxu0  ;;  %v3416_v58 = vpop.f32.mrb[72].mxu1 }
 0x1e1   : > { %1419 = vst [vmem:[%s3223_s20 + $0x120] sm:$0xff] %v993_v30  ;;  %v1551_v33 = vadd.f32 %v1550_v22, %v993_v30  ;;  %v1690_v35 = vmul.f32 %v993_v30, %v993_v30  ;;  %v2334_v36 = vpop.f32.mrb[73].mxu0  ;;  %1487 = vst [vmem:[%s3223_s20 + $0x340] sm:$0xff] %v3416_v58  ;;  %v2470_v62 = vpop.f32.mrb[73].mxu1 }
 0x1e2   : > { %v996_v38 = vpop.f32.mrb[74].mxu0  ;;  %v3421_v6 = vpop.f32.mrb[74].mxu1 }
 0x1e3   : > { %v1822_v41 = vadd.f32 %v1821_v29, %v1690_v35  ;;  %1420 = vst [vmem:[%s3223_s20 + $0x128] sm:$0xff] %v996_v38  ;;  %v1552_v43 = vadd.f32 %v1551_v33, %v996_v38  ;;  %v1691_v44 = vmul.f32 %v996_v38, %v996_v38  ;;  %v2335_v46 = vpop.f32.mrb[75].mxu0  ;;  %1488 = vst [vmem:[%s3223_s20 + $0x348] sm:$0xff] %v3421_v6  ;;  %v2471_v9 = vpop.f32.mrb[75].mxu1 }
 0x1e5   : > { %v1823_v50 = vadd.f32 %v1822_v41, %v1691_v44 }
 0x1e8   : > { %v1001_v53 = vpop.f32.mrb[76].mxu0  ;;  %v3426_v19 = vpop.f32.mrb[76].mxu1 }
 0x1e9   : > { %1421 = vst [vmem:[%s3223_s20 + $0x130] sm:$0xff] %v1001_v53  ;;  %v1553_v54 = vadd.f32 %v1552_v43, %v1001_v53  ;;  %v1692_v56 = vmul.f32 %v1001_v53, %v1001_v53  ;;  %v2338_v57 = vpop.f32.mrb[77].mxu0  ;;  %1489 = vst [vmem:[%s3223_s20 + $0x350] sm:$0xff] %v3426_v19  ;;  %v2474_v21 = vpop.f32.mrb[77].mxu1 }
 0x1ea   : > { %v1004_v60 = vpop.f32.mrb[78].mxu0  ;;  %v3431_v29 = vpop.f32.mrb[78].mxu1 }
 0x1eb   : > { %v1824_v1 = vadd.f32 %v1823_v50, %v1692_v56  ;;  %1422 = vst [vmem:[%s3223_s20 + $0x138] sm:$0xff] %v1004_v60  ;;  %v1554_v2 = vadd.f32 %v1553_v54, %v1004_v60  ;;  %v1693_v4 = vmul.f32 %v1004_v60, %v1004_v60  ;;  %v2339_v5 = vpop.f32.mrb[79].mxu0  ;;  %1490 = vst [vmem:[%s3223_s20 + $0x358] sm:$0xff] %v3431_v29  ;;  %v2475_v30 = vpop.f32.mrb[79].mxu1 }
 0x1ed   : > { %v1825_v11 = vadd.f32 %v1824_v1, %v1693_v4 }
 0x1f0   : > { %v1009_v12 = vpop.f32.mrb[80].mxu0  ;;  %v3436_v41 = vpop.f32.mrb[80].mxu1 }
 0x1f1   : > { %1423 = vst [vmem:[%s3223_s20 + $0x140] sm:$0xff] %v1009_v12  ;;  %v1555_v13 = vadd.f32 %v1554_v2, %v1009_v12  ;;  %v1694_v14 = vmul.f32 %v1009_v12, %v1009_v12  ;;  %v2342_v15 = vpop.f32.mrb[81].mxu0  ;;  %1491 = vst [vmem:[%s3223_s20 + $0x360] sm:$0xff] %v3436_v41  ;;  %v2478_v44 = vpop.f32.mrb[81].mxu1 }
 0x1f2   : > { %v1012_v20 = vpop.f32.mrb[82].mxu0  ;;  %v3441_v54 = vpop.f32.mrb[82].mxu1 }
 0x1f3   : > { %v1826_v22 = vadd.f32 %v1825_v11, %v1694_v14  ;;  %1424 = vst [vmem:[%s3223_s20 + $0x148] sm:$0xff] %v1012_v20  ;;  %v1556_v23 = vadd.f32 %v1555_v13, %v1012_v20  ;;  %v1695_v26 = vmul.f32 %v1012_v20, %v1012_v20  ;;  %v2343_v28 = vpop.f32.mrb[83].mxu0  ;;  %1492 = vst [vmem:[%s3223_s20 + $0x368] sm:$0xff] %v3441_v54  ;;  %v2479_v56 = vpop.f32.mrb[83].mxu1 }
 0x1f5   : > { %v1827_v33 = vadd.f32 %v1826_v22, %v1695_v26 }
 0x1f8   : > { %v1017_v35 = vpop.f32.mrb[84].mxu0  ;;  %v3446_v4 = vpop.f32.mrb[84].mxu1 }
 0x1f9   : > { %1425 = vst [vmem:[%s3223_s20 + $0x150] sm:$0xff] %v1017_v35  ;;  %v1557_v36 = vadd.f32 %v1556_v23, %v1017_v35  ;;  %v1696_v38 = vmul.f32 %v1017_v35, %v1017_v35  ;;  %v2346_v40 = vpop.f32.mrb[85].mxu0  ;;  %1493 = vst [vmem:[%s3223_s20 + $0x370] sm:$0xff] %v3446_v4  ;;  %v2482_v9 = vpop.f32.mrb[85].mxu1 }
 0x1fa   : > { %v1020_v43 = vpop.f32.mrb[86].mxu0  ;;  %v3451_v15 = vpop.f32.mrb[86].mxu1 }
 0x1fb   : > { %v1828_v46 = vadd.f32 %v1827_v33, %v1696_v38  ;;  %1426 = vst [vmem:[%s3223_s20 + $0x158] sm:$0xff] %v1020_v43  ;;  %v1558_v49 = vadd.f32 %v1557_v36, %v1020_v43  ;;  %v1697_v50 = vmul.f32 %v1020_v43, %v1020_v43  ;;  %v2347_v53 = vpop.f32.mrb[87].mxu0  ;;  %1494 = vst [vmem:[%s3223_s20 + $0x378] sm:$0xff] %v3451_v15  ;;  %v2483_v20 = vpop.f32.mrb[87].mxu1 }
 0x1fd   : > { %v1829_v57 = vadd.f32 %v1828_v46, %v1697_v50 }
 0x200   : > { %v1025_v60 = vpop.f32.mrb[88].mxu0  ;;  %v3456_v30 = vpop.f32.mrb[88].mxu1 }
 0x201   : > { %1427 = vst [vmem:[%s3223_s20 + $0x160] sm:$0xff] %v1025_v60  ;;  %v1559_v62 = vadd.f32 %v1558_v49, %v1025_v60  ;;  %v1698_v1 = vmul.f32 %v1025_v60, %v1025_v60  ;;  %v2350_v2 = vpop.f32.mrb[89].mxu0  ;;  %1495 = vst [vmem:[%s3223_s20 + $0x380] sm:$0xff] %v3456_v30  ;;  %v2486_v35 = vpop.f32.mrb[89].mxu1 }
 0x202   : > { %v1028_v5 = vpop.f32.mrb[90].mxu0  ;;  %v3461_v44 = vpop.f32.mrb[90].mxu1 }
 0x203   : > { %v1830_v11 = vadd.f32 %v1829_v57, %v1698_v1  ;;  %1428 = vst [vmem:[%s3223_s20 + $0x168] sm:$0xff] %v1028_v5  ;;  %v1560_v12 = vadd.f32 %v1559_v62, %v1028_v5  ;;  %v1699_v13 = vmul.f32 %v1028_v5, %v1028_v5  ;;  %v2351_v14 = vpop.f32.mrb[91].mxu0  ;;  %1496 = vst [vmem:[%s3223_s20 + $0x388] sm:$0xff] %v3461_v44  ;;  %v2487_v46 = vpop.f32.mrb[91].mxu1 }
 0x205   : > { %v1831_v21 = vadd.f32 %v1830_v11, %v1699_v13 }
 0x208   : > { %v1033_v22 = vpop.f32.mrb[92].mxu0  ;;  %v3466_v60 = vpop.f32.mrb[92].mxu1 }
 0x209   : > { %1429 = vst [vmem:[%s3223_s20 + $0x170] sm:$0xff] %v1033_v22  ;;  %v1561_v23 = vadd.f32 %v1560_v12, %v1033_v22  ;;  %v1700_v26 = vmul.f32 %v1033_v22, %v1033_v22  ;;  %v2354_v28 = vpop.f32.mrb[93].mxu0  ;;  %1497 = vst [vmem:[%s3223_s20 + $0x390] sm:$0xff] %v3466_v60  ;;  %v2490_v1 = vpop.f32.mrb[93].mxu1 }
 0x20a   : > { %v1036_v33 = vpop.f32.mrb[94].mxu0  ;;  %v3471_v12 = vpop.f32.mrb[94].mxu1 }
 0x20b   : > { %v1832_v36 = vadd.f32 %v1831_v21, %v1700_v26  ;;  %1430 = vst [vmem:[%s3223_s20 + $0x178] sm:$0xff] %v1036_v33  ;;  %v1562_v38 = vadd.f32 %v1561_v23, %v1036_v33  ;;  %v1701_v40 = vmul.f32 %v1036_v33, %v1036_v33  ;;  %v2355_v43 = vpop.f32.mrb[95].mxu0  ;;  %1498 = vst [vmem:[%s3223_s20 + $0x398] sm:$0xff] %v3471_v12  ;;  %v2491_v13 = vpop.f32.mrb[95].mxu1 }
 0x20d   : > { %v1833_v49 = vadd.f32 %v1832_v36, %v1701_v40 }
 0x210   : > { %v1041_v50 = vpop.f32.mrb[96].mxu0  ;;  %v3476_v26 = vpop.f32.mrb[96].mxu1 }
 0x211   : > { %1431 = vst [vmem:[%s3223_s20 + $0x180] sm:$0xff] %v1041_v50  ;;  %v1563_v53 = vadd.f32 %v1562_v38, %v1041_v50  ;;  %v1702_v56 = vmul.f32 %v1041_v50, %v1041_v50  ;;  %v2358_v57 = vpop.f32.mrb[97].mxu0  ;;  %1499 = vst [vmem:[%s3223_s20 + $0x3a0] sm:$0xff] %v3476_v26  ;;  %v2494_v33 = vpop.f32.mrb[97].mxu1 }
 0x212   : > { %v1044_v62 = vpop.f32.mrb[98].mxu0  ;;  %v3481_v43 = vpop.f32.mrb[98].mxu1 }
 0x213   : > { %v1834_v2 = vadd.f32 %v1833_v49, %v1702_v56  ;;  %1432 = vst [vmem:[%s3223_s20 + $0x188] sm:$0xff] %v1044_v62  ;;  %v1564_v5 = vadd.f32 %v1563_v53, %v1044_v62  ;;  %v1703_v9 = vmul.f32 %v1044_v62, %v1044_v62  ;;  %v2359_v11 = vpop.f32.mrb[99].mxu0  ;;  %1500 = vst [vmem:[%s3223_s20 + $0x3a8] sm:$0xff] %v3481_v43  ;;  %v2495_v46 = vpop.f32.mrb[99].mxu1 }
 0x215   : > { %v1835_v14 = vadd.f32 %v1834_v2, %v1703_v9 }
 0x218   : > { %v1049_v20 = vpop.f32.mrb[100].mxu0  ;;  %v3486_v62 = vpop.f32.mrb[100].mxu1 }
 0x219   : > { %1433 = vst [vmem:[%s3223_s20 + $0x190] sm:$0xff] %v1049_v20  ;;  %v1565_v21 = vadd.f32 %v1564_v5, %v1049_v20  ;;  %v1704_v22 = vmul.f32 %v1049_v20, %v1049_v20  ;;  %v2362_v23 = vpop.f32.mrb[101].mxu0  ;;  %1501 = vst [vmem:[%s3223_s20 + $0x3b0] sm:$0xff] %v3486_v62  ;;  %v2498_v2 = vpop.f32.mrb[101].mxu1 }
 0x21a   : > { %v1052_v28 = vpop.f32.mrb[102].mxu0 }
 0x21b   : > { %v1836_v35 = vadd.f32 %v1835_v14, %v1704_v22  ;;  %1434 = vst [vmem:[%s3223_s20 + $0x198] sm:$0xff] %v1052_v28  ;;  %v1566_v36 = vadd.f32 %v1565_v21, %v1052_v28  ;;  %v1705_v38 = vmul.f32 %v1052_v28, %v1052_v28  ;;  %v2363_v40 = vpop.f32.mrb[103].mxu0  ;;  %v3491_v14 = vpop.f32.mrb[102].mxu1 }
 0x21c   : > { %1502 = vst [vmem:[%s3223_s20 + $0x3b8] sm:$0xff] %v3491_v14  ;;  %v2499_v20 = vpop.f32.mrb[103].mxu1 }
 0x21d   : > { %v1837_v49 = vadd.f32 %v1836_v35, %v1705_v38 }
 0x220   : > { %v1057_v50 = vpop.f32.mrb[104].mxu0  ;;  %v3496_v35 = vpop.f32.mrb[104].mxu1 }
 0x221   : > { %1435 = vst [vmem:[%s3223_s20 + $0x1a0] sm:$0xff] %v1057_v50  ;;  %v1567_v53 = vadd.f32 %v1566_v36, %v1057_v50  ;;  %v1706_v56 = vmul.f32 %v1057_v50, %v1057_v50  ;;  %v2366_v57 = vpop.f32.mrb[105].mxu0  ;;  %1503 = vst [vmem:[%s3223_s20 + $0x3c0] sm:$0xff] %v3496_v35  ;;  %v2502_v38 = vpop.f32.mrb[105].mxu1 }
 0x222   : > { %v1060_v1 = vpop.f32.mrb[106].mxu0 }
 0x223   : > { %v1838_v5 = vadd.f32 %v1837_v49, %v1706_v56  ;;  %1436 = vst [vmem:[%s3223_s20 + $0x1a8] sm:$0xff] %v1060_v1  ;;  %v1568_v9 = vadd.f32 %v1567_v53, %v1060_v1  ;;  %v1707_v11 = vmul.f32 %v1060_v1, %v1060_v1  ;;  %v2367_v13 = vpop.f32.mrb[107].mxu0  ;;  %v3501_v53 = vpop.f32.mrb[106].mxu1 }
 0x224   : > { %3859 = vst [vmem:[#allocation14_spill] sm:$0xff] %v3501_v53  ;;  %1504 = vst [vmem:[%s3223_s20 + $0x3c8] sm:$0xff] %v3501_v53  ;;  %v2503_v56 = vpop.f32.mrb[107].mxu1 }
 0x225   : > { %v1839_v21 = vadd.f32 %v1838_v5, %v1707_v11 }
 0x228   : > { %v1065_v22 = vpop.f32.mrb[108].mxu0  ;;  %v3506_v11 = vpop.f32.mrb[108].mxu1 }
 0x229   : > { %1437 = vst [vmem:[%s3223_s20 + $0x1b0] sm:$0xff] %v1065_v22  ;;  %v1569_v23 = vadd.f32 %v1568_v9, %v1065_v22  ;;  %v1708_v28 = vmul.f32 %v1065_v22, %v1065_v22  ;;  %v2370_v33 = vpop.f32.mrb[109].mxu0  ;;  %3860 = vst [vmem:[#allocation15_spill] sm:$0xff] %v3506_v11  ;;  %v2506_v20 = vpop.f32.mrb[109].mxu1 }
 0x22a   : > { %v1068_v36 = vpop.f32.mrb[110].mxu0  ;;  %1505 = vst [vmem:[%s3223_s20 + $0x3d0] sm:$0xff] %v3506_v11  ;;  %v3511_v33 = vpop.f32.mrb[110].mxu1  ;;  %v2694_v11 = vld [vmem:[%s3223_s20 + $0x240] sm:$0xff] }
 0x22b   : > { %v1840_v40 = vadd.f32 %v1839_v21, %v1708_v28  ;;  %1438 = vst [vmem:[%s3223_s20 + $0x1b8] sm:$0xff] %v1068_v36  ;;  %v1570_v46 = vadd.f32 %v1569_v23, %v1068_v36  ;;  %v1709_v49 = vmul.f32 %v1068_v36, %v1068_v36  ;;  %v2371_v50 = vpop.f32.mrb[111].mxu0  ;;  %3861 = vst [vmem:[#allocation16_spill] sm:$0xff] %v3511_v33  ;;  %v2507_v36 = vpop.f32.mrb[111].mxu1 }
 0x22c   : > { %1506 = vst [vmem:[%s3223_s20 + $0x3d8] sm:$0xff] %v3511_v33  ;;  %v1726_v53 = vmul.f32 %v2694_v11, %v2694_v11 }
 0x22d   : > { %v1841_v57 = vadd.f32 %v1840_v40, %v1709_v49 }
 0x230   : > { %v1073_v1 = vpop.f32.mrb[112].mxu0  ;;  %v3516_v56 = vpop.f32.mrb[112].mxu1 }
 0x231   : > { %1439 = vst [vmem:[%s3223_s20 + $0x1c0] sm:$0xff] %v1073_v1  ;;  %v1571_v2 = vadd.f32 %v1570_v46, %v1073_v1  ;;  %v1710_v5 = vmul.f32 %v1073_v1, %v1073_v1  ;;  %v2374_v9 = vpop.f32.mrb[113].mxu0  ;;  %3862 = vst [vmem:[#allocation17_spill] sm:$0xff] %v3516_v56  ;;  %v2510_v1 = vpop.f32.mrb[113].mxu1 }
 0x232   : > { %v1076_v13 = vpop.f32.mrb[114].mxu0  ;;  %1507 = vst [vmem:[%s3223_s20 + $0x3e0] sm:$0xff] %v3516_v56  ;;  %v3521_v20 = vpop.f32.mrb[114].mxu1 }
 0x233   : > { %v1842_v21 = vadd.f32 %v1841_v57, %v1710_v5  ;;  %1440 = vst [vmem:[%s3223_s20 + $0x1c8] sm:$0xff] %v1076_v13  ;;  %v1572_v22 = vadd.f32 %v1571_v2, %v1076_v13  ;;  %v1711_v23 = vmul.f32 %v1076_v13, %v1076_v13  ;;  %v2375_v28 = vpop.f32.mrb[115].mxu0  ;;  %3863 = vst [vmem:[#allocation18_spill] sm:$0xff] %v3521_v20 }
 0x234   : > { %1508 = vst [vmem:[%s3223_s20 + $0x3e8] sm:$0xff] %v3521_v20  ;;  %v2691_v20 = vld [vmem:[%s3223_s20 + $0x228] sm:$0xff] }
 0x235   : > { %v1843_v38 = vadd.f32 %v1842_v21, %v1711_v23  ;;  %v2511_v21 = vpop.f32.mrb[115].mxu1  ;;  %v1723_v56 = vmul.f32 %v2691_v20, %v2691_v20 }
 0x238   : > { %v1081_v40 = vpop.f32.mrb[116].mxu0 }
 0x239   : > { %1441 = vst [vmem:[%s3223_s20 + $0x1d0] sm:$0xff] %v1081_v40  ;;  %v1573_v46 = vadd.f32 %v1572_v22, %v1081_v40  ;;  %v1712_v49 = vmul.f32 %v1081_v40, %v1081_v40  ;;  %v2378_v50 = vpop.f32.mrb[117].mxu0 }
 0x23a   : > { %v1084_v57 = vpop.f32.mrb[118].mxu0 }
 0x23b   : > { %v1844_v2 = vadd.f32 %v1843_v38, %v1712_v49  ;;  %1442 = vst [vmem:[%s3223_s20 + $0x1d8] sm:$0xff] %v1084_v57  ;;  %v1574_v5 = vadd.f32 %v1573_v46, %v1084_v57  ;;  %v1713_v9 = vmul.f32 %v1084_v57, %v1084_v57  ;;  %v2379_v13 = vpop.f32.mrb[119].mxu0  ;;  %v3526_v38 = vpop.f32.mrb[116].mxu1 }
 0x23c   : > { %3864 = vst [vmem:[#allocation19_spill] sm:$0xff] %v3526_v38  ;;  %1509 = vst [vmem:[%s3223_s20 + $0x3f0] sm:$0xff] %v3526_v38  ;;  %v2514_v46 = vpop.f32.mrb[117].mxu1 }
 0x23d   : > { %v1845_v22 = vadd.f32 %v1844_v2, %v1713_v9  ;;  %v3531_v9 = vpop.f32.mrb[118].mxu1 }
 0x23e   : > { %3865 = vst [vmem:[#allocation20_spill] sm:$0xff] %v3531_v9  ;;  %1510 = vst [vmem:[%s3223_s20 + $0x3f8] sm:$0xff] %v3531_v9 }
 0x240   : > { %v1089_v23 = vpop.f32.mrb[120].mxu0 }
 0x241   : > { %1443 = vst [vmem:[%s3223_s20 + $0x1e0] sm:$0xff] %v1089_v23  ;;  %v1575_v28 = vadd.f32 %v1574_v5, %v1089_v23  ;;  %v1714_v36 = vmul.f32 %v1089_v23, %v1089_v23  ;;  %v2382_v40 = vpop.f32.mrb[121].mxu0  ;;  %v2515_v5 = vpop.f32.mrb[119].mxu1 }
 0x242   : > { %v1092_v49 = vpop.f32.mrb[122].mxu0 }
 0x243   : > { %v1846_v50 = vadd.f32 %v1845_v22, %v1714_v36  ;;  %1444 = vst [vmem:[%s3223_s20 + $0x1e8] sm:$0xff] %v1092_v49  ;;  %v1576_v57 = vadd.f32 %v1575_v28, %v1092_v49  ;;  %v1715_v1 = vmul.f32 %v1092_v49, %v1092_v49  ;;  %v2383_v2 = vpop.f32.mrb[123].mxu0  ;;  %v3536_v22 = vpop.f32.mrb[120].mxu1 }
 0x244   : > { %3866 = vst [vmem:[#allocation21_spill] sm:$0xff] %v3536_v22  ;;  %1511 = vst [vmem:[%s3223_s20 + $0x400] sm:$0xff] %v3536_v22  ;;  %v2518_v28 = vpop.f32.mrb[121].mxu1 }
 0x245   : > { %v1847_v13 = vadd.f32 %v1846_v50, %v1715_v1  ;;  %v3541_v1 = vpop.f32.mrb[122].mxu1 }
 0x246   : > { %3867 = vst [vmem:[#allocation22_spill] sm:$0xff] %v3541_v1  ;;  %1512 = vst [vmem:[%s3223_s20 + $0x408] sm:$0xff] %v3541_v1 }
 0x248   : > { %v1097_v21 = vpop.f32.mrb[124].mxu0 }
 0x249   : > { %1445 = vst [vmem:[%s3223_s20 + $0x1f0] sm:$0xff] %v1097_v21  ;;  %v1577_v23 = vadd.f32 %v1576_v57, %v1097_v21  ;;  %v1716_v40 = vmul.f32 %v1097_v21, %v1097_v21  ;;  %v2386_v46 = vpop.f32.mrb[125].mxu0  ;;  %v2519_v57 = vpop.f32.mrb[123].mxu1 }
 0x24a   : > { %v1100_v36 = vpop.f32.mrb[126].mxu0 }
 0x24b   : > { %v1848_v49 = vadd.f32 %v1847_v13, %v1716_v40  ;;  %1446 = vst [vmem:[%s3223_s20 + $0x1f8] sm:$0xff] %v1100_v36  ;;  %v1578_v2 = vadd.f32 %v1577_v23, %v1100_v36  ;;  %v1717_v9 = vmul.f32 %v1100_v36, %v1100_v36  ;;  %v2387_v50 = vpop.f32.mrb[127].mxu0  ;;  %v3546_v13 = vpop.f32.mrb[124].mxu1 }
 0x24c   : > { %3868 = vst [vmem:[#allocation23_spill] sm:$0xff] %v3546_v13  ;;  %1513 = vst [vmem:[%s3223_s20 + $0x410] sm:$0xff] %v3546_v13  ;;  %v2522_v23 = vpop.f32.mrb[125].mxu1 }
 0x24d   : > { %v1849_v5 = vadd.f32 %v1848_v49, %v1717_v9  ;;  %v3551_v49 = vpop.f32.mrb[126].mxu1 }
 0x24e   : > { %3869 = vst [vmem:[#allocation24_spill] sm:$0xff] %v3551_v49  ;;  %1514 = vst [vmem:[%s3223_s20 + $0x418] sm:$0xff] %v3551_v49  ;;  %v2690_v49 = vld [vmem:[%s3223_s20 + $0x220] sm:$0xff] }
 0x250   : > { %v1105_v21 = vpop.f32.mrb[128].mxu0 }
 0x251   : > { %1447 = vst [vmem:[%s3223_s20 + $0x200] sm:$0xff] %v1105_v21  ;;  %v1579_v46 = vadd.f32 %v1578_v2, %v1105_v21  ;;  %v1718_v38 = vmul.f32 %v1105_v21, %v1105_v21  ;;  %v2390_v28 = vpop.f32.mrb[129].mxu0  ;;  %v2523_v2 = vpop.f32.mrb[127].mxu1 }
 0x252   : > { %v1108_v40 = vpop.f32.mrb[130].mxu0 }
 0x253   : > { %v1850_v36 = vadd.f32 %v1849_v5, %v1718_v38  ;;  %1448 = vst [vmem:[%s3223_s20 + $0x208] sm:$0xff] %v1108_v40  ;;  %v1580_v50 = vadd.f32 %v1579_v46, %v1108_v40  ;;  %v1719_v1 = vmul.f32 %v1108_v40, %v1108_v40  ;;  %v2391_v9 = vpop.f32.mrb[131].mxu0  ;;  %v3556_v38 = vpop.f32.mrb[128].mxu1 }
 0x254   : > { %3870 = vst [vmem:[#allocation25_spill] sm:$0xff] %v3556_v38  ;;  %1515 = vst [vmem:[%s3223_s20 + $0x420] sm:$0xff] %v3556_v38  ;;  %v2526_v46 = vpop.f32.mrb[129].mxu1 }
 0x255   : > { %v1851_v57 = vadd.f32 %v1850_v36, %v1719_v1  ;;  %v1380_v36 = vpop.f32.mrb[130].mxu1  ;;  %v2692_v46 = vld [vmem:[%s3223_s20 + $0x230] sm:$0xff] }
 0x256   : > { %v2527_v2 = vpop.f32.mrb[131].mxu1 }
 0x258   : > { %v1113_v21 = vpop.f32.mrb[132].mxu0 }
 0x259   : > { %1449 = vst [vmem:[%s3223_s20 + $0x210] sm:$0xff] %v1113_v21  ;;  %v1581_v28 = vadd.f32 %v1580_v50, %v1113_v21  ;;  %v1720_v22 = vmul.f32 %v1113_v21, %v1113_v21  ;;  %v2394_v13 = vpop.f32.mrb[133].mxu0  ;;  %v1722_v50 = vmul.f32 %v2690_v49, %v2690_v49 }
 0x25a   : > { %v1116_v5 = vpop.f32.mrb[134].mxu0 }
 0x25b   : > { %v1852_v40 = vadd.f32 %v1851_v57, %v1720_v22  ;;  %1450 = vst [vmem:[%s3223_s20 + $0x218] sm:$0xff] %v1116_v5  ;;  %v1582_v23 = vadd.f32 %v1581_v28, %v1116_v5  ;;  %v1721_v9 = vmul.f32 %v1116_v5, %v1116_v5  ;;  %v2395_v1 = vpop.f32.mrb[135].mxu0  ;;  %v1724_v22 = vmul.f32 %v2692_v46, %v2692_v46  ;;  %v2693_v5 = vld [vmem:[%s3223_s20 + $0x238] sm:$0xff] }
 0x25c   : > { %v1725_v1 = vmul.f32 %v2693_v5, %v2693_v5 }
 0x25d   : > { %v1583_v13 = vadd.f32 %v2690_v49, %v1582_v23  ;;  %v1853_v21 = vadd.f32 %v1852_v40, %v1721_v9  ;;  %v2695_v23 = vld [vmem:[%s3223_s20 + $0x248] sm:$0xff] }
 0x25f   : > { %v1584_v33 = vadd.f32 %v2691_v20, %v1583_v13  ;;  %v1854_v38 = vadd.f32 %v1853_v21, %v1722_v50  ;;  %v1727_v20 = vmul.f32 %v2695_v23, %v2695_v23  ;;  %v2696_v13 = vld [vmem:[%s3223_s20 + $0x250] sm:$0xff]  ;;  %v2697_v21 = vld [vmem:[%s3223_s20 + $0x258] sm:$0xff] }
 0x261   : > { %v1585_v57 = vadd.f32 %v2692_v46, %v1584_v33  ;;  %v1855_v28 = vadd.f32 %v1854_v38, %v1723_v56  ;;  %v1728_v33 = vmul.f32 %v2696_v13, %v2696_v13  ;;  %v1729_v46 = vmul.f32 %v2697_v21, %v2697_v21 }
 0x263   : > { %v1586_v36 = vadd.f32 %v2693_v5, %v1585_v57  ;;  %v1856_v2 = vadd.f32 %v1855_v28, %v1724_v22 }
 0x265   : > { %v1587_v49 = vadd.f32 %v2694_v11, %v1586_v36  ;;  %v1857_v40 = vadd.f32 %v1856_v2, %v1725_v1  ;;  %v2698_v11 = vld [vmem:[%s3223_s20 + $0x260] sm:$0xff] }
 0x266   : > { %v1730_v28 = vmul.f32 %v2698_v11, %v2698_v11 }
 0x267   : > { %v1588_v9 = vadd.f32 %v2695_v23, %v1587_v49  ;;  %v1858_v50 = vadd.f32 %v1857_v40, %v1726_v53  ;;  %v2699_v53 = vld [vmem:[%s3223_s20 + $0x268] sm:$0xff] }
 0x268   : > { %v1731_v36 = vmul.f32 %v2699_v53, %v2699_v53 }
 0x269   : > { %v1589_v56 = vadd.f32 %v2696_v13, %v1588_v9  ;;  %v1859_v38 = vadd.f32 %v1858_v50, %v1727_v20 }
 0x26b   : > { %v1590_v22 = vadd.f32 %v2697_v21, %v1589_v56  ;;  %v1860_v57 = vadd.f32 %v1859_v38, %v1728_v33 }
 0x26d   : > { %v1591_v5 = vadd.f32 %v2698_v11, %v1590_v22  ;;  %v1861_v1 = vadd.f32 %v1860_v57, %v1729_v46 }
 0x26f   : > { %v1592_v2 = vadd.f32 %v2699_v53, %v1591_v5  ;;  %v1862_v49 = vadd.f32 %v1861_v1, %v1730_v28 }
 0x270   : > { %2771 = shalt.err (!%p2768_p7)
}
 0x271   : > { %s2772_s26 = scalar_lea.hbm %s3575_s4, 17024  ;;  %s2776_s10 = scalar_lea.hbm %s3819_s2, 68096 }
 0x272   : > { %p2773_p9 = scmp.ne.s32.totalorder %s3575_s4, %s2772_s26  ;;  %p2777_p5 = scmp.lt.u32.totalorder %s3575_s4, %s3819_s2 }
 0x273   : > { %p2778_p13 = scmp.lt.u32.totalorder %s2776_s10, %s2772_s26  ;;  %p2780_p4 = scmp.lt.u32.totalorder %s2772_s26, %s3575_s4 }
 0x274   : > { %p2774_p1 = pnand %p2773_p9, %p2978_p12 }
 0x275   : > { %p2779_p2 = por %p2778_p13, %p2777_p5 }
 0x276   : > { %p2775_p0 = pneg %p2774_p1 }
 0x277   : > { %p2781_p6 = por %p2780_p4, %p2779_p2 }
 0x279   : > { %p2782_p8 = pnand %p2781_p6, %p2775_p0 }
 0x27b   : > { %2785 = shalt.err (!%p2782_p8)
}
 0x27c   : > { %s2869_s20 = smov 128   ;;  %s2870_s8 = smov 8   ;;  %v1732_v40 = vmul.f32 %v3285_v31, %v3285_v31  ;;  %v1593_v23 = vadd.f32 %v1592_v2, %v3285_v31  ;;  %v1863_v20 = vadd.f32 %v1862_v49, %v1731_v36  ;;  %v1733_v9 = vmul.f32 %v3290_v37, %v3290_v37 }
 0x27d   : > { %2553 = dma.vmem_to_hbm [thread:$0]  (%p2978_p12), %s3577_s9, 17024, %s3575_s4, %s1933_s5, %s2869_s20, %s2869_s20, %s2870_s8   ;;  %v1734_v33 = vmul.f32 %v3296_v45, %v3296_v45  ;;  %v1735_v21 = vmul.f32 %v3301_v52, %v3301_v52  ;;  %v1736_v31 = vmul.f32 %v3306_v59, %v3306_v59 }
 0x27e   : > { %v1594_v50 = vadd.f32 %v1593_v23, %v3290_v37  ;;  %v1864_v13 = vadd.f32 %v1863_v20, %v1732_v40  ;;  %v1737_v37 = vmul.f32 %v3311_v3, %v3311_v3  ;;  %s2086_s9 = sshll.u32 %s3029_s6, 3  ;;  %s2164_s29 = sshll.u32 %s2913_s16, 7 }
 0x27f   : > { %s214_s25 = scalar_lea.vmem [#allocation8], %s2086_s9  ;;  %s3774_s22 = scalar_lea.hbm %s3820_s3, %s2164_s29 }
 0x280   : > { %v1595_v56 = vadd.f32 %v1594_v50, %v3296_v45  ;;  %v1865_v38 = vadd.f32 %v1864_v13, %v1733_v9  ;;  %v1738_v45 = vmul.f32 %v3316_v10, %v3316_v10  ;;  %s1967_s4 = sshll.u32 %s214_s25, 4  ;;  %s1938_s23 = scalar_lea.sflag [#allocation9], %s3029_s6  ;;  %s3776_s4 = int_to_ptr.vmem [resolvable:$true] %s1967_s4 }
 0x281   : > { %s2786_s16 = scalar_lea.vmem %s3776_s4, 128  ;;  %s2871_s28 = smov [#allocation8]  }
 0x282   : > { %v1596_v46 = vadd.f32 %v1595_v56, %v3301_v52  ;;  %v1866_v22 = vadd.f32 %v1865_v38, %v1734_v33  ;;  %v1739_v52 = vmul.f32 %v3321_v17, %v3321_v17  ;;  %p2787_p11 = scmp.ne.s32.totalorder %s3776_s4, %s2786_s16  ;;  %s2790_s26 = sshll.u32 %s2871_s28, 4  ;;  %s2791_s26 = int_to_ptr.vmem [resolvable:$false] %s2790_s26 }
 0x283   : > { %s2792_s30 = scalar_lea.vmem %s2791_s26, 256  ;;  %p2793_p7 = scmp.lt.s32.totalorder %s3776_s4, %s2791_s26 }
 0x284   : > { %v1597_v57 = vadd.f32 %v1596_v46, %v3306_v59  ;;  %v1867_v11 = vadd.f32 %v1866_v22, %v1735_v21  ;;  %v1740_v59 = vmul.f32 %v3326_v24, %v3326_v24  ;;  %p2788_p10 = pnand %p2787_p11, %p2978_p12  ;;  %p2794_p9 = scmp.lt.s32.totalorder %s2792_s30, %s2786_s16 }
 0x286   : > { %v1598_v28 = vadd.f32 %v1597_v57, %v3311_v3  ;;  %v1868_v5 = vadd.f32 %v1867_v11, %v1736_v31  ;;  %v1741_v3 = vmul.f32 %v3331_v32, %v3331_v32  ;;  %p2789_p3 = pneg %p2788_p10  ;;  %p2795_p1 = por %p2794_p9, %p2793_p7 }
 0x288   : > { %v1599_v1 = vadd.f32 %v1598_v28, %v3316_v10  ;;  %v1869_v53 = vadd.f32 %v1868_v5, %v1737_v37  ;;  %v1742_v10 = vmul.f32 %v3336_v39, %v3336_v39  ;;  %p2796_p0 = pnand %p2795_p1, %p2789_p3 }
 0x28a   : > { %v1600_v36 = vadd.f32 %v1599_v1, %v3321_v17  ;;  %v1870_v2 = vadd.f32 %v1869_v53, %v1738_v45  ;;  %v1743_v17 = vmul.f32 %v3341_v47, %v3341_v47 }
 0x28c   : > { %v1871_v49 = vadd.f32 %v1870_v2, %v1739_v52  ;;  %v1601_v40 = vadd.f32 %v1600_v36, %v3326_v24  ;;  %v1744_v24 = vmul.f32 %v3346_v55, %v3346_v55 }
 0x28e   : > { %v1602_v23 = vadd.f32 %v1601_v40, %v3331_v32  ;;  %v1872_v20 = vadd.f32 %v1871_v49, %v1740_v59  ;;  %v1745_v32 = vmul.f32 %v3351_v63, %v3351_v63 }
 0x290   : > { %v1603_v9 = vadd.f32 %v1602_v23, %v3336_v39  ;;  %v1873_v50 = vadd.f32 %v1872_v20, %v1741_v3  ;;  %v1746_v39 = vmul.f32 %v3356_v8, %v3356_v8  ;;  %v1755_v20 = vmul.f32 %v3401_v27, %v3401_v27 }
 0x292   : > { %v1604_v13 = vadd.f32 %v1603_v9, %v3341_v47  ;;  %v1874_v33 = vadd.f32 %v1873_v50, %v1742_v10  ;;  %v1747_v47 = vmul.f32 %v3361_v16, %v3361_v16  ;;  %v1756_v50 = vmul.f32 %v3406_v0, %v3406_v0 }
 0x294   : > { %v1605_v56 = vadd.f32 %v1604_v13, %v3346_v55  ;;  %v1875_v38 = vadd.f32 %v1874_v33, %v1743_v17  ;;  %v1748_v55 = vmul.f32 %v3366_v25, %v3366_v25  ;;  %v1757_v13 = vmul.f32 %v3411_v48, %v3411_v48 }
 0x296   : > { %v1606_v21 = vadd.f32 %v1605_v56, %v3351_v63  ;;  %v1876_v46 = vadd.f32 %v1875_v38, %v1744_v24  ;;  %v1749_v63 = vmul.f32 %v3371_v34, %v3371_v34  ;;  %v1758_v24 = vmul.f32 %v3416_v58, %v3416_v58 }
 0x297   : > { %v1759_v38 = vmul.f32 %v3421_v6, %v3421_v6 }
 0x298   : > { %v1607_v22 = vadd.f32 %v1606_v21, %v3356_v8  ;;  %v1877_v31 = vadd.f32 %v1876_v46, %v1745_v32  ;;  %v1750_v8 = vmul.f32 %v3376_v42, %v3376_v42  ;;  %v1760_v21 = vmul.f32 %v3426_v19, %v3426_v19 }
 0x29a   : > { %v1608_v57 = vadd.f32 %v1607_v22, %v3361_v16  ;;  %v1878_v11 = vadd.f32 %v1877_v31, %v1746_v39  ;;  %v1751_v16 = vmul.f32 %v3381_v51, %v3381_v51  ;;  %v1761_v39 = vmul.f32 %v3431_v29, %v3431_v29 }
 0x29b   : > { %v1762_v31 = vmul.f32 %v3436_v41, %v3436_v41 }
 0x29c   : > { %v1609_v37 = vadd.f32 %v1608_v57, %v3366_v25  ;;  %v1879_v28 = vadd.f32 %v1878_v11, %v1747_v47  ;;  %v1752_v25 = vmul.f32 %v3386_v61, %v3386_v61  ;;  %v1763_v57 = vmul.f32 %v3441_v54, %v3441_v54 }
 0x29e   : > { %v1610_v5 = vadd.f32 %v1609_v37, %v3371_v34  ;;  %v1880_v45 = vadd.f32 %v1879_v28, %v1748_v55  ;;  %v1753_v34 = vmul.f32 %v3391_v7, %v3391_v7  ;;  %v1764_v55 = vmul.f32 %v3446_v4, %v3446_v4 }
 0x29f   : > { %v1765_v28 = vmul.f32 %v3451_v15, %v3451_v15 }
 0x2a0   : > { %v1611_v1 = vadd.f32 %v1610_v5, %v3376_v42  ;;  %v1881_v53 = vadd.f32 %v1880_v45, %v1749_v63  ;;  %v1754_v42 = vmul.f32 %v3396_v18, %v3396_v18  ;;  %v1766_v5 = vmul.f32 %v3456_v30, %v3456_v30 }
 0x2a2   : > { %v1612_v52 = vadd.f32 %v1611_v1, %v3381_v51  ;;  %v1882_v36 = vadd.f32 %v1881_v53, %v1750_v8  ;;  %v1767_v8 = vmul.f32 %v3461_v44, %v3461_v44  ;;  %v1768_v53 = vmul.f32 %v3466_v60, %v3466_v60 }
 0x2a4   : > { %v1613_v2 = vadd.f32 %v1612_v52, %v3386_v61  ;;  %v1883_v59 = vadd.f32 %v1882_v36, %v1751_v16  ;;  %v1769_v52 = vmul.f32 %v3471_v12, %v3471_v12 }
 0x2a6   : > { %v1614_v49 = vadd.f32 %v1613_v2, %v3391_v7  ;;  %v1884_v40 = vadd.f32 %v1883_v59, %v1752_v25  ;;  %v1770_v25 = vmul.f32 %v3476_v26, %v3476_v26  ;;  %v1771_v59 = vmul.f32 %v3481_v43, %v3481_v43 }
 0x2a8   : > { %v1615_v3 = vadd.f32 %v1614_v49, %v3396_v18  ;;  %v1885_v23 = vadd.f32 %v1884_v40, %v1753_v34  ;;  %v1772_v49 = vmul.f32 %v3486_v62, %v3486_v62 }
 0x2aa   : > { %v1616_v51 = vadd.f32 %v1615_v3, %v3401_v27  ;;  %v1886_v10 = vadd.f32 %v1885_v23, %v1754_v42  ;;  %v1773_v42 = vmul.f32 %v3491_v14, %v3491_v14  ;;  %v1774_v23 = vmul.f32 %v3496_v35, %v3496_v35 }
 0x2ac   : > { %v1887_v61 = vadd.f32 %v1886_v10, %v1755_v20  ;;  %v1617_v9 = vadd.f32 %v1616_v51, %v3406_v0 }
 0x2ae   : > { %v1888_v7 = vadd.f32 %v1887_v61, %v1756_v50  ;;  %v1618_v17 = vadd.f32 %v1617_v9, %v3411_v48 }
 0x2b0   : > { %v1889_v18 = vadd.f32 %v1888_v7, %v1757_v13  ;;  %v1619_v33 = vadd.f32 %v1618_v17, %v3416_v58 }
 0x2b2   : > { %v1890_v27 = vadd.f32 %v1889_v18, %v1758_v24  ;;  %v1620_v56 = vadd.f32 %v1619_v33, %v3421_v6 }
 0x2b4   : > { %v1891_v32 = vadd.f32 %v1890_v27, %v1759_v38  ;;  %v1621_v0 = vadd.f32 %v1620_v56, %v3426_v19  ;;  %v3875_v56 = vld [vmem:[#allocation18_spill] sm:$0xff] }
 0x2b6   : > { %v1892_v46 = vadd.f32 %v1891_v32, %v1760_v21  ;;  %v1622_v48 = vadd.f32 %v1621_v0, %v3431_v29  ;;  %v1779_v32 = vmul.f32 %v3875_v56, %v3875_v56  ;;  %v3876_v21 = vld [vmem:[#allocation19_spill] sm:$0xff] }
 0x2b8   : > { %v1893_v22 = vadd.f32 %v1892_v46, %v1761_v39  ;;  %v1623_v58 = vadd.f32 %v1622_v48, %v3436_v41  ;;  %v1780_v48 = vmul.f32 %v3876_v21, %v3876_v21 }
 0x2ba   : > { %v1894_v47 = vadd.f32 %v1893_v22, %v1762_v31  ;;  %v1624_v6 = vadd.f32 %v1623_v58, %v3441_v54  ;;  %v3877_v22 = vld [vmem:[#allocation20_spill] sm:$0xff] }
 0x2bb   : > { %v1781_v31 = vmul.f32 %v3877_v22, %v3877_v22 }
 0x2bc   : > { %v1895_v11 = vadd.f32 %v1894_v47, %v1763_v57  ;;  %v1625_v19 = vadd.f32 %v1624_v6, %v3446_v4  ;;  %v3878_v6 = vld [vmem:[#allocation21_spill] sm:$0xff] }
 0x2be   : > { %v1896_v37 = vadd.f32 %v1895_v11, %v1764_v55  ;;  %v1626_v29 = vadd.f32 %v1625_v19, %v3451_v15  ;;  %v1782_v11 = vmul.f32 %v3878_v6, %v3878_v6  ;;  %v3879_v55 = vld [vmem:[#allocation22_spill] sm:$0xff] }
 0x2c0   : > { %v1897_v63 = vadd.f32 %v1896_v37, %v1765_v28  ;;  %v1627_v41 = vadd.f32 %v1626_v29, %v3456_v30  ;;  %v1783_v29 = vmul.f32 %v3879_v55, %v3879_v55 }
 0x2c2   : > { %v1898_v45 = vadd.f32 %v1897_v63, %v1766_v5  ;;  %v1628_v54 = vadd.f32 %v1627_v41, %v3461_v44  ;;  %v3880_v63 = vld [vmem:[#allocation23_spill] sm:$0xff] }
 0x2c3   : > { %v1784_v5 = vmul.f32 %v3880_v63, %v3880_v63 }
 0x2c4   : > { %v1899_v1 = vadd.f32 %v1898_v45, %v1767_v8  ;;  %v1629_v4 = vadd.f32 %v1628_v54, %v3466_v60  ;;  %v3881_v54 = vld [vmem:[#allocation24_spill] sm:$0xff] }
 0x2c6   : > { %v1900_v16 = vadd.f32 %v1899_v1, %v1768_v53  ;;  %v1630_v15 = vadd.f32 %v1629_v4, %v3471_v12  ;;  %v1785_v1 = vmul.f32 %v3881_v54, %v3881_v54  ;;  %v3882_v4 = vld [vmem:[#allocation25_spill] sm:$0xff] }
 0x2c7   : > { %v1786_v53 = vmul.f32 %v3882_v4, %v3882_v4 }
 0x2c8   : > { %v1901_v36 = vadd.f32 %v1900_v16, %v1769_v52  ;;  %v1631_v30 = vadd.f32 %v1630_v15, %v3476_v26 }
 0x2ca   : > { %v1902_v2 = vadd.f32 %v1901_v36, %v1770_v25  ;;  %v1632_v44 = vadd.f32 %v1631_v30, %v3481_v43  ;;  %v3871_v43 = vld [vmem:[#allocation14_spill] sm:$0xff] }
 0x2cb   : > { %v1775_v10 = vmul.f32 %v3871_v43, %v3871_v43 }
 0x2cc   : > { %v1903_v34 = vadd.f32 %v1902_v2, %v1771_v59  ;;  %v1633_v60 = vadd.f32 %v1632_v44, %v3486_v62  ;;  %v3872_v62 = vld [vmem:[#allocation15_spill] sm:$0xff]  ;;  %v1925_v2 = vlaneseq }
 0x2cd   : > { %v1776_v50 = vmul.f32 %v3872_v62, %v3872_v62 }
 0x2ce   : > { %v1904_v40 = vadd.f32 %v1903_v34, %v1772_v49  ;;  %v1634_v12 = vadd.f32 %v1633_v60, %v3491_v14  ;;  %v3873_v14 = vld [vmem:[#allocation16_spill] sm:$0xff]  ;;  %v1926_v49 = vshrl.u32 %v1925_v2, 7 }
 0x2cf   : > { %v1777_v13 = vmul.f32 %v3873_v14, %v3873_v14 }
 0x2d0   : > { %v1905_v3 = vadd.f32 %v1904_v40, %v1773_v42  ;;  %v1635_v26 = vadd.f32 %v1634_v12, %v3496_v35  ;;  %v3874_v35 = vld [vmem:[#allocation17_spill] sm:$0xff]  ;;  %vm1928_vm1 = vcmp.eq.s32.totalorder %v1926_v49, 1  ;;  %vm1927_vm2 = vcmp.eq.s32.totalorder %v1926_v49, 0 }
 0x2d1   : > { %v1778_v24 = vmul.f32 %v3874_v35, %v3874_v35 }
 0x2d2   : > { %v1906_v51 = vadd.f32 %v1905_v3, %v1774_v23  ;;  %v1636_v20 = vadd.f32 %v1635_v26, %v3871_v43 }
 0x2d4   : > { %v1907_v61 = vadd.f32 %v1906_v51, %v1775_v10  ;;  %v1637_v9 = vadd.f32 %v1636_v20, %v3872_v62 }
 0x2d6   : > { %v1908_v7 = vadd.f32 %v1907_v61, %v1776_v50  ;;  %v1638_v17 = vadd.f32 %v1637_v9, %v3873_v14 }
 0x2d8   : > { %v1909_v18 = vadd.f32 %v1908_v7, %v1777_v13  ;;  %v1639_v33 = vadd.f32 %v1638_v17, %v3874_v35 }
 0x2da   : > { %v1910_v27 = vadd.f32 %v1909_v18, %v1778_v24  ;;  %v1640_v38 = vadd.f32 %v1639_v33, %v3875_v56 }
 0x2dc   : > { %v1911_v0 = vadd.f32 %v1910_v27, %v1779_v32  ;;  %v1641_v46 = vadd.f32 %v1640_v38, %v3876_v21 }
 0x2de   : > { %v1912_v39 = vadd.f32 %v1911_v0, %v1780_v48  ;;  %v1642_v58 = vadd.f32 %v1641_v46, %v3877_v22 }
 0x2e0   : > { %v1913_v47 = vadd.f32 %v1912_v39, %v1781_v31  ;;  %v1643_v57 = vadd.f32 %v1642_v58, %v3878_v6 }
 0x2e2   : > { %v1914_v19 = vadd.f32 %v1913_v47, %v1782_v11  ;;  %v1644_v37 = vadd.f32 %v1643_v57, %v3879_v55 }
 0x2e4   : > { %v1915_v28 = vadd.f32 %v1914_v19, %v1783_v29  ;;  %v1645_v41 = vadd.f32 %v1644_v37, %v3880_v63 }
 0x2e6   : > { %v1916_v45 = vadd.f32 %v1915_v28, %v1784_v5  ;;  %v1646_v8 = vadd.f32 %v1645_v41, %v3881_v54 }
 0x2e8   : > { %v1917_v16 = vadd.f32 %v1916_v45, %v1785_v1  ;;  %v1647_v15 = vadd.f32 %v1646_v8, %v3882_v4 }
 0x2ea   : > { %v1648_v52 = vrot.slane %v1647_v15, 4  ;;  %v1918_v36 = vadd.f32 %v1917_v16, %v1786_v53 }
 0x2ec   : > { %v1649_v30 = vadd.f32 %v1648_v52, %v1647_v15  ;;  %v1919_v25 = vrot.slane %v1918_v36, 4 }
 0x2ee   : > { %v1650_v44 = vrot.slane %v1649_v30, 2  ;;  %v1920_v59 = vadd.f32 %v1919_v25, %v1918_v36 }
 0x2f0   : > { %v1651_v34 = vadd.f32 %v1650_v44, %v1649_v30  ;;  %v1921_v60 = vrot.slane %v1920_v59, 2 }
 0x2f2   : > { %v1922_v40 = vadd.f32 %v1921_v60, %v1920_v59  ;;  %v1652_v12 = vrot.slane %v1651_v34, 1 }
 0x2f4   : > { %v1923_v42 = vrot.slane %v1922_v40, 1  ;;  %v1653_v26 = vadd.f32 %v1652_v12, %v1651_v34 }
 0x2f6   : > { %v1924_v3 = vadd.f32 %v1923_v42, %v1922_v40 }
 0x2f8   : > { %v1929_v23 = vsel %vm1928_vm1, %v1924_v3, 0.0 }
 0x2f9   : > { %v1930_v51 = vsel %vm1927_vm2, %v1653_v26, %v1929_v23 }
 0x2fa   : > { %1931 = vst [vmem:[%s214_s25] sm:$0xff] %v1930_v51 }
 0x2fb   : > { %2799 = shalt.err (!%p2796_p0)
}
 0x2fc   : > { %s2800_s6 = scalar_lea.hbm %s3774_s22, 128  ;;  %s2804_s11 = scalar_lea.hbm %s3820_s3, 512 }
 0x2fd   : > { %p2801_p5 = scmp.ne.s32.totalorder %s3774_s22, %s2800_s6  ;;  %p2805_p4 = scmp.lt.u32.totalorder %s3774_s22, %s3820_s3 }
 0x2fe   : > { %p2806_p6 = scmp.lt.u32.totalorder %s2804_s11, %s2800_s6  ;;  %p2808_p11 = scmp.lt.u32.totalorder %s2800_s6, %s3774_s22 }
 0x2ff   : > { %p2802_p13 = pnand %p2801_p5, %p2978_p12 }
 0x300   : > { %p2807_p8 = por %p2806_p6, %p2805_p4 }
 0x301   : > { %p2803_p2 = pneg %p2802_p13 }
 0x302   : > { %p2809_p10 = por %p2808_p11, %p2807_p8 }
 0x304   : > { %p2810_p3 = pnand %p2809_p10, %p2803_p2 }
 0x306   : > { %2813 = shalt.err (!%p2810_p3)
}
 0x307   : > { %2554 = dma.vmem_to_hbm [thread:$0]  (%p2978_p12), %s3776_s4, 128, %s3774_s22, %s1938_s23  }
 0x308 PF: > { %p2575_p7 = scmp.ge.s32.totalorder %s2860_s15, 2  ;;  %s1979_s8 = sand.u32 1, %s2848_s12  }
 0x309   : > { %p3883_p9 = scmp.ne.s32.totalorder %s3849_s19, 0  ;;  %s1980_s9 = scalar_lea.sflag [#allocation4], %s1979_s8 }
 0x30b   : > { %p2566_p1 = pnand %p2575_p7, %p3883_p9 }
 0x30d   : > { %2839 = dma.done.wait (!%p2566_p1), %s1980_s9, 17024  }
 0x30e   : > { %2841 = vsyncadd (!%p2566_p1), %s1980_s9, 4294950272  ;;  %s1989_s29 = scalar_lea.sflag [#allocation9], %s1979_s8 }
 0x30f   : > { %2843 = dma.done.wait (!%p2566_p1), %s1989_s29, 128  }
 0x310   : > { %2845 = vsyncadd (!%p2566_p1), %s1989_s29, 4294967168  ;;  %p21_p12 = scmp.ge.s32.totalorder %s2945_s24, 6   ;;  %s3884_s12 = smov %s2852_s13 }
 0x311   : > { %s3885_s13 = smov %s2856_s14  ;;  %s3886_s14 = smov %s2974_s17 }
 0x312   : > { %s3887_s15 = smov %s2945_s24  ;;  %23 = sbr.rel (!%p21_p12) target bundleno = 8 (0x8), region = 94 }
 0x319   :  { %1994 = vsyncpa [#allocation3], 1 }
 0x31a   :  { %1996 = vsyncpa [#allocation3 + $0x1], 1 }
 0x31b   :  { %1997 = vsyncpa [#allocation6], 1 }
 0x31c   :  { %1998 = vsyncpa [#allocation4], 1 }
 0x31d   :  { %2000 = vsyncpa [#allocation4 + $0x1], 1 }
 0x31e   :  { %2001 = vsyncpa [#allocation9], 1 }
 0x31f   :  { %2003 = vsyncpa [#allocation9 + $0x1], 1 }

// kernel: discriminator_forward.12
= control target key start
LH: loop header
LB: loop body
LE: loop exit
PB: predicated region body
PF: predicated region fallthrough
CT: control target
= control target key end

     0   :  { %8 = vsyncpa [#allocation3], 0  ;;  %s3318_s0 = inlined_call_operand.hbm [shape: f32[4256,128], index: 0, kind: input, shape index: {}]   ;;  %s3319_s1 = inlined_call_operand.hbm [shape: f32[1,128], index: 1, kind: input, shape index: {}]   ;;  %s3320_s2 = inlined_call_operand.hbm [shape: f32[1,128], index: 2, kind: input, shape index: {}]   ;;  %s3321_s3 = inlined_call_operand.hbm [shape: bf16[4256,128], index: 3, kind: output, shape index: {}]  }
   0x1   :  { %10 = vsyncpa [#allocation3 + $0x1], 0 }
   0x2   :  { %11 = vsyncpa [#allocation6], 0 }
   0x3   :  { %12 = vsyncpa [#allocation4], 0 }
   0x4   :  { %14 = vsyncpa [#allocation4 + $0x1], 0  ;;  %s2606_s12 = smov 0   ;;  %s2608_s13 = smov 0  }
   0x5   :  { %s2610_s14 = smov 0   ;;  %s2612_s15 = smov 0  }
   0x6 LB: > { %s2627_s16 = sadd.s32 4294967295, %s2576_s15   ;;  %s1667_s17 = sadd.s32 4294967294, %s2576_s15   ;;  %s2576_s15 = sphi %s2612_s15, %s3344_s15   ;;  %s2572_s14 = sphi %s2610_s14, %s3343_s14   ;;  %s2568_s13 = sphi %s2608_s13, %s3342_s13   ;;  %s2564_s12 = sphi %s2606_s12, %s3341_s12  }
   0x7   : > { %s2631_s18 = sadd.s32 1, %s2576_s15   ;;  %s27_s19 = sadd.s32 1, %s2572_s14 }
   0x8   : > { %s24_s20 = ssub.s32 %s2576_s15, %s2631_s18  ;;  %p34_p0 = scmp.ne.s32.totalorder %s2572_s14, %s2568_s13 }
   0x9   : > { %p25_p1 = scmp.eq.s32.totalorder %s24_s20, 0  ;;  %p35_p2 = scmp.eq.s32.totalorder %s2576_s15, 0 }
   0xa   : > { %p40_p3 = scmp.ne.s32.totalorder %s2568_s13, %s2564_s12  ;;  %p3322_p4 = scmp.eq.s32.totalorder %s2627_s16, 0 }
   0xb   : > { %s2643_s21 = scalar_select %p25_p1, %s2572_s14, %s27_s19  }
   0xc   : > { %p2645_p5 = por %p35_p2, %p34_p0  ;;  %p2651_p6 = por %p3322_p4, %p40_p3 }
   0xd   : > { %p106_p7 = scmp.eq.s32.totalorder %s2627_s16, 3  ;;  %p112_p8 = scmp.eq.s32.totalorder %s1667_s17, 3 }
   0xe   : > { %s3328_s23 = scalar_select %p2651_p6, 1, 0 }
   0xf   : > { %p1668_p9 = scmp.ge.s32.totalorder %s2576_s15, 1  ;;  %p119_p10 = scmp.lt.s32.totalorder %s2576_s15, 5 }
  0x10   : > { %p2658_p11 = por %p106_p7, %p34_p0  ;;  %p2662_p12 = por %p112_p8, %p40_p3 }
  0x11   : > { %p2666_p13 = pnand %p1668_p9, %p119_p10  ;;  %s2578_s27 = smov [#allocation5]  }
  0x12   : > { %s3329_s24 = scalar_select %p2658_p11, 1, 0 }
  0x13   : > { %s3330_s25 = scalar_select %p2662_p12, 1, 0 }
  0x14   : > { %s3331_s26 = scalar_select %p2666_p13, 1, 0 }
  0x15   : > { %p2359_p1 = pneg %p2666_p13  ;;  %s132_s28 = sshll.u32 %s2578_s27, 4  ;;  %s133_s28 = int_to_ptr.vmem [resolvable:$true] %s132_s28 }
  0x16   : > { %p2376_p2 = scmp.lt.s32.totalorder %s2576_s15, 4  ;;  %s2579_s4 = smov [#allocation7]  }
  0x17   : > { %p2675_p0 = pnand %p2359_p1, %p3322_p4  ;;  %s143_s5 = sshll.u32 %s2579_s4, 4  ;;  %s2685_s5 = int_to_ptr.vmem [resolvable:$true] %s143_s5 }
  0x18   : > { %p2681_p3 = pnand %p2376_p2, %p2645_p5  ;;  %s2420_s8 = scalar_lea.hbm %s3319_s1, 16 }
  0x19   : > { %p2421_p7 = scmp.ne.s32.totalorder %s3319_s1, %s2420_s8  ;;  %p2422_p8 = pneg %p2675_p0 }
  0x1a   : > { %s3333_s30 = scalar_select %p2681_p3, 1, 0 }
  0x1b   : > { %p2423_p5 = pnand %p2422_p8, %p2421_p7  ;;  %p2427_p10 = scmp.lt.u32.totalorder %s2420_s8, %s3319_s1 }
  0x1d   : > { %p2424_p9 = pneg %p2423_p5 }
  0x1f   : > { %p2429_p1 = pnand %p2427_p10, %p2424_p9 }
  0x21   : > { %2432 = shalt.err (!%p2429_p1)
}
  0x22   : > { %s2433_s19 = scalar_lea.vmem %s133_s28, 16  ;;  %s2440_s20 = scalar_lea.vmem %s133_s28, 32 }
  0x23   : > { %p2434_p2 = scmp.ne.s32.totalorder %s133_s28, %s2433_s19  ;;  %p2441_p11 = scmp.lt.s32.totalorder %s133_s28, %s133_s28 }
  0x24   : > { %p2442_p6 = scmp.lt.s32.totalorder %s2440_s20, %s2433_s19 }
  0x25   : > { %p2436_p4 = pnand %p2434_p2, %p2422_p8 }
  0x26   : > { %p2443_p13 = por %p2442_p6, %p2441_p11 }
  0x27   : > { %p2437_p12 = pneg %p2436_p4 }
  0x29   : > { %p2444_p3 = pnand %p2443_p13, %p2437_p12 }
  0x2b   : > { %2447 = shalt.err (!%p2444_p3)
}
  0x2c   : > { %2362 = dma.hbm_to_vmem [thread:$0]  (!%p2675_p0), %s3319_s1, 16, %s133_s28, [#allocation6]  }
  0x2d   : > { %s154_s4 = sand.u32 1, %s2572_s14   ;;  %s2448_s8 = scalar_lea.hbm %s3320_s2, 16 }
  0x2e   : > { %p2449_p4 = scmp.ne.s32.totalorder %s3320_s2, %s2448_s8  ;;  %p2455_p12 = scmp.lt.u32.totalorder %s2448_s8, %s3320_s2 }
  0x30   : > { %p2451_p6 = pnand %p2449_p4, %p2422_p8 }
  0x32   : > { %p2452_p11 = pneg %p2451_p6 }
  0x34   : > { %p2457_p13 = pnand %p2455_p12, %p2452_p11 }
  0x36   : > { %2460 = shalt.err (!%p2457_p13)
}
  0x37   : > { %s2461_s28 = scalar_lea.vmem %s2685_s5, 16  ;;  %s2468_s19 = scalar_lea.vmem %s2685_s5, 32 }
  0x38   : > { %p2462_p3 = scmp.ne.s32.totalorder %s2685_s5, %s2461_s28  ;;  %p2469_p9 = scmp.lt.s32.totalorder %s2685_s5, %s2685_s5 }
  0x39   : > { %p2470_p10 = scmp.lt.s32.totalorder %s2468_s19, %s2461_s28 }
  0x3a   : > { %p2464_p7 = pnand %p2462_p3, %p2422_p8 }
  0x3b   : > { %p2471_p1 = por %p2470_p10, %p2469_p9 }
  0x3c   : > { %p2465_p5 = pneg %p2464_p7 }
  0x3e   : > { %p2472_p2 = pnand %p2471_p1, %p2465_p5 }
  0x40   : > { %2475 = shalt.err (!%p2472_p2)
}
  0x41   : > { %2365 = dma.hbm_to_vmem [thread:$0]  (!%p2675_p0), %s3320_s2, 16, %s2685_s5, [#allocation6]  }
  0x42   : > { %s2344_s27 = smul.u32 1064, %s154_s4  ;;  %s2744_s11 = scalar_lea.sflag [#allocation3], %s154_s4 }
  0x43   : > { %s1814_s6 = smul.u32 17024, %s2576_s15  ;;  %p3334_p0 = scmp.ne.s32.totalorder %s3333_s30, 0 }
  0x44   : > { %s158_s29 = scalar_lea.vmem [#allocation2], %s2344_s27  ;;  %s2481_s19 = scalar_lea.hbm %s3318_s0, 68096 }
  0x45   : > { %s2740_s9 = scalar_lea.hbm %s3318_s0, %s1814_s6  ;;  %s165_s10 = sshll.u32 %s158_s29, 4  ;;  %s2742_s10 = int_to_ptr.vmem [resolvable:$true] %s165_s10 }
  0x46   : > { %s2476_s17 = scalar_lea.hbm %s2740_s9, 17024  ;;  %p2478_p4 = pneg %p3334_p0 }
  0x47   : > { %p2477_p8 = scmp.ne.s32.totalorder %s2740_s9, %s2476_s17  ;;  %p2482_p12 = scmp.lt.u32.totalorder %s2740_s9, %s3318_s0 }
  0x48   : > { %p2483_p13 = scmp.lt.u32.totalorder %s2481_s19, %s2476_s17  ;;  %p2485_p7 = scmp.lt.u32.totalorder %s2476_s17, %s2740_s9 }
  0x49   : > { %p2479_p6 = pnand %p2478_p4, %p2477_p8 }
  0x4a   : > { %p2484_p3 = por %p2483_p13, %p2482_p12 }
  0x4b   : > { %p2480_p11 = pneg %p2479_p6 }
  0x4c   : > { %p2486_p5 = por %p2485_p7, %p2484_p3 }
  0x4e   : > { %p2487_p9 = pnand %p2486_p5, %p2480_p11 }
  0x50   : > { %2490 = shalt.err (!%p2487_p9)
}
  0x51   : > { %s2491_s4 = scalar_lea.vmem %s2742_s10, 17024  ;;  %s2580_s27 = smov [#allocation2]  }
  0x52   : > { %p2492_p10 = scmp.ne.s32.totalorder %s2742_s10, %s2491_s4  ;;  %s2496_s6 = sshll.u32 %s2580_s27, 4  ;;  %s2497_s6 = int_to_ptr.vmem [resolvable:$false] %s2496_s6 }
  0x53   : > { %s2498_s7 = scalar_lea.vmem %s2497_s6, 34048  ;;  %p2499_p8 = scmp.lt.s32.totalorder %s2742_s10, %s2497_s6 }
  0x54   : > { %p2494_p1 = pnand %p2492_p10, %p2478_p4  ;;  %p2500_p6 = scmp.lt.s32.totalorder %s2498_s7, %s2491_s4 }
  0x56   : > { %p2495_p2 = pneg %p2494_p1  ;;  %p2501_p12 = por %p2500_p6, %p2499_p8 }
  0x58   : > { %p2502_p13 = pnand %p2501_p12, %p2495_p2 }
  0x5a   : > { %2505 = shalt.err (!%p2502_p13)
}
  0x5b   : > { %s2581_s8 = smov 128   ;;  %s2582_s29 = smov 8  }
  0x5c   : > { %2369 = dma.hbm_to_vmem [thread:$0]  (!%p3334_p0), %s2740_s9, 17024, %s2742_s10, %s2744_s11, %s2581_s8, %s2581_s8, %s2582_s29  }
  0x5d   : > { %p3335_p4 = scmp.ne.s32.totalorder %s3331_s26, 0 }
  0x5e   : > { %s2775_s17 = sand.u32 (!%p3335_p4), 1, %s2568_s13   ;;  %p3336_p11 = scmp.ne.s32.totalorder (!%p3335_p4), %s3328_s23, 0 }
  0x5f   : > { %177 = sbr.rel (%p3335_p4) target bundleno = 279 (0x117), region = 32  ;;  %s180_s28 = scalar_lea.sflag (!%p3335_p4), [#allocation3], %s2775_s17 }
  0x60   : > { %s2345_s5 = smul.u32 (!%p3335_p4), 1064, %s2775_s17 }
  0x62   : > { %s2779_s19 = scalar_lea.vmem (!%p3335_p4), [#allocation2], %s2345_s5 }
  0x66   : > { %2551 = dma.done.wait (%p3336_p11), %s180_s28, 17024  }
  0x67   : > { %2553 = vsyncadd (%p3336_p11), %s180_s28, 4294950272  ;;  %p3337_p0 = scmp.eq.s32.totalorder %s2627_s16, 0 }
  0x69   : > { %2555 = dma.done.wait (%p3337_p0), [#allocation6], 32   ;;  %p3338_p3 = pmov %p3337_p0 }
  0x6a   : > { %v216_v0 = vld [vmem:[%s2779_s19] sm:$0xff]  ;;  %v217_v1 = vld [vmem:[%s2779_s19 + $0x8] sm:$0xff]  ;;  %v218_v6 = vld [vmem:[%s2779_s19 + $0x10] sm:$0xff]  ;;  %s2346_s23 = smul.u32 532, %s2775_s17  ;;  %p3339_p5 = scmp.ne.s32.totalorder %s3329_s24, 0 }
  0x6b   : > { %2557 = vsyncadd (%p3338_p3), [#allocation6], 4294967264  ;;  %v2791_v2 = vld [vmem:[#allocation5] ss:$0 sm:$0xff]  ;;  %v2795_v5 = vld [vmem:[#allocation7] ss:$0 sm:$0xff] }
  0x6c   : > { %v356_v3 = vmul.f32 %v2791_v2, %v216_v0  ;;  %v357_v4 = vmul.f32 %v2791_v2, %v217_v1  ;;  %v219_v7 = vld [vmem:[%s2779_s19 + $0x18] sm:$0xff]  ;;  %v358_v8 = vmul.f32 %v2791_v2, %v218_v6  ;;  %v220_v10 = vld [vmem:[%s2779_s19 + $0x20] sm:$0xff]  ;;  %v221_v11 = vld [vmem:[%s2779_s19 + $0x28] sm:$0xff]  ;;  %s2829_s26 = scalar_lea.vmem [#allocation8], %s2346_s23  ;;  %s1948_s30 = smul.u32 8512, %s2627_s16 }
  0x6d   : > { %v359_v9 = vmul.f32 %v2791_v2, %v219_v7  ;;  %v222_v12 = vld [vmem:[%s2779_s19 + $0x30] sm:$0xff]  ;;  %v360_v15 = vmul.f32 %v2791_v2, %v220_v10  ;;  %v361_v16 = vmul.f32 %v2791_v2, %v221_v11  ;;  %v223_v17 = vld [vmem:[%s2779_s19 + $0x38] sm:$0xff]  ;;  %v224_v30 = vld [vmem:[%s2779_s19 + $0x40] sm:$0xff]  ;;  %s1575_s9 = sshll.u32 %s2829_s26, 4  ;;  %s1562_s16 = scalar_lea.sflag [#allocation4], %s2775_s17  ;;  %s3273_s9 = int_to_ptr.vmem [resolvable:$true] %s1575_s9 }
  0x6e   : > { %v496_v13 = vadd.f32 %v2795_v5, %v356_v3  ;;  %v497_v14 = vadd.f32 %v2795_v5, %v357_v4  ;;  %v498_v18 = vadd.f32 %v2795_v5, %v358_v8  ;;  %v362_v20 = vmul.f32 %v2791_v2, %v222_v12  ;;  %v225_v35 = vld [vmem:[%s2779_s19 + $0x48] sm:$0xff]  ;;  %v226_v40 = vld [vmem:[%s2779_s19 + $0x50] sm:$0xff]  ;;  %v227_v41 = vld [vmem:[%s2779_s19 + $0x58] sm:$0xff]  ;;  %s3271_s20 = scalar_lea.hbm %s3321_s3, %s1948_s30  ;;  %s2506_s22 = scalar_lea.vmem %s3273_s9, 8512 }
  0x6f   : > { %v499_v19 = vadd.f32 %v2795_v5, %v359_v9  ;;  %v363_v21 = vmul.f32 %v2791_v2, %v223_v17  ;;  %v500_v24 = vadd.f32 %v2795_v5, %v360_v15  ;;  %v501_v25 = vadd.f32 %v2795_v5, %v361_v16  ;;  %v228_v46 = vld [vmem:[%s2779_s19 + $0x60] sm:$0xff]  ;;  %v229_v47 = vld [vmem:[%s2779_s19 + $0x68] sm:$0xff]  ;;  %v230_v52 = vld [vmem:[%s2779_s19 + $0x70] sm:$0xff]  ;;  %p2507_p7 = scmp.ne.s32.totalorder %s3273_s9, %s2506_s22  ;;  %s2583_s4 = smov [#allocation8]  }
  0x70   : > { %v629_v22 = vmul.f32 0.2, %v496_v13  ;;  %v630_v23 = vmul.f32 0.2, %v497_v14  ;;  %v631_v26 = vmul.f32 0.2, %v498_v18  ;;  %v502_v28 = vadd.f32 %v2795_v5, %v362_v20 }
  0x71   : > { %v632_v27 = vmul.f32 0.2, %v499_v19  ;;  %v503_v29 = vadd.f32 %v2795_v5, %v363_v21  ;;  %v633_v33 = vmul.f32 0.2, %v500_v24  ;;  %v634_v34 = vmul.f32 0.2, %v501_v25  ;;  %p2508_p9 = pnand %p2507_p7, %p3339_p5 }
  0x72   : > { %v762_v31 = vmax.f32 %v496_v13, %v629_v22  ;;  %v763_v32 = vmax.f32 %v497_v14, %v630_v23  ;;  %v764_v36 = vmax.f32 %v498_v18, %v631_v26  ;;  %v635_v38 = vmul.f32 0.2, %v502_v28  ;;  %v231_v57 = vld [vmem:[%s2779_s19 + $0x78] sm:$0xff]  ;;  %v232_v8 = vld [vmem:[%s2779_s19 + $0x80] sm:$0xff]  ;;  %v233_v17 = vld [vmem:[%s2779_s19 + $0x88] sm:$0xff]  ;;  %s2510_s27 = sshll.u32 %s2583_s4, 4  ;;  %s2511_s27 = int_to_ptr.vmem [resolvable:$false] %s2510_s27 }
  0x73   : > { %v765_v37 = vmax.f32 %v499_v19, %v632_v27  ;;  %v636_v39 = vmul.f32 0.2, %v503_v29  ;;  %v766_v43 = vmax.f32 %v500_v24, %v633_v33  ;;  %v767_v44 = vmax.f32 %v501_v25, %v634_v34  ;;  %v234_v22 = vld [vmem:[%s2779_s19 + $0x90] sm:$0xff]  ;;  %v235_v23 = vld [vmem:[%s2779_s19 + $0x98] sm:$0xff]  ;;  %p2509_p10 = pneg %p2508_p9  ;;  %s2512_s6 = scalar_lea.vmem %s2511_s27, 17024 }
  0x74   : > { %v1952_v42 = vpack.c.bf16 %v763_v32, %v762_v31  ;;  %v364_v45 = vmul.f32 %v2791_v2, %v224_v30  ;;  %v768_v49 = vmax.f32 %v502_v28, %v635_v38  ;;  %v365_v51 = vmul.f32 %v2791_v2, %v225_v35  ;;  %v236_v28 = vld [vmem:[%s2779_s19 + $0xa0] sm:$0xff]  ;;  %v238_v34 = vld [vmem:[%s2779_s19 + $0xb0] sm:$0xff]  ;;  %p2513_p1 = scmp.lt.s32.totalorder %s3273_s9, %s2511_s27  ;;  %p2514_p2 = scmp.lt.s32.totalorder %s2512_s6, %s2506_s22 }
  0x75   : > { %v1957_v48 = vpack.c.bf16 %v765_v37, %v764_v36  ;;  %v769_v50 = vmax.f32 %v503_v29, %v636_v39  ;;  %v1962_v53 = vpack.c.bf16 %v767_v44, %v766_v43  ;;  %v366_v55 = vmul.f32 %v2791_v2, %v226_v40  ;;  %v237_v29 = vld [vmem:[%s2779_s19 + $0xa8] sm:$0xff]  ;;  %v239_v43 = vld [vmem:[%s2779_s19 + $0xb8] sm:$0xff] }
  0x76   : > { %1953 = vst [vmem:[%s2829_s26] sm:$0xff] %v1952_v42   ;;  %v504_v54 = vadd.f32 %v2795_v5, %v364_v45  ;;  %v367_v56 = vmul.f32 %v2791_v2, %v227_v41  ;;  %v505_v59 = vadd.f32 %v2795_v5, %v365_v51  ;;  %v368_v60 = vmul.f32 %v2791_v2, %v228_v46  ;;  %p2515_p8 = por %p2514_p2, %p2513_p1 }
  0x77   : > { %2279 = vst [vmem:[%s2829_s26 + $0x8] sm:$0xff] %v1957_v48   ;;  %v1967_v58 = vpack.c.bf16 %v769_v50, %v768_v49  ;;  %v369_v61 = vmul.f32 %v2791_v2, %v229_v47  ;;  %2280 = vst [vmem:[%s2829_s26 + $0x10] sm:$0xff] %v1962_v53   ;;  %v506_v63 = vadd.f32 %v2795_v5, %v366_v55  ;;  %v240_v48 = vld [vmem:[%s2779_s19 + $0xc0] sm:$0xff] }
  0x78   : > { %v637_v62 = vmul.f32 0.2, %v504_v54  ;;  %v507_v0 = vadd.f32 %v2795_v5, %v367_v56  ;;  %v370_v1 = vmul.f32 %v2791_v2, %v230_v52  ;;  %v638_v3 = vmul.f32 0.2, %v505_v59  ;;  %p2516_p6 = pnand %p2515_p8, %p2509_p10 }
  0x79   : > { %2281 = vst [vmem:[%s2829_s26 + $0x18] sm:$0xff] %v1967_v58   ;;  %v508_v4 = vadd.f32 %v2795_v5, %v368_v60  ;;  %v509_v6 = vadd.f32 %v2795_v5, %v369_v61  ;;  %v371_v7 = vmul.f32 %v2791_v2, %v231_v57  ;;  %v639_v10 = vmul.f32 0.2, %v506_v63  ;;  %v241_v57 = vld [vmem:[%s2779_s19 + $0xc8] sm:$0xff] }
  0x7a   : > { %v770_v9 = vmax.f32 %v504_v54, %v637_v62  ;;  %v640_v11 = vmul.f32 0.2, %v507_v0  ;;  %v510_v12 = vadd.f32 %v2795_v5, %v370_v1  ;;  %v771_v13 = vmax.f32 %v505_v59, %v638_v3  ;;  %v242_v3 = vld [vmem:[%s2779_s19 + $0xd0] sm:$0xff] }
  0x7b   : > { %v641_v14 = vmul.f32 0.2, %v508_v4  ;;  %v642_v15 = vmul.f32 0.2, %v509_v6  ;;  %v511_v16 = vadd.f32 %v2795_v5, %v371_v7  ;;  %v772_v18 = vmax.f32 %v506_v63, %v639_v10  ;;  %v244_v10 = vld [vmem:[%s2779_s19 + $0xe0] sm:$0xff] }
  0x7c   : > { %v773_v19 = vmax.f32 %v507_v0, %v640_v11  ;;  %v643_v20 = vmul.f32 0.2, %v510_v12  ;;  %v372_v21 = vmul.f32 %v2791_v2, %v232_v8  ;;  %v1972_v24 = vpack.c.bf16 %v771_v13, %v770_v9  ;;  %v245_v11 = vld [vmem:[%s2779_s19 + $0xe8] sm:$0xff] }
  0x7d   : > { %v774_v25 = vmax.f32 %v508_v4, %v641_v14  ;;  %v775_v26 = vmax.f32 %v509_v6, %v642_v15  ;;  %v644_v27 = vmul.f32 0.2, %v511_v16  ;;  %v373_v32 = vmul.f32 %v2791_v2, %v233_v17  ;;  %v243_v4 = vld [vmem:[%s2779_s19 + $0xd8] sm:$0xff] }
  0x7e   : > { %v1977_v30 = vpack.c.bf16 %v773_v19, %v772_v18  ;;  %v776_v31 = vmax.f32 %v510_v12, %v643_v20  ;;  %v512_v33 = vadd.f32 %v2795_v5, %v372_v21  ;;  %2282 = vst [vmem:[%s2829_s26 + $0x20] sm:$0xff] %v1972_v24   ;;  %v374_v37 = vmul.f32 %v2791_v2, %v234_v22 }
  0x7f   : > { %v1982_v35 = vpack.c.bf16 %v775_v26, %v774_v25  ;;  %v777_v36 = vmax.f32 %v511_v16, %v644_v27  ;;  %v375_v38 = vmul.f32 %v2791_v2, %v235_v23  ;;  %v513_v39 = vadd.f32 %v2795_v5, %v373_v32  ;;  %v246_v16 = vld [vmem:[%s2779_s19 + $0xf0] sm:$0xff]  ;;  %v247_v25 = vld [vmem:[%s2779_s19 + $0xf8] sm:$0xff] }
  0x80   : > { %2283 = vst [vmem:[%s2829_s26 + $0x28] sm:$0xff] %v1977_v30   ;;  %v645_v40 = vmul.f32 0.2, %v512_v33  ;;  %v376_v41 = vmul.f32 %v2791_v2, %v236_v28  ;;  %v377_v42 = vmul.f32 %v2791_v2, %v237_v29  ;;  %v514_v45 = vadd.f32 %v2795_v5, %v374_v37  ;;  %v248_v30 = vld [vmem:[%s2779_s19 + $0x100] sm:$0xff] }
  0x81   : > { %2284 = vst [vmem:[%s2829_s26 + $0x30] sm:$0xff] %v1982_v35   ;;  %v1987_v44 = vpack.c.bf16 %v777_v36, %v776_v31  ;;  %v515_v46 = vadd.f32 %v2795_v5, %v375_v38  ;;  %v378_v47 = vmul.f32 %v2791_v2, %v238_v34  ;;  %v646_v49 = vmul.f32 0.2, %v513_v39 }
  0x82   : > { %v778_v50 = vmax.f32 %v512_v33, %v645_v40  ;;  %v516_v51 = vadd.f32 %v2795_v5, %v376_v41  ;;  %v517_v52 = vadd.f32 %v2795_v5, %v377_v42  ;;  %v647_v53 = vmul.f32 0.2, %v514_v45 }
  0x83   : > { %2285 = vst [vmem:[%s2829_s26 + $0x38] sm:$0xff] %v1987_v44   ;;  %v648_v54 = vmul.f32 0.2, %v515_v46  ;;  %v379_v55 = vmul.f32 %v2791_v2, %v239_v43  ;;  %v518_v56 = vadd.f32 %v2795_v5, %v378_v47  ;;  %v779_v58 = vmax.f32 %v513_v39, %v646_v49  ;;  %v249_v39 = vld [vmem:[%s2779_s19 + $0x108] sm:$0xff]  ;;  %v250_v44 = vld [vmem:[%s2779_s19 + $0x110] sm:$0xff]  ;;  %v251_v49 = vld [vmem:[%s2779_s19 + $0x118] sm:$0xff] }
  0x84   : > { %v649_v59 = vmul.f32 0.2, %v516_v51  ;;  %v650_v60 = vmul.f32 0.2, %v517_v52  ;;  %v380_v61 = vmul.f32 %v2791_v2, %v240_v48  ;;  %v780_v62 = vmax.f32 %v514_v45, %v647_v53 }
  0x85   : > { %v781_v63 = vmax.f32 %v515_v46, %v648_v54  ;;  %v519_v0 = vadd.f32 %v2795_v5, %v379_v55  ;;  %v651_v1 = vmul.f32 0.2, %v518_v56  ;;  %v1992_v6 = vpack.c.bf16 %v779_v58, %v778_v50  ;;  %v252_v54 = vld [vmem:[%s2779_s19 + $0x120] sm:$0xff] }
  0x86   : > { %v782_v7 = vmax.f32 %v516_v51, %v649_v59  ;;  %v783_v8 = vmax.f32 %v517_v52, %v650_v60  ;;  %v381_v9 = vmul.f32 %v2791_v2, %v241_v57  ;;  %v520_v15 = vadd.f32 %v2795_v5, %v380_v61  ;;  %v253_v59 = vld [vmem:[%s2779_s19 + $0x128] sm:$0xff]  ;;  %v254_v60 = vld [vmem:[%s2779_s19 + $0x130] sm:$0xff] }
  0x87   : > { %v1997_v12 = vpack.c.bf16 %v781_v63, %v780_v62  ;;  %v652_v13 = vmul.f32 0.2, %v519_v0  ;;  %v784_v14 = vmax.f32 %v518_v56, %v651_v1  ;;  %2286 = vst [vmem:[%s2829_s26 + $0x40] sm:$0xff] %v1992_v6   ;;  %v382_v19 = vmul.f32 %v2791_v2, %v242_v3 }
  0x88   : > { %v2002_v17 = vpack.c.bf16 %v783_v8, %v782_v7  ;;  %v521_v18 = vadd.f32 %v2795_v5, %v381_v9  ;;  %v383_v20 = vmul.f32 %v2791_v2, %v243_v4  ;;  %v653_v22 = vmul.f32 0.2, %v520_v15  ;;  %v255_v7 = vld [vmem:[%s2779_s19 + $0x138] sm:$0xff] }
  0x89   : > { %2287 = vst [vmem:[%s2829_s26 + $0x48] sm:$0xff] %v1997_v12   ;;  %v785_v21 = vmax.f32 %v519_v0, %v652_v13  ;;  %v384_v23 = vmul.f32 %v2791_v2, %v244_v10  ;;  %v385_v24 = vmul.f32 %v2791_v2, %v245_v11  ;;  %v522_v27 = vadd.f32 %v2795_v5, %v382_v19  ;;  %v256_v12 = vld [vmem:[%s2779_s19 + $0x140] sm:$0xff] }
  0x8a   : > { %2288 = vst [vmem:[%s2829_s26 + $0x50] sm:$0xff] %v2002_v17   ;;  %v654_v26 = vmul.f32 0.2, %v521_v18  ;;  %v523_v28 = vadd.f32 %v2795_v5, %v383_v20  ;;  %v386_v29 = vmul.f32 %v2791_v2, %v246_v16  ;;  %v786_v32 = vmax.f32 %v520_v15, %v653_v22 }
  0x8b   : > { %v2007_v31 = vpack.c.bf16 %v785_v21, %v784_v14  ;;  %v524_v33 = vadd.f32 %v2795_v5, %v384_v23  ;;  %v525_v34 = vadd.f32 %v2795_v5, %v385_v24  ;;  %v655_v36 = vmul.f32 0.2, %v522_v27  ;;  %v257_v21 = vld [vmem:[%s2779_s19 + $0x148] sm:$0xff] }
  0x8c   : > { %v787_v35 = vmax.f32 %v521_v18, %v654_v26  ;;  %v656_v37 = vmul.f32 0.2, %v523_v28  ;;  %v387_v38 = vmul.f32 %v2791_v2, %v247_v25  ;;  %v526_v42 = vadd.f32 %v2795_v5, %v386_v29  ;;  %v258_v26 = vld [vmem:[%s2779_s19 + $0x150] sm:$0xff] }
  0x8d   : > { %2289 = vst [vmem:[%s2829_s26 + $0x58] sm:$0xff] %v2007_v31   ;;  %v657_v40 = vmul.f32 0.2, %v524_v33  ;;  %v658_v41 = vmul.f32 0.2, %v525_v34  ;;  %v388_v43 = vmul.f32 %v2791_v2, %v248_v30  ;;  %v788_v46 = vmax.f32 %v522_v27, %v655_v36  ;;  %v259_v31 = vld [vmem:[%s2779_s19 + $0x158] sm:$0xff] }
  0x8e   : > { %v2012_v45 = vpack.c.bf16 %v787_v35, %v786_v32  ;;  %v789_v47 = vmax.f32 %v523_v28, %v656_v37  ;;  %v527_v48 = vadd.f32 %v2795_v5, %v387_v38  ;;  %v659_v52 = vmul.f32 0.2, %v526_v42  ;;  %v260_v36 = vld [vmem:[%s2779_s19 + $0x160] sm:$0xff] }
  0x8f   : > { %v790_v50 = vmax.f32 %v524_v33, %v657_v40  ;;  %v791_v51 = vmax.f32 %v525_v34, %v658_v41  ;;  %v389_v53 = vmul.f32 %v2791_v2, %v249_v39  ;;  %v528_v57 = vadd.f32 %v2795_v5, %v388_v43  ;;  %v261_v41 = vld [vmem:[%s2779_s19 + $0x168] sm:$0xff] }
  0x90   : > { %2290 = vst [vmem:[%s2829_s26 + $0x60] sm:$0xff] %v2012_v45   ;;  %v2017_v55 = vpack.c.bf16 %v789_v47, %v788_v46  ;;  %v660_v56 = vmul.f32 0.2, %v527_v48  ;;  %v390_v58 = vmul.f32 %v2791_v2, %v250_v44  ;;  %v792_v62 = vmax.f32 %v526_v42, %v659_v52  ;;  %v262_v46 = vld [vmem:[%s2779_s19 + $0x170] sm:$0xff] }
  0x91   : > { %v2022_v61 = vpack.c.bf16 %v791_v51, %v790_v50  ;;  %v529_v63 = vadd.f32 %v2795_v5, %v389_v53  ;;  %v391_v0 = vmul.f32 %v2791_v2, %v251_v49  ;;  %v661_v3 = vmul.f32 0.2, %v528_v57  ;;  %v263_v51 = vld [vmem:[%s2779_s19 + $0x178] sm:$0xff] }
  0x92   : > { %2291 = vst [vmem:[%s2829_s26 + $0x68] sm:$0xff] %v2017_v55   ;;  %v793_v1 = vmax.f32 %v527_v48, %v660_v56  ;;  %v530_v4 = vadd.f32 %v2795_v5, %v390_v58  ;;  %v392_v6 = vmul.f32 %v2791_v2, %v252_v54  ;;  %v393_v10 = vmul.f32 %v2791_v2, %v253_v59  ;;  %v264_v56 = vld [vmem:[%s2779_s19 + $0x180] sm:$0xff] }
  0x93   : > { %2292 = vst [vmem:[%s2829_s26 + $0x70] sm:$0xff] %v2022_v61   ;;  %v662_v8 = vmul.f32 0.2, %v529_v63  ;;  %v531_v9 = vadd.f32 %v2795_v5, %v391_v0  ;;  %v394_v11 = vmul.f32 %v2791_v2, %v254_v60  ;;  %v794_v14 = vmax.f32 %v528_v57, %v661_v3 }
  0x94   : > { %v2027_v13 = vpack.c.bf16 %v793_v1, %v792_v62  ;;  %v663_v15 = vmul.f32 0.2, %v530_v4  ;;  %v532_v16 = vadd.f32 %v2795_v5, %v392_v6  ;;  %v533_v19 = vadd.f32 %v2795_v5, %v393_v10  ;;  %v265_v1 = vld [vmem:[%s2779_s19 + $0x188] sm:$0xff] }
  0x95   : > { %v795_v17 = vmax.f32 %v529_v63, %v662_v8  ;;  %v664_v18 = vmul.f32 0.2, %v531_v9  ;;  %v395_v20 = vmul.f32 %v2791_v2, %v255_v7  ;;  %v534_v24 = vadd.f32 %v2795_v5, %v394_v11  ;;  %v266_v8 = vld [vmem:[%s2779_s19 + $0x190] sm:$0xff] }
  0x96   : > { %2293 = vst [vmem:[%s2829_s26 + $0x78] sm:$0xff] %v2027_v13   ;;  %v796_v22 = vmax.f32 %v530_v4, %v663_v15  ;;  %v665_v23 = vmul.f32 0.2, %v532_v16  ;;  %v396_v25 = vmul.f32 %v2791_v2, %v256_v12  ;;  %v666_v29 = vmul.f32 0.2, %v533_v19  ;;  %v267_v13 = vld [vmem:[%s2779_s19 + $0x198] sm:$0xff] }
  0x97   : > { %v2032_v27 = vpack.c.bf16 %v795_v17, %v794_v14  ;;  %v797_v28 = vmax.f32 %v531_v9, %v664_v18  ;;  %v535_v30 = vadd.f32 %v2795_v5, %v395_v20  ;;  %v667_v33 = vmul.f32 0.2, %v534_v24  ;;  %v268_v18 = vld [vmem:[%s2779_s19 + $0x1a0] sm:$0xff] }
  0x98   : > { %v798_v32 = vmax.f32 %v532_v16, %v665_v23  ;;  %v397_v34 = vmul.f32 %v2791_v2, %v257_v21  ;;  %v536_v35 = vadd.f32 %v2795_v5, %v396_v25  ;;  %v799_v38 = vmax.f32 %v533_v19, %v666_v29  ;;  %v269_v23 = vld [vmem:[%s2779_s19 + $0x1a8] sm:$0xff] }
  0x99   : > { %2294 = vst [vmem:[%s2829_s26 + $0x80] sm:$0xff] %v2032_v27   ;;  %v2037_v37 = vpack.c.bf16 %v797_v28, %v796_v22  ;;  %v668_v39 = vmul.f32 0.2, %v535_v30  ;;  %v398_v40 = vmul.f32 %v2791_v2, %v258_v26  ;;  %v800_v42 = vmax.f32 %v534_v24, %v667_v33  ;;  %v270_v28 = vld [vmem:[%s2779_s19 + $0x1b0] sm:$0xff]  ;;  %v271_v33 = vld [vmem:[%s2779_s19 + $0x1b8] sm:$0xff] }
  0x9a   : > { %v537_v43 = vadd.f32 %v2795_v5, %v397_v34  ;;  %v669_v44 = vmul.f32 0.2, %v536_v35  ;;  %v399_v45 = vmul.f32 %v2791_v2, %v259_v31  ;;  %v2042_v47 = vpack.c.bf16 %v799_v38, %v798_v32  ;;  %v272_v38 = vld [vmem:[%s2779_s19 + $0x1c0] sm:$0xff] }
  0x9b   : > { %2295 = vst [vmem:[%s2829_s26 + $0x88] sm:$0xff] %v2037_v37   ;;  %v801_v48 = vmax.f32 %v535_v30, %v668_v39  ;;  %v538_v49 = vadd.f32 %v2795_v5, %v398_v40  ;;  %v400_v50 = vmul.f32 %v2791_v2, %v260_v36  ;;  %v401_v55 = vmul.f32 %v2791_v2, %v261_v41 }
  0x9c   : > { %v670_v52 = vmul.f32 0.2, %v537_v43  ;;  %v802_v53 = vmax.f32 %v536_v35, %v669_v44  ;;  %v539_v54 = vadd.f32 %v2795_v5, %v399_v45  ;;  %2296 = vst [vmem:[%s2829_s26 + $0x90] sm:$0xff] %v2042_v47   ;;  %v402_v60 = vmul.f32 %v2791_v2, %v262_v46  ;;  %v273_v47 = vld [vmem:[%s2779_s19 + $0x1c8] sm:$0xff] }
  0x9d   : > { %v2047_v57 = vpack.c.bf16 %v801_v48, %v800_v42  ;;  %v671_v58 = vmul.f32 0.2, %v538_v49  ;;  %v540_v59 = vadd.f32 %v2795_v5, %v400_v50  ;;  %v541_v63 = vadd.f32 %v2795_v5, %v401_v55 }
  0x9e   : > { %v803_v61 = vmax.f32 %v537_v43, %v670_v52  ;;  %v672_v62 = vmul.f32 0.2, %v539_v54  ;;  %v403_v0 = vmul.f32 %v2791_v2, %v263_v51  ;;  %v542_v6 = vadd.f32 %v2795_v5, %v402_v60  ;;  %v274_v52 = vld [vmem:[%s2779_s19 + $0x1d0] sm:$0xff] }
  0x9f   : > { %2297 = vst [vmem:[%s2829_s26 + $0x98] sm:$0xff] %v2047_v57   ;;  %v804_v3 = vmax.f32 %v538_v49, %v671_v58  ;;  %v673_v4 = vmul.f32 0.2, %v540_v59  ;;  %v404_v7 = vmul.f32 %v2791_v2, %v264_v56  ;;  %v674_v11 = vmul.f32 0.2, %v541_v63  ;;  %v275_v57 = vld [vmem:[%s2779_s19 + $0x1d8] sm:$0xff] }
  0xa0   : > { %v2052_v9 = vpack.c.bf16 %v803_v61, %v802_v53  ;;  %v805_v10 = vmax.f32 %v539_v54, %v672_v62  ;;  %v543_v12 = vadd.f32 %v2795_v5, %v403_v0  ;;  %v675_v15 = vmul.f32 0.2, %v542_v6  ;;  %v276_v62 = vld [vmem:[%s2779_s19 + $0x1e0] sm:$0xff] }
  0xa1   : > { %v806_v14 = vmax.f32 %v540_v59, %v673_v4  ;;  %v405_v16 = vmul.f32 %v2791_v2, %v265_v1  ;;  %v544_v17 = vadd.f32 %v2795_v5, %v404_v7  ;;  %v807_v20 = vmax.f32 %v541_v63, %v674_v11  ;;  %v277_v4 = vld [vmem:[%s2779_s19 + $0x1e8] sm:$0xff] }
  0xa2   : > { %2298 = vst [vmem:[%s2829_s26 + $0xa0] sm:$0xff] %v2052_v9   ;;  %v2057_v19 = vpack.c.bf16 %v805_v10, %v804_v3  ;;  %v676_v21 = vmul.f32 0.2, %v543_v12  ;;  %v406_v22 = vmul.f32 %v2791_v2, %v266_v8  ;;  %v808_v24 = vmax.f32 %v542_v6, %v675_v15  ;;  %v278_v10 = vld [vmem:[%s2779_s19 + $0x1f0] sm:$0xff]  ;;  %v279_v15 = vld [vmem:[%s2779_s19 + $0x1f8] sm:$0xff] }
  0xa3   : > { %v545_v25 = vadd.f32 %v2795_v5, %v405_v16  ;;  %v677_v26 = vmul.f32 0.2, %v544_v17  ;;  %v407_v27 = vmul.f32 %v2791_v2, %v267_v13  ;;  %v2062_v29 = vpack.c.bf16 %v807_v20, %v806_v14  ;;  %v280_v20 = vld [vmem:[%s2779_s19 + $0x200] sm:$0xff] }
  0xa4   : > { %2299 = vst [vmem:[%s2829_s26 + $0xa8] sm:$0xff] %v2057_v19   ;;  %v809_v30 = vmax.f32 %v543_v12, %v676_v21  ;;  %v546_v31 = vadd.f32 %v2795_v5, %v406_v22  ;;  %v408_v32 = vmul.f32 %v2791_v2, %v268_v18  ;;  %v409_v37 = vmul.f32 %v2791_v2, %v269_v23 }
  0xa5   : > { %v678_v34 = vmul.f32 0.2, %v545_v25  ;;  %v810_v35 = vmax.f32 %v544_v17, %v677_v26  ;;  %v547_v36 = vadd.f32 %v2795_v5, %v407_v27  ;;  %2300 = vst [vmem:[%s2829_s26 + $0xb0] sm:$0xff] %v2062_v29   ;;  %v410_v42 = vmul.f32 %v2791_v2, %v270_v28  ;;  %v281_v29 = vld [vmem:[%s2779_s19 + $0x208] sm:$0xff] }
  0xa6   : > { %v2067_v39 = vpack.c.bf16 %v809_v30, %v808_v24  ;;  %v679_v40 = vmul.f32 0.2, %v546_v31  ;;  %v548_v41 = vadd.f32 %v2795_v5, %v408_v32  ;;  %v549_v45 = vadd.f32 %v2795_v5, %v409_v37 }
  0xa7   : > { %v811_v43 = vmax.f32 %v545_v25, %v678_v34  ;;  %v680_v44 = vmul.f32 0.2, %v547_v36  ;;  %v411_v46 = vmul.f32 %v2791_v2, %v271_v33  ;;  %v550_v50 = vadd.f32 %v2795_v5, %v410_v42  ;;  %v282_v34 = vld [vmem:[%s2779_s19 + $0x210] sm:$0xff] }
  0xa8   : > { %2301 = vst [vmem:[%s2829_s26 + $0xb8] sm:$0xff] %v2067_v39   ;;  %v812_v48 = vmax.f32 %v546_v31, %v679_v40  ;;  %v681_v49 = vmul.f32 0.2, %v548_v41  ;;  %v412_v51 = vmul.f32 %v2791_v2, %v272_v38  ;;  %v682_v55 = vmul.f32 0.2, %v549_v45  ;;  %v283_v39 = vld [vmem:[%s2779_s19 + $0x218] sm:$0xff] }
  0xa9   : > { %v2072_v53 = vpack.c.bf16 %v811_v43, %v810_v35  ;;  %v813_v54 = vmax.f32 %v547_v36, %v680_v44  ;;  %v551_v56 = vadd.f32 %v2795_v5, %v411_v46  ;;  %v683_v59 = vmul.f32 0.2, %v550_v50  ;;  %v284_v44 = vld [vmem:[%s2779_s19 + $0x220] sm:$0xff] }
  0xaa   : > { %v814_v58 = vmax.f32 %v548_v41, %v681_v49  ;;  %v413_v60 = vmul.f32 %v2791_v2, %v273_v47  ;;  %v552_v61 = vadd.f32 %v2795_v5, %v412_v51  ;;  %v815_v0 = vmax.f32 %v549_v45, %v682_v55  ;;  %v285_v49 = vld [vmem:[%s2779_s19 + $0x228] sm:$0xff] }
  0xab   : > { %2302 = vst [vmem:[%s2829_s26 + $0xc0] sm:$0xff] %v2072_v53   ;;  %v2077_v63 = vpack.c.bf16 %v813_v54, %v812_v48  ;;  %v684_v1 = vmul.f32 0.2, %v551_v56  ;;  %v414_v3 = vmul.f32 %v2791_v2, %v274_v52  ;;  %v816_v6 = vmax.f32 %v550_v50, %v683_v59  ;;  %v286_v54 = vld [vmem:[%s2779_s19 + $0x230] sm:$0xff]  ;;  %v287_v59 = vld [vmem:[%s2779_s19 + $0x238] sm:$0xff] }
  0xac   : > { %v553_v7 = vadd.f32 %v2795_v5, %v413_v60  ;;  %v685_v8 = vmul.f32 0.2, %v552_v61  ;;  %v415_v9 = vmul.f32 %v2791_v2, %v275_v57  ;;  %v2082_v11 = vpack.c.bf16 %v815_v0, %v814_v58  ;;  %v288_v0 = vld [vmem:[%s2779_s19 + $0x240] sm:$0xff] }
  0xad   : > { %2303 = vst [vmem:[%s2829_s26 + $0xc8] sm:$0xff] %v2077_v63   ;;  %v817_v12 = vmax.f32 %v551_v56, %v684_v1  ;;  %v554_v13 = vadd.f32 %v2795_v5, %v414_v3  ;;  %v416_v14 = vmul.f32 %v2791_v2, %v276_v62  ;;  %v417_v19 = vmul.f32 %v2791_v2, %v277_v4 }
  0xae   : > { %v686_v16 = vmul.f32 0.2, %v553_v7  ;;  %v818_v17 = vmax.f32 %v552_v61, %v685_v8  ;;  %v555_v18 = vadd.f32 %v2795_v5, %v415_v9  ;;  %2304 = vst [vmem:[%s2829_s26 + $0xd0] sm:$0xff] %v2082_v11   ;;  %v418_v24 = vmul.f32 %v2791_v2, %v278_v10  ;;  %v289_v11 = vld [vmem:[%s2779_s19 + $0x248] sm:$0xff] }
  0xaf   : > { %v2087_v21 = vpack.c.bf16 %v817_v12, %v816_v6  ;;  %v687_v22 = vmul.f32 0.2, %v554_v13  ;;  %v556_v23 = vadd.f32 %v2795_v5, %v416_v14  ;;  %v557_v27 = vadd.f32 %v2795_v5, %v417_v19 }
  0xb0   : > { %v819_v25 = vmax.f32 %v553_v7, %v686_v16  ;;  %v688_v26 = vmul.f32 0.2, %v555_v18  ;;  %v419_v28 = vmul.f32 %v2791_v2, %v279_v15  ;;  %v558_v32 = vadd.f32 %v2795_v5, %v418_v24  ;;  %v290_v16 = vld [vmem:[%s2779_s19 + $0x250] sm:$0xff] }
  0xb1   : > { %2305 = vst [vmem:[%s2829_s26 + $0xd8] sm:$0xff] %v2087_v21   ;;  %v820_v30 = vmax.f32 %v554_v13, %v687_v22  ;;  %v689_v31 = vmul.f32 0.2, %v556_v23  ;;  %v420_v33 = vmul.f32 %v2791_v2, %v280_v20  ;;  %v690_v37 = vmul.f32 0.2, %v557_v27  ;;  %v291_v21 = vld [vmem:[%s2779_s19 + $0x258] sm:$0xff] }
  0xb2   : > { %v2092_v35 = vpack.c.bf16 %v819_v25, %v818_v17  ;;  %v821_v36 = vmax.f32 %v555_v18, %v688_v26  ;;  %v559_v38 = vadd.f32 %v2795_v5, %v419_v28  ;;  %v691_v41 = vmul.f32 0.2, %v558_v32  ;;  %v292_v26 = vld [vmem:[%s2779_s19 + $0x260] sm:$0xff] }
  0xb3   : > { %v822_v40 = vmax.f32 %v556_v23, %v689_v31  ;;  %v421_v42 = vmul.f32 %v2791_v2, %v281_v29  ;;  %v560_v43 = vadd.f32 %v2795_v5, %v420_v33  ;;  %v823_v46 = vmax.f32 %v557_v27, %v690_v37  ;;  %v293_v31 = vld [vmem:[%s2779_s19 + $0x268] sm:$0xff] }
  0xb4   : > { %2306 = vst [vmem:[%s2829_s26 + $0xe0] sm:$0xff] %v2092_v35   ;;  %v2097_v45 = vpack.c.bf16 %v821_v36, %v820_v30  ;;  %v692_v47 = vmul.f32 0.2, %v559_v38  ;;  %v422_v48 = vmul.f32 %v2791_v2, %v282_v34  ;;  %v824_v50 = vmax.f32 %v558_v32, %v691_v41  ;;  %v294_v36 = vld [vmem:[%s2779_s19 + $0x270] sm:$0xff]  ;;  %v295_v41 = vld [vmem:[%s2779_s19 + $0x278] sm:$0xff] }
  0xb5   : > { %v561_v51 = vadd.f32 %v2795_v5, %v421_v42  ;;  %v693_v52 = vmul.f32 0.2, %v560_v43  ;;  %v423_v53 = vmul.f32 %v2791_v2, %v283_v39  ;;  %v2102_v55 = vpack.c.bf16 %v823_v46, %v822_v40  ;;  %v296_v46 = vld [vmem:[%s2779_s19 + $0x280] sm:$0xff] }
  0xb6   : > { %2307 = vst [vmem:[%s2829_s26 + $0xe8] sm:$0xff] %v2097_v45   ;;  %v825_v56 = vmax.f32 %v559_v38, %v692_v47  ;;  %v562_v57 = vadd.f32 %v2795_v5, %v422_v48  ;;  %v424_v58 = vmul.f32 %v2791_v2, %v284_v44  ;;  %v425_v63 = vmul.f32 %v2791_v2, %v285_v49 }
  0xb7   : > { %v694_v60 = vmul.f32 0.2, %v561_v51  ;;  %v826_v61 = vmax.f32 %v560_v43, %v693_v52  ;;  %v563_v62 = vadd.f32 %v2795_v5, %v423_v53  ;;  %2308 = vst [vmem:[%s2829_s26 + $0xf0] sm:$0xff] %v2102_v55   ;;  %v426_v6 = vmul.f32 %v2791_v2, %v286_v54  ;;  %v297_v55 = vld [vmem:[%s2779_s19 + $0x288] sm:$0xff] }
  0xb8   : > { %v2107_v1 = vpack.c.bf16 %v825_v56, %v824_v50  ;;  %v695_v3 = vmul.f32 0.2, %v562_v57  ;;  %v564_v4 = vadd.f32 %v2795_v5, %v424_v58  ;;  %v565_v9 = vadd.f32 %v2795_v5, %v425_v63 }
  0xb9   : > { %v827_v7 = vmax.f32 %v561_v51, %v694_v60  ;;  %v696_v8 = vmul.f32 0.2, %v563_v62  ;;  %v427_v10 = vmul.f32 %v2791_v2, %v287_v59  ;;  %v566_v14 = vadd.f32 %v2795_v5, %v426_v6  ;;  %v298_v60 = vld [vmem:[%s2779_s19 + $0x290] sm:$0xff] }
  0xba   : > { %2309 = vst [vmem:[%s2829_s26 + $0xf8] sm:$0xff] %v2107_v1   ;;  %v828_v12 = vmax.f32 %v562_v57, %v695_v3  ;;  %v697_v13 = vmul.f32 0.2, %v564_v4  ;;  %v428_v15 = vmul.f32 %v2791_v2, %v288_v0  ;;  %v698_v19 = vmul.f32 0.2, %v565_v9  ;;  %v299_v1 = vld [vmem:[%s2779_s19 + $0x298] sm:$0xff] }
  0xbb   : > { %v2112_v17 = vpack.c.bf16 %v827_v7, %v826_v61  ;;  %v829_v18 = vmax.f32 %v563_v62, %v696_v8  ;;  %v567_v20 = vadd.f32 %v2795_v5, %v427_v10  ;;  %v699_v23 = vmul.f32 0.2, %v566_v14  ;;  %v300_v8 = vld [vmem:[%s2779_s19 + $0x2a0] sm:$0xff] }
  0xbc   : > { %v830_v22 = vmax.f32 %v564_v4, %v697_v13  ;;  %v429_v24 = vmul.f32 %v2791_v2, %v289_v11  ;;  %v568_v25 = vadd.f32 %v2795_v5, %v428_v15  ;;  %v831_v28 = vmax.f32 %v565_v9, %v698_v19  ;;  %v301_v13 = vld [vmem:[%s2779_s19 + $0x2a8] sm:$0xff] }
  0xbd   : > { %2310 = vst [vmem:[%s2829_s26 + $0x100] sm:$0xff] %v2112_v17   ;;  %v2117_v27 = vpack.c.bf16 %v829_v18, %v828_v12  ;;  %v700_v29 = vmul.f32 0.2, %v567_v20  ;;  %v430_v30 = vmul.f32 %v2791_v2, %v290_v16  ;;  %v832_v32 = vmax.f32 %v566_v14, %v699_v23  ;;  %v302_v18 = vld [vmem:[%s2779_s19 + $0x2b0] sm:$0xff]  ;;  %v303_v23 = vld [vmem:[%s2779_s19 + $0x2b8] sm:$0xff] }
  0xbe   : > { %v569_v33 = vadd.f32 %v2795_v5, %v429_v24  ;;  %v701_v34 = vmul.f32 0.2, %v568_v25  ;;  %v431_v35 = vmul.f32 %v2791_v2, %v291_v21  ;;  %v2122_v37 = vpack.c.bf16 %v831_v28, %v830_v22  ;;  %v304_v28 = vld [vmem:[%s2779_s19 + $0x2c0] sm:$0xff] }
  0xbf   : > { %2311 = vst [vmem:[%s2829_s26 + $0x108] sm:$0xff] %v2117_v27   ;;  %v833_v38 = vmax.f32 %v567_v20, %v700_v29  ;;  %v570_v39 = vadd.f32 %v2795_v5, %v430_v30  ;;  %v432_v40 = vmul.f32 %v2791_v2, %v292_v26  ;;  %v433_v45 = vmul.f32 %v2791_v2, %v293_v31 }
  0xc0   : > { %v702_v42 = vmul.f32 0.2, %v569_v33  ;;  %v834_v43 = vmax.f32 %v568_v25, %v701_v34  ;;  %v571_v44 = vadd.f32 %v2795_v5, %v431_v35  ;;  %2312 = vst [vmem:[%s2829_s26 + $0x110] sm:$0xff] %v2122_v37   ;;  %v434_v50 = vmul.f32 %v2791_v2, %v294_v36  ;;  %v305_v37 = vld [vmem:[%s2779_s19 + $0x2c8] sm:$0xff] }
  0xc1   : > { %v2127_v47 = vpack.c.bf16 %v833_v38, %v832_v32  ;;  %v703_v48 = vmul.f32 0.2, %v570_v39  ;;  %v572_v49 = vadd.f32 %v2795_v5, %v432_v40  ;;  %v573_v53 = vadd.f32 %v2795_v5, %v433_v45 }
  0xc2   : > { %v835_v51 = vmax.f32 %v569_v33, %v702_v42  ;;  %v704_v52 = vmul.f32 0.2, %v571_v44  ;;  %v435_v54 = vmul.f32 %v2791_v2, %v295_v41  ;;  %v574_v58 = vadd.f32 %v2795_v5, %v434_v50  ;;  %v3103_v41 = vld [vmem:[#allocation5] ss:$0 sm:$0xff] }
  0xc3   : > { %2313 = vst [vmem:[%s2829_s26 + $0x118] sm:$0xff] %v2127_v47   ;;  %v836_v56 = vmax.f32 %v570_v39, %v703_v48  ;;  %v705_v57 = vmul.f32 0.2, %v572_v49  ;;  %v436_v59 = vmul.f32 %v2791_v2, %v296_v46  ;;  %v706_v63 = vmul.f32 0.2, %v573_v53  ;;  %v307_v48 = vld [vmem:[%s2779_s19 + $0x2d8] sm:$0xff] }
  0xc4   : > { %v2132_v61 = vpack.c.bf16 %v835_v51, %v834_v43  ;;  %v837_v62 = vmax.f32 %v571_v44, %v704_v52  ;;  %v575_v0 = vadd.f32 %v2795_v5, %v435_v54  ;;  %v707_v4 = vmul.f32 0.2, %v574_v58  ;;  %v306_v43 = vld [vmem:[%s2779_s19 + $0x2d0] sm:$0xff]  ;;  %v308_v52 = vld [vmem:[%s2779_s19 + $0x2e0] sm:$0xff] }
  0xc5   : > { %v838_v3 = vmax.f32 %v572_v49, %v705_v57  ;;  %v437_v6 = vmul.f32 %v2791_v2, %v297_v55  ;;  %v576_v7 = vadd.f32 %v2795_v5, %v436_v59  ;;  %v839_v10 = vmax.f32 %v573_v53, %v706_v63  ;;  %v3107_v47 = vld [vmem:[#allocation7] ss:$0 sm:$0xff] }
  0xc6   : > { %2314 = vst [vmem:[%s2829_s26 + $0x120] sm:$0xff] %v2132_v61   ;;  %v2137_v9 = vpack.c.bf16 %v837_v62, %v836_v56  ;;  %v708_v11 = vmul.f32 0.2, %v575_v0  ;;  %v438_v12 = vmul.f32 %v2791_v2, %v298_v60  ;;  %v840_v14 = vmax.f32 %v574_v58, %v707_v4  ;;  %v309_v57 = vld [vmem:[%s2779_s19 + $0x2e8] sm:$0xff]  ;;  %v310_v62 = vld [vmem:[%s2779_s19 + $0x2f0] sm:$0xff]  ;;  %v311_v4 = vld [vmem:[%s2779_s19 + $0x2f8] sm:$0xff] }
  0xc7   : > { %v577_v15 = vadd.f32 %v2795_v5, %v437_v6  ;;  %v709_v16 = vmul.f32 0.2, %v576_v7  ;;  %v439_v17 = vmul.f32 %v2791_v2, %v299_v1  ;;  %v2142_v19 = vpack.c.bf16 %v839_v10, %v838_v3  ;;  %v312_v10 = vld [vmem:[%s2779_s19 + $0x300] sm:$0xff] }
  0xc8   : > { %2315 = vst [vmem:[%s2829_s26 + $0x128] sm:$0xff] %v2137_v9   ;;  %v841_v20 = vmax.f32 %v575_v0, %v708_v11  ;;  %v578_v21 = vadd.f32 %v2795_v5, %v438_v12  ;;  %v440_v22 = vmul.f32 %v2791_v2, %v300_v8  ;;  %v441_v27 = vmul.f32 %v2791_v2, %v301_v13 }
  0xc9   : > { %v710_v24 = vmul.f32 0.2, %v577_v15  ;;  %v842_v25 = vmax.f32 %v576_v7, %v709_v16  ;;  %v579_v26 = vadd.f32 %v2795_v5, %v439_v17  ;;  %2316 = vst [vmem:[%s2829_s26 + $0x130] sm:$0xff] %v2142_v19   ;;  %v442_v32 = vmul.f32 %v2791_v2, %v302_v18  ;;  %v313_v19 = vld [vmem:[%s2779_s19 + $0x308] sm:$0xff] }
  0xca   : > { %v2147_v29 = vpack.c.bf16 %v841_v20, %v840_v14  ;;  %v711_v30 = vmul.f32 0.2, %v578_v21  ;;  %v580_v31 = vadd.f32 %v2795_v5, %v440_v22  ;;  %v581_v35 = vadd.f32 %v2795_v5, %v441_v27 }
  0xcb   : > { %v843_v33 = vmax.f32 %v577_v15, %v710_v24  ;;  %v712_v34 = vmul.f32 0.2, %v579_v26  ;;  %v443_v36 = vmul.f32 %v2791_v2, %v303_v23  ;;  %v582_v40 = vadd.f32 %v2795_v5, %v442_v32  ;;  %v314_v24 = vld [vmem:[%s2779_s19 + $0x310] sm:$0xff] }
  0xcc   : > { %2317 = vst [vmem:[%s2829_s26 + $0x138] sm:$0xff] %v2147_v29   ;;  %v844_v38 = vmax.f32 %v578_v21, %v711_v30  ;;  %v713_v39 = vmul.f32 0.2, %v580_v31  ;;  %v444_v42 = vmul.f32 %v3103_v41, %v304_v28  ;;  %v714_v46 = vmul.f32 0.2, %v581_v35  ;;  %v315_v29 = vld [vmem:[%s2779_s19 + $0x318] sm:$0xff] }
  0xcd   : > { %v2152_v44 = vpack.c.bf16 %v843_v33, %v842_v25  ;;  %v845_v45 = vmax.f32 %v579_v26, %v712_v34  ;;  %v583_v2 = vadd.f32 %v3107_v47, %v443_v36  ;;  %v715_v50 = vmul.f32 0.2, %v582_v40  ;;  %v316_v34 = vld [vmem:[%s2779_s19 + $0x320] sm:$0xff] }
  0xce   : > { %v846_v49 = vmax.f32 %v580_v31, %v713_v39  ;;  %v445_v5 = vmul.f32 %v3103_v41, %v305_v37  ;;  %v584_v51 = vadd.f32 %v3107_v47, %v444_v42  ;;  %v847_v54 = vmax.f32 %v581_v35, %v714_v46  ;;  %v317_v39 = vld [vmem:[%s2779_s19 + $0x328] sm:$0xff] }
  0xcf   : > { %2318 = vst [vmem:[%s2829_s26 + $0x140] sm:$0xff] %v2152_v44   ;;  %v2157_v53 = vpack.c.bf16 %v845_v45, %v844_v38  ;;  %v716_v55 = vmul.f32 0.2, %v583_v2  ;;  %v446_v56 = vmul.f32 %v3103_v41, %v306_v43  ;;  %v848_v58 = vmax.f32 %v582_v40, %v715_v50  ;;  %v318_v45 = vld [vmem:[%s2779_s19 + $0x330] sm:$0xff]  ;;  %v319_v50 = vld [vmem:[%s2779_s19 + $0x338] sm:$0xff] }
  0xd0   : > { %v585_v59 = vadd.f32 %v3107_v47, %v445_v5  ;;  %v717_v60 = vmul.f32 0.2, %v584_v51  ;;  %v447_v61 = vmul.f32 %v3103_v41, %v307_v48  ;;  %v2162_v63 = vpack.c.bf16 %v847_v54, %v846_v49  ;;  %v320_v54 = vld [vmem:[%s2779_s19 + $0x340] sm:$0xff] }
  0xd1   : > { %2319 = vst [vmem:[%s2829_s26 + $0x148] sm:$0xff] %v2157_v53   ;;  %v849_v0 = vmax.f32 %v583_v2, %v716_v55  ;;  %v586_v1 = vadd.f32 %v3107_v47, %v446_v56  ;;  %v448_v3 = vmul.f32 %v3103_v41, %v308_v52  ;;  %v449_v9 = vmul.f32 %v3103_v41, %v309_v57 }
  0xd2   : > { %v718_v6 = vmul.f32 0.2, %v585_v59  ;;  %v850_v7 = vmax.f32 %v584_v51, %v717_v60  ;;  %v587_v8 = vadd.f32 %v3107_v47, %v447_v61  ;;  %2320 = vst [vmem:[%s2829_s26 + $0x150] sm:$0xff] %v2162_v63   ;;  %v450_v14 = vmul.f32 %v3103_v41, %v310_v62  ;;  %v321_v63 = vld [vmem:[%s2779_s19 + $0x348] sm:$0xff] }
  0xd3   : > { %v2167_v11 = vpack.c.bf16 %v849_v0, %v848_v58  ;;  %v719_v12 = vmul.f32 0.2, %v586_v1  ;;  %v588_v13 = vadd.f32 %v3107_v47, %v448_v3  ;;  %v589_v17 = vadd.f32 %v3107_v47, %v449_v9 }
  0xd4   : > { %v851_v15 = vmax.f32 %v585_v59, %v718_v6  ;;  %v720_v16 = vmul.f32 0.2, %v587_v8  ;;  %v451_v18 = vmul.f32 %v3103_v41, %v311_v4  ;;  %v590_v22 = vadd.f32 %v3107_v47, %v450_v14  ;;  %v322_v6 = vld [vmem:[%s2779_s19 + $0x350] sm:$0xff] }
  0xd5   : > { %2321 = vst [vmem:[%s2829_s26 + $0x158] sm:$0xff] %v2167_v11   ;;  %v852_v20 = vmax.f32 %v586_v1, %v719_v12  ;;  %v721_v21 = vmul.f32 0.2, %v588_v13  ;;  %v452_v23 = vmul.f32 %v3103_v41, %v312_v10  ;;  %v722_v27 = vmul.f32 0.2, %v589_v17  ;;  %v323_v11 = vld [vmem:[%s2779_s19 + $0x358] sm:$0xff] }
  0xd6   : > { %v2172_v25 = vpack.c.bf16 %v851_v15, %v850_v7  ;;  %v853_v26 = vmax.f32 %v587_v8, %v720_v16  ;;  %v591_v28 = vadd.f32 %v3107_v47, %v451_v18  ;;  %v723_v31 = vmul.f32 0.2, %v590_v22  ;;  %v324_v16 = vld [vmem:[%s2779_s19 + $0x360] sm:$0xff] }
  0xd7   : > { %v854_v30 = vmax.f32 %v588_v13, %v721_v21  ;;  %v453_v32 = vmul.f32 %v3103_v41, %v313_v19  ;;  %v592_v33 = vadd.f32 %v3107_v47, %v452_v23  ;;  %v855_v36 = vmax.f32 %v589_v17, %v722_v27  ;;  %v325_v21 = vld [vmem:[%s2779_s19 + $0x368] sm:$0xff] }
  0xd8   : > { %2322 = vst [vmem:[%s2829_s26 + $0x160] sm:$0xff] %v2172_v25   ;;  %v2177_v35 = vpack.c.bf16 %v853_v26, %v852_v20  ;;  %v724_v37 = vmul.f32 0.2, %v591_v28  ;;  %v454_v38 = vmul.f32 %v3103_v41, %v314_v24  ;;  %v856_v40 = vmax.f32 %v590_v22, %v723_v31  ;;  %v326_v26 = vld [vmem:[%s2779_s19 + $0x370] sm:$0xff]  ;;  %v327_v31 = vld [vmem:[%s2779_s19 + $0x378] sm:$0xff] }
  0xd9   : > { %v593_v42 = vadd.f32 %v3107_v47, %v453_v32  ;;  %v725_v43 = vmul.f32 0.2, %v592_v33  ;;  %v455_v44 = vmul.f32 %v3103_v41, %v315_v29  ;;  %v2182_v46 = vpack.c.bf16 %v855_v36, %v854_v30  ;;  %v328_v36 = vld [vmem:[%s2779_s19 + $0x380] sm:$0xff] }
  0xda   : > { %2323 = vst [vmem:[%s2829_s26 + $0x168] sm:$0xff] %v2177_v35   ;;  %v857_v2 = vmax.f32 %v591_v28, %v724_v37  ;;  %v594_v48 = vadd.f32 %v3107_v47, %v454_v38  ;;  %v456_v49 = vmul.f32 %v3103_v41, %v316_v34  ;;  %v457_v53 = vmul.f32 %v3103_v41, %v317_v39 }
  0xdb   : > { %v726_v5 = vmul.f32 0.2, %v593_v42  ;;  %v858_v51 = vmax.f32 %v592_v33, %v725_v43  ;;  %v595_v52 = vadd.f32 %v3107_v47, %v455_v44  ;;  %2324 = vst [vmem:[%s2829_s26 + $0x170] sm:$0xff] %v2182_v46   ;;  %v458_v58 = vmul.f32 %v3103_v41, %v318_v45  ;;  %v329_v46 = vld [vmem:[%s2779_s19 + $0x388] sm:$0xff] }
  0xdc   : > { %v2187_v55 = vpack.c.bf16 %v857_v2, %v856_v40  ;;  %v727_v56 = vmul.f32 0.2, %v594_v48  ;;  %v596_v57 = vadd.f32 %v3107_v47, %v456_v49  ;;  %v597_v61 = vadd.f32 %v3107_v47, %v457_v53 }
  0xdd   : > { %v859_v59 = vmax.f32 %v593_v42, %v726_v5  ;;  %v728_v60 = vmul.f32 0.2, %v595_v52  ;;  %v459_v62 = vmul.f32 %v3103_v41, %v319_v50  ;;  %v598_v3 = vadd.f32 %v3107_v47, %v458_v58  ;;  %v330_v5 = vld [vmem:[%s2779_s19 + $0x390] sm:$0xff] }
  0xde   : > { %2325 = vst [vmem:[%s2829_s26 + $0x178] sm:$0xff] %v2187_v55   ;;  %v860_v0 = vmax.f32 %v594_v48, %v727_v56  ;;  %v729_v1 = vmul.f32 0.2, %v596_v57  ;;  %v460_v4 = vmul.f32 %v3103_v41, %v320_v54  ;;  %v730_v9 = vmul.f32 0.2, %v597_v61  ;;  %v331_v55 = vld [vmem:[%s2779_s19 + $0x398] sm:$0xff] }
  0xdf   : > { %v2192_v7 = vpack.c.bf16 %v859_v59, %v858_v51  ;;  %v861_v8 = vmax.f32 %v595_v52, %v728_v60  ;;  %v599_v10 = vadd.f32 %v3107_v47, %v459_v62  ;;  %v731_v13 = vmul.f32 0.2, %v598_v3  ;;  %v332_v60 = vld [vmem:[%s2779_s19 + $0x3a0] sm:$0xff] }
  0xe0   : > { %v862_v12 = vmax.f32 %v596_v57, %v729_v1  ;;  %v461_v14 = vmul.f32 %v3103_v41, %v321_v63  ;;  %v600_v15 = vadd.f32 %v3107_v47, %v460_v4  ;;  %v863_v18 = vmax.f32 %v597_v61, %v730_v9  ;;  %v333_v1 = vld [vmem:[%s2779_s19 + $0x3a8] sm:$0xff] }
  0xe1   : > { %2326 = vst [vmem:[%s2829_s26 + $0x180] sm:$0xff] %v2192_v7   ;;  %v2197_v17 = vpack.c.bf16 %v861_v8, %v860_v0  ;;  %v732_v19 = vmul.f32 0.2, %v599_v10  ;;  %v462_v20 = vmul.f32 %v3103_v41, %v322_v6  ;;  %v864_v22 = vmax.f32 %v598_v3, %v731_v13  ;;  %v334_v8 = vld [vmem:[%s2779_s19 + $0x3b0] sm:$0xff]  ;;  %v335_v13 = vld [vmem:[%s2779_s19 + $0x3b8] sm:$0xff] }
  0xe2   : > { %v601_v23 = vadd.f32 %v3107_v47, %v461_v14  ;;  %v733_v24 = vmul.f32 0.2, %v600_v15  ;;  %v463_v25 = vmul.f32 %v3103_v41, %v323_v11  ;;  %v2202_v27 = vpack.c.bf16 %v863_v18, %v862_v12  ;;  %v336_v18 = vld [vmem:[%s2779_s19 + $0x3c0] sm:$0xff] }
  0xe3   : > { %2327 = vst [vmem:[%s2829_s26 + $0x188] sm:$0xff] %v2197_v17   ;;  %v865_v28 = vmax.f32 %v599_v10, %v732_v19  ;;  %v602_v29 = vadd.f32 %v3107_v47, %v462_v20  ;;  %v464_v30 = vmul.f32 %v3103_v41, %v324_v16  ;;  %v465_v35 = vmul.f32 %v3103_v41, %v325_v21 }
  0xe4   : > { %v734_v32 = vmul.f32 0.2, %v601_v23  ;;  %v866_v33 = vmax.f32 %v600_v15, %v733_v24  ;;  %v603_v34 = vadd.f32 %v3107_v47, %v463_v25  ;;  %2328 = vst [vmem:[%s2829_s26 + $0x190] sm:$0xff] %v2202_v27   ;;  %v466_v40 = vmul.f32 %v3103_v41, %v326_v26  ;;  %v337_v27 = vld [vmem:[%s2779_s19 + $0x3c8] sm:$0xff] }
  0xe5   : > { %v2207_v37 = vpack.c.bf16 %v865_v28, %v864_v22  ;;  %v735_v38 = vmul.f32 0.2, %v602_v29  ;;  %v604_v39 = vadd.f32 %v3107_v47, %v464_v30  ;;  %v605_v44 = vadd.f32 %v3107_v47, %v465_v35 }
  0xe6   : > { %v867_v42 = vmax.f32 %v601_v23, %v734_v32  ;;  %v736_v43 = vmul.f32 0.2, %v603_v34  ;;  %v467_v45 = vmul.f32 %v3103_v41, %v327_v31  ;;  %v606_v49 = vadd.f32 %v3107_v47, %v466_v40  ;;  %v338_v32 = vld [vmem:[%s2779_s19 + $0x3d0] sm:$0xff] }
  0xe7   : > { %2329 = vst [vmem:[%s2829_s26 + $0x198] sm:$0xff] %v2207_v37   ;;  %v868_v2 = vmax.f32 %v602_v29, %v735_v38  ;;  %v737_v48 = vmul.f32 0.2, %v604_v39  ;;  %v468_v50 = vmul.f32 %v3103_v41, %v328_v36  ;;  %v738_v53 = vmul.f32 0.2, %v605_v44  ;;  %v339_v37 = vld [vmem:[%s2779_s19 + $0x3d8] sm:$0xff] }
  0xe8   : > { %v2212_v51 = vpack.c.bf16 %v867_v42, %v866_v33  ;;  %v869_v52 = vmax.f32 %v603_v34, %v736_v43  ;;  %v607_v54 = vadd.f32 %v3107_v47, %v467_v45  ;;  %v739_v57 = vmul.f32 0.2, %v606_v49  ;;  %v340_v43 = vld [vmem:[%s2779_s19 + $0x3e0] sm:$0xff] }
  0xe9   : > { %v870_v56 = vmax.f32 %v604_v39, %v737_v48  ;;  %v469_v58 = vmul.f32 %v3103_v41, %v329_v46  ;;  %v608_v59 = vadd.f32 %v3107_v47, %v468_v50  ;;  %v871_v62 = vmax.f32 %v605_v44, %v738_v53  ;;  %v341_v48 = vld [vmem:[%s2779_s19 + $0x3e8] sm:$0xff] }
  0xea   : > { %2330 = vst [vmem:[%s2829_s26 + $0x1a0] sm:$0xff] %v2212_v51   ;;  %v2217_v61 = vpack.c.bf16 %v869_v52, %v868_v2  ;;  %v740_v63 = vmul.f32 0.2, %v607_v54  ;;  %v470_v0 = vmul.f32 %v3103_v41, %v330_v5  ;;  %v872_v3 = vmax.f32 %v606_v49, %v739_v57  ;;  %v342_v52 = vld [vmem:[%s2779_s19 + $0x3f0] sm:$0xff]  ;;  %v343_v57 = vld [vmem:[%s2779_s19 + $0x3f8] sm:$0xff] }
  0xeb   : > { %v609_v4 = vadd.f32 %v3107_v47, %v469_v58  ;;  %v741_v6 = vmul.f32 0.2, %v608_v59  ;;  %v471_v7 = vmul.f32 %v3103_v41, %v331_v55  ;;  %v2222_v9 = vpack.c.bf16 %v871_v62, %v870_v56  ;;  %v344_v62 = vld [vmem:[%s2779_s19 + $0x400] sm:$0xff] }
  0xec   : > { %2331 = vst [vmem:[%s2829_s26 + $0x1a8] sm:$0xff] %v2217_v61   ;;  %v873_v10 = vmax.f32 %v607_v54, %v740_v63  ;;  %v610_v11 = vadd.f32 %v3107_v47, %v470_v0  ;;  %v472_v12 = vmul.f32 %v3103_v41, %v332_v60  ;;  %v473_v17 = vmul.f32 %v3103_v41, %v333_v1 }
  0xed   : > { %v742_v14 = vmul.f32 0.2, %v609_v4  ;;  %v874_v15 = vmax.f32 %v608_v59, %v741_v6  ;;  %v611_v16 = vadd.f32 %v3107_v47, %v471_v7  ;;  %2332 = vst [vmem:[%s2829_s26 + $0x1b0] sm:$0xff] %v2222_v9   ;;  %v474_v22 = vmul.f32 %v3103_v41, %v334_v8  ;;  %v345_v9 = vld [vmem:[%s2779_s19 + $0x408] sm:$0xff] }
  0xee   : > { %v2227_v19 = vpack.c.bf16 %v873_v10, %v872_v3  ;;  %v743_v20 = vmul.f32 0.2, %v610_v11  ;;  %v612_v21 = vadd.f32 %v3107_v47, %v472_v12  ;;  %v613_v25 = vadd.f32 %v3107_v47, %v473_v17 }
  0xef   : > { %v875_v23 = vmax.f32 %v609_v4, %v742_v14  ;;  %v744_v24 = vmul.f32 0.2, %v611_v16  ;;  %v475_v26 = vmul.f32 %v3103_v41, %v335_v13  ;;  %v614_v30 = vadd.f32 %v3107_v47, %v474_v22  ;;  %v346_v14 = vld [vmem:[%s2779_s19 + $0x410] sm:$0xff] }
  0xf0   : > { %2333 = vst [vmem:[%s2829_s26 + $0x1b8] sm:$0xff] %v2227_v19   ;;  %v876_v28 = vmax.f32 %v610_v11, %v743_v20  ;;  %v745_v29 = vmul.f32 0.2, %v612_v21  ;;  %v476_v31 = vmul.f32 %v3103_v41, %v336_v18  ;;  %v746_v35 = vmul.f32 0.2, %v613_v25  ;;  %v347_v19 = vld [vmem:[%s2779_s19 + $0x418] sm:$0xff] }
  0xf1   : > { %v2232_v33 = vpack.c.bf16 %v875_v23, %v874_v15  ;;  %v877_v34 = vmax.f32 %v611_v16, %v744_v24  ;;  %v615_v36 = vadd.f32 %v3107_v47, %v475_v26  ;;  %v747_v39 = vmul.f32 0.2, %v614_v30  ;;  %v348_v24 = vld [vmem:[%s2779_s19 + $0x420] sm:$0xff] }
  0xf2   : > { %v878_v38 = vmax.f32 %v612_v21, %v745_v29  ;;  %v477_v40 = vmul.f32 %v3103_v41, %v337_v27  ;;  %v616_v42 = vadd.f32 %v3107_v47, %v476_v31  ;;  %v879_v45 = vmax.f32 %v613_v25, %v746_v35 }
  0xf3   : > { %2334 = vst [vmem:[%s2829_s26 + $0x1c0] sm:$0xff] %v2232_v33   ;;  %v2237_v44 = vpack.c.bf16 %v877_v34, %v876_v28  ;;  %v748_v46 = vmul.f32 0.2, %v615_v36  ;;  %v478_v2 = vmul.f32 %v3103_v41, %v338_v32  ;;  %v880_v49 = vmax.f32 %v614_v30, %v747_v39 }
  0xf4   : > { %v617_v50 = vadd.f32 %v3107_v47, %v477_v40  ;;  %v749_v5 = vmul.f32 0.2, %v616_v42  ;;  %v479_v51 = vmul.f32 %v3103_v41, %v339_v37  ;;  %v2242_v53 = vpack.c.bf16 %v879_v45, %v878_v38 }
  0xf5   : > { %2335 = vst [vmem:[%s2829_s26 + $0x1c8] sm:$0xff] %v2237_v44   ;;  %v881_v54 = vmax.f32 %v615_v36, %v748_v46  ;;  %v618_v55 = vadd.f32 %v3107_v47, %v478_v2  ;;  %v480_v56 = vmul.f32 %v3103_v41, %v340_v43  ;;  %v481_v61 = vmul.f32 %v3103_v41, %v341_v48 }
  0xf6   : > { %v750_v58 = vmul.f32 0.2, %v617_v50  ;;  %v882_v59 = vmax.f32 %v616_v42, %v749_v5  ;;  %v619_v60 = vadd.f32 %v3107_v47, %v479_v51  ;;  %2336 = vst [vmem:[%s2829_s26 + $0x1d0] sm:$0xff] %v2242_v53   ;;  %v482_v3 = vmul.f32 %v3103_v41, %v342_v52 }
  0xf7   : > { %v2247_v63 = vpack.c.bf16 %v881_v54, %v880_v49  ;;  %v751_v0 = vmul.f32 0.2, %v618_v55  ;;  %v620_v1 = vadd.f32 %v3107_v47, %v480_v56  ;;  %v621_v7 = vadd.f32 %v3107_v47, %v481_v61 }
  0xf8   : > { %v883_v4 = vmax.f32 %v617_v50, %v750_v58  ;;  %v752_v6 = vmul.f32 0.2, %v619_v60  ;;  %v483_v8 = vmul.f32 %v3103_v41, %v343_v57  ;;  %v622_v12 = vadd.f32 %v3107_v47, %v482_v3 }
  0xf9   : > { %2337 = vst [vmem:[%s2829_s26 + $0x1d8] sm:$0xff] %v2247_v63   ;;  %v884_v10 = vmax.f32 %v618_v55, %v751_v0  ;;  %v753_v11 = vmul.f32 0.2, %v620_v1  ;;  %v484_v13 = vmul.f32 %v3103_v41, %v344_v62  ;;  %v754_v17 = vmul.f32 0.2, %v621_v7 }
  0xfa   : > { %v2252_v15 = vpack.c.bf16 %v883_v4, %v882_v59  ;;  %v885_v16 = vmax.f32 %v619_v60, %v752_v6  ;;  %v623_v18 = vadd.f32 %v3107_v47, %v483_v8  ;;  %v755_v21 = vmul.f32 0.2, %v622_v12 }
  0xfb   : > { %v886_v20 = vmax.f32 %v620_v1, %v753_v11  ;;  %v485_v22 = vmul.f32 %v3103_v41, %v345_v9  ;;  %v624_v23 = vadd.f32 %v3107_v47, %v484_v13  ;;  %v887_v26 = vmax.f32 %v621_v7, %v754_v17 }
  0xfc   : > { %2338 = vst [vmem:[%s2829_s26 + $0x1e0] sm:$0xff] %v2252_v15   ;;  %v2257_v25 = vpack.c.bf16 %v885_v16, %v884_v10  ;;  %v756_v27 = vmul.f32 0.2, %v623_v18  ;;  %v486_v28 = vmul.f32 %v3103_v41, %v346_v14  ;;  %v888_v29 = vmax.f32 %v622_v12, %v755_v21 }
  0xfd   : > { %v625_v30 = vadd.f32 %v3107_v47, %v485_v22  ;;  %v757_v31 = vmul.f32 0.2, %v624_v23  ;;  %v487_v32 = vmul.f32 %v3103_v41, %v347_v19  ;;  %v2262_v33 = vpack.c.bf16 %v887_v26, %v886_v20 }
  0xfe   : > { %2339 = vst [vmem:[%s2829_s26 + $0x1e8] sm:$0xff] %v2257_v25   ;;  %v889_v34 = vmax.f32 %v623_v18, %v756_v27  ;;  %v626_v35 = vadd.f32 %v3107_v47, %v486_v28  ;;  %v488_v36 = vmul.f32 %v3103_v41, %v348_v24 }
  0xff   : > { %v758_v37 = vmul.f32 0.2, %v625_v30  ;;  %v890_v38 = vmax.f32 %v624_v23, %v757_v31  ;;  %v627_v39 = vadd.f32 %v3107_v47, %v487_v32  ;;  %2340 = vst [vmem:[%s2829_s26 + $0x1f0] sm:$0xff] %v2262_v33  }
 0x100   : > { %v2267_v40 = vpack.c.bf16 %v889_v34, %v888_v29  ;;  %v759_v42 = vmul.f32 0.2, %v626_v35  ;;  %v628_v43 = vadd.f32 %v3107_v47, %v488_v36 }
 0x101   : > { %v891_v44 = vmax.f32 %v625_v30, %v758_v37  ;;  %v760_v45 = vmul.f32 0.2, %v627_v39 }
 0x102   : > { %2341 = vst [vmem:[%s2829_s26 + $0x1f8] sm:$0xff] %v2267_v40   ;;  %v892_v46 = vmax.f32 %v626_v35, %v759_v42  ;;  %v761_v41 = vmul.f32 0.2, %v628_v43 }
 0x103   : > { %v2272_v2 = vpack.c.bf16 %v891_v44, %v890_v38  ;;  %v893_v48 = vmax.f32 %v627_v39, %v760_v45 }
 0x104   : > { %v894_v49 = vmax.f32 %v628_v43, %v761_v41 }
 0x105   : > { %2342 = vst [vmem:[%s2829_s26 + $0x200] sm:$0xff] %v2272_v2   ;;  %v2277_v50 = vpack.c.bf16 %v893_v48, %v892_v46 }
 0x106   : > { %v1947_v47 = vpack.c.bf16 %v894_v49, %v894_v49 }
 0x107   : > { %2343 = vst [vmem:[%s2829_s26 + $0x208] sm:$0xff] %v2277_v50  }
 0x108   : > { %1560 = vst [vmem:[%s2829_s26 + $0x210] sm:$0xf] %v1947_v47 }
 0x109   : > { %2519 = shalt.err (!%p2516_p6)
}
 0x10a   : > { %s2520_s7 = scalar_lea.hbm %s3271_s20, 8512  ;;  %s2524_s5 = scalar_lea.hbm %s3321_s3, 34048 }
 0x10b   : > { %p2521_p12 = scmp.ne.s32.totalorder %s3271_s20, %s2520_s7  ;;  %p2525_p11 = scmp.lt.u32.totalorder %s3271_s20, %s3321_s3 }
 0x10c   : > { %p2526_p0 = scmp.lt.u32.totalorder %s2524_s5, %s2520_s7  ;;  %p2528_p7 = scmp.lt.u32.totalorder %s2520_s7, %s3271_s20 }
 0x10d   : > { %p2522_p13 = pnand %p2521_p12, %p3339_p5 }
 0x10e   : > { %p2527_p3 = por %p2526_p0, %p2525_p11 }
 0x10f   : > { %p2523_p4 = pneg %p2522_p13 }
 0x110   : > { %p2529_p9 = por %p2528_p7, %p2527_p3 }
 0x112   : > { %p2530_p10 = pnand %p2529_p9, %p2523_p4 }
 0x114   : > { %2533 = shalt.err (!%p2530_p10)
}
 0x115   : > { %s2584_s23 = smov 64   ;;  %s2585_s26 = smov 4  }
 0x116   : > { %2357 = dma.vmem_to_hbm [thread:$0]  (%p3339_p5), %s3273_s9, 8512, %s3271_s20, %s1562_s16, %s2584_s23, %s2584_s23, %s2585_s26  }
 0x117 PF: > { %p2379_p1 = scmp.ge.s32.totalorder %s2576_s15, 2  ;;  %s1590_s30 = sand.u32 1, %s2564_s12  }
 0x118   : > { %p3340_p2 = scmp.ne.s32.totalorder %s3330_s25, 0  ;;  %s1591_s10 = scalar_lea.sflag [#allocation4], %s1590_s30 }
 0x11a   : > { %p2371_p8 = pnand %p2379_p1, %p3340_p2 }
 0x11c   : > { %2559 = dma.done.wait (!%p2371_p8), %s1591_s10, 8512  }
 0x11d   : > { %2561 = vsyncadd (!%p2371_p8), %s1591_s10, 4294958784  ;;  %p17_p6 = scmp.ge.s32.totalorder %s2631_s18, 6   ;;  %s3341_s12 = smov %s2568_s13 }
 0x11e   : > { %s3342_s13 = smov %s2572_s14  ;;  %s3343_s14 = smov %s2643_s21 }
 0x11f   : > { %s3344_s15 = smov %s2631_s18  ;;  %19 = sbr.rel (!%p17_p6) target bundleno = 6 (0x6), region = 85 }
 0x126   :  { %1596 = vsyncpa [#allocation3], 1 }
 0x127   :  { %1598 = vsyncpa [#allocation3 + $0x1], 1 }
 0x128   :  { %1599 = vsyncpa [#allocation6], 1 }
 0x129   :  { %1600 = vsyncpa [#allocation4], 1 }
 0x12a   :  { %1602 = vsyncpa [#allocation4 + $0x1], 1 }

// kernel: discriminator_forward.14
= control target key start
LH: loop header
LB: loop body
LE: loop exit
PB: predicated region body
PF: predicated region fallthrough
CT: control target
= control target key end

     0   :  { %8 = vsyncpa [#allocation3], 0  ;;  %s1982_s0 = inlined_call_operand.hbm [shape: f32[976,128], index: 0, kind: input, shape index: {}]   ;;  %s1983_s1 = inlined_call_operand.hbm [shape: f32[1,128], index: 1, kind: input, shape index: {}]   ;;  %s1984_s2 = inlined_call_operand.hbm [shape: f32[1,128], index: 2, kind: input, shape index: {}]   ;;  %s1985_s3 = inlined_call_operand.hbm [shape: bf16[976,128], index: 3, kind: output, shape index: {}]  }
   0x1   :  { %10 = vsyncpa [#allocation3 + $0x1], 0 }
   0x2   :  { %11 = vsyncpa [#allocation6], 0 }
   0x3   :  { %12 = vsyncpa [#allocation4], 0 }
   0x4   :  { %14 = vsyncpa [#allocation4 + $0x1], 0  ;;  %s1524_s12 = smov 0   ;;  %s1526_s13 = smov 0  }
   0x5   :  { %s1528_s14 = smov 0   ;;  %s1530_s15 = smov 0  }
   0x6 LB: > { %s1545_s16 = sadd.s32 4294967295, %s1494_s15   ;;  %s947_s17 = sadd.s32 4294967294, %s1494_s15   ;;  %s1494_s15 = sphi %s1530_s15, %s2010_s15   ;;  %s1490_s14 = sphi %s1528_s14, %s2009_s14   ;;  %s1486_s13 = sphi %s1526_s13, %s2008_s13   ;;  %s1482_s12 = sphi %s1524_s12, %s2007_s12  }
   0x7   : > { %s1549_s18 = sadd.s32 1, %s1494_s15   ;;  %s27_s19 = sadd.s32 1, %s1490_s14 }
   0x8   : > { %s24_s20 = ssub.s32 %s1494_s15, %s1549_s18  ;;  %p34_p0 = scmp.ne.s32.totalorder %s1490_s14, %s1486_s13 }
   0x9   : > { %p25_p1 = scmp.eq.s32.totalorder %s24_s20, 0  ;;  %p35_p2 = scmp.eq.s32.totalorder %s1494_s15, 0 }
   0xa   : > { %p40_p3 = scmp.ne.s32.totalorder %s1486_s13, %s1482_s12  ;;  %p1986_p4 = scmp.eq.s32.totalorder %s1545_s16, 0 }
   0xb   : > { %s1561_s21 = scalar_select %p25_p1, %s1490_s14, %s27_s19  }
   0xc   : > { %p1563_p5 = por %p35_p2, %p34_p0  ;;  %p1569_p6 = por %p1986_p4, %p40_p3 }
   0xd   : > { %p106_p7 = scmp.eq.s32.totalorder %s1545_s16, 1  ;;  %p112_p8 = scmp.eq.s32.totalorder %s947_s17, 1 }
   0xe   : > { %s1992_s23 = scalar_select %p1569_p6, 1, 0 }
   0xf   : > { %p948_p9 = scmp.ge.s32.totalorder %s1494_s15, 1  ;;  %p119_p10 = scmp.lt.s32.totalorder %s1494_s15, 3 }
  0x10   : > { %p1576_p11 = por %p106_p7, %p34_p0  ;;  %p1580_p12 = por %p112_p8, %p40_p3 }
  0x11   : > { %p1584_p13 = pnand %p948_p9, %p119_p10  ;;  %s1496_s27 = smov [#allocation5]  }
  0x12   : > { %s1993_s24 = scalar_select %p1576_p11, 1, 0 }
  0x13   : > { %s1994_s25 = scalar_select %p1580_p12, 1, 0 }
  0x14   : > { %s1995_s26 = scalar_select %p1584_p13, 1, 0 }
  0x15   : > { %p1279_p2 = pneg %p1584_p13  ;;  %s132_s28 = sshll.u32 %s1496_s27, 4  ;;  %s133_s28 = int_to_ptr.vmem [resolvable:$true] %s132_s28 }
  0x16   : > { %p1296_p4 = scmp.lt.s32.totalorder %s1494_s15, 2  ;;  %p1996_p0 = scmp.eq.s32.totalorder %s1545_s16, 0 }
  0x17   : > { %s1497_s4 = smov [#allocation7]   ;;  %s1338_s8 = scalar_lea.hbm %s1983_s1, 16 }
  0x18   : > { %p1594_p7 = pnand %p1279_p2, %p1996_p0  ;;  %p1600_p3 = pnand %p1296_p4, %p1563_p5 }
  0x19   : > { %s143_s5 = sshll.u32 %s1497_s4, 4  ;;  %p1339_p8 = scmp.ne.s32.totalorder %s1983_s1, %s1338_s8  ;;  %s1604_s5 = int_to_ptr.vmem [resolvable:$true] %s143_s5 }
  0x1a   : > { %s1998_s30 = scalar_select %p1600_p3, 1, 0 }
  0x1b   : > { %p1340_p9 = pneg %p1594_p7  ;;  %p1345_p10 = scmp.lt.u32.totalorder %s1338_s8, %s1983_s1 }
  0x1d   : > { %p1341_p4 = pnand %p1340_p9, %p1339_p8 }
  0x1f   : > { %p1342_p5 = pneg %p1341_p4 }
  0x21   : > { %p1347_p2 = pnand %p1345_p10, %p1342_p5 }
  0x23   : > { %1350 = shalt.err (!%p1347_p2)
}
  0x24   : > { %s1351_s19 = scalar_lea.vmem %s133_s28, 16  ;;  %s1358_s20 = scalar_lea.vmem %s133_s28, 32 }
  0x25   : > { %p1352_p0 = scmp.ne.s32.totalorder %s133_s28, %s1351_s19  ;;  %p1359_p11 = scmp.lt.s32.totalorder %s133_s28, %s133_s28 }
  0x26   : > { %p1360_p6 = scmp.lt.s32.totalorder %s1358_s20, %s1351_s19 }
  0x27   : > { %p1354_p1 = pnand %p1352_p0, %p1340_p9 }
  0x28   : > { %p1361_p13 = por %p1360_p6, %p1359_p11 }
  0x29   : > { %p1355_p12 = pneg %p1354_p1 }
  0x2b   : > { %p1362_p3 = pnand %p1361_p13, %p1355_p12 }
  0x2d   : > { %1365 = shalt.err (!%p1362_p3)
}
  0x2e   : > { %1282 = dma.hbm_to_vmem [thread:$0]  (!%p1594_p7), %s1983_s1, 16, %s133_s28, [#allocation6]  }
  0x2f   : > { %s154_s4 = sand.u32 1, %s1490_s14   ;;  %s1366_s8 = scalar_lea.hbm %s1984_s2, 16 }
  0x30   : > { %p1367_p1 = scmp.ne.s32.totalorder %s1984_s2, %s1366_s8  ;;  %p1373_p12 = scmp.lt.u32.totalorder %s1366_s8, %s1984_s2 }
  0x32   : > { %p1369_p6 = pnand %p1367_p1, %p1340_p9 }
  0x34   : > { %p1370_p11 = pneg %p1369_p6 }
  0x36   : > { %p1375_p13 = pnand %p1373_p12, %p1370_p11 }
  0x38   : > { %1378 = shalt.err (!%p1375_p13)
}
  0x39   : > { %s1379_s28 = scalar_lea.vmem %s1604_s5, 16  ;;  %s1386_s19 = scalar_lea.vmem %s1604_s5, 32 }
  0x3a   : > { %p1380_p3 = scmp.ne.s32.totalorder %s1604_s5, %s1379_s28  ;;  %p1387_p5 = scmp.lt.s32.totalorder %s1604_s5, %s1604_s5 }
  0x3b   : > { %p1388_p10 = scmp.lt.s32.totalorder %s1386_s19, %s1379_s28 }
  0x3c   : > { %p1382_p8 = pnand %p1380_p3, %p1340_p9 }
  0x3d   : > { %p1389_p2 = por %p1388_p10, %p1387_p5 }
  0x3e   : > { %p1383_p4 = pneg %p1382_p8 }
  0x40   : > { %p1390_p0 = pnand %p1389_p2, %p1383_p4 }
  0x42   : > { %1393 = shalt.err (!%p1390_p0)
}
  0x43   : > { %1285 = dma.hbm_to_vmem [thread:$0]  (!%p1594_p7), %s1984_s2, 16, %s1604_s5, [#allocation6]  }
  0x44   : > { %s1264_s27 = smul.u32 488, %s154_s4  ;;  %s1663_s11 = scalar_lea.sflag [#allocation3], %s154_s4 }
  0x45   : > { %s1022_s6 = smul.u32 7808, %s1494_s15  ;;  %p1999_p7 = scmp.ne.s32.totalorder %s1998_s30, 0 }
  0x46   : > { %s158_s29 = scalar_lea.vmem [#allocation2], %s1264_s27  ;;  %s1399_s19 = scalar_lea.hbm %s1982_s0, 15616 }
  0x47   : > { %s1659_s9 = scalar_lea.hbm %s1982_s0, %s1022_s6  ;;  %s165_s10 = sshll.u32 %s158_s29, 4  ;;  %s1661_s10 = int_to_ptr.vmem [resolvable:$true] %s165_s10 }
  0x48   : > { %s1394_s17 = scalar_lea.hbm %s1659_s9, 7808  ;;  %p1396_p1 = pneg %p1999_p7 }
  0x49   : > { %p1395_p9 = scmp.ne.s32.totalorder %s1659_s9, %s1394_s17  ;;  %p1400_p12 = scmp.lt.u32.totalorder %s1659_s9, %s1982_s0 }
  0x4a   : > { %p1401_p13 = scmp.lt.u32.totalorder %s1399_s19, %s1394_s17  ;;  %p1403_p8 = scmp.lt.u32.totalorder %s1394_s17, %s1659_s9 }
  0x4b   : > { %p1397_p6 = pnand %p1396_p1, %p1395_p9 }
  0x4c   : > { %p1402_p3 = por %p1401_p13, %p1400_p12 }
  0x4d   : > { %p1398_p11 = pneg %p1397_p6 }
  0x4e   : > { %p1404_p4 = por %p1403_p8, %p1402_p3 }
  0x50   : > { %p1405_p5 = pnand %p1404_p4, %p1398_p11 }
  0x52   : > { %1408 = shalt.err (!%p1405_p5)
}
  0x53   : > { %s1409_s4 = scalar_lea.vmem %s1661_s10, 7808  ;;  %s1498_s27 = smov [#allocation2]  }
  0x54   : > { %p1410_p10 = scmp.ne.s32.totalorder %s1661_s10, %s1409_s4  ;;  %s1414_s6 = sshll.u32 %s1498_s27, 4  ;;  %s1415_s6 = int_to_ptr.vmem [resolvable:$false] %s1414_s6 }
  0x55   : > { %s1416_s7 = scalar_lea.vmem %s1415_s6, 15616  ;;  %p1417_p9 = scmp.lt.s32.totalorder %s1661_s10, %s1415_s6 }
  0x56   : > { %p1412_p2 = pnand %p1410_p10, %p1396_p1  ;;  %p1418_p6 = scmp.lt.s32.totalorder %s1416_s7, %s1409_s4 }
  0x58   : > { %p1413_p0 = pneg %p1412_p2  ;;  %p1419_p12 = por %p1418_p6, %p1417_p9 }
  0x5a   : > { %p1420_p13 = pnand %p1419_p12, %p1413_p0 }
  0x5c   : > { %1423 = shalt.err (!%p1420_p13)
}
  0x5d   : > { %s1499_s8 = smov 128   ;;  %s1500_s29 = smov 8  }
  0x5e   : > { %1289 = dma.hbm_to_vmem [thread:$0]  (!%p1999_p7), %s1659_s9, 7808, %s1661_s10, %s1663_s11, %s1499_s8, %s1499_s8, %s1500_s29  }
  0x5f   : > { %p2000_p1 = scmp.ne.s32.totalorder %s1995_s26, 0 }
  0x60   : > { %s1694_s17 = sand.u32 (!%p2000_p1), 1, %s1486_s13   ;;  %p2001_p11 = scmp.ne.s32.totalorder (!%p2000_p1), %s1992_s23, 0 }
  0x61   : > { %177 = sbr.rel (%p2000_p1) target bundleno = 200 (0xc8), region = 32  ;;  %s180_s28 = scalar_lea.sflag (!%p2000_p1), [#allocation3], %s1694_s17 }
  0x62   : > { %s1265_s5 = smul.u32 (!%p2000_p1), 488, %s1694_s17 }
  0x64   : > { %s1698_s19 = scalar_lea.vmem (!%p2000_p1), [#allocation2], %s1265_s5 }
  0x68   : > { %1469 = dma.done.wait (%p2001_p11), %s180_s28, 7808  }
  0x69   : > { %1471 = vsyncadd (%p2001_p11), %s180_s28, 4294959488  ;;  %p2002_p7 = scmp.eq.s32.totalorder %s1545_s16, 0 }
  0x6b   : > { %1473 = dma.done.wait (%p2002_p7), [#allocation6], 32   ;;  %p2003_p3 = pmov %p2002_p7 }
  0x6c   : > { %v216_v0 = vld [vmem:[%s1698_s19] sm:$0xff]  ;;  %v217_v1 = vld [vmem:[%s1698_s19 + $0x8] sm:$0xff]  ;;  %v218_v6 = vld [vmem:[%s1698_s19 + $0x10] sm:$0xff]  ;;  %s1266_s23 = smul.u32 244, %s1694_s17  ;;  %p2004_p4 = scmp.ne.s32.totalorder %s1993_s24, 0 }
  0x6d   : > { %1475 = vsyncadd (%p2003_p3), [#allocation6], 4294967264  ;;  %v1710_v2 = vld [vmem:[#allocation5] ss:$0 sm:$0xff]  ;;  %v1714_v5 = vld [vmem:[#allocation7] ss:$0 sm:$0xff] }
  0x6e   : > { %v284_v3 = vmul.f32 %v1710_v2, %v216_v0  ;;  %v285_v4 = vmul.f32 %v1710_v2, %v217_v1  ;;  %v219_v7 = vld [vmem:[%s1698_s19 + $0x18] sm:$0xff]  ;;  %v286_v8 = vmul.f32 %v1710_v2, %v218_v6  ;;  %v220_v10 = vld [vmem:[%s1698_s19 + $0x20] sm:$0xff]  ;;  %v221_v11 = vld [vmem:[%s1698_s19 + $0x28] sm:$0xff]  ;;  %s1748_s26 = scalar_lea.vmem [#allocation8], %s1266_s23  ;;  %s1084_s30 = smul.u32 3904, %s1545_s16 }
  0x6f   : > { %v287_v9 = vmul.f32 %v1710_v2, %v219_v7  ;;  %v222_v12 = vld [vmem:[%s1698_s19 + $0x30] sm:$0xff]  ;;  %v288_v15 = vmul.f32 %v1710_v2, %v220_v10  ;;  %v289_v16 = vmul.f32 %v1710_v2, %v221_v11  ;;  %v223_v17 = vld [vmem:[%s1698_s19 + $0x38] sm:$0xff]  ;;  %v224_v30 = vld [vmem:[%s1698_s19 + $0x40] sm:$0xff]  ;;  %s855_s9 = sshll.u32 %s1748_s26, 4  ;;  %s842_s16 = scalar_lea.sflag [#allocation4], %s1694_s17  ;;  %s1936_s9 = int_to_ptr.vmem [resolvable:$true] %s855_s9 }
  0x70   : > { %v352_v13 = vadd.f32 %v1714_v5, %v284_v3  ;;  %v353_v14 = vadd.f32 %v1714_v5, %v285_v4  ;;  %v354_v18 = vadd.f32 %v1714_v5, %v286_v8  ;;  %v290_v20 = vmul.f32 %v1710_v2, %v222_v12  ;;  %v225_v35 = vld [vmem:[%s1698_s19 + $0x48] sm:$0xff]  ;;  %v226_v40 = vld [vmem:[%s1698_s19 + $0x50] sm:$0xff]  ;;  %v227_v41 = vld [vmem:[%s1698_s19 + $0x58] sm:$0xff]  ;;  %s1934_s20 = scalar_lea.hbm %s1985_s3, %s1084_s30  ;;  %s1424_s22 = scalar_lea.vmem %s1936_s9, 3904 }
  0x71   : > { %v355_v19 = vadd.f32 %v1714_v5, %v287_v9  ;;  %v291_v21 = vmul.f32 %v1710_v2, %v223_v17  ;;  %v356_v24 = vadd.f32 %v1714_v5, %v288_v15  ;;  %v357_v25 = vadd.f32 %v1714_v5, %v289_v16  ;;  %v228_v46 = vld [vmem:[%s1698_s19 + $0x60] sm:$0xff]  ;;  %v229_v47 = vld [vmem:[%s1698_s19 + $0x68] sm:$0xff]  ;;  %v230_v52 = vld [vmem:[%s1698_s19 + $0x70] sm:$0xff]  ;;  %p1425_p8 = scmp.ne.s32.totalorder %s1936_s9, %s1424_s22  ;;  %s1501_s4 = smov [#allocation8]  }
  0x72   : > { %v413_v22 = vmul.f32 0.2, %v352_v13  ;;  %v414_v23 = vmul.f32 0.2, %v353_v14  ;;  %v415_v26 = vmul.f32 0.2, %v354_v18  ;;  %v358_v28 = vadd.f32 %v1714_v5, %v290_v20 }
  0x73   : > { %v416_v27 = vmul.f32 0.2, %v355_v19  ;;  %v359_v29 = vadd.f32 %v1714_v5, %v291_v21  ;;  %v417_v33 = vmul.f32 0.2, %v356_v24  ;;  %v418_v34 = vmul.f32 0.2, %v357_v25  ;;  %p1426_p5 = pnand %p1425_p8, %p2004_p4 }
  0x74   : > { %v474_v31 = vmax.f32 %v352_v13, %v413_v22  ;;  %v475_v32 = vmax.f32 %v353_v14, %v414_v23  ;;  %v476_v36 = vmax.f32 %v354_v18, %v415_v26  ;;  %v419_v38 = vmul.f32 0.2, %v358_v28  ;;  %v231_v57 = vld [vmem:[%s1698_s19 + $0x78] sm:$0xff]  ;;  %v232_v8 = vld [vmem:[%s1698_s19 + $0x80] sm:$0xff]  ;;  %v233_v17 = vld [vmem:[%s1698_s19 + $0x88] sm:$0xff]  ;;  %s1428_s27 = sshll.u32 %s1501_s4, 4  ;;  %s1429_s27 = int_to_ptr.vmem [resolvable:$false] %s1428_s27 }
  0x75   : > { %v477_v37 = vmax.f32 %v355_v19, %v416_v27  ;;  %v420_v39 = vmul.f32 0.2, %v359_v29  ;;  %v478_v43 = vmax.f32 %v356_v24, %v417_v33  ;;  %v479_v44 = vmax.f32 %v357_v25, %v418_v34  ;;  %v234_v22 = vld [vmem:[%s1698_s19 + $0x90] sm:$0xff]  ;;  %v235_v23 = vld [vmem:[%s1698_s19 + $0x98] sm:$0xff]  ;;  %p1427_p10 = pneg %p1426_p5  ;;  %s1430_s6 = scalar_lea.vmem %s1429_s27, 7808 }
  0x76   : > { %v1088_v42 = vpack.c.bf16 %v475_v32, %v474_v31  ;;  %v292_v45 = vmul.f32 %v1710_v2, %v224_v30  ;;  %v480_v49 = vmax.f32 %v358_v28, %v419_v38  ;;  %v293_v51 = vmul.f32 %v1710_v2, %v225_v35  ;;  %v236_v28 = vld [vmem:[%s1698_s19 + $0xa0] sm:$0xff]  ;;  %v238_v34 = vld [vmem:[%s1698_s19 + $0xb0] sm:$0xff]  ;;  %p1431_p2 = scmp.lt.s32.totalorder %s1936_s9, %s1429_s27  ;;  %p1432_p0 = scmp.lt.s32.totalorder %s1430_s6, %s1424_s22 }
  0x77   : > { %v1093_v48 = vpack.c.bf16 %v477_v37, %v476_v36  ;;  %v481_v50 = vmax.f32 %v359_v29, %v420_v39  ;;  %v1098_v53 = vpack.c.bf16 %v479_v44, %v478_v43  ;;  %v294_v55 = vmul.f32 %v1710_v2, %v226_v40  ;;  %v237_v29 = vld [vmem:[%s1698_s19 + $0xa8] sm:$0xff]  ;;  %v239_v43 = vld [vmem:[%s1698_s19 + $0xb8] sm:$0xff] }
  0x78   : > { %1089 = vst [vmem:[%s1748_s26] sm:$0xff] %v1088_v42   ;;  %v360_v54 = vadd.f32 %v1714_v5, %v292_v45  ;;  %v295_v56 = vmul.f32 %v1710_v2, %v227_v41  ;;  %v361_v59 = vadd.f32 %v1714_v5, %v293_v51  ;;  %v296_v60 = vmul.f32 %v1710_v2, %v228_v46  ;;  %p1433_p9 = por %p1432_p0, %p1431_p2 }
  0x79   : > { %1235 = vst [vmem:[%s1748_s26 + $0x8] sm:$0xff] %v1093_v48   ;;  %v1103_v58 = vpack.c.bf16 %v481_v50, %v480_v49  ;;  %v297_v61 = vmul.f32 %v1710_v2, %v229_v47  ;;  %1236 = vst [vmem:[%s1748_s26 + $0x10] sm:$0xff] %v1098_v53   ;;  %v362_v63 = vadd.f32 %v1714_v5, %v294_v55  ;;  %v240_v48 = vld [vmem:[%s1698_s19 + $0xc0] sm:$0xff] }
  0x7a   : > { %v421_v62 = vmul.f32 0.2, %v360_v54  ;;  %v363_v0 = vadd.f32 %v1714_v5, %v295_v56  ;;  %v298_v1 = vmul.f32 %v1710_v2, %v230_v52  ;;  %v422_v3 = vmul.f32 0.2, %v361_v59  ;;  %p1434_p6 = pnand %p1433_p9, %p1427_p10 }
  0x7b   : > { %1237 = vst [vmem:[%s1748_s26 + $0x18] sm:$0xff] %v1103_v58   ;;  %v364_v4 = vadd.f32 %v1714_v5, %v296_v60  ;;  %v365_v6 = vadd.f32 %v1714_v5, %v297_v61  ;;  %v299_v7 = vmul.f32 %v1710_v2, %v231_v57  ;;  %v423_v10 = vmul.f32 0.2, %v362_v63  ;;  %v241_v57 = vld [vmem:[%s1698_s19 + $0xc8] sm:$0xff] }
  0x7c   : > { %v482_v9 = vmax.f32 %v360_v54, %v421_v62  ;;  %v424_v11 = vmul.f32 0.2, %v363_v0  ;;  %v366_v12 = vadd.f32 %v1714_v5, %v298_v1  ;;  %v483_v13 = vmax.f32 %v361_v59, %v422_v3  ;;  %v242_v3 = vld [vmem:[%s1698_s19 + $0xd0] sm:$0xff] }
  0x7d   : > { %v425_v14 = vmul.f32 0.2, %v364_v4  ;;  %v426_v15 = vmul.f32 0.2, %v365_v6  ;;  %v367_v16 = vadd.f32 %v1714_v5, %v299_v7  ;;  %v484_v18 = vmax.f32 %v362_v63, %v423_v10  ;;  %v244_v10 = vld [vmem:[%s1698_s19 + $0xe0] sm:$0xff] }
  0x7e   : > { %v485_v19 = vmax.f32 %v363_v0, %v424_v11  ;;  %v427_v20 = vmul.f32 0.2, %v366_v12  ;;  %v300_v21 = vmul.f32 %v1710_v2, %v232_v8  ;;  %v1108_v24 = vpack.c.bf16 %v483_v13, %v482_v9  ;;  %v245_v11 = vld [vmem:[%s1698_s19 + $0xe8] sm:$0xff] }
  0x7f   : > { %v486_v25 = vmax.f32 %v364_v4, %v425_v14  ;;  %v487_v26 = vmax.f32 %v365_v6, %v426_v15  ;;  %v428_v27 = vmul.f32 0.2, %v367_v16  ;;  %v301_v32 = vmul.f32 %v1710_v2, %v233_v17  ;;  %v243_v4 = vld [vmem:[%s1698_s19 + $0xd8] sm:$0xff] }
  0x80   : > { %v1113_v30 = vpack.c.bf16 %v485_v19, %v484_v18  ;;  %v488_v31 = vmax.f32 %v366_v12, %v427_v20  ;;  %v368_v33 = vadd.f32 %v1714_v5, %v300_v21  ;;  %1238 = vst [vmem:[%s1748_s26 + $0x20] sm:$0xff] %v1108_v24   ;;  %v302_v37 = vmul.f32 %v1710_v2, %v234_v22 }
  0x81   : > { %v1118_v35 = vpack.c.bf16 %v487_v26, %v486_v25  ;;  %v489_v36 = vmax.f32 %v367_v16, %v428_v27  ;;  %v303_v38 = vmul.f32 %v1710_v2, %v235_v23  ;;  %v369_v39 = vadd.f32 %v1714_v5, %v301_v32  ;;  %v246_v16 = vld [vmem:[%s1698_s19 + $0xf0] sm:$0xff]  ;;  %v247_v25 = vld [vmem:[%s1698_s19 + $0xf8] sm:$0xff] }
  0x82   : > { %1239 = vst [vmem:[%s1748_s26 + $0x28] sm:$0xff] %v1113_v30   ;;  %v429_v40 = vmul.f32 0.2, %v368_v33  ;;  %v304_v41 = vmul.f32 %v1710_v2, %v236_v28  ;;  %v305_v42 = vmul.f32 %v1710_v2, %v237_v29  ;;  %v370_v45 = vadd.f32 %v1714_v5, %v302_v37  ;;  %v248_v30 = vld [vmem:[%s1698_s19 + $0x100] sm:$0xff] }
  0x83   : > { %1240 = vst [vmem:[%s1748_s26 + $0x30] sm:$0xff] %v1118_v35   ;;  %v1123_v44 = vpack.c.bf16 %v489_v36, %v488_v31  ;;  %v371_v46 = vadd.f32 %v1714_v5, %v303_v38  ;;  %v306_v47 = vmul.f32 %v1710_v2, %v238_v34  ;;  %v430_v49 = vmul.f32 0.2, %v369_v39 }
  0x84   : > { %v490_v50 = vmax.f32 %v368_v33, %v429_v40  ;;  %v372_v51 = vadd.f32 %v1714_v5, %v304_v41  ;;  %v373_v52 = vadd.f32 %v1714_v5, %v305_v42  ;;  %v431_v53 = vmul.f32 0.2, %v370_v45 }
  0x85   : > { %1241 = vst [vmem:[%s1748_s26 + $0x38] sm:$0xff] %v1123_v44   ;;  %v432_v54 = vmul.f32 0.2, %v371_v46  ;;  %v307_v55 = vmul.f32 %v1710_v2, %v239_v43  ;;  %v374_v56 = vadd.f32 %v1714_v5, %v306_v47  ;;  %v491_v58 = vmax.f32 %v369_v39, %v430_v49  ;;  %v249_v39 = vld [vmem:[%s1698_s19 + $0x108] sm:$0xff]  ;;  %v250_v44 = vld [vmem:[%s1698_s19 + $0x110] sm:$0xff]  ;;  %v251_v49 = vld [vmem:[%s1698_s19 + $0x118] sm:$0xff] }
  0x86   : > { %v433_v59 = vmul.f32 0.2, %v372_v51  ;;  %v434_v60 = vmul.f32 0.2, %v373_v52  ;;  %v308_v61 = vmul.f32 %v1710_v2, %v240_v48  ;;  %v492_v62 = vmax.f32 %v370_v45, %v431_v53 }
  0x87   : > { %v493_v63 = vmax.f32 %v371_v46, %v432_v54  ;;  %v375_v0 = vadd.f32 %v1714_v5, %v307_v55  ;;  %v435_v1 = vmul.f32 0.2, %v374_v56  ;;  %v1128_v6 = vpack.c.bf16 %v491_v58, %v490_v50  ;;  %v252_v54 = vld [vmem:[%s1698_s19 + $0x120] sm:$0xff] }
  0x88   : > { %v494_v7 = vmax.f32 %v372_v51, %v433_v59  ;;  %v495_v8 = vmax.f32 %v373_v52, %v434_v60  ;;  %v309_v9 = vmul.f32 %v1710_v2, %v241_v57  ;;  %v376_v15 = vadd.f32 %v1714_v5, %v308_v61  ;;  %v253_v59 = vld [vmem:[%s1698_s19 + $0x128] sm:$0xff]  ;;  %v254_v60 = vld [vmem:[%s1698_s19 + $0x130] sm:$0xff] }
  0x89   : > { %v1133_v12 = vpack.c.bf16 %v493_v63, %v492_v62  ;;  %v436_v13 = vmul.f32 0.2, %v375_v0  ;;  %v496_v14 = vmax.f32 %v374_v56, %v435_v1  ;;  %1242 = vst [vmem:[%s1748_s26 + $0x40] sm:$0xff] %v1128_v6   ;;  %v310_v19 = vmul.f32 %v1710_v2, %v242_v3 }
  0x8a   : > { %v1138_v17 = vpack.c.bf16 %v495_v8, %v494_v7  ;;  %v377_v18 = vadd.f32 %v1714_v5, %v309_v9  ;;  %v311_v20 = vmul.f32 %v1710_v2, %v243_v4  ;;  %v437_v22 = vmul.f32 0.2, %v376_v15  ;;  %v255_v7 = vld [vmem:[%s1698_s19 + $0x138] sm:$0xff] }
  0x8b   : > { %1243 = vst [vmem:[%s1748_s26 + $0x48] sm:$0xff] %v1133_v12   ;;  %v497_v21 = vmax.f32 %v375_v0, %v436_v13  ;;  %v312_v23 = vmul.f32 %v1710_v2, %v244_v10  ;;  %v313_v24 = vmul.f32 %v1710_v2, %v245_v11  ;;  %v378_v27 = vadd.f32 %v1714_v5, %v310_v19  ;;  %v256_v12 = vld [vmem:[%s1698_s19 + $0x140] sm:$0xff] }
  0x8c   : > { %1244 = vst [vmem:[%s1748_s26 + $0x50] sm:$0xff] %v1138_v17   ;;  %v438_v26 = vmul.f32 0.2, %v377_v18  ;;  %v379_v28 = vadd.f32 %v1714_v5, %v311_v20  ;;  %v314_v29 = vmul.f32 %v1710_v2, %v246_v16  ;;  %v498_v32 = vmax.f32 %v376_v15, %v437_v22 }
  0x8d   : > { %v1143_v31 = vpack.c.bf16 %v497_v21, %v496_v14  ;;  %v380_v33 = vadd.f32 %v1714_v5, %v312_v23  ;;  %v381_v34 = vadd.f32 %v1714_v5, %v313_v24  ;;  %v439_v36 = vmul.f32 0.2, %v378_v27  ;;  %v257_v21 = vld [vmem:[%s1698_s19 + $0x148] sm:$0xff] }
  0x8e   : > { %v499_v35 = vmax.f32 %v377_v18, %v438_v26  ;;  %v440_v37 = vmul.f32 0.2, %v379_v28  ;;  %v315_v38 = vmul.f32 %v1710_v2, %v247_v25  ;;  %v382_v42 = vadd.f32 %v1714_v5, %v314_v29  ;;  %v258_v26 = vld [vmem:[%s1698_s19 + $0x150] sm:$0xff] }
  0x8f   : > { %1245 = vst [vmem:[%s1748_s26 + $0x58] sm:$0xff] %v1143_v31   ;;  %v441_v40 = vmul.f32 0.2, %v380_v33  ;;  %v442_v41 = vmul.f32 0.2, %v381_v34  ;;  %v316_v43 = vmul.f32 %v1710_v2, %v248_v30  ;;  %v500_v46 = vmax.f32 %v378_v27, %v439_v36  ;;  %v259_v31 = vld [vmem:[%s1698_s19 + $0x158] sm:$0xff] }
  0x90   : > { %v1148_v45 = vpack.c.bf16 %v499_v35, %v498_v32  ;;  %v501_v47 = vmax.f32 %v379_v28, %v440_v37  ;;  %v383_v48 = vadd.f32 %v1714_v5, %v315_v38  ;;  %v443_v52 = vmul.f32 0.2, %v382_v42  ;;  %v260_v36 = vld [vmem:[%s1698_s19 + $0x160] sm:$0xff] }
  0x91   : > { %v502_v50 = vmax.f32 %v380_v33, %v441_v40  ;;  %v503_v51 = vmax.f32 %v381_v34, %v442_v41  ;;  %v317_v53 = vmul.f32 %v1710_v2, %v249_v39  ;;  %v384_v57 = vadd.f32 %v1714_v5, %v316_v43  ;;  %v261_v41 = vld [vmem:[%s1698_s19 + $0x168] sm:$0xff] }
  0x92   : > { %1246 = vst [vmem:[%s1748_s26 + $0x60] sm:$0xff] %v1148_v45   ;;  %v1153_v55 = vpack.c.bf16 %v501_v47, %v500_v46  ;;  %v444_v56 = vmul.f32 0.2, %v383_v48  ;;  %v318_v58 = vmul.f32 %v1710_v2, %v250_v44  ;;  %v504_v62 = vmax.f32 %v382_v42, %v443_v52  ;;  %v262_v46 = vld [vmem:[%s1698_s19 + $0x170] sm:$0xff] }
  0x93   : > { %v1158_v61 = vpack.c.bf16 %v503_v51, %v502_v50  ;;  %v385_v63 = vadd.f32 %v1714_v5, %v317_v53  ;;  %v319_v0 = vmul.f32 %v1710_v2, %v251_v49  ;;  %v445_v3 = vmul.f32 0.2, %v384_v57  ;;  %v263_v51 = vld [vmem:[%s1698_s19 + $0x178] sm:$0xff] }
  0x94   : > { %1247 = vst [vmem:[%s1748_s26 + $0x68] sm:$0xff] %v1153_v55   ;;  %v505_v1 = vmax.f32 %v383_v48, %v444_v56  ;;  %v386_v4 = vadd.f32 %v1714_v5, %v318_v58  ;;  %v320_v6 = vmul.f32 %v1710_v2, %v252_v54  ;;  %v321_v10 = vmul.f32 %v1710_v2, %v253_v59  ;;  %v264_v56 = vld [vmem:[%s1698_s19 + $0x180] sm:$0xff] }
  0x95   : > { %1248 = vst [vmem:[%s1748_s26 + $0x70] sm:$0xff] %v1158_v61   ;;  %v446_v8 = vmul.f32 0.2, %v385_v63  ;;  %v387_v9 = vadd.f32 %v1714_v5, %v319_v0  ;;  %v322_v11 = vmul.f32 %v1710_v2, %v254_v60  ;;  %v506_v14 = vmax.f32 %v384_v57, %v445_v3 }
  0x96   : > { %v1163_v13 = vpack.c.bf16 %v505_v1, %v504_v62  ;;  %v447_v15 = vmul.f32 0.2, %v386_v4  ;;  %v388_v16 = vadd.f32 %v1714_v5, %v320_v6  ;;  %v389_v19 = vadd.f32 %v1714_v5, %v321_v10  ;;  %v265_v1 = vld [vmem:[%s1698_s19 + $0x188] sm:$0xff] }
  0x97   : > { %v507_v17 = vmax.f32 %v385_v63, %v446_v8  ;;  %v448_v18 = vmul.f32 0.2, %v387_v9  ;;  %v323_v20 = vmul.f32 %v1710_v2, %v255_v7  ;;  %v390_v24 = vadd.f32 %v1714_v5, %v322_v11  ;;  %v266_v8 = vld [vmem:[%s1698_s19 + $0x190] sm:$0xff] }
  0x98   : > { %1249 = vst [vmem:[%s1748_s26 + $0x78] sm:$0xff] %v1163_v13   ;;  %v508_v22 = vmax.f32 %v386_v4, %v447_v15  ;;  %v449_v23 = vmul.f32 0.2, %v388_v16  ;;  %v324_v25 = vmul.f32 %v1710_v2, %v256_v12  ;;  %v450_v29 = vmul.f32 0.2, %v389_v19  ;;  %v267_v13 = vld [vmem:[%s1698_s19 + $0x198] sm:$0xff] }
  0x99   : > { %v1168_v27 = vpack.c.bf16 %v507_v17, %v506_v14  ;;  %v509_v28 = vmax.f32 %v387_v9, %v448_v18  ;;  %v391_v30 = vadd.f32 %v1714_v5, %v323_v20  ;;  %v451_v33 = vmul.f32 0.2, %v390_v24  ;;  %v268_v18 = vld [vmem:[%s1698_s19 + $0x1a0] sm:$0xff] }
  0x9a   : > { %v510_v32 = vmax.f32 %v388_v16, %v449_v23  ;;  %v325_v34 = vmul.f32 %v1710_v2, %v257_v21  ;;  %v392_v35 = vadd.f32 %v1714_v5, %v324_v25  ;;  %v511_v38 = vmax.f32 %v389_v19, %v450_v29  ;;  %v269_v23 = vld [vmem:[%s1698_s19 + $0x1a8] sm:$0xff] }
  0x9b   : > { %1250 = vst [vmem:[%s1748_s26 + $0x80] sm:$0xff] %v1168_v27   ;;  %v1173_v37 = vpack.c.bf16 %v509_v28, %v508_v22  ;;  %v452_v39 = vmul.f32 0.2, %v391_v30  ;;  %v326_v40 = vmul.f32 %v1710_v2, %v258_v26  ;;  %v512_v42 = vmax.f32 %v390_v24, %v451_v33  ;;  %v270_v28 = vld [vmem:[%s1698_s19 + $0x1b0] sm:$0xff]  ;;  %v271_v33 = vld [vmem:[%s1698_s19 + $0x1b8] sm:$0xff] }
  0x9c   : > { %v393_v43 = vadd.f32 %v1714_v5, %v325_v34  ;;  %v453_v44 = vmul.f32 0.2, %v392_v35  ;;  %v327_v45 = vmul.f32 %v1710_v2, %v259_v31  ;;  %v1178_v47 = vpack.c.bf16 %v511_v38, %v510_v32  ;;  %v272_v38 = vld [vmem:[%s1698_s19 + $0x1c0] sm:$0xff] }
  0x9d   : > { %1251 = vst [vmem:[%s1748_s26 + $0x88] sm:$0xff] %v1173_v37   ;;  %v513_v48 = vmax.f32 %v391_v30, %v452_v39  ;;  %v394_v49 = vadd.f32 %v1714_v5, %v326_v40  ;;  %v328_v50 = vmul.f32 %v1710_v2, %v260_v36  ;;  %v329_v55 = vmul.f32 %v1710_v2, %v261_v41 }
  0x9e   : > { %v454_v52 = vmul.f32 0.2, %v393_v43  ;;  %v514_v53 = vmax.f32 %v392_v35, %v453_v44  ;;  %v395_v54 = vadd.f32 %v1714_v5, %v327_v45  ;;  %1252 = vst [vmem:[%s1748_s26 + $0x90] sm:$0xff] %v1178_v47   ;;  %v330_v60 = vmul.f32 %v1710_v2, %v262_v46  ;;  %v273_v47 = vld [vmem:[%s1698_s19 + $0x1c8] sm:$0xff] }
  0x9f   : > { %v1183_v57 = vpack.c.bf16 %v513_v48, %v512_v42  ;;  %v455_v58 = vmul.f32 0.2, %v394_v49  ;;  %v396_v59 = vadd.f32 %v1714_v5, %v328_v50  ;;  %v397_v63 = vadd.f32 %v1714_v5, %v329_v55 }
  0xa0   : > { %v515_v61 = vmax.f32 %v393_v43, %v454_v52  ;;  %v456_v62 = vmul.f32 0.2, %v395_v54  ;;  %v331_v0 = vmul.f32 %v1710_v2, %v263_v51  ;;  %v398_v6 = vadd.f32 %v1714_v5, %v330_v60  ;;  %v274_v52 = vld [vmem:[%s1698_s19 + $0x1d0] sm:$0xff] }
  0xa1   : > { %1253 = vst [vmem:[%s1748_s26 + $0x98] sm:$0xff] %v1183_v57   ;;  %v516_v3 = vmax.f32 %v394_v49, %v455_v58  ;;  %v457_v4 = vmul.f32 0.2, %v396_v59  ;;  %v332_v7 = vmul.f32 %v1710_v2, %v264_v56  ;;  %v458_v11 = vmul.f32 0.2, %v397_v63  ;;  %v275_v57 = vld [vmem:[%s1698_s19 + $0x1d8] sm:$0xff] }
  0xa2   : > { %v1188_v9 = vpack.c.bf16 %v515_v61, %v514_v53  ;;  %v517_v10 = vmax.f32 %v395_v54, %v456_v62  ;;  %v399_v12 = vadd.f32 %v1714_v5, %v331_v0  ;;  %v459_v15 = vmul.f32 0.2, %v398_v6  ;;  %v276_v62 = vld [vmem:[%s1698_s19 + $0x1e0] sm:$0xff] }
  0xa3   : > { %v518_v14 = vmax.f32 %v396_v59, %v457_v4  ;;  %v333_v16 = vmul.f32 %v1710_v2, %v265_v1  ;;  %v400_v17 = vadd.f32 %v1714_v5, %v332_v7  ;;  %v519_v20 = vmax.f32 %v397_v63, %v458_v11 }
  0xa4   : > { %1254 = vst [vmem:[%s1748_s26 + $0xa0] sm:$0xff] %v1188_v9   ;;  %v1193_v19 = vpack.c.bf16 %v517_v10, %v516_v3  ;;  %v460_v21 = vmul.f32 0.2, %v399_v12  ;;  %v334_v22 = vmul.f32 %v1710_v2, %v266_v8  ;;  %v520_v24 = vmax.f32 %v398_v6, %v459_v15 }
  0xa5   : > { %v401_v25 = vadd.f32 %v1714_v5, %v333_v16  ;;  %v461_v26 = vmul.f32 0.2, %v400_v17  ;;  %v335_v27 = vmul.f32 %v1710_v2, %v267_v13  ;;  %v1198_v29 = vpack.c.bf16 %v519_v20, %v518_v14 }
  0xa6   : > { %1255 = vst [vmem:[%s1748_s26 + $0xa8] sm:$0xff] %v1193_v19   ;;  %v521_v30 = vmax.f32 %v399_v12, %v460_v21  ;;  %v402_v31 = vadd.f32 %v1714_v5, %v334_v22  ;;  %v336_v32 = vmul.f32 %v1710_v2, %v268_v18  ;;  %v337_v37 = vmul.f32 %v1710_v2, %v269_v23 }
  0xa7   : > { %v462_v34 = vmul.f32 0.2, %v401_v25  ;;  %v522_v35 = vmax.f32 %v400_v17, %v461_v26  ;;  %v403_v36 = vadd.f32 %v1714_v5, %v335_v27  ;;  %1256 = vst [vmem:[%s1748_s26 + $0xb0] sm:$0xff] %v1198_v29   ;;  %v338_v42 = vmul.f32 %v1710_v2, %v270_v28 }
  0xa8   : > { %v1203_v39 = vpack.c.bf16 %v521_v30, %v520_v24  ;;  %v463_v40 = vmul.f32 0.2, %v402_v31  ;;  %v404_v41 = vadd.f32 %v1714_v5, %v336_v32  ;;  %v405_v45 = vadd.f32 %v1714_v5, %v337_v37 }
  0xa9   : > { %v523_v43 = vmax.f32 %v401_v25, %v462_v34  ;;  %v464_v44 = vmul.f32 0.2, %v403_v36  ;;  %v339_v46 = vmul.f32 %v1710_v2, %v271_v33  ;;  %v406_v50 = vadd.f32 %v1714_v5, %v338_v42 }
  0xaa   : > { %1257 = vst [vmem:[%s1748_s26 + $0xb8] sm:$0xff] %v1203_v39   ;;  %v524_v48 = vmax.f32 %v402_v31, %v463_v40  ;;  %v465_v49 = vmul.f32 0.2, %v404_v41  ;;  %v340_v51 = vmul.f32 %v1710_v2, %v272_v38  ;;  %v466_v55 = vmul.f32 0.2, %v405_v45 }
  0xab   : > { %v1208_v53 = vpack.c.bf16 %v523_v43, %v522_v35  ;;  %v525_v54 = vmax.f32 %v403_v36, %v464_v44  ;;  %v407_v56 = vadd.f32 %v1714_v5, %v339_v46  ;;  %v467_v59 = vmul.f32 0.2, %v406_v50 }
  0xac   : > { %v526_v58 = vmax.f32 %v404_v41, %v465_v49  ;;  %v341_v60 = vmul.f32 %v1710_v2, %v273_v47  ;;  %v408_v61 = vadd.f32 %v1714_v5, %v340_v51  ;;  %v527_v0 = vmax.f32 %v405_v45, %v466_v55 }
  0xad   : > { %1258 = vst [vmem:[%s1748_s26 + $0xc0] sm:$0xff] %v1208_v53   ;;  %v1213_v63 = vpack.c.bf16 %v525_v54, %v524_v48  ;;  %v468_v1 = vmul.f32 0.2, %v407_v56  ;;  %v342_v3 = vmul.f32 %v1710_v2, %v274_v52  ;;  %v528_v4 = vmax.f32 %v406_v50, %v467_v59 }
  0xae   : > { %v409_v6 = vadd.f32 %v1714_v5, %v341_v60  ;;  %v469_v7 = vmul.f32 0.2, %v408_v61  ;;  %v343_v8 = vmul.f32 %v1710_v2, %v275_v57  ;;  %v1218_v9 = vpack.c.bf16 %v527_v0, %v526_v58 }
  0xaf   : > { %1259 = vst [vmem:[%s1748_s26 + $0xc8] sm:$0xff] %v1213_v63   ;;  %v529_v10 = vmax.f32 %v407_v56, %v468_v1  ;;  %v410_v11 = vadd.f32 %v1714_v5, %v342_v3  ;;  %v344_v12 = vmul.f32 %v1710_v2, %v276_v62 }
  0xb0   : > { %v470_v13 = vmul.f32 0.2, %v409_v6  ;;  %v530_v14 = vmax.f32 %v408_v61, %v469_v7  ;;  %v411_v15 = vadd.f32 %v1714_v5, %v343_v8  ;;  %1260 = vst [vmem:[%s1748_s26 + $0xd0] sm:$0xff] %v1218_v9  }
  0xb1   : > { %v1223_v16 = vpack.c.bf16 %v529_v10, %v528_v4  ;;  %v471_v17 = vmul.f32 0.2, %v410_v11  ;;  %v412_v18 = vadd.f32 %v1714_v5, %v344_v12 }
  0xb2   : > { %v531_v19 = vmax.f32 %v409_v6, %v470_v13  ;;  %v472_v20 = vmul.f32 0.2, %v411_v15 }
  0xb3   : > { %1261 = vst [vmem:[%s1748_s26 + $0xd8] sm:$0xff] %v1223_v16   ;;  %v532_v21 = vmax.f32 %v410_v11, %v471_v17  ;;  %v473_v22 = vmul.f32 0.2, %v412_v18 }
  0xb4   : > { %v1228_v2 = vpack.c.bf16 %v531_v19, %v530_v14  ;;  %v533_v23 = vmax.f32 %v411_v15, %v472_v20 }
  0xb5   : > { %v534_v24 = vmax.f32 %v412_v18, %v473_v22 }
  0xb6   : > { %1262 = vst [vmem:[%s1748_s26 + $0xe0] sm:$0xff] %v1228_v2   ;;  %v1233_v25 = vpack.c.bf16 %v533_v23, %v532_v21 }
  0xb7   : > { %v1083_v26 = vpack.c.bf16 %v534_v24, %v534_v24 }
  0xb8   : > { %1263 = vst [vmem:[%s1748_s26 + $0xe8] sm:$0xff] %v1233_v25  }
  0xb9   : > { %840 = vst [vmem:[%s1748_s26 + $0xf0] sm:$0xf] %v1083_v26 }
  0xba   : > { %1437 = shalt.err (!%p1434_p6)
}
  0xbb   : > { %s1438_s7 = scalar_lea.hbm %s1934_s20, 3904  ;;  %s1442_s5 = scalar_lea.hbm %s1985_s3, 7808 }
  0xbc   : > { %p1439_p12 = scmp.ne.s32.totalorder %s1934_s20, %s1438_s7  ;;  %p1443_p11 = scmp.lt.u32.totalorder %s1934_s20, %s1985_s3 }
  0xbd   : > { %p1444_p7 = scmp.lt.u32.totalorder %s1442_s5, %s1438_s7  ;;  %p1446_p8 = scmp.lt.u32.totalorder %s1438_s7, %s1934_s20 }
  0xbe   : > { %p1440_p13 = pnand %p1439_p12, %p2004_p4 }
  0xbf   : > { %p1445_p3 = por %p1444_p7, %p1443_p11 }
  0xc0   : > { %p1441_p1 = pneg %p1440_p13 }
  0xc1   : > { %p1447_p5 = por %p1446_p8, %p1445_p3 }
  0xc3   : > { %p1448_p10 = pnand %p1447_p5, %p1441_p1 }
  0xc5   : > { %1451 = shalt.err (!%p1448_p10)
}
  0xc6   : > { %s1502_s23 = smov 64   ;;  %s1503_s26 = smov 4  }
  0xc7   : > { %1277 = dma.vmem_to_hbm [thread:$0]  (%p2004_p4), %s1936_s9, 3904, %s1934_s20, %s842_s16, %s1502_s23, %s1502_s23, %s1503_s26  }
  0xc8 PF: > { %s870_s30 = sand.u32 1, %s1482_s12   ;;  %p2005_p2 = scmp.ne.s32.totalorder %s1994_s25, 0 }
  0xc9   : > { %p2006_p0 = scmp.ge.s32.totalorder %s1494_s15, 2  ;;  %s871_s10 = scalar_lea.sflag [#allocation4], %s870_s30 }
  0xcb   : > { %p1291_p9 = pnand %p2006_p0, %p2005_p2 }
  0xcd   : > { %1477 = dma.done.wait (!%p1291_p9), %s871_s10, 3904  }
  0xce   : > { %1479 = vsyncadd (!%p1291_p9), %s871_s10, 4294963392  ;;  %p17_p6 = scmp.ge.s32.totalorder %s1549_s18, 4   ;;  %s2007_s12 = smov %s1486_s13 }
  0xcf   : > { %s2008_s13 = smov %s1490_s14  ;;  %s2009_s14 = smov %s1561_s21 }
  0xd0   : > { %s2010_s15 = smov %s1549_s18  ;;  %19 = sbr.rel (!%p17_p6) target bundleno = 6 (0x6), region = 85 }
  0xd7   :  { %876 = vsyncpa [#allocation3], 1 }
  0xd8   :  { %878 = vsyncpa [#allocation3 + $0x1], 1 }
  0xd9   :  { %879 = vsyncpa [#allocation6], 1 }
  0xda   :  { %880 = vsyncpa [#allocation4], 1 }
  0xdb   :  { %882 = vsyncpa [#allocation4 + $0x1], 1 }

// kernel: discriminator_forward.13
= control target key start
LH: loop header
LB: loop body
LE: loop exit
PB: predicated region body
PF: predicated region fallthrough
CT: control target
= control target key end

     0   :  { %9 = vsyncpa [#allocation3], 0  ;;  %s2354_s0 = inlined_call_operand.hbm [shape: bf16[976,128], index: 0, kind: input, shape index: {}]   ;;  %s2355_s1 = inlined_call_operand.hbm [shape: bf16[128,128], index: 1, kind: input, shape index: {}]   ;;  %s2356_s2 = inlined_call_operand.hbm [shape: f32[976,128], index: 2, kind: output, shape index: {0}]   ;;  %s2357_s3 = inlined_call_operand.hbm [shape: f32[2,8,128], index: 3, kind: output, shape index: {1}]  }
   0x1   :  { %11 = vsyncpa [#allocation3 + $0x1], 0 }
   0x2   :  { %12 = vsyncpa [#allocation6], 0 }
   0x3   :  { %13 = vsyncpa [#allocation4], 0 }
   0x4   :  { %15 = vsyncpa [#allocation4 + $0x1], 0 }
   0x5   :  { %16 = vsyncpa [#allocation9], 0 }
   0x6   :  { %18 = vsyncpa [#allocation9 + $0x1], 0  ;;  %s1766_s12 = smov 0   ;;  %s1768_s13 = smov 0  }
   0x7   :  { %s1770_s14 = smov 0   ;;  %s1772_s15 = smov 0  }
   0x8 LB: > { %s1787_s16 = sadd.s32 4294967295, %s1734_s15   ;;  %s1215_s17 = sadd.s32 4294967294, %s1734_s15   ;;  %s1734_s15 = sphi %s1772_s15, %s2377_s15   ;;  %s1730_s14 = sphi %s1770_s14, %s2376_s14   ;;  %s1726_s13 = sphi %s1768_s13, %s2375_s13   ;;  %s1722_s12 = sphi %s1766_s12, %s2374_s12  }
   0x9   : > { %p44_p0 = scmp.ne.s32.totalorder %s1726_s13, %s1722_s12  ;;  %p2358_p1 = scmp.eq.s32.totalorder %s1787_s16, 0 }
   0xa   : > { %p95_p3 = scmp.eq.s32.totalorder %s1215_s17, 1  ;;  %p1216_p5 = scmp.ge.s32.totalorder %s1734_s15, 1 }
   0xb   : > { %p1796_p4 = por %p2358_p1, %p44_p0  ;;  %p128_p7 = scmp.lt.s32.totalorder %s1734_s15, 3 }
   0xc   : > { %p1801_p6 = por %p95_p3, %p44_p0  ;;  %s1736_s21 = smov [#allocation5]  }
   0xd   : > { %s2361_s18 = scalar_select %p1796_p4, 1, 0 }
   0xe   : > { %s2362_s19 = scalar_select %p1801_p6, 1, 0 }
   0xf   : > { %p1806_p8 = pnand %p1216_p5, %p128_p7  ;;  %s140_s22 = sshll.u32 %s1736_s21, 4  ;;  %s1810_s22 = int_to_ptr.vmem [resolvable:$true] %s140_s22 }
  0x10   : > { %s1822_s24 = sadd.s32 1, %s1734_s15   ;;  %s31_s25 = sadd.s32 1, %s1730_s14 }
  0x11   : > { %s2363_s20 = scalar_select %p1806_p8, 1, 0 }
  0x12   : > { %p1477_p9 = pneg %p1806_p8  ;;  %s28_s26 = ssub.s32 %s1734_s15, %s1822_s24 }
  0x13   : > { %s1574_s29 = scalar_lea.hbm %s2355_s1, 1024 }
  0x14   : > { %p1817_p11 = pnand %p1477_p9, %p2358_p1  ;;  %p1575_p12 = scmp.ne.s32.totalorder %s2355_s1, %s1574_s29 }
  0x15   : > { %p1581_p5 = scmp.lt.u32.totalorder %s1574_s29, %s2355_s1 }
  0x16   : > { %p1576_p13 = pneg %p1817_p11 }
  0x18   : > { %p1577_p0 = pnand %p1576_p13, %p1575_p12 }
  0x1a   : > { %p1578_p3 = pneg %p1577_p0 }
  0x1c   : > { %p1583_p7 = pnand %p1581_p5, %p1578_p3 }
  0x1e   : > { %1586 = shalt.err (!%p1583_p7)
}
  0x1f   : > { %s1587_s7 = scalar_lea.vmem %s1810_s22, 1024  ;;  %p1595_p2 = scmp.lt.s32.totalorder %s1810_s22, %s1810_s22 }
  0x20   : > { %p1588_p9 = scmp.ne.s32.totalorder %s1810_s22, %s1587_s7  ;;  %p1596_p6 = scmp.lt.s32.totalorder %s1587_s7, %s1587_s7 }
  0x22   : > { %p1590_p10 = pnand %p1588_p9, %p1576_p13  ;;  %p1597_p4 = por %p1596_p6, %p1595_p2 }
  0x24   : > { %p1591_p1 = pneg %p1590_p10 }
  0x26   : > { %p1598_p8 = pnand %p1597_p4, %p1591_p1 }
  0x28   : > { %1601 = shalt.err (!%p1598_p8)
}
  0x29   : > { %s1737_s8 = smov 64   ;;  %s1738_s9 = smov 4  }
  0x2a   : > { %1480 = dma.hbm_to_vmem [thread:$0]  (!%p1817_p11), %s2355_s1, 1024, %s1810_s22, [#allocation6], %s1737_s8, %s1737_s8, %s1738_s9  }
  0x2b   : > { %p29_p1 = scmp.eq.s32.totalorder %s28_s26, 0  ;;  %p38_p2 = scmp.ne.s32.totalorder %s1730_s14, %s1726_s13 }
  0x2c   : > { %p39_p4 = scmp.eq.s32.totalorder %s1734_s15, 0  ;;  %p1493_p6 = scmp.lt.s32.totalorder %s1734_s15, 2 }
  0x2d   : > { %s1856_s17 = scalar_select %p29_p1, %s1730_s14, %s31_s25  }
  0x2e   : > { %p40_p8 = por %p39_p4, %p38_p2  ;;  %p2365_p10 = scmp.eq.s32.totalorder %s1787_s16, 1 }
  0x2f   : > { %s154_s23 = sand.u32 1, %s1730_s14   ;;  %s1267_s27 = smul.u32 3904, %s1734_s15 }
  0x30   : > { %p1860_p12 = por %p2365_p10, %p38_p2  ;;  %s1464_s28 = smul.u32 244, %s154_s23 }
  0x31   : > { %p1866_p13 = pnand %p1493_p6, %p40_p8  ;;  %s1873_s25 = scalar_lea.hbm %s2354_s0, %s1267_s27 }
  0x32   : > { %s158_s30 = scalar_lea.vmem [#allocation2], %s1464_s28  ;;  %s1877_s5 = scalar_lea.sflag [#allocation3], %s154_s23 }
  0x33   : > { %s165_s4 = sshll.u32 %s158_s30, 4  ;;  %s1602_s6 = scalar_lea.hbm %s1873_s25, 3904  ;;  %s1875_s4 = int_to_ptr.vmem [resolvable:$true] %s165_s4 }
  0x34   : > { %p1603_p11 = scmp.ne.s32.totalorder %s1873_s25, %s1602_s6  ;;  %p1604_p0 = pneg %p1866_p13 }
  0x35   : > { %s1607_s11 = scalar_lea.hbm %s2354_s0, 7808  ;;  %p1608_p7 = scmp.lt.u32.totalorder %s1873_s25, %s2354_s0 }
  0x36   : > { %p1605_p3 = pnand %p1604_p0, %p1603_p11  ;;  %p1609_p9 = scmp.lt.u32.totalorder %s1607_s11, %s1602_s6 }
  0x37   : > { %p1611_p2 = scmp.lt.u32.totalorder %s1602_s6, %s1873_s25 }
  0x38   : > { %p1606_p5 = pneg %p1605_p3  ;;  %p1610_p1 = por %p1609_p9, %p1608_p7 }
  0x3a   : > { %p1612_p4 = por %p1611_p2, %p1610_p1 }
  0x3c   : > { %p1613_p6 = pnand %p1612_p4, %p1606_p5 }
  0x3e   : > { %1616 = shalt.err (!%p1613_p6)
}
  0x3f   : > { %s1617_s23 = scalar_lea.vmem %s1875_s4, 3904  ;;  %s1739_s28 = smov [#allocation2]  }
  0x40   : > { %p1618_p8 = scmp.ne.s32.totalorder %s1875_s4, %s1617_s23  ;;  %s1622_s26 = sshll.u32 %s1739_s28, 4  ;;  %s1623_s26 = int_to_ptr.vmem [resolvable:$false] %s1622_s26 }
  0x41   : > { %s1624_s30 = scalar_lea.vmem %s1623_s26, 7808  ;;  %p1625_p3 = scmp.lt.s32.totalorder %s1875_s4, %s1623_s26 }
  0x42   : > { %p1620_p10 = pnand %p1618_p8, %p1604_p0  ;;  %p1626_p7 = scmp.lt.s32.totalorder %s1624_s30, %s1617_s23 }
  0x44   : > { %p1621_p11 = pneg %p1620_p10  ;;  %p1627_p9 = por %p1626_p7, %p1625_p3 }
  0x46   : > { %p1628_p1 = pnand %p1627_p9, %p1621_p11 }
  0x48   : > { %1631 = shalt.err (!%p1628_p1)
}
  0x49   : > { %1484 = dma.hbm_to_vmem [thread:$0]  (!%p1866_p13), %s1873_s25, 3904, %s1875_s4, %s1877_s5, %s1737_s8, %s1737_s8, %s1738_s9  }
  0x4a   : > { %p2368_p0 = scmp.ne.s32.totalorder %s2363_s20, 0 }
  0x4b   : > { %s1911_s6 = sand.u32 (!%p2368_p0), 1, %s1726_s13   ;;  %p2369_p5 = scmp.ne.s32.totalorder (!%p2368_p0), %s2361_s18, 0 }
  0x4c   : > { %177 = sbr.rel (%p2368_p0) target bundleno = 556 (0x22c), region = 28  ;;  %s180_s10 = scalar_lea.sflag (!%p2368_p0), [#allocation3], %s1911_s6 }
  0x4d   : > { %s1465_s7 = smul.u32 (!%p2368_p0), 244, %s1911_s6 }
  0x4f   : > { %s1915_s11 = scalar_lea.vmem (!%p2368_p0), [#allocation2], %s1465_s7 }
  0x53   : > { %1705 = dma.done.wait (%p2369_p5), %s180_s10, 3904  }
  0x54   : > { %1707 = vsyncadd (%p2369_p5), %s180_s10, 4294963392  ;;  %p2370_p13 = scmp.eq.s32.totalorder %s1787_s16, 0 }
  0x56   : > { %1709 = dma.done.wait (%p2370_p13), [#allocation6], 1024   ;;  %p2371_p2 = pmov %p2370_p13 }
  0x57   : > { %v1740_v0 = vmov 0.0   ;;  %vm1741_vm0 = vmmov 0   ;;  %v1535_v1 = vld [vmem:[#allocation5] sm:$0xff]   ;;  %v1536_v2 = vld [vmem:[#allocation5 + $0x8] sm:$0xff]   ;;  %v1537_v3 = vld [vmem:[#allocation5 + $0x10] sm:$0xff]   ;;  %s1466_s18 = smul.u32 488, %s1911_s6 }
  0x58   : > { %1711 = vsyncadd (%p2371_p2), [#allocation6], 4294966272  ;;  %1308 = vmatprep.subr.bf16.mxu0 %v1740_v0  ;;  %1324 = vmatprep.mubr.msk.bf16.mxu0 %vm1741_vm0, %v1740_v0  ;;  %v1538_v4 = vld [vmem:[#allocation5 + $0x18] sm:$0xff]   ;;  %v1539_v5 = vld [vmem:[#allocation5 + $0x20] sm:$0xff]   ;;  %s1268_s8 = smul.u32 7808, %s1787_s16  ;;  %s1069_s5 = scalar_lea.sflag [#allocation4], %s1911_s6 }
  0x59   : > { %1448 = vmatprep.subr.bf16.mxu1 %v1740_v0  ;;  %1388 = vmatprep.mubr.msk.bf16.mxu1 %vm1741_vm0, %v1740_v0  ;;  %v1540_v6 = vld [vmem:[#allocation5 + $0x28] sm:$0xff]   ;;  %v1541_v7 = vld [vmem:[#allocation5 + $0x30] sm:$0xff]   ;;  %v1542_v8 = vld [vmem:[#allocation5 + $0x38] sm:$0xff]   ;;  %s2037_s20 = scalar_lea.vmem [#allocation7], %s1466_s18  ;;  %s1742_s22 = smov [#allocation7]  }
  0x5a   : > { %1309 = vmatpush3.bf16.msra.mxu0 %v1535_v1  ;;  %1456 = vmatpush3.bf16.msra.mxu1 %v1535_v1  ;;  %v1543_v9 = vld [vmem:[%s1915_s11] sm:$0xff]   ;;  %v1544_v11 = vld [vmem:[%s1915_s11 + $0x8] sm:$0xff]   ;;  %v1545_v13 = vld [vmem:[%s1915_s11 + $0x10] sm:$0xff]   ;;  %s1087_s9 = sshll.u32 %s2037_s20, 4  ;;  %s2188_s4 = scalar_lea.hbm %s2356_s2, %s1268_s8  ;;  %s2191_s9 = int_to_ptr.vmem [resolvable:$true] %s1087_s9 }
  0x5b   : > { %1310 = vmatprep.subr.bf16.mxu0 %v1740_v0  ;;  %1449 = vmatprep.subr.bf16.mxu1 %v1740_v0  ;;  %v1552_v10 = vld [vmem:[%s1915_s11 + $0x80] sm:$0xff]   ;;  %v1554_v12 = vld [vmem:[%s1915_s11 + $0x88] sm:$0xff]   ;;  %v1556_v14 = vld [vmem:[%s1915_s11 + $0x90] sm:$0xff]   ;;  %s1632_s27 = scalar_lea.vmem %s2191_s9, 7808  ;;  %s1636_s23 = sshll.u32 %s1742_s22, 4  ;;  %s1637_s23 = int_to_ptr.vmem [resolvable:$false] %s1636_s23 }
  0x5c   : > { %v1546_v15 = vld [vmem:[%s1915_s11 + $0x18] sm:$0xff]   ;;  %v1547_v17 = vld [vmem:[%s1915_s11 + $0x20] sm:$0xff]   ;;  %v1548_v19 = vld [vmem:[%s1915_s11 + $0x28] sm:$0xff]   ;;  %p1633_p4 = scmp.ne.s32.totalorder %s2191_s9, %s1632_s27  ;;  %s1638_s28 = scalar_lea.vmem %s1637_s23, 15616 }
  0x5d   : > { %v1558_v16 = vld [vmem:[%s1915_s11 + $0x98] sm:$0xff]   ;;  %v1560_v18 = vld [vmem:[%s1915_s11 + $0xa0] sm:$0xff]   ;;  %v1562_v20 = vld [vmem:[%s1915_s11 + $0xa8] sm:$0xff]   ;;  %p1639_p10 = scmp.lt.s32.totalorder %s2191_s9, %s1637_s23  ;;  %p1640_p11 = scmp.lt.s32.totalorder %s1638_s28, %s1632_s27 }
  0x5e   : > { %1311 = vmatpush3.bf16.msra.mxu0 %v1536_v2  ;;  %1457 = vmatpush3.bf16.msra.mxu1 %v1536_v2  ;;  %v1549_v21 = vld [vmem:[%s1915_s11 + $0x30] sm:$0xff]   ;;  %v1550_v23 = vld [vmem:[%s1915_s11 + $0x38] sm:$0xff]   ;;  %v1551_v25 = vld [vmem:[%s1915_s11 + $0x40] sm:$0xff]   ;;  %p1634_p6 = pnand %p1633_p4, %p1860_p12 }
  0x5f   : > { %1312 = vmatprep.subr.bf16.mxu0 %v1740_v0  ;;  %1450 = vmatprep.subr.bf16.mxu1 %v1740_v0  ;;  %v1564_v22 = vld [vmem:[%s1915_s11 + $0xb0] sm:$0xff]   ;;  %v1566_v24 = vld [vmem:[%s1915_s11 + $0xb8] sm:$0xff]   ;;  %v1567_v26 = vld [vmem:[%s1915_s11 + $0xc0] sm:$0xff]   ;;  %p1641_p3 = por %p1640_p11, %p1639_p10 }
  0x60   : > { %v1553_v27 = vld [vmem:[%s1915_s11 + $0x48] sm:$0xff]   ;;  %v1555_v29 = vld [vmem:[%s1915_s11 + $0x50] sm:$0xff]   ;;  %v1557_v31 = vld [vmem:[%s1915_s11 + $0x58] sm:$0xff]   ;;  %p1635_p8 = pneg %p1634_p6 }
  0x61   : > { %v1568_v28 = vld [vmem:[%s1915_s11 + $0xc8] sm:$0xff]   ;;  %v1569_v30 = vld [vmem:[%s1915_s11 + $0xd0] sm:$0xff]   ;;  %v1570_v32 = vld [vmem:[%s1915_s11 + $0xd8] sm:$0xff]  }
  0x62   : > { %1313 = vmatpush3.bf16.msra.mxu0 %v1537_v3  ;;  %1458 = vmatpush3.bf16.msra.mxu1 %v1537_v3  ;;  %v1559_v33 = vld [vmem:[%s1915_s11 + $0x60] sm:$0xff]   ;;  %v1561_v35 = vld [vmem:[%s1915_s11 + $0x68] sm:$0xff]   ;;  %v1563_v37 = vld [vmem:[%s1915_s11 + $0x70] sm:$0xff]   ;;  %p1642_p7 = pnand %p1641_p3, %p1635_p8 }
  0x63   : > { %1314 = vmatprep.subr.bf16.mxu0 %v1740_v0  ;;  %1451 = vmatprep.subr.bf16.mxu1 %v1740_v0  ;;  %v1571_v34 = vld [vmem:[%s1915_s11 + $0xe0] sm:$0xff]   ;;  %v1572_v36 = vld [vmem:[%s1915_s11 + $0xe8] sm:$0xff]   ;;  %v1573_v38 = vld [vmem:[%s1915_s11 + $0xf0] ss:$0 sps:$4 sm:$0xff]  }
  0x64   : > { %v1565_v39 = vld [vmem:[%s1915_s11 + $0x78] sm:$0xff]  }
  0x66   : > { %1315 = vmatpush3.bf16.msra.mxu0 %v1538_v4  ;;  %1459 = vmatpush3.bf16.msra.mxu1 %v1538_v4 }
  0x67   : > { %1316 = vmatprep.subr.bf16.mxu0 %v1740_v0  ;;  %1452 = vmatprep.subr.bf16.mxu1 %v1740_v0 }
  0x6a   : > { %1317 = vmatpush3.bf16.msra.mxu0 %v1539_v5  ;;  %1460 = vmatpush3.bf16.msra.mxu1 %v1539_v5 }
  0x6b   : > { %1318 = vmatprep.subr.bf16.mxu0 %v1740_v0  ;;  %1453 = vmatprep.subr.bf16.mxu1 %v1740_v0 }
  0x6e   : > { %1319 = vmatpush3.bf16.msra.mxu0 %v1540_v6  ;;  %1461 = vmatpush3.bf16.msra.mxu1 %v1540_v6 }
  0x6f   : > { %1320 = vmatprep.subr.bf16.mxu0 %v1740_v0  ;;  %1454 = vmatprep.subr.bf16.mxu1 %v1740_v0 }
  0x72   : > { %1321 = vmatpush3.bf16.msra.mxu0 %v1541_v7  ;;  %1462 = vmatpush3.bf16.msra.mxu1 %v1541_v7 }
  0x73   : > { %1322 = vmatprep.subr.bf16.mxu0 %v1740_v0  ;;  %1455 = vmatprep.subr.bf16.mxu1 %v1740_v0 }
  0x76   : > { %1323 = vmatpush3.bf16.msra.mxu0 %v1542_v8  ;;  %1463 = vmatpush3.bf16.msra.mxu1 %v1542_v8 }
  0x79   : > { %1325 = vmatmul.mubr.bf16.vlgmr.msra.gmra.mrb[0].mxu0 %v1543_v9  ;;  %1389 = vmatmul.mubr.bf16.vlgmr.msra.gmra.mrb[0].mxu1 %v1552_v10 }
  0x7a   : > { %1328 = vmatprep.mubr.msk.bf16.mxu0 %vm1741_vm0, %v1740_v0  ;;  %1392 = vmatprep.mubr.msk.bf16.mxu1 %vm1741_vm0, %v1740_v0 }
  0x81   : > { %1329 = vmatmul.mubr.bf16.gmra.mrb[4].mxu0 %v1544_v11  ;;  %1393 = vmatmul.mubr.bf16.gmra.mrb[4].mxu1 %v1554_v12 }
  0x82   : > { %1332 = vmatprep.mubr.msk.bf16.mxu0 %vm1741_vm0, %v1740_v0  ;;  %1396 = vmatprep.mubr.msk.bf16.mxu1 %vm1741_vm0, %v1740_v0 }
  0x89   : > { %1333 = vmatmul.mubr.bf16.gmra.mrb[8].mxu0 %v1545_v13  ;;  %1397 = vmatmul.mubr.bf16.gmra.mrb[8].mxu1 %v1556_v14 }
  0x8a   : > { %1336 = vmatprep.mubr.msk.bf16.mxu0 %vm1741_vm0, %v1740_v0  ;;  %1400 = vmatprep.mubr.msk.bf16.mxu1 %vm1741_vm0, %v1740_v0 }
  0x91   : > { %1337 = vmatmul.mubr.bf16.gmra.mrb[12].mxu0 %v1546_v15  ;;  %1401 = vmatmul.mubr.bf16.gmra.mrb[12].mxu1 %v1558_v16 }
  0x92   : > { %1340 = vmatprep.mubr.msk.bf16.mxu0 %vm1741_vm0, %v1740_v0  ;;  %1404 = vmatprep.mubr.msk.bf16.mxu1 %vm1741_vm0, %v1740_v0 }
  0x99   : > { %1341 = vmatmul.mubr.bf16.gmra.mrb[16].mxu0 %v1547_v17  ;;  %1405 = vmatmul.mubr.bf16.gmra.mrb[16].mxu1 %v1560_v18 }
  0x9a   : > { %1344 = vmatprep.mubr.msk.bf16.mxu0 %vm1741_vm0, %v1740_v0  ;;  %1408 = vmatprep.mubr.msk.bf16.mxu1 %vm1741_vm0, %v1740_v0 }
  0xa1   : > { %1345 = vmatmul.mubr.bf16.gmra.mrb[20].mxu0 %v1548_v19  ;;  %1409 = vmatmul.mubr.bf16.gmra.mrb[20].mxu1 %v1562_v20 }
  0xa2   : > { %1348 = vmatprep.mubr.msk.bf16.mxu0 %vm1741_vm0, %v1740_v0  ;;  %1412 = vmatprep.mubr.msk.bf16.mxu1 %vm1741_vm0, %v1740_v0 }
  0xa9   : > { %1349 = vmatmul.mubr.bf16.gmra.mrb[24].mxu0 %v1549_v21  ;;  %1413 = vmatmul.mubr.bf16.gmra.mrb[24].mxu1 %v1564_v22 }
  0xaa   : > { %1352 = vmatprep.mubr.msk.bf16.mxu0 %vm1741_vm0, %v1740_v0  ;;  %1416 = vmatprep.mubr.msk.bf16.mxu1 %vm1741_vm0, %v1740_v0 }
  0xb1   : > { %1353 = vmatmul.mubr.bf16.gmra.mrb[28].mxu0 %v1550_v23  ;;  %1417 = vmatmul.mubr.bf16.gmra.mrb[28].mxu1 %v1566_v24 }
  0xb2   : > { %1356 = vmatprep.mubr.msk.bf16.mxu0 %vm1741_vm0, %v1740_v0  ;;  %1420 = vmatprep.mubr.msk.bf16.mxu1 %vm1741_vm0, %v1740_v0 }
  0xb9   : > { %1357 = vmatmul.mubr.bf16.gmra.mrb[32].mxu0 %v1551_v25  ;;  %1421 = vmatmul.mubr.bf16.gmra.mrb[32].mxu1 %v1567_v26 }
  0xba   : > { %1360 = vmatprep.mubr.msk.bf16.mxu0 %vm1741_vm0, %v1740_v0  ;;  %1424 = vmatprep.mubr.msk.bf16.mxu1 %vm1741_vm0, %v1740_v0 }
  0xc1   : > { %1361 = vmatmul.mubr.bf16.gmra.mrb[36].mxu0 %v1553_v27  ;;  %1425 = vmatmul.mubr.bf16.gmra.mrb[36].mxu1 %v1568_v28 }
  0xc2   : > { %1364 = vmatprep.mubr.msk.bf16.mxu0 %vm1741_vm0, %v1740_v0  ;;  %1428 = vmatprep.mubr.msk.bf16.mxu1 %vm1741_vm0, %v1740_v0 }
  0xc9   : > { %1365 = vmatmul.mubr.bf16.gmra.mrb[40].mxu0 %v1555_v29  ;;  %1429 = vmatmul.mubr.bf16.gmra.mrb[40].mxu1 %v1569_v30 }
  0xca   : > { %1368 = vmatprep.mubr.msk.bf16.mxu0 %vm1741_vm0, %v1740_v0  ;;  %1432 = vmatprep.mubr.msk.bf16.mxu1 %vm1741_vm0, %v1740_v0 }
  0xd1   : > { %1369 = vmatmul.mubr.bf16.gmra.mrb[44].mxu0 %v1557_v31  ;;  %1433 = vmatmul.mubr.bf16.gmra.mrb[44].mxu1 %v1570_v32 }
  0xd2   : > { %1372 = vmatprep.mubr.msk.bf16.mxu0 %vm1741_vm0, %v1740_v0  ;;  %1436 = vmatprep.mubr.msk.bf16.mxu1 %vm1741_vm0, %v1740_v0 }
  0xd9   : > { %1373 = vmatmul.mubr.bf16.gmra.mrb[48].mxu0 %v1559_v33  ;;  %1437 = vmatmul.mubr.bf16.gmra.mrb[48].mxu1 %v1571_v34 }
  0xda   : > { %1376 = vmatprep.mubr.msk.bf16.mxu0 %vm1741_vm0, %v1740_v0  ;;  %1440 = vmatprep.mubr.msk.bf16.mxu1 %vm1741_vm0, %v1740_v0 }
  0xe1   : > { %1377 = vmatmul.mubr.bf16.gmra.mrb[52].mxu0 %v1561_v35  ;;  %1441 = vmatmul.mubr.bf16.gmra.mrb[52].mxu1 %v1572_v36 }
  0xe2   : > { %1380 = vmatprep.mubr.msk.bf16.mxu0 %vm1741_vm0, %v1740_v0  ;;  %1444 = vmatprep.mubr.msk.bf16.mxu1 %vm1741_vm0, %v1740_v0 }
  0xe9   : > { %1381 = vmatmul.mubr.bf16.gmra.mrb[56].mxu0 %v1563_v37  ;;  %1445 = vmatmul.mubr.bf16.gmra.mrb[56].mxu1 %v1573_v38 }
  0xea   : > { %1384 = vmatprep.mubr.msk.bf16.mxu0 %vm1741_vm0, %v1740_v0 }
  0xf1   : > { %1385 = vmatmul.mubr.bf16.gmra.mrb[60].mxu0 %v1565_v39 }
 0x14c   : > { %v561_v40 = vpop.f32.mrb[0].mxu0  ;;  %v2035_v41 = vpop.f32.mrb[0].mxu1 }
 0x14d   : > { %807 = vst [vmem:[%s2037_s20] sm:$0xff] %v561_v40  ;;  %v1326_v42 = vpop.f32.mrb[1].mxu0  ;;  %839 = vst [vmem:[%s2037_s20 + $0x100] sm:$0xff] %v2035_v41  ;;  %v1390_v43 = vpop.f32.mrb[1].mxu1  ;;  %v934_v46 = vmul.f32 %v561_v40, %v561_v40 }
 0x14e   : > { %v564_v44 = vpop.f32.mrb[2].mxu0  ;;  %v2042_v45 = vpop.f32.mrb[2].mxu1 }
 0x14f   : > { %808 = vst [vmem:[%s2037_s20 + $0x8] sm:$0xff] %v564_v44  ;;  %v868_v47 = vadd.f32 %v564_v44, %v561_v40  ;;  %v935_v48 = vmul.f32 %v564_v44, %v564_v44  ;;  %v1327_v49 = vpop.f32.mrb[3].mxu0  ;;  %840 = vst [vmem:[%s2037_s20 + $0x108] sm:$0xff] %v2042_v45  ;;  %v1391_v50 = vpop.f32.mrb[3].mxu1 }
 0x151   : > { %v995_v51 = vadd.f32 %v935_v48, %v934_v46 }
 0x154   : > { %v569_v52 = vpop.f32.mrb[4].mxu0  ;;  %v2047_v53 = vpop.f32.mrb[4].mxu1 }
 0x155   : > { %809 = vst [vmem:[%s2037_s20 + $0x10] sm:$0xff] %v569_v52  ;;  %v869_v54 = vadd.f32 %v868_v47, %v569_v52  ;;  %v936_v55 = vmul.f32 %v569_v52, %v569_v52  ;;  %v1330_v56 = vpop.f32.mrb[5].mxu0  ;;  %841 = vst [vmem:[%s2037_s20 + $0x110] sm:$0xff] %v2047_v53  ;;  %v1394_v57 = vpop.f32.mrb[5].mxu1 }
 0x156   : > { %v572_v58 = vpop.f32.mrb[6].mxu0  ;;  %v2052_v59 = vpop.f32.mrb[6].mxu1 }
 0x157   : > { %v996_v60 = vadd.f32 %v995_v51, %v936_v55  ;;  %810 = vst [vmem:[%s2037_s20 + $0x18] sm:$0xff] %v572_v58  ;;  %v870_v61 = vadd.f32 %v869_v54, %v572_v58  ;;  %v937_v62 = vmul.f32 %v572_v58, %v572_v58  ;;  %v1331_v63 = vpop.f32.mrb[7].mxu0  ;;  %842 = vst [vmem:[%s2037_s20 + $0x118] sm:$0xff] %v2052_v59  ;;  %v1395_v0 = vpop.f32.mrb[7].mxu1 }
 0x159   : > { %v997_v1 = vadd.f32 %v996_v60, %v937_v62 }
 0x15c   : > { %v577_v2 = vpop.f32.mrb[8].mxu0  ;;  %v2057_v3 = vpop.f32.mrb[8].mxu1 }
 0x15d   : > { %811 = vst [vmem:[%s2037_s20 + $0x20] sm:$0xff] %v577_v2  ;;  %v871_v4 = vadd.f32 %v870_v61, %v577_v2  ;;  %v938_v5 = vmul.f32 %v577_v2, %v577_v2  ;;  %v1334_v6 = vpop.f32.mrb[9].mxu0  ;;  %843 = vst [vmem:[%s2037_s20 + $0x120] sm:$0xff] %v2057_v3  ;;  %v1398_v7 = vpop.f32.mrb[9].mxu1 }
 0x15e   : > { %v580_v8 = vpop.f32.mrb[10].mxu0  ;;  %v2062_v9 = vpop.f32.mrb[10].mxu1 }
 0x15f   : > { %v998_v10 = vadd.f32 %v997_v1, %v938_v5  ;;  %812 = vst [vmem:[%s2037_s20 + $0x28] sm:$0xff] %v580_v8  ;;  %v872_v11 = vadd.f32 %v871_v4, %v580_v8  ;;  %v939_v12 = vmul.f32 %v580_v8, %v580_v8  ;;  %v1335_v13 = vpop.f32.mrb[11].mxu0  ;;  %844 = vst [vmem:[%s2037_s20 + $0x128] sm:$0xff] %v2062_v9  ;;  %v1399_v14 = vpop.f32.mrb[11].mxu1 }
 0x161   : > { %v999_v15 = vadd.f32 %v998_v10, %v939_v12 }
 0x164   : > { %v585_v16 = vpop.f32.mrb[12].mxu0  ;;  %v2067_v17 = vpop.f32.mrb[12].mxu1 }
 0x165   : > { %813 = vst [vmem:[%s2037_s20 + $0x30] sm:$0xff] %v585_v16  ;;  %v873_v18 = vadd.f32 %v872_v11, %v585_v16  ;;  %v940_v19 = vmul.f32 %v585_v16, %v585_v16  ;;  %v1338_v20 = vpop.f32.mrb[13].mxu0  ;;  %845 = vst [vmem:[%s2037_s20 + $0x130] sm:$0xff] %v2067_v17  ;;  %v1402_v21 = vpop.f32.mrb[13].mxu1 }
 0x166   : > { %v588_v22 = vpop.f32.mrb[14].mxu0  ;;  %v2072_v23 = vpop.f32.mrb[14].mxu1 }
 0x167   : > { %v1000_v24 = vadd.f32 %v999_v15, %v940_v19  ;;  %814 = vst [vmem:[%s2037_s20 + $0x38] sm:$0xff] %v588_v22  ;;  %v874_v25 = vadd.f32 %v873_v18, %v588_v22  ;;  %v941_v26 = vmul.f32 %v588_v22, %v588_v22  ;;  %v1339_v27 = vpop.f32.mrb[15].mxu0  ;;  %846 = vst [vmem:[%s2037_s20 + $0x138] sm:$0xff] %v2072_v23  ;;  %v1403_v28 = vpop.f32.mrb[15].mxu1 }
 0x169   : > { %v1001_v29 = vadd.f32 %v1000_v24, %v941_v26 }
 0x16c   : > { %v593_v30 = vpop.f32.mrb[16].mxu0  ;;  %v2077_v31 = vpop.f32.mrb[16].mxu1 }
 0x16d   : > { %815 = vst [vmem:[%s2037_s20 + $0x40] sm:$0xff] %v593_v30  ;;  %v875_v32 = vadd.f32 %v874_v25, %v593_v30  ;;  %v942_v33 = vmul.f32 %v593_v30, %v593_v30  ;;  %v1342_v34 = vpop.f32.mrb[17].mxu0  ;;  %847 = vst [vmem:[%s2037_s20 + $0x140] sm:$0xff] %v2077_v31  ;;  %v1406_v35 = vpop.f32.mrb[17].mxu1 }
 0x16e   : > { %v596_v36 = vpop.f32.mrb[18].mxu0  ;;  %v2082_v37 = vpop.f32.mrb[18].mxu1 }
 0x16f   : > { %v1002_v38 = vadd.f32 %v1001_v29, %v942_v33  ;;  %816 = vst [vmem:[%s2037_s20 + $0x48] sm:$0xff] %v596_v36  ;;  %v876_v39 = vadd.f32 %v875_v32, %v596_v36  ;;  %v943_v40 = vmul.f32 %v596_v36, %v596_v36  ;;  %v1343_v42 = vpop.f32.mrb[19].mxu0  ;;  %848 = vst [vmem:[%s2037_s20 + $0x148] sm:$0xff] %v2082_v37  ;;  %v1407_v43 = vpop.f32.mrb[19].mxu1 }
 0x171   : > { %v1003_v44 = vadd.f32 %v1002_v38, %v943_v40 }
 0x174   : > { %v601_v46 = vpop.f32.mrb[20].mxu0  ;;  %v2087_v47 = vpop.f32.mrb[20].mxu1 }
 0x175   : > { %817 = vst [vmem:[%s2037_s20 + $0x50] sm:$0xff] %v601_v46  ;;  %v877_v48 = vadd.f32 %v876_v39, %v601_v46  ;;  %v944_v49 = vmul.f32 %v601_v46, %v601_v46  ;;  %v1346_v50 = vpop.f32.mrb[21].mxu0  ;;  %849 = vst [vmem:[%s2037_s20 + $0x150] sm:$0xff] %v2087_v47  ;;  %v1410_v51 = vpop.f32.mrb[21].mxu1 }
 0x176   : > { %v604_v52 = vpop.f32.mrb[22].mxu0  ;;  %v2092_v54 = vpop.f32.mrb[22].mxu1 }
 0x177   : > { %v1004_v55 = vadd.f32 %v1003_v44, %v944_v49  ;;  %818 = vst [vmem:[%s2037_s20 + $0x58] sm:$0xff] %v604_v52  ;;  %v878_v56 = vadd.f32 %v877_v48, %v604_v52  ;;  %v945_v57 = vmul.f32 %v604_v52, %v604_v52  ;;  %v1347_v58 = vpop.f32.mrb[23].mxu0  ;;  %850 = vst [vmem:[%s2037_s20 + $0x158] sm:$0xff] %v2092_v54  ;;  %v1411_v60 = vpop.f32.mrb[23].mxu1 }
 0x179   : > { %v1005_v61 = vadd.f32 %v1004_v55, %v945_v57 }
 0x17c   : > { %v609_v62 = vpop.f32.mrb[24].mxu0  ;;  %v2097_v63 = vpop.f32.mrb[24].mxu1 }
 0x17d   : > { %819 = vst [vmem:[%s2037_s20 + $0x60] sm:$0xff] %v609_v62  ;;  %v879_v0 = vadd.f32 %v878_v56, %v609_v62  ;;  %v946_v1 = vmul.f32 %v609_v62, %v609_v62  ;;  %v1350_v2 = vpop.f32.mrb[25].mxu0  ;;  %851 = vst [vmem:[%s2037_s20 + $0x160] sm:$0xff] %v2097_v63  ;;  %v1414_v4 = vpop.f32.mrb[25].mxu1 }
 0x17e   : > { %v612_v5 = vpop.f32.mrb[26].mxu0  ;;  %v2102_v6 = vpop.f32.mrb[26].mxu1 }
 0x17f   : > { %v1006_v7 = vadd.f32 %v1005_v61, %v946_v1  ;;  %820 = vst [vmem:[%s2037_s20 + $0x68] sm:$0xff] %v612_v5  ;;  %v880_v8 = vadd.f32 %v879_v0, %v612_v5  ;;  %v947_v10 = vmul.f32 %v612_v5, %v612_v5  ;;  %v1351_v11 = vpop.f32.mrb[27].mxu0  ;;  %852 = vst [vmem:[%s2037_s20 + $0x168] sm:$0xff] %v2102_v6  ;;  %v1415_v12 = vpop.f32.mrb[27].mxu1 }
 0x181   : > { %v1007_v13 = vadd.f32 %v1006_v7, %v947_v10 }
 0x184   : > { %v617_v14 = vpop.f32.mrb[28].mxu0  ;;  %v2107_v15 = vpop.f32.mrb[28].mxu1 }
 0x185   : > { %821 = vst [vmem:[%s2037_s20 + $0x70] sm:$0xff] %v617_v14  ;;  %v881_v16 = vadd.f32 %v880_v8, %v617_v14  ;;  %v948_v18 = vmul.f32 %v617_v14, %v617_v14  ;;  %v1354_v19 = vpop.f32.mrb[29].mxu0  ;;  %853 = vst [vmem:[%s2037_s20 + $0x170] sm:$0xff] %v2107_v15  ;;  %v1418_v20 = vpop.f32.mrb[29].mxu1 }
 0x186   : > { %v620_v21 = vpop.f32.mrb[30].mxu0  ;;  %v2112_v22 = vpop.f32.mrb[30].mxu1 }
 0x187   : > { %v1008_v24 = vadd.f32 %v1007_v13, %v948_v18  ;;  %822 = vst [vmem:[%s2037_s20 + $0x78] sm:$0xff] %v620_v21  ;;  %v882_v25 = vadd.f32 %v881_v16, %v620_v21  ;;  %v949_v26 = vmul.f32 %v620_v21, %v620_v21  ;;  %v1355_v27 = vpop.f32.mrb[31].mxu0  ;;  %854 = vst [vmem:[%s2037_s20 + $0x178] sm:$0xff] %v2112_v22  ;;  %v1419_v28 = vpop.f32.mrb[31].mxu1 }
 0x189   : > { %v1009_v29 = vadd.f32 %v1008_v24, %v949_v26 }
 0x18c   : > { %v625_v30 = vpop.f32.mrb[32].mxu0  ;;  %v2117_v32 = vpop.f32.mrb[32].mxu1 }
 0x18d   : > { %823 = vst [vmem:[%s2037_s20 + $0x80] sm:$0xff] %v625_v30  ;;  %v883_v33 = vadd.f32 %v882_v25, %v625_v30  ;;  %v950_v34 = vmul.f32 %v625_v30, %v625_v30  ;;  %v1358_v35 = vpop.f32.mrb[33].mxu0  ;;  %855 = vst [vmem:[%s2037_s20 + $0x180] sm:$0xff] %v2117_v32  ;;  %v1422_v36 = vpop.f32.mrb[33].mxu1 }
 0x18e   : > { %v628_v38 = vpop.f32.mrb[34].mxu0  ;;  %v2122_v39 = vpop.f32.mrb[34].mxu1 }
 0x18f   : > { %v1010_v40 = vadd.f32 %v1009_v29, %v950_v34  ;;  %824 = vst [vmem:[%s2037_s20 + $0x88] sm:$0xff] %v628_v38  ;;  %v884_v42 = vadd.f32 %v883_v33, %v628_v38  ;;  %v951_v43 = vmul.f32 %v628_v38, %v628_v38  ;;  %v1359_v44 = vpop.f32.mrb[35].mxu0  ;;  %856 = vst [vmem:[%s2037_s20 + $0x188] sm:$0xff] %v2122_v39  ;;  %v1423_v46 = vpop.f32.mrb[35].mxu1 }
 0x191   : > { %v1011_v48 = vadd.f32 %v1010_v40, %v951_v43 }
 0x194   : > { %v633_v49 = vpop.f32.mrb[36].mxu0  ;;  %v2127_v50 = vpop.f32.mrb[36].mxu1 }
 0x195   : > { %825 = vst [vmem:[%s2037_s20 + $0x90] sm:$0xff] %v633_v49  ;;  %v885_v51 = vadd.f32 %v884_v42, %v633_v49  ;;  %v952_v52 = vmul.f32 %v633_v49, %v633_v49  ;;  %v1362_v55 = vpop.f32.mrb[37].mxu0  ;;  %857 = vst [vmem:[%s2037_s20 + $0x190] sm:$0xff] %v2127_v50  ;;  %v1426_v56 = vpop.f32.mrb[37].mxu1 }
 0x196   : > { %v636_v57 = vpop.f32.mrb[38].mxu0  ;;  %v2132_v58 = vpop.f32.mrb[38].mxu1 }
 0x197   : > { %v1012_v60 = vadd.f32 %v1011_v48, %v952_v52  ;;  %826 = vst [vmem:[%s2037_s20 + $0x98] sm:$0xff] %v636_v57  ;;  %v886_v61 = vadd.f32 %v885_v51, %v636_v57  ;;  %v953_v62 = vmul.f32 %v636_v57, %v636_v57  ;;  %v1363_v0 = vpop.f32.mrb[39].mxu0  ;;  %858 = vst [vmem:[%s2037_s20 + $0x198] sm:$0xff] %v2132_v58  ;;  %v1427_v1 = vpop.f32.mrb[39].mxu1 }
 0x199   : > { %v1013_v2 = vadd.f32 %v1012_v60, %v953_v62 }
 0x19c   : > { %v641_v4 = vpop.f32.mrb[40].mxu0  ;;  %v2137_v5 = vpop.f32.mrb[40].mxu1 }
 0x19d   : > { %827 = vst [vmem:[%s2037_s20 + $0xa0] sm:$0xff] %v641_v4  ;;  %v887_v7 = vadd.f32 %v886_v61, %v641_v4  ;;  %v954_v8 = vmul.f32 %v641_v4, %v641_v4  ;;  %v1366_v10 = vpop.f32.mrb[41].mxu0  ;;  %859 = vst [vmem:[%s2037_s20 + $0x1a0] sm:$0xff] %v2137_v5  ;;  %v1430_v11 = vpop.f32.mrb[41].mxu1 }
 0x19e   : > { %v644_v12 = vpop.f32.mrb[42].mxu0  ;;  %v2142_v13 = vpop.f32.mrb[42].mxu1 }
 0x19f   : > { %v1014_v14 = vadd.f32 %v1013_v2, %v954_v8  ;;  %828 = vst [vmem:[%s2037_s20 + $0xa8] sm:$0xff] %v644_v12  ;;  %v888_v16 = vadd.f32 %v887_v7, %v644_v12  ;;  %v955_v18 = vmul.f32 %v644_v12, %v644_v12  ;;  %v1367_v19 = vpop.f32.mrb[43].mxu0  ;;  %860 = vst [vmem:[%s2037_s20 + $0x1a8] sm:$0xff] %v2142_v13  ;;  %v1431_v20 = vpop.f32.mrb[43].mxu1 }
 0x1a1   : > { %v1015_v21 = vadd.f32 %v1014_v14, %v955_v18 }
 0x1a4   : > { %v649_v24 = vpop.f32.mrb[44].mxu0  ;;  %v2147_v25 = vpop.f32.mrb[44].mxu1 }
 0x1a5   : > { %829 = vst [vmem:[%s2037_s20 + $0xb0] sm:$0xff] %v649_v24  ;;  %v889_v26 = vadd.f32 %v888_v16, %v649_v24  ;;  %v956_v27 = vmul.f32 %v649_v24, %v649_v24  ;;  %v1370_v28 = vpop.f32.mrb[45].mxu0  ;;  %861 = vst [vmem:[%s2037_s20 + $0x1b0] sm:$0xff] %v2147_v25  ;;  %v1434_v29 = vpop.f32.mrb[45].mxu1 }
 0x1a6   : > { %v652_v30 = vpop.f32.mrb[46].mxu0  ;;  %v2152_v33 = vpop.f32.mrb[46].mxu1 }
 0x1a7   : > { %v1016_v34 = vadd.f32 %v1015_v21, %v956_v27  ;;  %830 = vst [vmem:[%s2037_s20 + $0xb8] sm:$0xff] %v652_v30  ;;  %v890_v35 = vadd.f32 %v889_v26, %v652_v30  ;;  %v957_v36 = vmul.f32 %v652_v30, %v652_v30  ;;  %v1371_v38 = vpop.f32.mrb[47].mxu0  ;;  %862 = vst [vmem:[%s2037_s20 + $0x1b8] sm:$0xff] %v2152_v33  ;;  %v1435_v40 = vpop.f32.mrb[47].mxu1 }
 0x1a9   : > { %v1017_v42 = vadd.f32 %v1016_v34, %v957_v36 }
 0x1ac   : > { %v657_v43 = vpop.f32.mrb[48].mxu0  ;;  %v2157_v44 = vpop.f32.mrb[48].mxu1 }
 0x1ad   : > { %831 = vst [vmem:[%s2037_s20 + $0xc0] sm:$0xff] %v657_v43  ;;  %v891_v46 = vadd.f32 %v890_v35, %v657_v43  ;;  %v958_v48 = vmul.f32 %v657_v43, %v657_v43  ;;  %v1374_v49 = vpop.f32.mrb[49].mxu0  ;;  %863 = vst [vmem:[%s2037_s20 + $0x1c0] sm:$0xff] %v2157_v44  ;;  %v1438_v51 = vpop.f32.mrb[49].mxu1 }
 0x1ae   : > { %v660_v52 = vpop.f32.mrb[50].mxu0  ;;  %v2162_v55 = vpop.f32.mrb[50].mxu1 }
 0x1af   : > { %v1018_v56 = vadd.f32 %v1017_v42, %v958_v48  ;;  %832 = vst [vmem:[%s2037_s20 + $0xc8] sm:$0xff] %v660_v52  ;;  %v892_v57 = vadd.f32 %v891_v46, %v660_v52  ;;  %v959_v60 = vmul.f32 %v660_v52, %v660_v52  ;;  %v1375_v61 = vpop.f32.mrb[51].mxu0  ;;  %864 = vst [vmem:[%s2037_s20 + $0x1c8] sm:$0xff] %v2162_v55  ;;  %v1439_v62 = vpop.f32.mrb[51].mxu1 }
 0x1b1   : > { %v1019_v0 = vadd.f32 %v1018_v56, %v959_v60 }
 0x1b4   : > { %v665_v1 = vpop.f32.mrb[52].mxu0  ;;  %v2167_v2 = vpop.f32.mrb[52].mxu1 }
 0x1b5   : > { %833 = vst [vmem:[%s2037_s20 + $0xd0] sm:$0xff] %v665_v1  ;;  %v893_v4 = vadd.f32 %v892_v57, %v665_v1  ;;  %v960_v7 = vmul.f32 %v665_v1, %v665_v1  ;;  %v1378_v8 = vpop.f32.mrb[53].mxu0  ;;  %865 = vst [vmem:[%s2037_s20 + $0x1d0] sm:$0xff] %v2167_v2  ;;  %v1442_v10 = vpop.f32.mrb[53].mxu1 }
 0x1b6   : > { %v668_v11 = vpop.f32.mrb[54].mxu0  ;;  %v2172_v12 = vpop.f32.mrb[54].mxu1 }
 0x1b7   : > { %v1020_v14 = vadd.f32 %v1019_v0, %v960_v7  ;;  %834 = vst [vmem:[%s2037_s20 + $0xd8] sm:$0xff] %v668_v11  ;;  %v894_v16 = vadd.f32 %v893_v4, %v668_v11  ;;  %v961_v18 = vmul.f32 %v668_v11, %v668_v11  ;;  %v1379_v19 = vpop.f32.mrb[55].mxu0  ;;  %866 = vst [vmem:[%s2037_s20 + $0x1d8] sm:$0xff] %v2172_v12  ;;  %v1443_v20 = vpop.f32.mrb[55].mxu1 }
 0x1b9   : > { %v1021_v21 = vadd.f32 %v1020_v14, %v961_v18 }
 0x1bc   : > { %v673_v24 = vpop.f32.mrb[56].mxu0  ;;  %v2177_v26 = vpop.f32.mrb[56].mxu1 }
 0x1bd   : > { %835 = vst [vmem:[%s2037_s20 + $0xe0] sm:$0xff] %v673_v24  ;;  %v895_v27 = vadd.f32 %v894_v16, %v673_v24  ;;  %v962_v28 = vmul.f32 %v673_v24, %v673_v24  ;;  %v1382_v29 = vpop.f32.mrb[57].mxu0  ;;  %867 = vst [vmem:[%s2037_s20 + $0x1e0] sm:$0xff] %v2177_v26  ;;  %v1446_v30 = vpop.f32.mrb[57].mxu1 }
 0x1be   : > { %v676_v34 = vpop.f32.mrb[58].mxu0  ;;  %v804_v35 = vpop.f32.mrb[58].mxu1 }
 0x1bf   : > { %v1022_v36 = vadd.f32 %v1021_v21, %v962_v28  ;;  %836 = vst [vmem:[%s2037_s20 + $0xe8] sm:$0xff] %v676_v34  ;;  %v896_v38 = vadd.f32 %v895_v27, %v676_v34  ;;  %v963_v40 = vmul.f32 %v676_v34, %v676_v34  ;;  %v1383_v42 = vpop.f32.mrb[59].mxu0  ;;  %v1447_v43 = vpop.f32.mrb[59].mxu1 }
 0x1c1   : > { %v1023_v46 = vadd.f32 %v1022_v36, %v963_v40 }
 0x1c4   : > { %v681_v48 = vpop.f32.mrb[60].mxu0 }
 0x1c5   : > { %837 = vst [vmem:[%s2037_s20 + $0xf0] sm:$0xff] %v681_v48  ;;  %v897_v49 = vadd.f32 %v896_v38, %v681_v48  ;;  %v964_v51 = vmul.f32 %v681_v48, %v681_v48  ;;  %v1386_v52 = vpop.f32.mrb[61].mxu0 }
 0x1c6   : > { %v684_v56 = vpop.f32.mrb[62].mxu0 }
 0x1c7   : > { %v1024_v57 = vadd.f32 %v1023_v46, %v964_v51  ;;  %838 = vst [vmem:[%s2037_s20 + $0xf8] sm:$0xff] %v684_v56  ;;  %v898_v60 = vadd.f32 %v897_v49, %v684_v56  ;;  %v965_v61 = vmul.f32 %v684_v56, %v684_v56  ;;  %v1387_v62 = vpop.f32.mrb[63].mxu0 }
 0x1c8   : > { %1645 = shalt.err (!%p1642_p7)
}
 0x1c9   : > { %s1646_s26 = scalar_lea.hbm %s2188_s4, 7808  ;;  %s1650_s10 = scalar_lea.hbm %s2356_s2, 15616 }
 0x1ca   : > { %p1647_p9 = scmp.ne.s32.totalorder %s2188_s4, %s1646_s26  ;;  %p1651_p5 = scmp.lt.u32.totalorder %s2188_s4, %s2356_s2 }
 0x1cb   : > { %p1652_p13 = scmp.lt.u32.totalorder %s1650_s10, %s1646_s26  ;;  %p1654_p4 = scmp.lt.u32.totalorder %s1646_s26, %s2188_s4 }
 0x1cc   : > { %p1648_p1 = pnand %p1647_p9, %p1860_p12 }
 0x1cd   : > { %p1653_p2 = por %p1652_p13, %p1651_p5 }
 0x1ce   : > { %p1649_p0 = pneg %p1648_p1 }
 0x1cf   : > { %p1655_p6 = por %p1654_p4, %p1653_p2 }
 0x1d1   : > { %p1656_p8 = pnand %p1655_p6, %p1649_p0 }
 0x1d3   : > { %1659 = shalt.err (!%p1656_p8)
}
 0x1d4   : > { %s1743_s20 = smov 128   ;;  %s1744_s8 = smov 8   ;;  %v966_v0 = vmul.f32 %v2035_v41, %v2035_v41  ;;  %v899_v1 = vadd.f32 %v898_v60, %v2035_v41  ;;  %v1025_v4 = vadd.f32 %v1024_v57, %v965_v61  ;;  %v967_v7 = vmul.f32 %v2042_v45, %v2042_v45 }
 0x1d5   : > { %1473 = dma.vmem_to_hbm [thread:$0]  (%p1860_p12), %s2191_s9, 7808, %s2188_s4, %s1069_s5, %s1743_s20, %s1743_s20, %s1744_s8   ;;  %v968_v11 = vmul.f32 %v2047_v53, %v2047_v53  ;;  %v969_v18 = vmul.f32 %v2052_v59, %v2052_v59  ;;  %v970_v41 = vmul.f32 %v2057_v3, %v2057_v3  ;;  %v981_v62 = vmul.f32 %v2112_v22, %v2112_v22 }
 0x1d6   : > { %v900_v8 = vadd.f32 %v899_v1, %v2042_v45  ;;  %v1026_v10 = vadd.f32 %v1025_v4, %v966_v0  ;;  %v971_v45 = vmul.f32 %v2062_v9, %v2062_v9  ;;  %v982_v4 = vmul.f32 %v2117_v32, %v2117_v32  ;;  %s1222_s9 = sshll.u32 %s1911_s6, 3  ;;  %s1264_s29 = sshll.u32 %s1787_s16, 7 }
 0x1d7   : > { %s214_s25 = scalar_lea.vmem [#allocation8], %s1222_s9  ;;  %s2310_s22 = scalar_lea.hbm %s2357_s3, %s1264_s29 }
 0x1d8   : > { %v901_v14 = vadd.f32 %v900_v8, %v2047_v53  ;;  %v1027_v16 = vadd.f32 %v1026_v10, %v967_v7  ;;  %v972_v53 = vmul.f32 %v2067_v17, %v2067_v17  ;;  %v983_v8 = vmul.f32 %v2122_v39, %v2122_v39  ;;  %s1103_s4 = sshll.u32 %s214_s25, 4  ;;  %s1074_s23 = scalar_lea.sflag [#allocation9], %s1911_s6  ;;  %s2312_s4 = int_to_ptr.vmem [resolvable:$true] %s1103_s4 }
 0x1d9   : > { %s1660_s16 = scalar_lea.vmem %s2312_s4, 128  ;;  %s1745_s28 = smov [#allocation8]  }
 0x1da   : > { %v902_v19 = vadd.f32 %v901_v14, %v2052_v59  ;;  %v1028_v20 = vadd.f32 %v1027_v16, %v968_v11  ;;  %v973_v59 = vmul.f32 %v2072_v23, %v2072_v23  ;;  %v984_v11 = vmul.f32 %v2127_v50, %v2127_v50  ;;  %p1661_p10 = scmp.ne.s32.totalorder %s2312_s4, %s1660_s16  ;;  %s1664_s26 = sshll.u32 %s1745_s28, 4  ;;  %s1665_s26 = int_to_ptr.vmem [resolvable:$false] %s1664_s26 }
 0x1db   : > { %v985_v16 = vmul.f32 %v2132_v58, %v2132_v58  ;;  %s1666_s30 = scalar_lea.vmem %s1665_s26, 256  ;;  %p1667_p7 = scmp.lt.s32.totalorder %s2312_s4, %s1665_s26 }
 0x1dc   : > { %v903_v21 = vadd.f32 %v902_v19, %v2057_v3  ;;  %v1029_v24 = vadd.f32 %v1028_v20, %v969_v18  ;;  %v974_v3 = vmul.f32 %v2077_v31, %v2077_v31  ;;  %v986_v19 = vmul.f32 %v2137_v5, %v2137_v5  ;;  %p1662_p11 = pnand %p1661_p10, %p1860_p12  ;;  %p1668_p9 = scmp.lt.s32.totalorder %s1666_s30, %s1660_s16 }
 0x1de   : > { %v904_v27 = vadd.f32 %v903_v21, %v2062_v9  ;;  %v1030_v28 = vadd.f32 %v1029_v24, %v970_v41  ;;  %v975_v9 = vmul.f32 %v2082_v37, %v2082_v37  ;;  %v987_v41 = vmul.f32 %v2142_v13, %v2142_v13  ;;  %p1663_p3 = pneg %p1662_p11  ;;  %p1669_p1 = por %p1668_p9, %p1667_p7 }
 0x1df   : > { %v988_v24 = vmul.f32 %v2147_v25, %v2147_v25 }
 0x1e0   : > { %v905_v29 = vadd.f32 %v904_v27, %v2067_v17  ;;  %v1031_v30 = vadd.f32 %v1030_v28, %v971_v45  ;;  %v976_v17 = vmul.f32 %v2087_v47, %v2087_v47  ;;  %v989_v27 = vmul.f32 %v2152_v33, %v2152_v33  ;;  %p1670_p0 = pnand %p1669_p1, %p1663_p3 }
 0x1e2   : > { %v1032_v34 = vadd.f32 %v1031_v30, %v972_v53  ;;  %v906_v35 = vadd.f32 %v905_v29, %v2072_v23  ;;  %v977_v23 = vmul.f32 %v2092_v54, %v2092_v54  ;;  %v990_v53 = vmul.f32 %v2157_v44, %v2157_v44 }
 0x1e3   : > { %v991_v30 = vmul.f32 %v2162_v55, %v2162_v55 }
 0x1e4   : > { %v907_v36 = vadd.f32 %v906_v35, %v2077_v31  ;;  %v1033_v38 = vadd.f32 %v1032_v34, %v973_v59  ;;  %v978_v31 = vmul.f32 %v2097_v63, %v2097_v63  ;;  %v992_v34 = vmul.f32 %v2167_v2, %v2167_v2 }
 0x1e6   : > { %v908_v40 = vadd.f32 %v907_v36, %v2082_v37  ;;  %v1034_v42 = vadd.f32 %v1033_v38, %v974_v3  ;;  %v979_v37 = vmul.f32 %v2102_v6, %v2102_v6  ;;  %v993_v3 = vmul.f32 %v2172_v12, %v2172_v12 }
 0x1e8   : > { %v909_v43 = vadd.f32 %v908_v40, %v2087_v47  ;;  %v1035_v46 = vadd.f32 %v1034_v42, %v975_v9  ;;  %v980_v47 = vmul.f32 %v2107_v15, %v2107_v15 }
 0x1ea   : > { %v910_v48 = vadd.f32 %v909_v43, %v2092_v54  ;;  %v1036_v49 = vadd.f32 %v1035_v46, %v976_v17  ;;  %v1061_v17 = vlaneseq }
 0x1ec   : > { %v911_v51 = vadd.f32 %v910_v48, %v2097_v63  ;;  %v1037_v52 = vadd.f32 %v1036_v49, %v977_v23  ;;  %v1062_v48 = vshrl.u32 %v1061_v17, 7 }
 0x1ee   : > { %v912_v56 = vadd.f32 %v911_v51, %v2102_v6  ;;  %v1038_v57 = vadd.f32 %v1037_v52, %v978_v31  ;;  %vm1064_vm1 = vcmp.eq.s32.totalorder %v1062_v48, 1  ;;  %vm1063_vm2 = vcmp.eq.s32.totalorder %v1062_v48, 0 }
 0x1f0   : > { %v913_v60 = vadd.f32 %v912_v56, %v2107_v15  ;;  %v1039_v61 = vadd.f32 %v1038_v57, %v979_v37 }
 0x1f2   : > { %v914_v54 = vadd.f32 %v913_v60, %v2112_v22  ;;  %v1040_v0 = vadd.f32 %v1039_v61, %v980_v47 }
 0x1f4   : > { %v1041_v63 = vadd.f32 %v1040_v0, %v981_v62  ;;  %v915_v1 = vadd.f32 %v914_v54, %v2117_v32 }
 0x1f6   : > { %v1042_v6 = vadd.f32 %v1041_v63, %v982_v4  ;;  %v916_v7 = vadd.f32 %v915_v1, %v2122_v39 }
 0x1f8   : > { %v1043_v15 = vadd.f32 %v1042_v6, %v983_v8  ;;  %v917_v10 = vadd.f32 %v916_v7, %v2127_v50 }
 0x1fa   : > { %v1044_v22 = vadd.f32 %v1043_v15, %v984_v11  ;;  %v918_v14 = vadd.f32 %v917_v10, %v2132_v58 }
 0x1fc   : > { %v1045_v18 = vadd.f32 %v1044_v22, %v985_v16  ;;  %v919_v32 = vadd.f32 %v918_v14, %v2137_v5 }
 0x1fe   : > { %v1046_v20 = vadd.f32 %v1045_v18, %v986_v19  ;;  %v920_v39 = vadd.f32 %v919_v32, %v2142_v13 }
 0x200   : > { %v1047_v21 = vadd.f32 %v1046_v20, %v987_v41  ;;  %v921_v50 = vadd.f32 %v920_v39, %v2147_v25 }
 0x202   : > { %v1048_v45 = vadd.f32 %v1047_v21, %v988_v24  ;;  %v922_v58 = vadd.f32 %v921_v50, %v2152_v33 }
 0x204   : > { %v1049_v28 = vadd.f32 %v1048_v45, %v989_v27  ;;  %v923_v5 = vadd.f32 %v922_v58, %v2157_v44  ;;  %v994_v44 = vmul.f32 %v2177_v26, %v2177_v26 }
 0x206   : > { %v1050_v29 = vadd.f32 %v1049_v28, %v990_v53  ;;  %v924_v13 = vadd.f32 %v923_v5, %v2162_v55 }
 0x208   : > { %v1051_v59 = vadd.f32 %v1050_v29, %v991_v30  ;;  %v925_v25 = vadd.f32 %v924_v13, %v2167_v2 }
 0x20a   : > { %v1052_v33 = vadd.f32 %v1051_v59, %v992_v34  ;;  %v926_v35 = vadd.f32 %v925_v25, %v2172_v12 }
 0x20c   : > { %v1053_v36 = vadd.f32 %v1052_v33, %v993_v3  ;;  %v927_v38 = vadd.f32 %v926_v35, %v2177_v26 }
 0x20e   : > { %v928_v55 = vrot.slane %v927_v38, 4  ;;  %v1054_v9 = vadd.f32 %v1053_v36, %v994_v44 }
 0x210   : > { %v929_v40 = vadd.f32 %v928_v55, %v927_v38  ;;  %v1055_v42 = vrot.slane %v1054_v9, 4 }
 0x212   : > { %v930_v43 = vrot.slane %v929_v40, 2  ;;  %v1056_v2 = vadd.f32 %v1055_v42, %v1054_v9 }
 0x214   : > { %v931_v46 = vadd.f32 %v930_v43, %v929_v40  ;;  %v1057_v23 = vrot.slane %v1056_v2, 2 }
 0x216   : > { %v1058_v12 = vadd.f32 %v1057_v23, %v1056_v2  ;;  %v932_v49 = vrot.slane %v931_v46, 1 }
 0x218   : > { %v1059_v31 = vrot.slane %v1058_v12, 1  ;;  %v933_v51 = vadd.f32 %v932_v49, %v931_v46 }
 0x21a   : > { %v1060_v26 = vadd.f32 %v1059_v31, %v1058_v12 }
 0x21c   : > { %v1065_v52 = vsel %vm1064_vm1, %v1060_v26, 0.0 }
 0x21d   : > { %v1066_v37 = vsel %vm1063_vm2, %v933_v51, %v1065_v52 }
 0x21e   : > { %1067 = vst [vmem:[%s214_s25] sm:$0xff] %v1066_v37 }
 0x21f   : > { %1673 = shalt.err (!%p1670_p0)
}
 0x220   : > { %s1674_s6 = scalar_lea.hbm %s2310_s22, 128  ;;  %s1678_s11 = scalar_lea.hbm %s2357_s3, 256 }
 0x221   : > { %p1675_p5 = scmp.ne.s32.totalorder %s2310_s22, %s1674_s6  ;;  %p1679_p4 = scmp.lt.u32.totalorder %s2310_s22, %s2357_s3 }
 0x222   : > { %p1680_p6 = scmp.lt.u32.totalorder %s1678_s11, %s1674_s6  ;;  %p1682_p10 = scmp.lt.u32.totalorder %s1674_s6, %s2310_s22 }
 0x223   : > { %p1676_p13 = pnand %p1675_p5, %p1860_p12 }
 0x224   : > { %p1681_p8 = por %p1680_p6, %p1679_p4 }
 0x225   : > { %p1677_p2 = pneg %p1676_p13 }
 0x226   : > { %p1683_p11 = por %p1682_p10, %p1681_p8 }
 0x228   : > { %p1684_p3 = pnand %p1683_p11, %p1677_p2 }
 0x22a   : > { %1687 = shalt.err (!%p1684_p3)
}
 0x22b   : > { %1474 = dma.vmem_to_hbm [thread:$0]  (%p1860_p12), %s2312_s4, 128, %s2310_s22, %s1074_s23  }
 0x22c PF: > { %s1115_s8 = sand.u32 1, %s1722_s12   ;;  %p2372_p7 = scmp.ne.s32.totalorder %s2362_s19, 0 }
 0x22d   : > { %p2373_p9 = scmp.ge.s32.totalorder %s1734_s15, 2  ;;  %s1116_s9 = scalar_lea.sflag [#allocation4], %s1115_s8 }
 0x22f   : > { %p1486_p1 = pnand %p2373_p9, %p2372_p7 }
 0x231   : > { %1713 = dma.done.wait (!%p1486_p1), %s1116_s9, 7808  }
 0x232   : > { %1715 = vsyncadd (!%p1486_p1), %s1116_s9, 4294959488  ;;  %s1125_s29 = scalar_lea.sflag [#allocation9], %s1115_s8 }
 0x233   : > { %1717 = dma.done.wait (!%p1486_p1), %s1125_s29, 128  }
 0x234   : > { %1719 = vsyncadd (!%p1486_p1), %s1125_s29, 4294967168  ;;  %p21_p12 = scmp.ge.s32.totalorder %s1822_s24, 4   ;;  %s2374_s12 = smov %s1726_s13 }
 0x235   : > { %s2375_s13 = smov %s1730_s14  ;;  %s2376_s14 = smov %s1856_s17 }
 0x236   : > { %s2377_s15 = smov %s1822_s24  ;;  %23 = sbr.rel (!%p21_p12) target bundleno = 8 (0x8), region = 94 }
 0x23d   :  { %1130 = vsyncpa [#allocation3], 1 }
 0x23e   :  { %1132 = vsyncpa [#allocation3 + $0x1], 1 }
 0x23f   :  { %1133 = vsyncpa [#allocation6], 1 }
 0x240   :  { %1134 = vsyncpa [#allocation4], 1 }
 0x241   :  { %1136 = vsyncpa [#allocation4 + $0x1], 1 }
 0x242   :  { %1137 = vsyncpa [#allocation9], 1 }
 0x243   :  { %1139 = vsyncpa [#allocation9 + $0x1], 1 }

// kernel: discriminator_forward.16
= control target key start
LH: loop header
LB: loop body
LE: loop exit
PB: predicated region body
PF: predicated region fallthrough
CT: control target
= control target key end

     0   :  { %8 = vsyncpa [#allocation3], 0  ;;  %s1079_s0 = inlined_call_operand.hbm [shape: f32[208,128], index: 0, kind: input, shape index: {}]   ;;  %s1080_s1 = inlined_call_operand.hbm [shape: f32[1,128], index: 1, kind: input, shape index: {}]   ;;  %s1081_s2 = inlined_call_operand.hbm [shape: f32[1,128], index: 2, kind: input, shape index: {}]   ;;  %s1082_s3 = inlined_call_operand.hbm [shape: bf16[208,128], index: 3, kind: output, shape index: {}]  }
   0x1   :  { %10 = vsyncpa [#allocation3 + $0x1], 0 }
   0x2   :  { %11 = vsyncpa [#allocation6], 0 }
   0x3   :  { %12 = vsyncpa [#allocation4], 0 }
   0x4   :  { %14 = vsyncpa [#allocation4 + $0x1], 0  ;;  %s804_s12 = smov 0   ;;  %s806_s13 = smov 0  }
   0x5   :  { %s808_s14 = smov 0   ;;  %s810_s15 = smov 0  }
   0x6 LB: > { %s825_s16 = sadd.s32 4294967295, %s774_s15   ;;  %s467_s17 = sadd.s32 4294967294, %s774_s15   ;;  %s774_s15 = sphi %s810_s15, %s1107_s15   ;;  %s770_s14 = sphi %s808_s14, %s1106_s14   ;;  %s766_s13 = sphi %s806_s13, %s1105_s13   ;;  %s762_s12 = sphi %s804_s12, %s1104_s12  }
   0x7   : > { %s829_s18 = sadd.s32 1, %s774_s15   ;;  %s27_s19 = sadd.s32 1, %s770_s14 }
   0x8   : > { %s24_s20 = ssub.s32 %s774_s15, %s829_s18  ;;  %p34_p0 = scmp.ne.s32.totalorder %s770_s14, %s766_s13 }
   0x9   : > { %p25_p1 = scmp.eq.s32.totalorder %s24_s20, 0  ;;  %p35_p2 = scmp.eq.s32.totalorder %s774_s15, 0 }
   0xa   : > { %p40_p3 = scmp.ne.s32.totalorder %s766_s13, %s762_s12  ;;  %p1083_p4 = scmp.eq.s32.totalorder %s825_s16, 0 }
   0xb   : > { %s841_s21 = scalar_select %p25_p1, %s770_s14, %s27_s19  }
   0xc   : > { %p843_p5 = por %p35_p2, %p34_p0  ;;  %p849_p6 = por %p1083_p4, %p40_p3 }
   0xd   : > { %p106_p7 = scmp.eq.s32.totalorder %s825_s16, 1  ;;  %p112_p8 = scmp.eq.s32.totalorder %s467_s17, 1 }
   0xe   : > { %s1089_s23 = scalar_select %p849_p6, 1, 0 }
   0xf   : > { %p468_p9 = scmp.ge.s32.totalorder %s774_s15, 1  ;;  %p119_p10 = scmp.lt.s32.totalorder %s774_s15, 3 }
  0x10   : > { %p856_p11 = por %p106_p7, %p34_p0  ;;  %p860_p12 = por %p112_p8, %p40_p3 }
  0x11   : > { %p864_p13 = pnand %p468_p9, %p119_p10  ;;  %s776_s27 = smov [#allocation5]  }
  0x12   : > { %s1090_s24 = scalar_select %p856_p11, 1, 0 }
  0x13   : > { %s1091_s25 = scalar_select %p860_p12, 1, 0 }
  0x14   : > { %s1092_s26 = scalar_select %p864_p13, 1, 0 }
  0x15   : > { %p559_p2 = pneg %p864_p13  ;;  %s132_s28 = sshll.u32 %s776_s27, 4  ;;  %s133_s28 = int_to_ptr.vmem [resolvable:$true] %s132_s28 }
  0x16   : > { %p576_p4 = scmp.lt.s32.totalorder %s774_s15, 2  ;;  %p1093_p0 = scmp.eq.s32.totalorder %s825_s16, 0 }
  0x17   : > { %s777_s4 = smov [#allocation7]   ;;  %s618_s8 = scalar_lea.hbm %s1080_s1, 16 }
  0x18   : > { %p874_p7 = pnand %p559_p2, %p1093_p0  ;;  %p880_p3 = pnand %p576_p4, %p843_p5 }
  0x19   : > { %s143_s5 = sshll.u32 %s777_s4, 4  ;;  %p619_p8 = scmp.ne.s32.totalorder %s1080_s1, %s618_s8  ;;  %s884_s5 = int_to_ptr.vmem [resolvable:$true] %s143_s5 }
  0x1a   : > { %s1095_s30 = scalar_select %p880_p3, 1, 0 }
  0x1b   : > { %p620_p9 = pneg %p874_p7  ;;  %p625_p10 = scmp.lt.u32.totalorder %s618_s8, %s1080_s1 }
  0x1d   : > { %p621_p4 = pnand %p620_p9, %p619_p8 }
  0x1f   : > { %p622_p5 = pneg %p621_p4 }
  0x21   : > { %p627_p2 = pnand %p625_p10, %p622_p5 }
  0x23   : > { %630 = shalt.err (!%p627_p2)
}
  0x24   : > { %s631_s19 = scalar_lea.vmem %s133_s28, 16  ;;  %s638_s20 = scalar_lea.vmem %s133_s28, 32 }
  0x25   : > { %p632_p0 = scmp.ne.s32.totalorder %s133_s28, %s631_s19  ;;  %p639_p11 = scmp.lt.s32.totalorder %s133_s28, %s133_s28 }
  0x26   : > { %p640_p6 = scmp.lt.s32.totalorder %s638_s20, %s631_s19 }
  0x27   : > { %p634_p1 = pnand %p632_p0, %p620_p9 }
  0x28   : > { %p641_p13 = por %p640_p6, %p639_p11 }
  0x29   : > { %p635_p12 = pneg %p634_p1 }
  0x2b   : > { %p642_p3 = pnand %p641_p13, %p635_p12 }
  0x2d   : > { %645 = shalt.err (!%p642_p3)
}
  0x2e   : > { %562 = dma.hbm_to_vmem [thread:$0]  (!%p874_p7), %s1080_s1, 16, %s133_s28, [#allocation6]  }
  0x2f   : > { %s154_s4 = sand.u32 1, %s770_s14   ;;  %s646_s8 = scalar_lea.hbm %s1081_s2, 16 }
  0x30   : > { %p647_p1 = scmp.ne.s32.totalorder %s1081_s2, %s646_s8  ;;  %p653_p12 = scmp.lt.u32.totalorder %s646_s8, %s1081_s2 }
  0x32   : > { %p649_p6 = pnand %p647_p1, %p620_p9 }
  0x34   : > { %p650_p11 = pneg %p649_p6 }
  0x36   : > { %p655_p13 = pnand %p653_p12, %p650_p11 }
  0x38   : > { %658 = shalt.err (!%p655_p13)
}
  0x39   : > { %s659_s28 = scalar_lea.vmem %s884_s5, 16  ;;  %s666_s19 = scalar_lea.vmem %s884_s5, 32 }
  0x3a   : > { %p660_p3 = scmp.ne.s32.totalorder %s884_s5, %s659_s28  ;;  %p667_p5 = scmp.lt.s32.totalorder %s884_s5, %s884_s5 }
  0x3b   : > { %p668_p10 = scmp.lt.s32.totalorder %s666_s19, %s659_s28 }
  0x3c   : > { %p662_p8 = pnand %p660_p3, %p620_p9 }
  0x3d   : > { %p669_p2 = por %p668_p10, %p667_p5 }
  0x3e   : > { %p663_p4 = pneg %p662_p8 }
  0x40   : > { %p670_p0 = pnand %p669_p2, %p663_p4 }
  0x42   : > { %673 = shalt.err (!%p670_p0)
}
  0x43   : > { %565 = dma.hbm_to_vmem [thread:$0]  (!%p874_p7), %s1081_s2, 16, %s884_s5, [#allocation6]  }
  0x44   : > { %s544_s27 = smul.u32 104, %s154_s4  ;;  %s943_s11 = scalar_lea.sflag [#allocation3], %s154_s4 }
  0x45   : > { %s494_s6 = smul.u32 1664, %s774_s15  ;;  %p1096_p7 = scmp.ne.s32.totalorder %s1095_s30, 0 }
  0x46   : > { %s158_s29 = scalar_lea.vmem [#allocation2], %s544_s27  ;;  %s679_s19 = scalar_lea.hbm %s1079_s0, 3328 }
  0x47   : > { %s939_s9 = scalar_lea.hbm %s1079_s0, %s494_s6  ;;  %s165_s10 = sshll.u32 %s158_s29, 4  ;;  %s941_s10 = int_to_ptr.vmem [resolvable:$true] %s165_s10 }
  0x48   : > { %s674_s17 = scalar_lea.hbm %s939_s9, 1664  ;;  %p676_p1 = pneg %p1096_p7 }
  0x49   : > { %p675_p9 = scmp.ne.s32.totalorder %s939_s9, %s674_s17  ;;  %p680_p12 = scmp.lt.u32.totalorder %s939_s9, %s1079_s0 }
  0x4a   : > { %p681_p13 = scmp.lt.u32.totalorder %s679_s19, %s674_s17  ;;  %p683_p8 = scmp.lt.u32.totalorder %s674_s17, %s939_s9 }
  0x4b   : > { %p677_p6 = pnand %p676_p1, %p675_p9 }
  0x4c   : > { %p682_p3 = por %p681_p13, %p680_p12 }
  0x4d   : > { %p678_p11 = pneg %p677_p6 }
  0x4e   : > { %p684_p4 = por %p683_p8, %p682_p3 }
  0x50   : > { %p685_p5 = pnand %p684_p4, %p678_p11 }
  0x52   : > { %688 = shalt.err (!%p685_p5)
}
  0x53   : > { %s689_s4 = scalar_lea.vmem %s941_s10, 1664  ;;  %s778_s27 = smov [#allocation2]  }
  0x54   : > { %p690_p10 = scmp.ne.s32.totalorder %s941_s10, %s689_s4  ;;  %s694_s6 = sshll.u32 %s778_s27, 4  ;;  %s695_s6 = int_to_ptr.vmem [resolvable:$false] %s694_s6 }
  0x55   : > { %s696_s7 = scalar_lea.vmem %s695_s6, 3328  ;;  %p697_p9 = scmp.lt.s32.totalorder %s941_s10, %s695_s6 }
  0x56   : > { %p692_p2 = pnand %p690_p10, %p676_p1  ;;  %p698_p6 = scmp.lt.s32.totalorder %s696_s7, %s689_s4 }
  0x58   : > { %p693_p0 = pneg %p692_p2  ;;  %p699_p12 = por %p698_p6, %p697_p9 }
  0x5a   : > { %p700_p13 = pnand %p699_p12, %p693_p0 }
  0x5c   : > { %703 = shalt.err (!%p700_p13)
}
  0x5d   : > { %s779_s8 = smov 128   ;;  %s780_s29 = smov 8  }
  0x5e   : > { %569 = dma.hbm_to_vmem [thread:$0]  (!%p1096_p7), %s939_s9, 1664, %s941_s10, %s943_s11, %s779_s8, %s779_s8, %s780_s29  }
  0x5f   : > { %p1097_p1 = scmp.ne.s32.totalorder %s1092_s26, 0 }
  0x60   : > { %s974_s17 = sand.u32 (!%p1097_p1), 1, %s766_s13   ;;  %p1098_p11 = scmp.ne.s32.totalorder (!%p1097_p1), %s1089_s23, 0 }
  0x61   : > { %177 = sbr.rel (%p1097_p1) target bundleno = 145 (0x91), region = 32  ;;  %s180_s28 = scalar_lea.sflag (!%p1097_p1), [#allocation3], %s974_s17 }
  0x62   : > { %s545_s5 = smul.u32 (!%p1097_p1), 104, %s974_s17 }
  0x64   : > { %s978_s19 = scalar_lea.vmem (!%p1097_p1), [#allocation2], %s545_s5 }
  0x68   : > { %749 = dma.done.wait (%p1098_p11), %s180_s28, 1664  }
  0x69   : > { %751 = vsyncadd (%p1098_p11), %s180_s28, 4294965632  ;;  %p1099_p7 = scmp.eq.s32.totalorder %s825_s16, 0 }
  0x6b   : > { %753 = dma.done.wait (%p1099_p7), [#allocation6], 32   ;;  %p1100_p3 = pmov %p1099_p7 }
  0x6c   : > { %v216_v0 = vld [vmem:[%s978_s19] sm:$0xff]  ;;  %v217_v1 = vld [vmem:[%s978_s19 + $0x8] sm:$0xff]  ;;  %v218_v6 = vld [vmem:[%s978_s19 + $0x10] sm:$0xff]  ;;  %s546_s23 = smul.u32 52, %s974_s17  ;;  %p1101_p4 = scmp.ne.s32.totalorder %s1090_s24, 0 }
  0x6d   : > { %755 = vsyncadd (%p1100_p3), [#allocation6], 4294967264  ;;  %v476_v2 = vld [vmem:[#allocation5] ss:$0 sm:$0xff]  ;;  %v990_v5 = vld [vmem:[#allocation7] ss:$0 sm:$0xff] }
  0x6e   : > { %v236_v3 = vmul.f32 %v476_v2, %v216_v0  ;;  %v237_v4 = vmul.f32 %v476_v2, %v217_v1  ;;  %v219_v7 = vld [vmem:[%s978_s19 + $0x18] sm:$0xff]  ;;  %v238_v8 = vmul.f32 %v476_v2, %v218_v6  ;;  %v220_v10 = vld [vmem:[%s978_s19 + $0x20] sm:$0xff]  ;;  %v221_v11 = vld [vmem:[%s978_s19 + $0x28] sm:$0xff]  ;;  %s1014_s26 = scalar_lea.vmem [#allocation8], %s546_s23  ;;  %s508_s30 = smul.u32 832, %s825_s16 }
  0x6f   : > { %v239_v9 = vmul.f32 %v476_v2, %v219_v7  ;;  %v222_v12 = vld [vmem:[%s978_s19 + $0x30] sm:$0xff]  ;;  %v240_v15 = vmul.f32 %v476_v2, %v220_v10  ;;  %v241_v16 = vmul.f32 %v476_v2, %v221_v11  ;;  %v223_v17 = vld [vmem:[%s978_s19 + $0x38] sm:$0xff]  ;;  %v224_v30 = vld [vmem:[%s978_s19 + $0x40] sm:$0xff]  ;;  %s375_s9 = sshll.u32 %s1014_s26, 4  ;;  %s362_s16 = scalar_lea.sflag [#allocation4], %s974_s17  ;;  %s1027_s9 = int_to_ptr.vmem [resolvable:$true] %s375_s9 }
  0x70   : > { %v256_v13 = vadd.f32 %v990_v5, %v236_v3  ;;  %v257_v14 = vadd.f32 %v990_v5, %v237_v4  ;;  %v258_v18 = vadd.f32 %v990_v5, %v238_v8  ;;  %v242_v20 = vmul.f32 %v476_v2, %v222_v12  ;;  %v225_v35 = vld [vmem:[%s978_s19 + $0x48] sm:$0xff]  ;;  %v226_v40 = vld [vmem:[%s978_s19 + $0x50] sm:$0xff]  ;;  %v227_v41 = vld [vmem:[%s978_s19 + $0x58] sm:$0xff]  ;;  %s1033_s20 = scalar_lea.hbm %s1082_s3, %s508_s30  ;;  %s704_s22 = scalar_lea.vmem %s1027_s9, 832 }
  0x71   : > { %v259_v19 = vadd.f32 %v990_v5, %v239_v9  ;;  %v243_v21 = vmul.f32 %v476_v2, %v223_v17  ;;  %v260_v24 = vadd.f32 %v990_v5, %v240_v15  ;;  %v261_v25 = vadd.f32 %v990_v5, %v241_v16  ;;  %v228_v46 = vld [vmem:[%s978_s19 + $0x60] sm:$0xff]  ;;  %p705_p8 = scmp.ne.s32.totalorder %s1027_s9, %s704_s22  ;;  %s781_s4 = smov [#allocation8]  }
  0x72   : > { %v269_v22 = vmul.f32 0.2, %v256_v13  ;;  %v270_v23 = vmul.f32 0.2, %v257_v14  ;;  %v271_v26 = vmul.f32 0.2, %v258_v18  ;;  %v262_v28 = vadd.f32 %v990_v5, %v242_v20 }
  0x73   : > { %v272_v27 = vmul.f32 0.2, %v259_v19  ;;  %v263_v29 = vadd.f32 %v990_v5, %v243_v21  ;;  %v273_v33 = vmul.f32 0.2, %v260_v24  ;;  %v274_v34 = vmul.f32 0.2, %v261_v25  ;;  %p706_p5 = pnand %p705_p8, %p1101_p4 }
  0x74   : > { %v282_v31 = vmax.f32 %v256_v13, %v269_v22  ;;  %v283_v32 = vmax.f32 %v257_v14, %v270_v23  ;;  %v284_v36 = vmax.f32 %v258_v18, %v271_v26  ;;  %v275_v38 = vmul.f32 0.2, %v262_v28  ;;  %s708_s27 = sshll.u32 %s781_s4, 4  ;;  %s709_s27 = int_to_ptr.vmem [resolvable:$false] %s708_s27 }
  0x75   : > { %v285_v37 = vmax.f32 %v259_v19, %v272_v27  ;;  %v276_v39 = vmul.f32 0.2, %v263_v29  ;;  %v286_v43 = vmax.f32 %v260_v24, %v273_v33  ;;  %v287_v44 = vmax.f32 %v261_v25, %v274_v34  ;;  %p707_p10 = pneg %p706_p5  ;;  %s710_s6 = scalar_lea.vmem %s709_s27, 1664 }
  0x76   : > { %v512_v42 = vpack.c.bf16 %v283_v32, %v282_v31  ;;  %v244_v45 = vmul.f32 %v476_v2, %v224_v30  ;;  %v288_v48 = vmax.f32 %v262_v28, %v275_v38  ;;  %v245_v50 = vmul.f32 %v476_v2, %v225_v35  ;;  %p711_p2 = scmp.lt.s32.totalorder %s1027_s9, %s709_s27  ;;  %p712_p0 = scmp.lt.s32.totalorder %s710_s6, %s704_s22 }
  0x77   : > { %v517_v47 = vpack.c.bf16 %v285_v37, %v284_v36  ;;  %v289_v49 = vmax.f32 %v263_v29, %v276_v39  ;;  %v522_v51 = vpack.c.bf16 %v287_v44, %v286_v43  ;;  %v246_v53 = vmul.f32 %v476_v2, %v226_v40 }
  0x78   : > { %513 = vst [vmem:[%s1014_s26] sm:$0xff] %v512_v42   ;;  %v264_v52 = vadd.f32 %v990_v5, %v244_v45  ;;  %v247_v54 = vmul.f32 %v476_v2, %v227_v41  ;;  %v265_v56 = vadd.f32 %v990_v5, %v245_v50  ;;  %v248_v57 = vmul.f32 %v476_v2, %v228_v46  ;;  %p713_p9 = por %p712_p0, %p711_p2 }
  0x79   : > { %539 = vst [vmem:[%s1014_s26 + $0x8] sm:$0xff] %v517_v47   ;;  %v527_v55 = vpack.c.bf16 %v289_v49, %v288_v48  ;;  %540 = vst [vmem:[%s1014_s26 + $0x10] sm:$0xff] %v522_v51   ;;  %v266_v59 = vadd.f32 %v990_v5, %v246_v53 }
  0x7a   : > { %v277_v58 = vmul.f32 0.2, %v264_v52  ;;  %v267_v60 = vadd.f32 %v990_v5, %v247_v54  ;;  %v278_v61 = vmul.f32 0.2, %v265_v56  ;;  %v268_v62 = vadd.f32 %v990_v5, %v248_v57  ;;  %p714_p6 = pnand %p713_p9, %p707_p10 }
  0x7b   : > { %541 = vst [vmem:[%s1014_s26 + $0x18] sm:$0xff] %v527_v55   ;;  %v279_v0 = vmul.f32 0.2, %v266_v59 }
  0x7c   : > { %v290_v63 = vmax.f32 %v264_v52, %v277_v58  ;;  %v280_v1 = vmul.f32 0.2, %v267_v60  ;;  %v291_v3 = vmax.f32 %v265_v56, %v278_v61  ;;  %v281_v4 = vmul.f32 0.2, %v268_v62 }
  0x7d   : > { %v292_v2 = vmax.f32 %v266_v59, %v279_v0 }
  0x7e   : > { %v293_v6 = vmax.f32 %v267_v60, %v280_v1  ;;  %v532_v7 = vpack.c.bf16 %v291_v3, %v290_v63  ;;  %v294_v8 = vmax.f32 %v268_v62, %v281_v4 }
  0x80   : > { %v537_v9 = vpack.c.bf16 %v293_v6, %v292_v2  ;;  %542 = vst [vmem:[%s1014_s26 + $0x20] sm:$0xff] %v532_v7   ;;  %v507_v5 = vpack.c.bf16 %v294_v8, %v294_v8 }
  0x82   : > { %543 = vst [vmem:[%s1014_s26 + $0x28] sm:$0xff] %v537_v9   ;;  %360 = vst [vmem:[%s1014_s26 + $0x30] sm:$0xf] %v507_v5 }
  0x83   : > { %717 = shalt.err (!%p714_p6)
}
  0x84   : > { %s718_s7 = scalar_lea.hbm %s1033_s20, 832  ;;  %s722_s5 = scalar_lea.hbm %s1082_s3, 1664 }
  0x85   : > { %p719_p12 = scmp.ne.s32.totalorder %s1033_s20, %s718_s7  ;;  %p723_p11 = scmp.lt.u32.totalorder %s1033_s20, %s1082_s3 }
  0x86   : > { %p724_p7 = scmp.lt.u32.totalorder %s722_s5, %s718_s7  ;;  %p726_p8 = scmp.lt.u32.totalorder %s718_s7, %s1033_s20 }
  0x87   : > { %p720_p13 = pnand %p719_p12, %p1101_p4 }
  0x88   : > { %p725_p3 = por %p724_p7, %p723_p11 }
  0x89   : > { %p721_p1 = pneg %p720_p13 }
  0x8a   : > { %p727_p5 = por %p726_p8, %p725_p3 }
  0x8c   : > { %p728_p10 = pnand %p727_p5, %p721_p1 }
  0x8e   : > { %731 = shalt.err (!%p728_p10)
}
  0x8f   : > { %s782_s23 = smov 64   ;;  %s783_s26 = smov 4  }
  0x90   : > { %557 = dma.vmem_to_hbm [thread:$0]  (%p1101_p4), %s1027_s9, 832, %s1033_s20, %s362_s16, %s782_s23, %s782_s23, %s783_s26  }
  0x91 PF: > { %s390_s30 = sand.u32 1, %s762_s12   ;;  %p1102_p2 = scmp.ne.s32.totalorder %s1091_s25, 0 }
  0x92   : > { %p1103_p0 = scmp.ge.s32.totalorder %s774_s15, 2  ;;  %s391_s10 = scalar_lea.sflag [#allocation4], %s390_s30 }
  0x94   : > { %p571_p9 = pnand %p1103_p0, %p1102_p2 }
  0x96   : > { %757 = dma.done.wait (!%p571_p9), %s391_s10, 832  }
  0x97   : > { %759 = vsyncadd (!%p571_p9), %s391_s10, 4294966464  ;;  %p17_p6 = scmp.ge.s32.totalorder %s829_s18, 4   ;;  %s1104_s12 = smov %s766_s13 }
  0x98   : > { %s1105_s13 = smov %s770_s14  ;;  %s1106_s14 = smov %s841_s21 }
  0x99   : > { %s1107_s15 = smov %s829_s18  ;;  %19 = sbr.rel (!%p17_p6) target bundleno = 6 (0x6), region = 85 }
  0xa0   :  { %396 = vsyncpa [#allocation3], 1 }
  0xa1   :  { %398 = vsyncpa [#allocation3 + $0x1], 1 }
  0xa2   :  { %399 = vsyncpa [#allocation6], 1 }
  0xa3   :  { %400 = vsyncpa [#allocation4], 1 }
  0xa4   :  { %402 = vsyncpa [#allocation4 + $0x1], 1 }

// kernel: discriminator_forward.15
= control target key start
LH: loop header
LB: loop body
LE: loop exit
PB: predicated region body
PF: predicated region fallthrough
CT: control target
= control target key end

     0   :  { %9 = vsyncpa [#allocation3], 0  ;;  %s1323_s0 = inlined_call_operand.hbm [shape: bf16[208,128], index: 0, kind: input, shape index: {}]   ;;  %s1324_s1 = inlined_call_operand.hbm [shape: bf16[128,128], index: 1, kind: input, shape index: {}]   ;;  %s1325_s2 = inlined_call_operand.hbm [shape: f32[208,128], index: 2, kind: output, shape index: {0}]   ;;  %s1326_s3 = inlined_call_operand.hbm [shape: f32[2,8,128], index: 3, kind: output, shape index: {1}]  }
   0x1   :  { %11 = vsyncpa [#allocation3 + $0x1], 0 }
   0x2   :  { %12 = vsyncpa [#allocation6], 0 }
   0x3   :  { %13 = vsyncpa [#allocation4], 0 }
   0x4   :  { %15 = vsyncpa [#allocation4 + $0x1], 0 }
   0x5   :  { %16 = vsyncpa [#allocation9], 0 }
   0x6   :  { %18 = vsyncpa [#allocation9 + $0x1], 0  ;;  %s1022_s12 = smov 0   ;;  %s1024_s13 = smov 0  }
   0x7   :  { %s1026_s14 = smov 0   ;;  %s1028_s15 = smov 0  }
   0x8 LB: > { %s1043_s16 = sadd.s32 4294967295, %s990_s15   ;;  %s639_s17 = sadd.s32 4294967294, %s990_s15   ;;  %s990_s15 = sphi %s1028_s15, %s1346_s15   ;;  %s986_s14 = sphi %s1026_s14, %s1345_s14   ;;  %s982_s13 = sphi %s1024_s13, %s1344_s13   ;;  %s978_s12 = sphi %s1022_s12, %s1343_s12  }
   0x9   : > { %p44_p0 = scmp.ne.s32.totalorder %s982_s13, %s978_s12  ;;  %p1327_p1 = scmp.eq.s32.totalorder %s1043_s16, 0 }
   0xa   : > { %p95_p3 = scmp.eq.s32.totalorder %s639_s17, 1  ;;  %p640_p5 = scmp.ge.s32.totalorder %s990_s15, 1 }
   0xb   : > { %p1052_p4 = por %p1327_p1, %p44_p0  ;;  %p128_p7 = scmp.lt.s32.totalorder %s990_s15, 3 }
   0xc   : > { %p1057_p6 = por %p95_p3, %p44_p0  ;;  %s992_s21 = smov [#allocation5]  }
   0xd   : > { %s1330_s18 = scalar_select %p1052_p4, 1, 0 }
   0xe   : > { %s1331_s19 = scalar_select %p1057_p6, 1, 0 }
   0xf   : > { %p1062_p8 = pnand %p640_p5, %p128_p7  ;;  %s140_s22 = sshll.u32 %s992_s21, 4  ;;  %s1066_s22 = int_to_ptr.vmem [resolvable:$true] %s140_s22 }
  0x10   : > { %s1078_s24 = sadd.s32 1, %s990_s15   ;;  %s31_s25 = sadd.s32 1, %s986_s14 }
  0x11   : > { %s1332_s20 = scalar_select %p1062_p8, 1, 0 }
  0x12   : > { %p757_p9 = pneg %p1062_p8  ;;  %s28_s26 = ssub.s32 %s990_s15, %s1078_s24 }
  0x13   : > { %s830_s29 = scalar_lea.hbm %s1324_s1, 1024 }
  0x14   : > { %p1073_p11 = pnand %p757_p9, %p1327_p1  ;;  %p831_p12 = scmp.ne.s32.totalorder %s1324_s1, %s830_s29 }
  0x15   : > { %p837_p5 = scmp.lt.u32.totalorder %s830_s29, %s1324_s1 }
  0x16   : > { %p832_p13 = pneg %p1073_p11 }
  0x18   : > { %p833_p0 = pnand %p832_p13, %p831_p12 }
  0x1a   : > { %p834_p3 = pneg %p833_p0 }
  0x1c   : > { %p839_p7 = pnand %p837_p5, %p834_p3 }
  0x1e   : > { %842 = shalt.err (!%p839_p7)
}
  0x1f   : > { %s843_s7 = scalar_lea.vmem %s1066_s22, 1024  ;;  %p851_p2 = scmp.lt.s32.totalorder %s1066_s22, %s1066_s22 }
  0x20   : > { %p844_p9 = scmp.ne.s32.totalorder %s1066_s22, %s843_s7  ;;  %p852_p6 = scmp.lt.s32.totalorder %s843_s7, %s843_s7 }
  0x22   : > { %p846_p10 = pnand %p844_p9, %p832_p13  ;;  %p853_p4 = por %p852_p6, %p851_p2 }
  0x24   : > { %p847_p1 = pneg %p846_p10 }
  0x26   : > { %p854_p8 = pnand %p853_p4, %p847_p1 }
  0x28   : > { %857 = shalt.err (!%p854_p8)
}
  0x29   : > { %s993_s8 = smov 64   ;;  %s994_s9 = smov 4  }
  0x2a   : > { %760 = dma.hbm_to_vmem [thread:$0]  (!%p1073_p11), %s1324_s1, 1024, %s1066_s22, [#allocation6], %s993_s8, %s993_s8, %s994_s9  }
  0x2b   : > { %p29_p1 = scmp.eq.s32.totalorder %s28_s26, 0  ;;  %p38_p2 = scmp.ne.s32.totalorder %s986_s14, %s982_s13 }
  0x2c   : > { %p39_p4 = scmp.eq.s32.totalorder %s990_s15, 0  ;;  %p773_p6 = scmp.lt.s32.totalorder %s990_s15, 2 }
  0x2d   : > { %s1112_s17 = scalar_select %p29_p1, %s986_s14, %s31_s25  }
  0x2e   : > { %p40_p8 = por %p39_p4, %p38_p2  ;;  %p1334_p10 = scmp.eq.s32.totalorder %s1043_s16, 1 }
  0x2f   : > { %s154_s23 = sand.u32 1, %s986_s14   ;;  %s667_s27 = smul.u32 832, %s990_s15 }
  0x30   : > { %p1116_p12 = por %p1334_p10, %p38_p2  ;;  %s744_s28 = smul.u32 52, %s154_s23 }
  0x31   : > { %p1122_p13 = pnand %p773_p6, %p40_p8  ;;  %s1129_s25 = scalar_lea.hbm %s1323_s0, %s667_s27 }
  0x32   : > { %s158_s30 = scalar_lea.vmem [#allocation2], %s744_s28  ;;  %s1133_s5 = scalar_lea.sflag [#allocation3], %s154_s23 }
  0x33   : > { %s165_s4 = sshll.u32 %s158_s30, 4  ;;  %s858_s6 = scalar_lea.hbm %s1129_s25, 832  ;;  %s1131_s4 = int_to_ptr.vmem [resolvable:$true] %s165_s4 }
  0x34   : > { %p859_p11 = scmp.ne.s32.totalorder %s1129_s25, %s858_s6  ;;  %p860_p0 = pneg %p1122_p13 }
  0x35   : > { %s863_s11 = scalar_lea.hbm %s1323_s0, 1664  ;;  %p864_p7 = scmp.lt.u32.totalorder %s1129_s25, %s1323_s0 }
  0x36   : > { %p861_p3 = pnand %p860_p0, %p859_p11  ;;  %p865_p9 = scmp.lt.u32.totalorder %s863_s11, %s858_s6 }
  0x37   : > { %p867_p2 = scmp.lt.u32.totalorder %s858_s6, %s1129_s25 }
  0x38   : > { %p862_p5 = pneg %p861_p3  ;;  %p866_p1 = por %p865_p9, %p864_p7 }
  0x3a   : > { %p868_p4 = por %p867_p2, %p866_p1 }
  0x3c   : > { %p869_p6 = pnand %p868_p4, %p862_p5 }
  0x3e   : > { %872 = shalt.err (!%p869_p6)
}
  0x3f   : > { %s873_s23 = scalar_lea.vmem %s1131_s4, 832  ;;  %s995_s28 = smov [#allocation2]  }
  0x40   : > { %p874_p8 = scmp.ne.s32.totalorder %s1131_s4, %s873_s23  ;;  %s878_s26 = sshll.u32 %s995_s28, 4  ;;  %s879_s26 = int_to_ptr.vmem [resolvable:$false] %s878_s26 }
  0x41   : > { %s880_s30 = scalar_lea.vmem %s879_s26, 1664  ;;  %p881_p3 = scmp.lt.s32.totalorder %s1131_s4, %s879_s26 }
  0x42   : > { %p876_p10 = pnand %p874_p8, %p860_p0  ;;  %p882_p7 = scmp.lt.s32.totalorder %s880_s30, %s873_s23 }
  0x44   : > { %p877_p11 = pneg %p876_p10  ;;  %p883_p9 = por %p882_p7, %p881_p3 }
  0x46   : > { %p884_p1 = pnand %p883_p9, %p877_p11 }
  0x48   : > { %887 = shalt.err (!%p884_p1)
}
  0x49   : > { %764 = dma.hbm_to_vmem [thread:$0]  (!%p1122_p13), %s1129_s25, 832, %s1131_s4, %s1133_s5, %s993_s8, %s993_s8, %s994_s9  }
  0x4a   : > { %p1337_p0 = scmp.ne.s32.totalorder %s1332_s20, 0 }
  0x4b   : > { %s1167_s6 = sand.u32 (!%p1337_p0), 1, %s982_s13   ;;  %p1338_p5 = scmp.ne.s32.totalorder (!%p1337_p0), %s1330_s18, 0 }
  0x4c   : > { %177 = sbr.rel (%p1337_p0) target bundleno = 412 (0x19c), region = 28  ;;  %s180_s10 = scalar_lea.sflag (!%p1337_p0), [#allocation3], %s1167_s6 }
  0x4d   : > { %s745_s7 = smul.u32 (!%p1337_p0), 52, %s1167_s6 }
  0x4f   : > { %s1171_s11 = scalar_lea.vmem (!%p1337_p0), [#allocation2], %s745_s7 }
  0x53   : > { %961 = dma.done.wait (%p1338_p5), %s180_s10, 832  }
  0x54   : > { %963 = vsyncadd (%p1338_p5), %s180_s10, 4294966464  ;;  %p1339_p13 = scmp.eq.s32.totalorder %s1043_s16, 0 }
  0x56   : > { %965 = dma.done.wait (%p1339_p13), [#allocation6], 1024   ;;  %p1340_p2 = pmov %p1339_p13 }
  0x57   : > { %v996_v0 = vmov 0.0   ;;  %vm997_vm0 = vmmov 0   ;;  %v815_v1 = vld [vmem:[#allocation5] sm:$0xff]   ;;  %v816_v2 = vld [vmem:[#allocation5 + $0x8] sm:$0xff]   ;;  %v817_v3 = vld [vmem:[#allocation5 + $0x10] sm:$0xff]   ;;  %s746_s18 = smul.u32 104, %s1167_s6 }
  0x58   : > { %967 = vsyncadd (%p1340_p2), [#allocation6], 4294966272  ;;  %684 = vmatprep.subr.bf16.mxu0 %v996_v0  ;;  %728 = vmatprep.subr.bf16.mxu1 %v996_v0  ;;  %v818_v4 = vld [vmem:[#allocation5 + $0x18] sm:$0xff]   ;;  %v819_v5 = vld [vmem:[#allocation5 + $0x20] sm:$0xff]   ;;  %s668_s8 = smul.u32 1664, %s1043_s16  ;;  %s493_s5 = scalar_lea.sflag [#allocation4], %s1167_s6 }
  0x59   : > { %700 = vmatprep.mubr.msk.bf16.mxu0 %vm997_vm0, %v996_v0  ;;  %716 = vmatprep.mubr.msk.bf16.mxu1 %vm997_vm0, %v996_v0  ;;  %v820_v6 = vld [vmem:[#allocation5 + $0x28] sm:$0xff]   ;;  %v821_v7 = vld [vmem:[#allocation5 + $0x30] sm:$0xff]   ;;  %v822_v8 = vld [vmem:[#allocation5 + $0x38] sm:$0xff]   ;;  %s1198_s20 = scalar_lea.vmem [#allocation7], %s746_s18  ;;  %s998_s22 = smov [#allocation7]  }
  0x5a   : > { %685 = vmatpush3.bf16.msra.mxu0 %v815_v1  ;;  %736 = vmatpush3.bf16.msra.mxu1 %v815_v1  ;;  %v823_v9 = vld [vmem:[%s1171_s11] sm:$0xff]   ;;  %v824_v11 = vld [vmem:[%s1171_s11 + $0x8] sm:$0xff]   ;;  %v825_v13 = vld [vmem:[%s1171_s11 + $0x10] sm:$0xff]   ;;  %s511_s9 = sshll.u32 %s1198_s20, 4  ;;  %s1229_s4 = scalar_lea.hbm %s1325_s2, %s668_s8  ;;  %s1232_s9 = int_to_ptr.vmem [resolvable:$true] %s511_s9 }
  0x5b   : > { %686 = vmatprep.subr.bf16.mxu0 %v996_v0  ;;  %729 = vmatprep.subr.bf16.mxu1 %v996_v0  ;;  %v826_v10 = vld [vmem:[%s1171_s11 + $0x20] sm:$0xff]   ;;  %v828_v12 = vld [vmem:[%s1171_s11 + $0x28] sm:$0xff]   ;;  %v829_v14 = vld [vmem:[%s1171_s11 + $0x30] ss:$0 sps:$4 sm:$0xff]   ;;  %s888_s27 = scalar_lea.vmem %s1232_s9, 1664  ;;  %s892_s23 = sshll.u32 %s998_s22, 4  ;;  %s893_s23 = int_to_ptr.vmem [resolvable:$false] %s892_s23 }
  0x5c   : > { %v827_v15 = vld [vmem:[%s1171_s11 + $0x18] sm:$0xff]   ;;  %p889_p4 = scmp.ne.s32.totalorder %s1232_s9, %s888_s27  ;;  %s894_s28 = scalar_lea.vmem %s893_s23, 3328 }
  0x5d   : > { %p895_p10 = scmp.lt.s32.totalorder %s1232_s9, %s893_s23  ;;  %p896_p11 = scmp.lt.s32.totalorder %s894_s28, %s888_s27 }
  0x5e   : > { %687 = vmatpush3.bf16.msra.mxu0 %v816_v2  ;;  %737 = vmatpush3.bf16.msra.mxu1 %v816_v2  ;;  %p890_p6 = pnand %p889_p4, %p1116_p12 }
  0x5f   : > { %688 = vmatprep.subr.bf16.mxu0 %v996_v0  ;;  %730 = vmatprep.subr.bf16.mxu1 %v996_v0  ;;  %p897_p3 = por %p896_p11, %p895_p10 }
  0x60   : > { %p891_p8 = pneg %p890_p6 }
  0x62   : > { %689 = vmatpush3.bf16.msra.mxu0 %v817_v3  ;;  %738 = vmatpush3.bf16.msra.mxu1 %v817_v3  ;;  %p898_p7 = pnand %p897_p3, %p891_p8 }
  0x63   : > { %690 = vmatprep.subr.bf16.mxu0 %v996_v0  ;;  %731 = vmatprep.subr.bf16.mxu1 %v996_v0 }
  0x66   : > { %691 = vmatpush3.bf16.msra.mxu0 %v818_v4  ;;  %739 = vmatpush3.bf16.msra.mxu1 %v818_v4 }
  0x67   : > { %692 = vmatprep.subr.bf16.mxu0 %v996_v0  ;;  %732 = vmatprep.subr.bf16.mxu1 %v996_v0 }
  0x6a   : > { %693 = vmatpush3.bf16.msra.mxu0 %v819_v5  ;;  %740 = vmatpush3.bf16.msra.mxu1 %v819_v5 }
  0x6b   : > { %694 = vmatprep.subr.bf16.mxu0 %v996_v0  ;;  %733 = vmatprep.subr.bf16.mxu1 %v996_v0 }
  0x6e   : > { %695 = vmatpush3.bf16.msra.mxu0 %v820_v6  ;;  %741 = vmatpush3.bf16.msra.mxu1 %v820_v6 }
  0x6f   : > { %696 = vmatprep.subr.bf16.mxu0 %v996_v0  ;;  %734 = vmatprep.subr.bf16.mxu1 %v996_v0 }
  0x72   : > { %697 = vmatpush3.bf16.msra.mxu0 %v821_v7  ;;  %742 = vmatpush3.bf16.msra.mxu1 %v821_v7 }
  0x73   : > { %698 = vmatprep.subr.bf16.mxu0 %v996_v0  ;;  %735 = vmatprep.subr.bf16.mxu1 %v996_v0 }
  0x76   : > { %699 = vmatpush3.bf16.msra.mxu0 %v822_v8  ;;  %743 = vmatpush3.bf16.msra.mxu1 %v822_v8 }
  0x79   : > { %701 = vmatmul.mubr.bf16.vlgmr.msra.gmra.mrb[0].mxu0 %v823_v9  ;;  %717 = vmatmul.mubr.bf16.vlgmr.msra.gmra.mrb[0].mxu1 %v826_v10 }
  0x7a   : > { %704 = vmatprep.mubr.msk.bf16.mxu0 %vm997_vm0, %v996_v0  ;;  %720 = vmatprep.mubr.msk.bf16.mxu1 %vm997_vm0, %v996_v0 }
  0x81   : > { %705 = vmatmul.mubr.bf16.gmra.mrb[4].mxu0 %v824_v11  ;;  %721 = vmatmul.mubr.bf16.gmra.mrb[4].mxu1 %v828_v12 }
  0x82   : > { %708 = vmatprep.mubr.msk.bf16.mxu0 %vm997_vm0, %v996_v0  ;;  %724 = vmatprep.mubr.msk.bf16.mxu1 %vm997_vm0, %v996_v0 }
  0x89   : > { %709 = vmatmul.mubr.bf16.gmra.mrb[8].mxu0 %v825_v13  ;;  %725 = vmatmul.mubr.bf16.gmra.mrb[8].mxu1 %v829_v14 }
  0x8a   : > { %712 = vmatprep.mubr.msk.bf16.mxu0 %vm997_vm0, %v996_v0 }
  0x91   : > { %713 = vmatmul.mubr.bf16.gmra.mrb[12].mxu0 %v827_v15 }
 0x14c   : > { %v369_v16 = vpop.f32.mrb[0].mxu0  ;;  %v1196_v17 = vpop.f32.mrb[0].mxu1 }
 0x14d   : > { %423 = vst [vmem:[%s1198_s20] sm:$0xff] %v369_v16  ;;  %v702_v18 = vpop.f32.mrb[1].mxu0  ;;  %431 = vst [vmem:[%s1198_s20 + $0x40] sm:$0xff] %v1196_v17  ;;  %v718_v19 = vpop.f32.mrb[1].mxu1  ;;  %v454_v22 = vmul.f32 %v369_v16, %v369_v16 }
 0x14e   : > { %v372_v20 = vpop.f32.mrb[2].mxu0  ;;  %v1203_v21 = vpop.f32.mrb[2].mxu1 }
 0x14f   : > { %424 = vst [vmem:[%s1198_s20 + $0x8] sm:$0xff] %v372_v20  ;;  %v436_v23 = vadd.f32 %v372_v20, %v369_v16  ;;  %v455_v24 = vmul.f32 %v372_v20, %v372_v20  ;;  %v703_v25 = vpop.f32.mrb[3].mxu0  ;;  %432 = vst [vmem:[%s1198_s20 + $0x48] sm:$0xff] %v1203_v21  ;;  %v719_v26 = vpop.f32.mrb[3].mxu1 }
 0x151   : > { %v467_v27 = vadd.f32 %v455_v24, %v454_v22 }
 0x154   : > { %v377_v28 = vpop.f32.mrb[4].mxu0  ;;  %v1208_v29 = vpop.f32.mrb[4].mxu1 }
 0x155   : > { %425 = vst [vmem:[%s1198_s20 + $0x10] sm:$0xff] %v377_v28  ;;  %v437_v30 = vadd.f32 %v436_v23, %v377_v28  ;;  %v456_v31 = vmul.f32 %v377_v28, %v377_v28  ;;  %v706_v32 = vpop.f32.mrb[5].mxu0  ;;  %433 = vst [vmem:[%s1198_s20 + $0x50] sm:$0xff] %v1208_v29  ;;  %v722_v33 = vpop.f32.mrb[5].mxu1 }
 0x156   : > { %v380_v34 = vpop.f32.mrb[6].mxu0  ;;  %v1213_v35 = vpop.f32.mrb[6].mxu1 }
 0x157   : > { %v468_v36 = vadd.f32 %v467_v27, %v456_v31  ;;  %426 = vst [vmem:[%s1198_s20 + $0x18] sm:$0xff] %v380_v34  ;;  %v438_v37 = vadd.f32 %v437_v30, %v380_v34  ;;  %v457_v38 = vmul.f32 %v380_v34, %v380_v34  ;;  %v707_v39 = vpop.f32.mrb[7].mxu0  ;;  %434 = vst [vmem:[%s1198_s20 + $0x58] sm:$0xff] %v1213_v35  ;;  %v723_v40 = vpop.f32.mrb[7].mxu1 }
 0x159   : > { %v469_v41 = vadd.f32 %v468_v36, %v457_v38 }
 0x15c   : > { %v385_v42 = vpop.f32.mrb[8].mxu0  ;;  %v1218_v43 = vpop.f32.mrb[8].mxu1 }
 0x15d   : > { %427 = vst [vmem:[%s1198_s20 + $0x20] sm:$0xff] %v385_v42  ;;  %v439_v44 = vadd.f32 %v438_v37, %v385_v42  ;;  %v458_v45 = vmul.f32 %v385_v42, %v385_v42  ;;  %v710_v46 = vpop.f32.mrb[9].mxu0  ;;  %435 = vst [vmem:[%s1198_s20 + $0x60] sm:$0xff] %v1218_v43  ;;  %v726_v47 = vpop.f32.mrb[9].mxu1 }
 0x15e   : > { %v388_v48 = vpop.f32.mrb[10].mxu0  ;;  %v420_v49 = vpop.f32.mrb[10].mxu1 }
 0x15f   : > { %v470_v50 = vadd.f32 %v469_v41, %v458_v45  ;;  %428 = vst [vmem:[%s1198_s20 + $0x28] sm:$0xff] %v388_v48  ;;  %v440_v51 = vadd.f32 %v439_v44, %v388_v48  ;;  %v459_v52 = vmul.f32 %v388_v48, %v388_v48  ;;  %v711_v53 = vpop.f32.mrb[11].mxu0  ;;  %v727_v54 = vpop.f32.mrb[11].mxu1 }
 0x161   : > { %v471_v55 = vadd.f32 %v470_v50, %v459_v52 }
 0x164   : > { %v393_v56 = vpop.f32.mrb[12].mxu0 }
 0x165   : > { %429 = vst [vmem:[%s1198_s20 + $0x30] sm:$0xff] %v393_v56  ;;  %v441_v57 = vadd.f32 %v440_v51, %v393_v56  ;;  %v460_v58 = vmul.f32 %v393_v56, %v393_v56  ;;  %v714_v59 = vpop.f32.mrb[13].mxu0 }
 0x166   : > { %v396_v60 = vpop.f32.mrb[14].mxu0 }
 0x167   : > { %v472_v61 = vadd.f32 %v471_v55, %v460_v58  ;;  %430 = vst [vmem:[%s1198_s20 + $0x38] sm:$0xff] %v396_v60  ;;  %v442_v62 = vadd.f32 %v441_v57, %v396_v60  ;;  %v461_v63 = vmul.f32 %v396_v60, %v396_v60  ;;  %v715_v0 = vpop.f32.mrb[15].mxu0 }
 0x168   : > { %901 = shalt.err (!%p898_p7)
}
 0x169   : > { %s902_s26 = scalar_lea.hbm %s1229_s4, 1664  ;;  %s906_s10 = scalar_lea.hbm %s1325_s2, 3328 }
 0x16a   : > { %p903_p9 = scmp.ne.s32.totalorder %s1229_s4, %s902_s26  ;;  %p907_p5 = scmp.lt.u32.totalorder %s1229_s4, %s1325_s2 }
 0x16b   : > { %p908_p13 = scmp.lt.u32.totalorder %s906_s10, %s902_s26  ;;  %p910_p4 = scmp.lt.u32.totalorder %s902_s26, %s1229_s4 }
 0x16c   : > { %p904_p1 = pnand %p903_p9, %p1116_p12 }
 0x16d   : > { %p909_p2 = por %p908_p13, %p907_p5 }
 0x16e   : > { %p905_p0 = pneg %p904_p1 }
 0x16f   : > { %p911_p6 = por %p910_p4, %p909_p2 }
 0x171   : > { %p912_p8 = pnand %p911_p6, %p905_p0 }
 0x173   : > { %915 = shalt.err (!%p912_p8)
}
 0x174   : > { %s999_s20 = smov 128   ;;  %s1000_s8 = smov 8   ;;  %v462_v1 = vmul.f32 %v1196_v17, %v1196_v17  ;;  %v443_v2 = vadd.f32 %v442_v62, %v1196_v17  ;;  %v473_v3 = vadd.f32 %v472_v61, %v461_v63  ;;  %v463_v4 = vmul.f32 %v1203_v21, %v1203_v21 }
 0x175   : > { %753 = dma.vmem_to_hbm [thread:$0]  (%p1116_p12), %s1232_s9, 1664, %s1229_s4, %s493_s5, %s999_s20, %s999_s20, %s1000_s8   ;;  %v464_v7 = vmul.f32 %v1208_v29, %v1208_v29  ;;  %v465_v11 = vmul.f32 %v1213_v35, %v1213_v35  ;;  %v466_v13 = vmul.f32 %v1218_v43, %v1218_v43  ;;  %v485_v20 = vlaneseq }
 0x176   : > { %v474_v5 = vadd.f32 %v473_v3, %v462_v1  ;;  %v444_v6 = vadd.f32 %v443_v2, %v1203_v21  ;;  %s646_s9 = sshll.u32 %s1167_s6, 3  ;;  %s664_s29 = sshll.u32 %s1043_s16, 7 }
 0x177   : > { %v486_v25 = vshrl.u32 %v485_v20, 7  ;;  %s214_s25 = scalar_lea.vmem [#allocation8], %s646_s9  ;;  %s1279_s22 = scalar_lea.hbm %s1326_s3, %s664_s29 }
 0x178   : > { %v445_v8 = vadd.f32 %v444_v6, %v1208_v29  ;;  %v475_v9 = vadd.f32 %v474_v5, %v463_v4  ;;  %s527_s4 = sshll.u32 %s214_s25, 4  ;;  %s498_s23 = scalar_lea.sflag [#allocation9], %s1167_s6  ;;  %s1281_s4 = int_to_ptr.vmem [resolvable:$true] %s527_s4 }
 0x179   : > { %vm488_vm1 = vcmp.eq.s32.totalorder %v486_v25, 1  ;;  %vm487_vm2 = vcmp.eq.s32.totalorder %v486_v25, 0  ;;  %s916_s16 = scalar_lea.vmem %s1281_s4, 128  ;;  %s1001_s28 = smov [#allocation8]  }
 0x17a   : > { %v446_v10 = vadd.f32 %v445_v8, %v1213_v35  ;;  %v476_v12 = vadd.f32 %v475_v9, %v464_v7  ;;  %p917_p10 = scmp.ne.s32.totalorder %s1281_s4, %s916_s16  ;;  %s920_s26 = sshll.u32 %s1001_s28, 4  ;;  %s921_s26 = int_to_ptr.vmem [resolvable:$false] %s920_s26 }
 0x17b   : > { %s922_s30 = scalar_lea.vmem %s921_s26, 256  ;;  %p923_p7 = scmp.lt.s32.totalorder %s1281_s4, %s921_s26 }
 0x17c   : > { %v477_v14 = vadd.f32 %v476_v12, %v465_v11  ;;  %v447_v15 = vadd.f32 %v446_v10, %v1218_v43  ;;  %p918_p11 = pnand %p917_p10, %p1116_p12  ;;  %p924_p9 = scmp.lt.s32.totalorder %s922_s30, %s916_s16 }
 0x17e   : > { %v448_v16 = vrot.slane %v447_v15, 4  ;;  %v478_v17 = vadd.f32 %v477_v14, %v466_v13  ;;  %p919_p3 = pneg %p918_p11  ;;  %p925_p1 = por %p924_p9, %p923_p7 }
 0x180   : > { %v449_v18 = vadd.f32 %v448_v16, %v447_v15  ;;  %v479_v19 = vrot.slane %v478_v17, 4  ;;  %p926_p0 = pnand %p925_p1, %p919_p3 }
 0x182   : > { %v450_v21 = vrot.slane %v449_v18, 2  ;;  %v480_v22 = vadd.f32 %v479_v19, %v478_v17 }
 0x184   : > { %v451_v23 = vadd.f32 %v450_v21, %v449_v18  ;;  %v481_v24 = vrot.slane %v480_v22, 2 }
 0x186   : > { %v482_v26 = vadd.f32 %v481_v24, %v480_v22  ;;  %v452_v27 = vrot.slane %v451_v23, 1 }
 0x188   : > { %v483_v28 = vrot.slane %v482_v26, 1  ;;  %v453_v30 = vadd.f32 %v452_v27, %v451_v23 }
 0x18a   : > { %v484_v29 = vadd.f32 %v483_v28, %v482_v26 }
 0x18c   : > { %v489_v31 = vsel %vm488_vm1, %v484_v29, 0.0 }
 0x18d   : > { %v490_v32 = vsel %vm487_vm2, %v453_v30, %v489_v31 }
 0x18e   : > { %491 = vst [vmem:[%s214_s25] sm:$0xff] %v490_v32 }
 0x18f   : > { %929 = shalt.err (!%p926_p0)
}
 0x190   : > { %s930_s6 = scalar_lea.hbm %s1279_s22, 128  ;;  %s934_s11 = scalar_lea.hbm %s1326_s3, 256 }
 0x191   : > { %p931_p5 = scmp.ne.s32.totalorder %s1279_s22, %s930_s6  ;;  %p935_p4 = scmp.lt.u32.totalorder %s1279_s22, %s1326_s3 }
 0x192   : > { %p936_p6 = scmp.lt.u32.totalorder %s934_s11, %s930_s6  ;;  %p938_p10 = scmp.lt.u32.totalorder %s930_s6, %s1279_s22 }
 0x193   : > { %p932_p13 = pnand %p931_p5, %p1116_p12 }
 0x194   : > { %p937_p8 = por %p936_p6, %p935_p4 }
 0x195   : > { %p933_p2 = pneg %p932_p13 }
 0x196   : > { %p939_p11 = por %p938_p10, %p937_p8 }
 0x198   : > { %p940_p3 = pnand %p939_p11, %p933_p2 }
 0x19a   : > { %943 = shalt.err (!%p940_p3)
}
 0x19b   : > { %754 = dma.vmem_to_hbm [thread:$0]  (%p1116_p12), %s1281_s4, 128, %s1279_s22, %s498_s23  }
 0x19c PF: > { %s539_s8 = sand.u32 1, %s978_s12   ;;  %p1341_p7 = scmp.ne.s32.totalorder %s1331_s19, 0 }
 0x19d   : > { %p1342_p9 = scmp.ge.s32.totalorder %s990_s15, 2  ;;  %s540_s9 = scalar_lea.sflag [#allocation4], %s539_s8 }
 0x19f   : > { %p766_p1 = pnand %p1342_p9, %p1341_p7 }
 0x1a1   : > { %969 = dma.done.wait (!%p766_p1), %s540_s9, 1664  }
 0x1a2   : > { %971 = vsyncadd (!%p766_p1), %s540_s9, 4294965632  ;;  %s549_s29 = scalar_lea.sflag [#allocation9], %s539_s8 }
 0x1a3   : > { %973 = dma.done.wait (!%p766_p1), %s549_s29, 128  }
 0x1a4   : > { %975 = vsyncadd (!%p766_p1), %s549_s29, 4294967168  ;;  %p21_p12 = scmp.ge.s32.totalorder %s1078_s24, 4   ;;  %s1343_s12 = smov %s982_s13 }
 0x1a5   : > { %s1344_s13 = smov %s986_s14  ;;  %s1345_s14 = smov %s1112_s17 }
 0x1a6   : > { %s1346_s15 = smov %s1078_s24  ;;  %23 = sbr.rel (!%p21_p12) target bundleno = 8 (0x8), region = 94 }
 0x1ad   :  { %554 = vsyncpa [#allocation3], 1 }
 0x1ae   :  { %556 = vsyncpa [#allocation3 + $0x1], 1 }
 0x1af   :  { %557 = vsyncpa [#allocation6], 1 }
 0x1b0   :  { %558 = vsyncpa [#allocation4], 1 }
 0x1b1   :  { %560 = vsyncpa [#allocation4 + $0x1], 1 }
 0x1b2   :  { %561 = vsyncpa [#allocation9], 1 }
 0x1b3   :  { %563 = vsyncpa [#allocation9 + $0x1], 1 }

// kernel: discriminator_forward.18
= control target key start
LH: loop header
LB: loop body
LE: loop exit
PB: predicated region body
PF: predicated region fallthrough
CT: control target
= control target key end

     0   :  { %8 = vsyncpa [#allocation3], 0  ;;  %s877_s0 = inlined_call_operand.hbm [shape: f32[32,128], index: 0, kind: input, shape index: {}]   ;;  %s878_s1 = inlined_call_operand.hbm [shape: f32[1,128], index: 1, kind: input, shape index: {}]   ;;  %s879_s2 = inlined_call_operand.hbm [shape: f32[1,128], index: 2, kind: input, shape index: {}]   ;;  %s880_s3 = inlined_call_operand.hbm [shape: bf16[32,128], index: 3, kind: output, shape index: {}]  }
   0x1   :  { %10 = vsyncpa [#allocation3 + $0x1], 0 }
   0x2   :  { %11 = vsyncpa [#allocation6], 0 }
   0x3   :  { %12 = vsyncpa [#allocation4], 0 }
   0x4   :  { %14 = vsyncpa [#allocation4 + $0x1], 0  ;;  %s644_s12 = smov 0   ;;  %s646_s13 = smov 0  }
   0x5   :  { %s648_s14 = smov 0   ;;  %s650_s15 = smov 0  }
   0x6 LB: > { %s665_s16 = sadd.s32 4294967295, %s614_s15   ;;  %s356_s17 = sadd.s32 4294967294, %s614_s15   ;;  %s614_s15 = sphi %s650_s15, %s905_s15   ;;  %s610_s14 = sphi %s648_s14, %s904_s14   ;;  %s606_s13 = sphi %s646_s13, %s903_s13   ;;  %s602_s12 = sphi %s644_s12, %s902_s12  }
   0x7   : > { %s669_s18 = sadd.s32 1, %s614_s15   ;;  %s27_s19 = sadd.s32 1, %s610_s14 }
   0x8   : > { %s24_s20 = ssub.s32 %s614_s15, %s669_s18  ;;  %p34_p0 = scmp.ne.s32.totalorder %s610_s14, %s606_s13 }
   0x9   : > { %p25_p1 = scmp.eq.s32.totalorder %s24_s20, 0  ;;  %p35_p2 = scmp.eq.s32.totalorder %s614_s15, 0 }
   0xa   : > { %p40_p3 = scmp.ne.s32.totalorder %s606_s13, %s602_s12  ;;  %p881_p4 = scmp.eq.s32.totalorder %s665_s16, 0 }
   0xb   : > { %s681_s21 = scalar_select %p25_p1, %s610_s14, %s27_s19  }
   0xc   : > { %p683_p5 = por %p35_p2, %p34_p0  ;;  %p689_p6 = por %p881_p4, %p40_p3 }
   0xd   : > { %p106_p7 = scmp.eq.s32.totalorder %s665_s16, 1  ;;  %p112_p8 = scmp.eq.s32.totalorder %s356_s17, 1 }
   0xe   : > { %s887_s23 = scalar_select %p689_p6, 1, 0 }
   0xf   : > { %p357_p9 = scmp.ge.s32.totalorder %s614_s15, 1  ;;  %p119_p10 = scmp.lt.s32.totalorder %s614_s15, 3 }
  0x10   : > { %p696_p11 = por %p106_p7, %p34_p0  ;;  %p700_p12 = por %p112_p8, %p40_p3 }
  0x11   : > { %p704_p13 = pnand %p357_p9, %p119_p10  ;;  %s616_s27 = smov [#allocation5]  }
  0x12   : > { %s888_s24 = scalar_select %p696_p11, 1, 0 }
  0x13   : > { %s889_s25 = scalar_select %p700_p12, 1, 0 }
  0x14   : > { %s890_s26 = scalar_select %p704_p13, 1, 0 }
  0x15   : > { %p399_p2 = pneg %p704_p13  ;;  %s132_s28 = sshll.u32 %s616_s27, 4  ;;  %s133_s28 = int_to_ptr.vmem [resolvable:$true] %s132_s28 }
  0x16   : > { %p416_p4 = scmp.lt.s32.totalorder %s614_s15, 2  ;;  %p891_p0 = scmp.eq.s32.totalorder %s665_s16, 0 }
  0x17   : > { %s617_s4 = smov [#allocation7]   ;;  %s458_s8 = scalar_lea.hbm %s878_s1, 16 }
  0x18   : > { %p714_p7 = pnand %p399_p2, %p891_p0  ;;  %p720_p3 = pnand %p416_p4, %p683_p5 }
  0x19   : > { %s143_s5 = sshll.u32 %s617_s4, 4  ;;  %p459_p8 = scmp.ne.s32.totalorder %s878_s1, %s458_s8  ;;  %s724_s5 = int_to_ptr.vmem [resolvable:$true] %s143_s5 }
  0x1a   : > { %s893_s30 = scalar_select %p720_p3, 1, 0 }
  0x1b   : > { %p460_p9 = pneg %p714_p7  ;;  %p465_p10 = scmp.lt.u32.totalorder %s458_s8, %s878_s1 }
  0x1d   : > { %p461_p4 = pnand %p460_p9, %p459_p8 }
  0x1f   : > { %p462_p5 = pneg %p461_p4 }
  0x21   : > { %p467_p2 = pnand %p465_p10, %p462_p5 }
  0x23   : > { %470 = shalt.err (!%p467_p2)
}
  0x24   : > { %s471_s19 = scalar_lea.vmem %s133_s28, 16  ;;  %s478_s20 = scalar_lea.vmem %s133_s28, 32 }
  0x25   : > { %p472_p0 = scmp.ne.s32.totalorder %s133_s28, %s471_s19  ;;  %p479_p11 = scmp.lt.s32.totalorder %s133_s28, %s133_s28 }
  0x26   : > { %p480_p6 = scmp.lt.s32.totalorder %s478_s20, %s471_s19 }
  0x27   : > { %p474_p1 = pnand %p472_p0, %p460_p9 }
  0x28   : > { %p481_p13 = por %p480_p6, %p479_p11 }
  0x29   : > { %p475_p12 = pneg %p474_p1 }
  0x2b   : > { %p482_p3 = pnand %p481_p13, %p475_p12 }
  0x2d   : > { %485 = shalt.err (!%p482_p3)
}
  0x2e   : > { %402 = dma.hbm_to_vmem [thread:$0]  (!%p714_p7), %s878_s1, 16, %s133_s28, [#allocation6]  }
  0x2f   : > { %s154_s4 = sand.u32 1, %s610_s14   ;;  %s486_s8 = scalar_lea.hbm %s879_s2, 16 }
  0x30   : > { %p487_p1 = scmp.ne.s32.totalorder %s879_s2, %s486_s8  ;;  %p493_p12 = scmp.lt.u32.totalorder %s486_s8, %s879_s2 }
  0x32   : > { %p489_p6 = pnand %p487_p1, %p460_p9 }
  0x34   : > { %p490_p11 = pneg %p489_p6 }
  0x36   : > { %p495_p13 = pnand %p493_p12, %p490_p11 }
  0x38   : > { %498 = shalt.err (!%p495_p13)
}
  0x39   : > { %s499_s28 = scalar_lea.vmem %s724_s5, 16  ;;  %s506_s19 = scalar_lea.vmem %s724_s5, 32 }
  0x3a   : > { %p500_p3 = scmp.ne.s32.totalorder %s724_s5, %s499_s28  ;;  %p507_p5 = scmp.lt.s32.totalorder %s724_s5, %s724_s5 }
  0x3b   : > { %p508_p10 = scmp.lt.s32.totalorder %s506_s19, %s499_s28 }
  0x3c   : > { %p502_p8 = pnand %p500_p3, %p460_p9 }
  0x3d   : > { %p509_p2 = por %p508_p10, %p507_p5 }
  0x3e   : > { %p503_p4 = pneg %p502_p8 }
  0x40   : > { %p510_p0 = pnand %p509_p2, %p503_p4 }
  0x42   : > { %513 = shalt.err (!%p510_p0)
}
  0x43   : > { %405 = dma.hbm_to_vmem [thread:$0]  (!%p714_p7), %s879_s2, 16, %s724_s5, [#allocation6]  }
  0x44   : > { %s361_s27 = sshll.u32 %s154_s4, 4  ;;  %s378_s6 = sshll.u32 %s614_s15, 8 }
  0x45   : > { %s779_s9 = scalar_lea.hbm %s877_s0, %s378_s6  ;;  %s158_s29 = scalar_lea.vmem [#allocation2], %s361_s27 }
  0x46   : > { %s165_s10 = sshll.u32 %s158_s29, 4  ;;  %s783_s11 = scalar_lea.sflag [#allocation3], %s154_s4  ;;  %s781_s10 = int_to_ptr.vmem [resolvable:$true] %s165_s10 }
  0x47   : > { %s514_s17 = scalar_lea.hbm %s779_s9, 256  ;;  %p894_p7 = scmp.ne.s32.totalorder %s893_s30, 0 }
  0x48   : > { %p515_p9 = scmp.ne.s32.totalorder %s779_s9, %s514_s17  ;;  %s519_s19 = scalar_lea.hbm %s877_s0, 512 }
  0x49   : > { %p516_p1 = pneg %p894_p7  ;;  %p520_p12 = scmp.lt.u32.totalorder %s779_s9, %s877_s0 }
  0x4a   : > { %p521_p13 = scmp.lt.u32.totalorder %s519_s19, %s514_s17  ;;  %p523_p8 = scmp.lt.u32.totalorder %s514_s17, %s779_s9 }
  0x4b   : > { %p517_p6 = pnand %p516_p1, %p515_p9 }
  0x4c   : > { %p522_p3 = por %p521_p13, %p520_p12 }
  0x4d   : > { %p518_p11 = pneg %p517_p6 }
  0x4e   : > { %p524_p4 = por %p523_p8, %p522_p3 }
  0x50   : > { %p525_p5 = pnand %p524_p4, %p518_p11 }
  0x52   : > { %528 = shalt.err (!%p525_p5)
}
  0x53   : > { %s529_s4 = scalar_lea.vmem %s781_s10, 256  ;;  %s618_s27 = smov [#allocation2]  }
  0x54   : > { %p530_p10 = scmp.ne.s32.totalorder %s781_s10, %s529_s4  ;;  %s534_s6 = sshll.u32 %s618_s27, 4  ;;  %s535_s6 = int_to_ptr.vmem [resolvable:$false] %s534_s6 }
  0x55   : > { %s536_s7 = scalar_lea.vmem %s535_s6, 512  ;;  %p537_p9 = scmp.lt.s32.totalorder %s781_s10, %s535_s6 }
  0x56   : > { %p532_p2 = pnand %p530_p10, %p516_p1  ;;  %p538_p6 = scmp.lt.s32.totalorder %s536_s7, %s529_s4 }
  0x58   : > { %p533_p0 = pneg %p532_p2  ;;  %p539_p12 = por %p538_p6, %p537_p9 }
  0x5a   : > { %p540_p13 = pnand %p539_p12, %p533_p0 }
  0x5c   : > { %543 = shalt.err (!%p540_p13)
}
  0x5d   : > { %s619_s8 = smov 128   ;;  %s620_s29 = smov 8  }
  0x5e   : > { %409 = dma.hbm_to_vmem [thread:$0]  (!%p894_p7), %s779_s9, 256, %s781_s10, %s783_s11, %s619_s8, %s619_s8, %s620_s29  }
  0x5f   : > { %p895_p1 = scmp.ne.s32.totalorder %s890_s26, 0 }
  0x60   : > { %s814_s17 = sand.u32 (!%p895_p1), 1, %s606_s13   ;;  %p896_p11 = scmp.ne.s32.totalorder (!%p895_p1), %s887_s23, 0 }
  0x61   : > { %177 = sbr.rel (%p895_p1) target bundleno = 135 (0x87), region = 32  ;;  %s365_s5 = sshll.u32 (!%p895_p1), %s814_s17, 4 }
  0x62   : > { %s180_s28 = scalar_lea.sflag (!%p895_p1), [#allocation3], %s814_s17  ;;  %s183_s19 = scalar_lea.vmem (!%p895_p1), [#allocation2], %s365_s5 }
  0x68   : > { %589 = dma.done.wait (%p896_p11), %s180_s28, 256  }
  0x69   : > { %591 = vsyncadd (%p896_p11), %s180_s28, 4294967040  ;;  %p897_p3 = scmp.eq.s32.totalorder %s665_s16, 0 }
  0x6b   : > { %593 = dma.done.wait (%p897_p3), [#allocation6], 32   ;;  %p898_p7 = pmov %p897_p3 }
  0x6c   : > { %s368_s26 = sshll.u32 %s814_s17, 3  ;;  %v216_v0 = vld [vmem:[%s183_s19] sm:$0xff]  ;;  %v217_v1 = vld [vmem:[%s183_s19 + $0x8] sm:$0xff]  ;;  %s381_s9 = sshll.u32 %s665_s16, 7 }
  0x6d   : > { %595 = vsyncadd (%p898_p7), [#allocation6], 4294967264  ;;  %v369_v2 = vld [vmem:[#allocation5] ss:$0 sm:$0xff]  ;;  %v370_v5 = vld [vmem:[#allocation7] ss:$0 sm:$0xff]  ;;  %s833_s20 = scalar_lea.hbm %s880_s3, %s381_s9 }
  0x6e   : > { %v225_v3 = vmul.f32 %v369_v2, %v216_v0  ;;  %v226_v4 = vmul.f32 %v369_v2, %v217_v1  ;;  %s213_s23 = scalar_lea.vmem [#allocation8], %s368_s26  ;;  %s251_s22 = scalar_lea.sflag [#allocation4], %s814_s17 }
  0x6f   : > { %s264_s30 = sshll.u32 %s213_s23, 4  ;;  %p899_p4 = scmp.ne.s32.totalorder %s888_s24, 0  ;;  %s828_s30 = int_to_ptr.vmem [resolvable:$true] %s264_s30 }
  0x70   : > { %v234_v6 = vadd.f32 %v370_v5, %v225_v3  ;;  %v235_v7 = vadd.f32 %v370_v5, %v226_v4  ;;  %s544_s4 = scalar_lea.vmem %s828_s30, 128  ;;  %s621_s16 = smov [#allocation8]  }
  0x71   : > { %p545_p8 = scmp.ne.s32.totalorder %s828_s30, %s544_s4  ;;  %s548_s27 = sshll.u32 %s621_s16, 4  ;;  %s549_s27 = int_to_ptr.vmem [resolvable:$false] %s548_s27 }
  0x72   : > { %v236_v8 = vmul.f32 0.2, %v234_v6  ;;  %v237_v9 = vmul.f32 0.2, %v235_v7  ;;  %s550_s6 = scalar_lea.vmem %s549_s27, 256  ;;  %p551_p2 = scmp.lt.s32.totalorder %s828_s30, %s549_s27 }
  0x73   : > { %p546_p5 = pnand %p545_p8, %p899_p4  ;;  %p552_p0 = scmp.lt.s32.totalorder %s550_s6, %s544_s4 }
  0x74   : > { %v238_v10 = vmax.f32 %v234_v6, %v236_v8  ;;  %v239_v11 = vmax.f32 %v235_v7, %v237_v9 }
  0x75   : > { %p547_p10 = pneg %p546_p5  ;;  %p553_p9 = por %p552_p0, %p551_p2 }
  0x76   : > { %v385_v12 = vpack.c.bf16 %v239_v11, %v238_v10 }
  0x77   : > { %p554_p6 = pnand %p553_p9, %p547_p10 }
  0x78   : > { %386 = vst [vmem:[%s213_s23] sm:$0xff] %v385_v12  }
  0x79   : > { %557 = shalt.err (!%p554_p6)
}
  0x7a   : > { %s558_s7 = scalar_lea.hbm %s833_s20, 128  ;;  %s562_s5 = scalar_lea.hbm %s880_s3, 256 }
  0x7b   : > { %p559_p12 = scmp.ne.s32.totalorder %s833_s20, %s558_s7  ;;  %p563_p11 = scmp.lt.u32.totalorder %s833_s20, %s880_s3 }
  0x7c   : > { %p564_p3 = scmp.lt.u32.totalorder %s562_s5, %s558_s7  ;;  %p566_p8 = scmp.lt.u32.totalorder %s558_s7, %s833_s20 }
  0x7d   : > { %p560_p13 = pnand %p559_p12, %p899_p4 }
  0x7e   : > { %p565_p7 = por %p564_p3, %p563_p11 }
  0x7f   : > { %p561_p1 = pneg %p560_p13 }
  0x80   : > { %p567_p5 = por %p566_p8, %p565_p7 }
  0x82   : > { %p568_p10 = pnand %p567_p5, %p561_p1 }
  0x84   : > { %571 = shalt.err (!%p568_p10)
}
  0x85   : > { %s622_s26 = smov 64   ;;  %s623_s23 = smov 4  }
  0x86   : > { %397 = dma.vmem_to_hbm [thread:$0]  (%p899_p4), %s828_s30, 128, %s833_s20, %s251_s22, %s622_s26, %s622_s26, %s623_s23  }
  0x87 PF: > { %s279_s9 = sand.u32 1, %s602_s12   ;;  %p900_p2 = scmp.ne.s32.totalorder %s889_s25, 0 }
  0x88   : > { %p901_p0 = scmp.ge.s32.totalorder %s614_s15, 2  ;;  %s280_s10 = scalar_lea.sflag [#allocation4], %s279_s9 }
  0x8a   : > { %p411_p9 = pnand %p901_p0, %p900_p2 }
  0x8c   : > { %597 = dma.done.wait (!%p411_p9), %s280_s10, 128  }
  0x8d   : > { %599 = vsyncadd (!%p411_p9), %s280_s10, 4294967168  ;;  %p17_p6 = scmp.ge.s32.totalorder %s669_s18, 4   ;;  %s902_s12 = smov %s606_s13 }
  0x8e   : > { %s903_s13 = smov %s610_s14  ;;  %s904_s14 = smov %s681_s21 }
  0x8f   : > { %s905_s15 = smov %s669_s18  ;;  %19 = sbr.rel (!%p17_p6) target bundleno = 6 (0x6), region = 85 }
  0x96   :  { %285 = vsyncpa [#allocation3], 1 }
  0x97   :  { %287 = vsyncpa [#allocation3 + $0x1], 1 }
  0x98   :  { %288 = vsyncpa [#allocation6], 1 }
  0x99   :  { %289 = vsyncpa [#allocation4], 1 }
  0x9a   :  { %291 = vsyncpa [#allocation4 + $0x1], 1 }

// kernel: discriminator_forward.17
= control target key start
LH: loop header
LB: loop body
LE: loop exit
PB: predicated region body
PF: predicated region fallthrough
CT: control target
= control target key end

     0   :  { %9 = vsyncpa [#allocation3], 0  ;;  %s1154_s0 = inlined_call_operand.hbm [shape: bf16[32,256], index: 0, kind: input, shape index: {}]   ;;  %s1155_s1 = inlined_call_operand.hbm [shape: bf16[256,128], index: 1, kind: input, shape index: {}]   ;;  %s1156_s2 = inlined_call_operand.hbm [shape: f32[32,128], index: 2, kind: output, shape index: {0}]   ;;  %s1157_s3 = inlined_call_operand.hbm [shape: f32[2,8,128], index: 3, kind: output, shape index: {1}]  }
   0x1   :  { %11 = vsyncpa [#allocation3 + $0x1], 0 }
   0x2   :  { %12 = vsyncpa [#allocation6], 0 }
   0x3   :  { %13 = vsyncpa [#allocation4], 0 }
   0x4   :  { %15 = vsyncpa [#allocation4 + $0x1], 0 }
   0x5   :  { %16 = vsyncpa [#allocation9], 0 }
   0x6   :  { %18 = vsyncpa [#allocation9 + $0x1], 0  ;;  %s914_s12 = smov 0   ;;  %s916_s13 = smov 0  }
   0x7   :  { %s918_s14 = smov 0   ;;  %s920_s15 = smov 0  }
   0x8 LB: > { %s935_s16 = sadd.s32 4294967295, %s882_s15   ;;  %s572_s17 = sadd.s32 4294967294, %s882_s15   ;;  %s882_s15 = sphi %s920_s15, %s1177_s15   ;;  %s878_s14 = sphi %s918_s14, %s1176_s14   ;;  %s874_s13 = sphi %s916_s13, %s1175_s13   ;;  %s870_s12 = sphi %s914_s12, %s1174_s12  }
   0x9   : > { %p44_p0 = scmp.ne.s32.totalorder %s874_s13, %s870_s12  ;;  %p1158_p1 = scmp.eq.s32.totalorder %s935_s16, 0 }
   0xa   : > { %p95_p3 = scmp.eq.s32.totalorder %s572_s17, 1  ;;  %p573_p5 = scmp.ge.s32.totalorder %s882_s15, 1 }
   0xb   : > { %p944_p4 = por %p1158_p1, %p44_p0  ;;  %p128_p7 = scmp.lt.s32.totalorder %s882_s15, 3 }
   0xc   : > { %p949_p6 = por %p95_p3, %p44_p0  ;;  %s884_s21 = smov [#allocation5]  }
   0xd   : > { %s1161_s18 = scalar_select %p944_p4, 1, 0 }
   0xe   : > { %s1162_s19 = scalar_select %p949_p6, 1, 0 }
   0xf   : > { %p954_p8 = pnand %p573_p5, %p128_p7  ;;  %s140_s22 = sshll.u32 %s884_s21, 4  ;;  %s958_s22 = int_to_ptr.vmem [resolvable:$true] %s140_s22 }
  0x10   : > { %s970_s24 = sadd.s32 1, %s882_s15   ;;  %s31_s25 = sadd.s32 1, %s878_s14 }
  0x11   : > { %s1163_s20 = scalar_select %p954_p8, 1, 0 }
  0x12   : > { %p645_p9 = pneg %p954_p8  ;;  %s28_s26 = ssub.s32 %s882_s15, %s970_s24 }
  0x13   : > { %s722_s29 = scalar_lea.hbm %s1155_s1, 2048 }
  0x14   : > { %p965_p11 = pnand %p645_p9, %p1158_p1  ;;  %p723_p12 = scmp.ne.s32.totalorder %s1155_s1, %s722_s29 }
  0x15   : > { %p729_p5 = scmp.lt.u32.totalorder %s722_s29, %s1155_s1 }
  0x16   : > { %p724_p13 = pneg %p965_p11 }
  0x18   : > { %p725_p0 = pnand %p724_p13, %p723_p12 }
  0x1a   : > { %p726_p3 = pneg %p725_p0 }
  0x1c   : > { %p731_p7 = pnand %p729_p5, %p726_p3 }
  0x1e   : > { %734 = shalt.err (!%p731_p7)
}
  0x1f   : > { %s735_s7 = scalar_lea.vmem %s958_s22, 2048  ;;  %p743_p2 = scmp.lt.s32.totalorder %s958_s22, %s958_s22 }
  0x20   : > { %p736_p9 = scmp.ne.s32.totalorder %s958_s22, %s735_s7  ;;  %p744_p6 = scmp.lt.s32.totalorder %s735_s7, %s735_s7 }
  0x22   : > { %p738_p10 = pnand %p736_p9, %p724_p13  ;;  %p745_p4 = por %p744_p6, %p743_p2 }
  0x24   : > { %p739_p1 = pneg %p738_p10 }
  0x26   : > { %p746_p8 = pnand %p745_p4, %p739_p1 }
  0x28   : > { %749 = shalt.err (!%p746_p8)
}
  0x29   : > { %s885_s8 = smov 64   ;;  %s886_s9 = smov 4  }
  0x2a   : > { %648 = dma.hbm_to_vmem [thread:$0]  (!%p965_p11), %s1155_s1, 2048, %s958_s22, [#allocation6], %s885_s8, %s885_s8, %s886_s9  }
  0x2b   : > { %p29_p2 = scmp.eq.s32.totalorder %s28_s26, 0  ;;  %p38_p1 = scmp.ne.s32.totalorder %s878_s14, %s874_s13 }
  0x2c   : > { %p39_p4 = scmp.eq.s32.totalorder %s882_s15, 0  ;;  %p661_p6 = scmp.lt.s32.totalorder %s882_s15, 2 }
  0x2d   : > { %s1001_s17 = scalar_select %p29_p2, %s878_s14, %s31_s25  }
  0x2e   : > { %p40_p8 = por %p39_p4, %p38_p1  ;;  %p1165_p10 = scmp.eq.s32.totalorder %s935_s16, 1 }
  0x2f   : > { %s154_s27 = sand.u32 1, %s878_s14   ;;  %s611_s28 = sshll.u32 %s882_s15, 8 }
  0x30   : > { %p1005_p12 = por %p1165_p10, %p38_p1  ;;  %s576_s29 = sshll.u32 %s154_s27, 4 }
  0x31   : > { %s1014_s4 = scalar_lea.hbm %s1154_s0, %s611_s28  ;;  %s158_s22 = scalar_lea.vmem [#allocation2], %s576_s29 }
  0x32   : > { %s166_s25 = sshll.u32 %s158_s22, 4  ;;  %p1016_p11 = pnand %p661_p6, %p40_p8  ;;  %s1020_s25 = int_to_ptr.vmem [resolvable:$true] %s166_s25 }
  0x33   : > { %s1022_s5 = scalar_lea.sflag [#allocation3], %s154_s27  ;;  %s750_s6 = scalar_lea.hbm %s1014_s4, 256 }
  0x34   : > { %p751_p13 = scmp.ne.s32.totalorder %s1014_s4, %s750_s6  ;;  %p752_p0 = pneg %p1016_p11 }
  0x35   : > { %s755_s9 = scalar_lea.hbm %s1154_s0, 512  ;;  %p756_p7 = scmp.lt.u32.totalorder %s1014_s4, %s1154_s0 }
  0x36   : > { %p753_p3 = pnand %p752_p0, %p751_p13  ;;  %p757_p9 = scmp.lt.u32.totalorder %s755_s9, %s750_s6 }
  0x37   : > { %p759_p1 = scmp.lt.u32.totalorder %s750_s6, %s1014_s4 }
  0x38   : > { %p754_p5 = pneg %p753_p3  ;;  %p758_p2 = por %p757_p9, %p756_p7 }
  0x3a   : > { %p760_p4 = por %p759_p1, %p758_p2 }
  0x3c   : > { %p761_p6 = pnand %p760_p4, %p754_p5 }
  0x3e   : > { %764 = shalt.err (!%p761_p6)
}
  0x3f   : > { %s765_s27 = scalar_lea.vmem %s1020_s25, 256  ;;  %s887_s28 = smov [#allocation2]  }
  0x40   : > { %p766_p8 = scmp.ne.s32.totalorder %s1020_s25, %s765_s27  ;;  %s770_s29 = sshll.u32 %s887_s28, 4  ;;  %s771_s29 = int_to_ptr.vmem [resolvable:$false] %s770_s29 }
  0x41   : > { %s772_s23 = scalar_lea.vmem %s771_s29, 512  ;;  %p773_p3 = scmp.lt.s32.totalorder %s1020_s25, %s771_s29 }
  0x42   : > { %p768_p10 = pnand %p766_p8, %p752_p0  ;;  %p774_p7 = scmp.lt.s32.totalorder %s772_s23, %s765_s27 }
  0x44   : > { %p769_p13 = pneg %p768_p10  ;;  %p775_p9 = por %p774_p7, %p773_p3 }
  0x46   : > { %p776_p2 = pnand %p775_p9, %p769_p13 }
  0x48   : > { %779 = shalt.err (!%p776_p2)
}
  0x49   : > { %s888_s30 = smov 128   ;;  %s889_s22 = smov 8  }
  0x4a   : > { %652 = dma.hbm_to_vmem [thread:$0]  (!%p1016_p11), %s1014_s4, 256, %s1020_s25, %s1022_s5, %s888_s30, %s888_s30, %s889_s22  }
  0x4b   : > { %p1168_p0 = scmp.ne.s32.totalorder %s1163_s20, 0 }
  0x4c   : > { %s1053_s6 = sand.u32 (!%p1168_p0), 1, %s874_s13   ;;  %p1169_p5 = scmp.ne.s32.totalorder (!%p1168_p0), %s1161_s18, 0 }
  0x4d   : > { %178 = sbr.rel (%p1168_p0) target bundleno = 381 (0x17d), region = 28  ;;  %s581_s7 = sshll.u32 (!%p1168_p0), %s1053_s6, 4 }
  0x4e   : > { %s181_s8 = scalar_lea.sflag (!%p1168_p0), [#allocation3], %s1053_s6  ;;  %s1059_s9 = scalar_lea.vmem (!%p1168_p0), [#allocation2], %s581_s7 }
  0x54   : > { %853 = dma.done.wait (%p1169_p5), %s181_s8, 256  }
  0x55   : > { %855 = vsyncadd (%p1169_p5), %s181_s8, 4294967040  ;;  %p1170_p11 = scmp.eq.s32.totalorder %s935_s16, 0 }
  0x57   : > { %857 = dma.done.wait (%p1170_p11), [#allocation6], 2048   ;;  %p1171_p1 = pmov %p1170_p11 }
  0x58   : > { %v703_v0 = vld [vmem:[#allocation5 + $0x40] sm:$0xff]   ;;  %v705_v2 = vld [vmem:[#allocation5 + $0x48] sm:$0xff]   ;;  %v707_v4 = vld [vmem:[#allocation5 + $0x50] sm:$0xff]   ;;  %s208_s18 = scalar_lea.vmem [#allocation7], %s581_s7  ;;  %s612_s4 = sshll.u32 %s935_s16, 8 }
  0x59   : > { %859 = vsyncadd (%p1171_p1), [#allocation6], 4294965248  ;;  %v704_v1 = vld [vmem:[#allocation5] sm:$0xff]   ;;  %613 = vmatprep.subr.bf16.mxu0 %v703_v0  ;;  %v706_v3 = vld [vmem:[#allocation5 + $0x8] sm:$0xff]   ;;  %s444_s20 = sshll.u32 %s208_s18, 4  ;;  %s1079_s5 = scalar_lea.hbm %s1156_s2, %s612_s4  ;;  %s1074_s20 = int_to_ptr.vmem [resolvable:$true] %s444_s20 }
  0x5a   : > { %614 = vmatpush3.bf16.msra.mxu0 %v704_v1  ;;  %v708_v5 = vld [vmem:[#allocation5 + $0x10] sm:$0xff]   ;;  %v709_v6 = vld [vmem:[#allocation5 + $0x58] sm:$0xff]   ;;  %v711_v8 = vld [vmem:[#allocation5 + $0x60] sm:$0xff]   ;;  %s426_s10 = scalar_lea.sflag [#allocation4], %s1053_s6  ;;  %s780_s11 = scalar_lea.vmem %s1074_s20, 256 }
  0x5b   : > { %615 = vmatprep.subr.bf16.mxu0 %v705_v2  ;;  %v710_v7 = vld [vmem:[#allocation5 + $0x18] sm:$0xff]   ;;  %v712_v9 = vld [vmem:[#allocation5 + $0x20] sm:$0xff]   ;;  %v713_v10 = vld [vmem:[#allocation5 + $0x68] sm:$0xff]   ;;  %p781_p4 = scmp.ne.s32.totalorder %s1074_s20, %s780_s11  ;;  %s890_s27 = smov [#allocation7]  }
  0x5c   : > { %v721_v11 = vld [vmem:[%s1059_s9 + $0x4] ss:$8 sps:$4 sm:$0xff]   ;;  %v719_v17 = vld [vmem:[%s1059_s9] ss:$8 sps:$4 sm:$0xff]   ;;  %s784_s28 = sshll.u32 %s890_s27, 4  ;;  %s785_s28 = int_to_ptr.vmem [resolvable:$false] %s784_s28 }
  0x5d   : > { %v714_v12 = vld [vmem:[#allocation5 + $0x28] sm:$0xff]   ;;  %391 = vmatprep.mubr.bf16.mxu0 %v721_v11  ;;  %v715_v13 = vld [vmem:[#allocation5 + $0x70] sm:$0xff]   ;;  %v717_v15 = vld [vmem:[#allocation5 + $0x78] sm:$0xff]   ;;  %p782_p6 = pnand %p781_p4, %p1005_p12  ;;  %s786_s29 = scalar_lea.vmem %s785_s28, 512 }
  0x5e   : > { %616 = vmatpush3.bf16.msra.mxu0 %v706_v3  ;;  %v716_v14 = vld [vmem:[#allocation5 + $0x30] sm:$0xff]   ;;  %v718_v16 = vld [vmem:[#allocation5 + $0x38] sm:$0xff]   ;;  %p787_p10 = scmp.lt.s32.totalorder %s1074_s20, %s785_s28  ;;  %p788_p13 = scmp.lt.s32.totalorder %s786_s29, %s780_s11 }
  0x5f   : > { %617 = vmatprep.subr.bf16.mxu0 %v707_v4  ;;  %p783_p8 = pneg %p782_p6 }
  0x60   : > { %p789_p3 = por %p788_p13, %p787_p10 }
  0x62   : > { %618 = vmatpush3.bf16.msra.mxu0 %v708_v5  ;;  %p790_p7 = pnand %p789_p3, %p783_p8 }
  0x63   : > { %619 = vmatprep.subr.bf16.mxu0 %v709_v6 }
  0x66   : > { %620 = vmatpush3.bf16.msra.mxu0 %v710_v7 }
  0x67   : > { %621 = vmatprep.subr.bf16.mxu0 %v711_v8 }
  0x6a   : > { %622 = vmatpush3.bf16.msra.mxu0 %v712_v9 }
  0x6b   : > { %623 = vmatprep.subr.bf16.mxu0 %v713_v10 }
  0x6e   : > { %624 = vmatpush3.bf16.msra.mxu0 %v714_v12 }
  0x6f   : > { %625 = vmatprep.subr.bf16.mxu0 %v715_v13 }
  0x72   : > { %626 = vmatpush3.bf16.msra.mxu0 %v716_v14 }
  0x73   : > { %627 = vmatprep.subr.bf16.mxu0 %v717_v15 }
  0x76   : > { %628 = vmatpush3.bf16.msra.mxu0 %v718_v16 }
  0x79   : > { %392 = vmatmul.mubr.bf16.vlgmr.msra.gmra.mrb[0].mxu0 %v719_v17 }
 0x14c   : > { %v629_v18 = vpop.f32.mrb[0].mxu0 }
 0x14d   : > { %v630_v19 = vpop.f32.mrb[1].mxu0 }
 0x14e   : > { %v631_v20 = vadd.f32 %v630_v19, %v629_v18  ;;  %v632_v21 = vpop.f32.mrb[2].mxu0 }
 0x14f   : > { %v633_v22 = vpop.f32.mrb[3].mxu0 }
 0x150   : > { %400 = vst [vmem:[%s208_s18] sm:$0xff] %v631_v20  ;;  %v634_v23 = vadd.f32 %v633_v22, %v632_v21  ;;  %v409_v24 = vmul.f32 %v631_v20, %v631_v20 }
 0x152   : > { %401 = vst [vmem:[%s208_s18 + $0x8] sm:$0xff] %v634_v23  ;;  %v402_v25 = vadd.f32 %v634_v23, %v631_v20  ;;  %v410_v26 = vmul.f32 %v634_v23, %v634_v23 }
 0x153   : > { %793 = shalt.err (!%p790_p7)
}
 0x154   : > { %s794_s23 = scalar_lea.hbm %s1079_s5, 256  ;;  %s798_s7 = scalar_lea.hbm %s1156_s2, 512 }
 0x155   : > { %p795_p9 = scmp.ne.s32.totalorder %s1079_s5, %s794_s23  ;;  %p799_p5 = scmp.lt.u32.totalorder %s1079_s5, %s1156_s2 }
 0x156   : > { %p800_p11 = scmp.lt.u32.totalorder %s798_s7, %s794_s23  ;;  %p802_p4 = scmp.lt.u32.totalorder %s794_s23, %s1079_s5 }
 0x157   : > { %p796_p2 = pnand %p795_p9, %p1005_p12 }
 0x158   : > { %p801_p1 = por %p800_p11, %p799_p5 }
 0x159   : > { %p797_p0 = pneg %p796_p2 }
 0x15a   : > { %p803_p6 = por %p802_p4, %p801_p1 }
 0x15c   : > { %p804_p8 = pnand %p803_p6, %p797_p0 }
 0x15e   : > { %807 = shalt.err (!%p804_p8)
}
 0x15f   : > { %s891_s18 = smov 128   ;;  %s892_s4 = smov 8   ;;  %v403_v27 = vrot.slane %v402_v25, 4  ;;  %v411_v28 = vadd.f32 %v410_v26, %v409_v24  ;;  %v418_v31 = vlaneseq }
 0x160   : > { %641 = dma.vmem_to_hbm [thread:$0]  (%p1005_p12), %s1074_s20, 256, %s1079_s5, %s426_s10, %s891_s18, %s891_s18, %s892_s4  }
 0x161   : > { %v404_v29 = vadd.f32 %v403_v27, %v402_v25  ;;  %v412_v30 = vrot.slane %v411_v28, 4  ;;  %s584_s25 = sshll.u32 %s1053_s6, 3  ;;  %v419_v36 = vshrl.u32 %v418_v31, 7  ;;  %s607_s26 = sshll.u32 %s935_s16, 7 }
 0x162   : > { %s215_s20 = scalar_lea.vmem [#allocation8], %s584_s25  ;;  %s1110_s27 = scalar_lea.hbm %s1157_s3, %s607_s26 }
 0x163   : > { %v405_v32 = vrot.slane %v404_v29, 2  ;;  %v413_v33 = vadd.f32 %v412_v30, %v411_v28  ;;  %vm421_vm0 = vcmp.eq.s32.totalorder %v419_v36, 1  ;;  %s460_s5 = sshll.u32 %s215_s20, 4  ;;  %vm420_vm1 = vcmp.eq.s32.totalorder %v419_v36, 0  ;;  %s431_s28 = scalar_lea.sflag [#allocation9], %s1053_s6  ;;  %s1112_s5 = int_to_ptr.vmem [resolvable:$true] %s460_s5 }
 0x164   : > { %s808_s16 = scalar_lea.vmem %s1112_s5, 128  ;;  %s893_s29 = smov [#allocation8]  }
 0x165   : > { %v406_v34 = vadd.f32 %v405_v32, %v404_v29  ;;  %v414_v35 = vrot.slane %v413_v33, 2  ;;  %p809_p10 = scmp.ne.s32.totalorder %s1112_s5, %s808_s16  ;;  %s812_s23 = sshll.u32 %s893_s29, 4  ;;  %s813_s23 = int_to_ptr.vmem [resolvable:$false] %s812_s23 }
 0x166   : > { %s814_s30 = scalar_lea.vmem %s813_s23, 256  ;;  %p815_p7 = scmp.lt.s32.totalorder %s1112_s5, %s813_s23 }
 0x167   : > { %v415_v37 = vadd.f32 %v414_v35, %v413_v33  ;;  %v407_v38 = vrot.slane %v406_v34, 1  ;;  %p810_p13 = pnand %p809_p10, %p1005_p12  ;;  %p816_p9 = scmp.lt.s32.totalorder %s814_s30, %s808_s16 }
 0x169   : > { %v416_v39 = vrot.slane %v415_v37, 1  ;;  %v408_v41 = vadd.f32 %v407_v38, %v406_v34  ;;  %p811_p3 = pneg %p810_p13  ;;  %p817_p2 = por %p816_p9, %p815_p7 }
 0x16b   : > { %v417_v40 = vadd.f32 %v416_v39, %v415_v37  ;;  %p818_p0 = pnand %p817_p2, %p811_p3 }
 0x16d   : > { %v422_v42 = vsel %vm421_vm0, %v417_v40, 0.0 }
 0x16e   : > { %v423_v43 = vsel %vm420_vm1, %v408_v41, %v422_v42 }
 0x16f   : > { %424 = vst [vmem:[%s215_s20] sm:$0xff] %v423_v43 }
 0x170   : > { %821 = shalt.err (!%p818_p0)
}
 0x171   : > { %s822_s6 = scalar_lea.hbm %s1110_s27, 128  ;;  %s826_s8 = scalar_lea.hbm %s1157_s3, 256 }
 0x172   : > { %p823_p5 = scmp.ne.s32.totalorder %s1110_s27, %s822_s6  ;;  %p827_p4 = scmp.lt.u32.totalorder %s1110_s27, %s1157_s3 }
 0x173   : > { %p828_p6 = scmp.lt.u32.totalorder %s826_s8, %s822_s6  ;;  %p830_p10 = scmp.lt.u32.totalorder %s822_s6, %s1110_s27 }
 0x174   : > { %p824_p11 = pnand %p823_p5, %p1005_p12 }
 0x175   : > { %p829_p8 = por %p828_p6, %p827_p4 }
 0x176   : > { %p825_p1 = pneg %p824_p11 }
 0x177   : > { %p831_p13 = por %p830_p10, %p829_p8 }
 0x179   : > { %p832_p3 = pnand %p831_p13, %p825_p1 }
 0x17b   : > { %835 = shalt.err (!%p832_p3)
}
 0x17c   : > { %642 = dma.vmem_to_hbm [thread:$0]  (%p1005_p12), %s1112_s5, 128, %s1110_s27, %s431_s28  }
 0x17d PF: > { %s472_s4 = sand.u32 1, %s870_s12   ;;  %p1172_p7 = scmp.ne.s32.totalorder %s1162_s19, 0 }
 0x17e   : > { %p1173_p9 = scmp.ge.s32.totalorder %s882_s15, 2  ;;  %s473_s25 = scalar_lea.sflag [#allocation4], %s472_s4 }
 0x180   : > { %p654_p2 = pnand %p1173_p9, %p1172_p7 }
 0x182   : > { %861 = dma.done.wait (!%p654_p2), %s473_s25, 256  }
 0x183   : > { %863 = vsyncadd (!%p654_p2), %s473_s25, 4294967040  ;;  %s482_s26 = scalar_lea.sflag [#allocation9], %s472_s4 }
 0x184   : > { %865 = dma.done.wait (!%p654_p2), %s482_s26, 128  }
 0x185   : > { %867 = vsyncadd (!%p654_p2), %s482_s26, 4294967168  ;;  %p21_p12 = scmp.ge.s32.totalorder %s970_s24, 4   ;;  %s1174_s12 = smov %s874_s13 }
 0x186   : > { %s1175_s13 = smov %s878_s14  ;;  %s1176_s14 = smov %s1001_s17 }
 0x187   : > { %s1177_s15 = smov %s970_s24  ;;  %23 = sbr.rel (!%p21_p12) target bundleno = 8 (0x8), region = 94 }
 0x18e   :  { %487 = vsyncpa [#allocation3], 1 }
 0x18f   :  { %489 = vsyncpa [#allocation3 + $0x1], 1 }
 0x190   :  { %490 = vsyncpa [#allocation6], 1 }
 0x191   :  { %491 = vsyncpa [#allocation4], 1 }
 0x192   :  { %493 = vsyncpa [#allocation4 + $0x1], 1 }
 0x193   :  { %494 = vsyncpa [#allocation9], 1 }
 0x194   :  { %496 = vsyncpa [#allocation9 + $0x1], 1 }

// kernel: discriminator_forward.19
= control target key start
LH: loop header
LB: loop body
LE: loop exit
PB: predicated region body
PF: predicated region fallthrough
CT: control target
= control target key end

     0   :  { %8 = vsyncpa [#allocation3], 0  ;;  %s730_s0 = inlined_call_operand.hbm [shape: bf16[8,512], index: 0, kind: input, shape index: {}]   ;;  %s731_s1 = inlined_call_operand.hbm [shape: bf16[512,128], index: 1, kind: input, shape index: {}]   ;;  %s732_s2 = inlined_call_operand.hbm [shape: f32[1,128], index: 2, kind: input, shape index: {}]   ;;  %s733_s3 = inlined_call_operand.hbm [shape: f32[8,128], index: 3, kind: output, shape index: {}]  }
   0x1   :  { %9 = vsyncpa [#allocation6], 0 }
   0x2   :  { %10 = vsyncpa [#allocation4], 0  ;;  %s656_s12 = smov [#allocation5]   ;;  %s562_s16 = scalar_lea.hbm %s731_s1, 4096 }
   0x3   :  { %s26_s13 = sshll.u32 %s656_s12, 4  ;;  %p563_p0 = scmp.ne.s32.totalorder %s731_s1, %s562_s16  ;;  %s27_s13 = int_to_ptr.vmem [resolvable:$true] %s26_s13 }
   0x4   :  { %p566_p1 = scmp.lt.u32.totalorder %s562_s16, %s731_s1 }
   0x6   :  { %p568_p2 = pnand %p566_p1, %p563_p0 }
   0x8   :  { %571 = shalt.err (!%p568_p2)
}
   0x9   :  { %s572_s21 = scalar_lea.vmem %s27_s13, 4096  ;;  %p577_p4 = scmp.lt.s32.totalorder %s27_s13, %s27_s13 }
   0xa   :  { %p573_p3 = scmp.ne.s32.totalorder %s27_s13, %s572_s21  ;;  %p578_p5 = scmp.lt.s32.totalorder %s572_s21, %s572_s21 }
   0xc   :  { %p579_p6 = por %p578_p5, %p577_p4 }
   0xe   :  { %p580_p7 = pnand %p579_p6, %p573_p3 }
  0x10   :  { %583 = shalt.err (!%p580_p7)
}
  0x11   :  { %s657_s22 = smov 64   ;;  %s658_s23 = smov 4  }
  0x12   :  { %32 = dma.hbm_to_vmem [thread:$0]  %s731_s1, 4096, %s27_s13, [#allocation6], %s657_s22, %s657_s22, %s658_s23  }
  0x13   :  { %s659_s26 = smov [#allocation2]   ;;  %s660_s28 = smov [#allocation7]  }
  0x14   :  { %s17_s27 = sshll.u32 %s659_s26, 4  ;;  %s39_s29 = sshll.u32 %s660_s28, 4  ;;  %s18_s27 = int_to_ptr.vmem [resolvable:$true] %s17_s27  ;;  %s40_s29 = int_to_ptr.vmem [resolvable:$true] %s39_s29 }
  0x15   :  { %s584_s5 = scalar_lea.hbm %s730_s0, 256 }
  0x16   :  { %p585_p8 = scmp.ne.s32.totalorder %s730_s0, %s584_s5  ;;  %p588_p9 = scmp.lt.u32.totalorder %s584_s5, %s730_s0 }
  0x18   :  { %p590_p10 = pnand %p588_p9, %p585_p8 }
  0x1a   :  { %593 = shalt.err (!%p590_p10)
}
  0x1b   :  { %s594_s1 = scalar_lea.vmem %s18_s27, 256  ;;  %p599_p12 = scmp.lt.s32.totalorder %s18_s27, %s18_s27 }
  0x1c   :  { %p595_p11 = scmp.ne.s32.totalorder %s18_s27, %s594_s1  ;;  %p600_p13 = scmp.lt.s32.totalorder %s594_s1, %s594_s1 }
  0x1e   :  { %p601_p0 = por %p600_p13, %p599_p12 }
  0x20   :  { %p602_p1 = pnand %p601_p0, %p595_p11 }
  0x22   :  { %605 = shalt.err (!%p602_p1)
}
  0x23   :  { %20 = dma.hbm_to_vmem [thread:$0]  %s730_s0, 256, %s18_s27, [#allocation3]  }
  0x24   :  { %s606_s14 = scalar_lea.hbm %s732_s2, 16 }
  0x25   :  { %p607_p2 = scmp.ne.s32.totalorder %s732_s2, %s606_s14  ;;  %p610_p3 = scmp.lt.u32.totalorder %s606_s14, %s732_s2 }
  0x27   :  { %p612_p4 = pnand %p610_p3, %p607_p2 }
  0x29   :  { %615 = shalt.err (!%p612_p4)
}
  0x2a   :  { %s616_s19 = scalar_lea.vmem %s40_s29, 16  ;;  %s620_s20 = scalar_lea.vmem %s40_s29, 32 }
  0x2b   :  { %p617_p5 = scmp.ne.s32.totalorder %s40_s29, %s616_s19  ;;  %p621_p6 = scmp.lt.s32.totalorder %s40_s29, %s40_s29 }
  0x2c   :  { %p622_p7 = scmp.lt.s32.totalorder %s620_s20, %s616_s19 }
  0x2e   :  { %p623_p8 = por %p622_p7, %p621_p6 }
  0x30   :  { %p624_p9 = pnand %p623_p8, %p617_p5 }
  0x32   :  { %627 = shalt.err (!%p624_p9)
}
  0x33   :  { %42 = dma.hbm_to_vmem [thread:$0]  %s732_s2, 16, %s40_s29, [#allocation6]  }
  0x34   :  { %650 = dma.done.wait [#allocation3], 256  }
  0x35   :  { %651 = vsyncadd [#allocation3], 4294967040 }
  0x36   :  { %652 = dma.done.wait [#allocation6], 4112  }
  0x37   :  { %653 = vsyncadd [#allocation6], 4294963184  ;;  %v522_v0 = vld [vmem:[#allocation5 + $0x40] sm:$0xff]   ;;  %v526_v4 = vld [vmem:[#allocation5 + $0x48] sm:$0xff]   ;;  %s661_s2 = smov [#allocation8]  }
  0x38   :  { %v523_v1 = vld [vmem:[#allocation5 + $0xc0] sm:$0xff]   ;;  %472 = vmatprep.subr.bf16.mxu0 %v522_v0  ;;  %v527_v5 = vld [vmem:[#allocation5 + $0xc8] sm:$0xff]   ;;  %v530_v8 = vld [vmem:[#allocation5 + $0x50] sm:$0xff]   ;;  %s425_s22 = sshll.u32 %s661_s2, 4  ;;  %s426_s22 = int_to_ptr.vmem [resolvable:$true] %s425_s22 }
  0x39   :  { %v524_v2 = vld [vmem:[#allocation5] sm:$0xff]   ;;  %494 = vmatprep.subr.bf16.mxu1 %v523_v1  ;;  %v528_v6 = vld [vmem:[#allocation5 + $0x8] sm:$0xff]   ;;  %v531_v9 = vld [vmem:[#allocation5 + $0xd0] sm:$0xff]   ;;  %s628_s23 = scalar_lea.vmem %s426_s22, 128  ;;  %p633_p11 = scmp.lt.s32.totalorder %s426_s22, %s426_s22 }
  0x3a   :  { %v525_v3 = vld [vmem:[#allocation5 + $0x80] sm:$0xff]   ;;  %473 = vmatpush3.bf16.msra.mxu0 %v524_v2  ;;  %v529_v7 = vld [vmem:[#allocation5 + $0x88] sm:$0xff]   ;;  %v532_v10 = vld [vmem:[#allocation5 + $0x10] sm:$0xff]   ;;  %p629_p10 = scmp.ne.s32.totalorder %s426_s22, %s628_s23  ;;  %p634_p12 = scmp.lt.s32.totalorder %s628_s23, %s628_s23 }
  0x3b   :  { %495 = vmatpush3.bf16.msra.mxu1 %v525_v3  ;;  %474 = vmatprep.subr.bf16.mxu0 %v526_v4  ;;  %v533_v11 = vld [vmem:[#allocation5 + $0x90] sm:$0xff]   ;;  %v534_v12 = vld [vmem:[#allocation5 + $0x58] sm:$0xff]   ;;  %v538_v16 = vld [vmem:[#allocation5 + $0x60] sm:$0xff]  }
  0x3c   :  { %496 = vmatprep.subr.bf16.mxu1 %v527_v5  ;;  %v535_v13 = vld [vmem:[#allocation5 + $0xd8] sm:$0xff]   ;;  %v539_v17 = vld [vmem:[#allocation5 + $0xe0] sm:$0xff]   ;;  %v542_v20 = vld [vmem:[#allocation5 + $0x68] sm:$0xff]   ;;  %p635_p13 = por %p634_p12, %p633_p11 }
  0x3d   :  { %v536_v14 = vld [vmem:[#allocation5 + $0x18] sm:$0xff]   ;;  %v540_v18 = vld [vmem:[#allocation5 + $0x20] sm:$0xff]   ;;  %v543_v21 = vld [vmem:[#allocation5 + $0xe8] sm:$0xff]  }
  0x3e   :  { %475 = vmatpush3.bf16.msra.mxu0 %v528_v6  ;;  %v537_v15 = vld [vmem:[#allocation5 + $0x98] sm:$0xff]   ;;  %v541_v19 = vld [vmem:[#allocation5 + $0xa0] sm:$0xff]   ;;  %v544_v22 = vld [vmem:[#allocation5 + $0x28] sm:$0xff]   ;;  %p636_p0 = pnand %p635_p13, %p629_p10 }
  0x3f   :  { %497 = vmatpush3.bf16.msra.mxu1 %v529_v7  ;;  %476 = vmatprep.subr.bf16.mxu0 %v530_v8  ;;  %v545_v23 = vld [vmem:[#allocation5 + $0xa8] sm:$0xff]   ;;  %v546_v24 = vld [vmem:[#allocation5 + $0x70] sm:$0xff]   ;;  %v550_v28 = vld [vmem:[#allocation5 + $0x78] sm:$0xff]  }
  0x40   :  { %498 = vmatprep.subr.bf16.mxu1 %v531_v9  ;;  %v547_v25 = vld [vmem:[#allocation5 + $0xf0] sm:$0xff]   ;;  %v551_v29 = vld [vmem:[#allocation5 + $0xf8] sm:$0xff]   ;;  %v435_v40 = vld [vmem:[#allocation7] ss:$0 sm:$0xff] }
  0x41   :  { %v548_v26 = vld [vmem:[#allocation5 + $0x30] sm:$0xff]   ;;  %v552_v30 = vld [vmem:[#allocation5 + $0x38] sm:$0xff]  }
  0x42   :  { %477 = vmatpush3.bf16.msra.mxu0 %v532_v10  ;;  %v549_v27 = vld [vmem:[#allocation5 + $0xb0] sm:$0xff]   ;;  %v553_v31 = vld [vmem:[#allocation5 + $0xb8] sm:$0xff]  }
  0x43   :  { %499 = vmatpush3.bf16.msra.mxu1 %v533_v11  ;;  %478 = vmatprep.subr.bf16.mxu0 %v534_v12  ;;  %v53_v32 = vld [vmem:[#allocation2] sm:$0xff]  ;;  %v54_v33 = vld [vmem:[#allocation2 + $0x8] sm:$0xff] }
  0x44   :  { %500 = vmatprep.subr.bf16.mxu1 %v535_v13  ;;  %v436_v34 = vcombine.low %v53_v32, %v53_v32  ;;  %v437_v35 = vcombine.high %v53_v32, %v53_v32  ;;  %v438_v36 = vcombine.low %v54_v33, %v54_v33  ;;  %v439_v37 = vcombine.high %v54_v33, %v54_v33 }
  0x46   :  { %479 = vmatpush3.bf16.msra.mxu0 %v536_v14  ;;  %364 = vmatprep.mubr.bf16.mxu0 %v437_v35 }
  0x47   :  { %501 = vmatpush3.bf16.msra.mxu1 %v537_v15  ;;  %480 = vmatprep.subr.bf16.mxu0 %v538_v16 }
  0x48   :  { %502 = vmatprep.subr.bf16.mxu1 %v539_v17  ;;  %404 = vmatprep.mubr.bf16.mxu1 %v439_v37 }
  0x4a   :  { %481 = vmatpush3.bf16.msra.mxu0 %v540_v18 }
  0x4b   :  { %503 = vmatpush3.bf16.msra.mxu1 %v541_v19  ;;  %482 = vmatprep.subr.bf16.mxu0 %v542_v20 }
  0x4c   :  { %504 = vmatprep.subr.bf16.mxu1 %v543_v21 }
  0x4e   :  { %483 = vmatpush3.bf16.msra.mxu0 %v544_v22 }
  0x4f   :  { %505 = vmatpush3.bf16.msra.mxu1 %v545_v23  ;;  %484 = vmatprep.subr.bf16.mxu0 %v546_v24 }
  0x50   :  { %506 = vmatprep.subr.bf16.mxu1 %v547_v25 }
  0x52   :  { %485 = vmatpush3.bf16.msra.mxu0 %v548_v26 }
  0x53   :  { %507 = vmatpush3.bf16.msra.mxu1 %v549_v27  ;;  %486 = vmatprep.subr.bf16.mxu0 %v550_v28 }
  0x54   :  { %508 = vmatprep.subr.bf16.mxu1 %v551_v29 }
  0x56   :  { %487 = vmatpush3.bf16.msra.mxu0 %v552_v30 }
  0x57   :  { %509 = vmatpush3.bf16.msra.mxu1 %v553_v31 }
  0x59   :  { %365 = vmatmul.mubr.bf16.vlgmr.msra.gmra.mrb[0].mxu0 %v436_v34 }
  0x5a   :  { %405 = vmatmul.mubr.bf16.vlgmr.msra.gmra.mrb[0].mxu1 %v438_v36 }
 0x12c   :  { %v488_v38 = vpop.f32.mrb[0].mxu0 }
 0x12d   :  { %v510_v39 = vpop.f32.mrb[0].mxu1  ;;  %v489_v41 = vpop.f32.mrb[1].mxu0 }
 0x12e   :  { %v511_v42 = vpop.f32.mrb[1].mxu1  ;;  %v490_v43 = vadd.f32 %v489_v41, %v488_v38  ;;  %v491_v45 = vpop.f32.mrb[2].mxu0 }
 0x12f   :  { %v512_v44 = vadd.f32 %v511_v42, %v510_v39  ;;  %v513_v46 = vpop.f32.mrb[2].mxu1  ;;  %v492_v47 = vpop.f32.mrb[3].mxu0 }
 0x130   :  { %v514_v48 = vpop.f32.mrb[3].mxu1  ;;  %v367_v49 = vadd.f32 %v490_v43, %v435_v40 }
 0x132   :  { %v407_v50 = vadd.f32 %v512_v44, %v367_v49 }
 0x134   :  { %v412_v51 = vsub.f32 0.0, %v407_v50 }
 0x136   :  { %v413_v52 = vmul.f32 1.442695, %v412_v51 }
 0x138   :  { %558 = vpow2.f32 %v413_v52 }
 0x142   :  { %v559_v53 = vpop.eup %558 }
 0x143   :  { %v415_v54 = vadd.f32 1.0, %v559_v53 }
 0x145   :  { %560 = vrcp.f32 %v415_v54 }
 0x14f   :  { %v561_v55 = vpop.eup %560 }
 0x150   :  { %418 = vst [vmem:[#allocation8] sm:$0xff] %v561_v55 }
 0x151   :  { %639 = shalt.err (!%p636_p0)
}
 0x152   :  { %s640_s26 = scalar_lea.hbm %s733_s3, 128 }
 0x153   :  { %p641_p1 = scmp.ne.s32.totalorder %s733_s3, %s640_s26  ;;  %p644_p2 = scmp.lt.u32.totalorder %s640_s26, %s733_s3 }
 0x155   :  { %p646_p3 = pnand %p644_p2, %p641_p1 }
 0x157   :  { %649 = shalt.err (!%p646_p3)
}
 0x158   :  { %428 = dma.vmem_to_hbm [thread:$0]  %s426_s22, 128, %s733_s3, [#allocation4]  }
 0x159   :  { %654 = dma.done.wait [#allocation4], 128  }
 0x15a   :  { %655 = vsyncadd [#allocation4], 4294967168 }
 0x15b   :  { %432 = vsyncpa [#allocation3], 1 }
 0x15c   :  { %433 = vsyncpa [#allocation6], 1 }
 0x15d   :  { %434 = vsyncpa [#allocation4], 1 }

</bundles_post_ra>
